<compile_context>
chip_gen: v7x
topology: tpu7x:2x2x1
jax: 0.10.0
libtpu: 0.0.40
codegen_flags: <defaults>
</compile_context>

<pallas_src>
import functools

import jax
import jax.numpy as jnp
import numpy as np
from jax.experimental import pallas as pl
from jax.experimental.pallas import tpu as pltpu


_CF_PAD = 8   # constant field channel group padded to 8 -> sublane-aligned concat


def _round128(n):
    return ((n + 127) // 128) * 128


def _seg_layout(cin, cout):
    """Lane layout of one packed residual block: [w1 b1 w2 b2 wh bh].

    Every segment starts on a 128-lane boundary so the in-kernel static lane
    slices are tile-aligned.  Used by BOTH the host packer and the kernel, so
    offsets can never disagree."""
    widths = (9 * cin, 1, 9 * cout, 1, cin, 1)
    offs, off = [], 0
    for w in widths:
        offs.append(off)
        off += _round128(w)
    return widths, tuple(offs), off


# ----------------------------------------------------------------------------
# Fused decoder kernel (one batch element per grid step)
# ----------------------------------------------------------------------------
def _decoder_kernel(*refs, alpha, wp_s, wp_b, n_res1, n_res2, meta, cf_pad):
    """refs = (noise, logvar, mean, cf, mask_s, mask_b, U,
               wpack_0..wpack_{n_blocks-1}, wo, bo, out)."""
    n_blocks = len(meta)
    noise_ref, logvar_ref, mean_ref, cf_ref, ms_ref, mb_ref, u_ref = refs[:7]
    wb_refs = refs[7:7 + n_blocks]
    wo_ref, bo_ref = refs[7 + n_blocks], refs[8 + n_blocks]
    o_ref = refs[-1]

    mask_s = ms_ref[...]          # (1, Ns)  interior mask, small canvas
    mask_b = mb_ref[...]          # (1, Nb)  interior mask, large canvas

    def shift_lanes(x, d):
        # result[:, i] = x[:, i + d]  (zero fill at the canvas ends)
        c, n = x.shape
        if d == 0:
            return x
        if d > 0:
            return jnp.concatenate(
                [x[:, d:], jnp.zeros((c, d), jnp.float32)], axis=1)
        return jnp.concatenate(
            [jnp.zeros((c, -d), jnp.float32), x[:, :n + d]], axis=1)

    def conv3x3(x, w, b, mask, wp):
        # LeakyReLU -> 3x3 'same' conv (zero padding) + bias; border re-zeroed.
        a = jnp.where(x >= 0, x, alpha * x)
        taps = [shift_lanes(a, (ky - 1) * wp + (kx - 1))
                for ky in range(3) for kx in range(3)]
        patches = jnp.concatenate(taps, axis=0)            # (9*Cin, N)
        y = jnp.dot(w, patches, preferred_element_type=jnp.float32) + b
        return y * mask

    def res_block(x, wref, cin, cout, mask, wp):
        widths, offs, _ = _seg_layout(cin, cout)
        w1 = wref[:, offs[0]:offs[0] + widths[0]]          # (Cout, 9*Cin)
        b1 = wref[:, offs[1]:offs[1] + 1]                  # (Cout, 1)
        w2 = wref[:, offs[2]:offs[2] + widths[2]]          # (Cout, 9*Cout)
        b2 = wref[:, offs[3]:offs[3] + 1]
        wh = wref[:, offs[4]:offs[4] + widths[4]]          # (Cout, Cin)
        bh = wref[:, offs[5]:offs[5] + 1]
        y = conv3x3(x, w1, b1, mask, wp)                   # block1
        y = conv3x3(y, w2, b2, mask, wp)                   # block2
        hwy = jnp.dot(wh, x, preferred_element_type=jnp.float32) + bh
        return (y + hwy) * mask                            # + highway (1x1)

    # sample_z = noise * exp(0.5 * logvar) + mean          (C, Ns)
    x = noise_ref[0] * jnp.exp(logvar_ref[0] * 0.5) + mean_ref[0]

    # residual_block1 + first half of upsample residual block (small canvas)
    for i in range(n_res1 + 1):
        x = res_block(x, wb_refs[i], meta[i][0], meta[i][1], mask_s, wp_s)

    # bilinear upsample (align_corners=True) as one canvas->canvas matmul
    x = jnp.dot(x, u_ref[...], preferred_element_type=jnp.float32)

    # second half of the upsample residual block (large canvas)
    i = n_res1 + 1
    x = res_block(x, wb_refs[i], meta[i][0], meta[i][1], mask_b, wp_b)

    # channel concat with the constant field (zero-padded to a sublane tile)
    nb = x.shape[1]
    x = jnp.concatenate(
        [x, cf_ref[0], jnp.zeros((cf_pad - 1, nb), jnp.float32)], axis=0)

    # residual_block2
    for i in range(n_res1 + 2, n_res1 + 2 + n_res2):
        x = res_block(x, wb_refs[i], meta[i][0], meta[i][1], mask_b, wp_b)

    # output layer: 1x1 conv -> Softplus(beta=1, threshold=20)
    y = jnp.dot(wo_ref[...], x, preferred_element_type=jnp.float32) + bo_ref[...]
    y = jnp.where(y > 20.0, y, jnp.log(1.0 + jnp.exp(jnp.minimum(y, 20.0))))
    o_ref[...] = y[None]


# ----------------------------------------------------------------------------
# Host-side helpers: specs, constant operators, weight packing
# ----------------------------------------------------------------------------
def _batched_spec(shape):
    n = len(shape)
    return pl.BlockSpec((1,) + tuple(shape[1:]),
                        lambda b, _n=n: (b,) + (0,) * (_n - 1))


def _const_spec(shape):
    n = len(shape)
    return pl.BlockSpec(tuple(shape), lambda b, _n=n: (0,) * _n)


def bilinear_matrix(n_in, n_out):
    """Interpolation matrix matching UpsamplingBilinear2d(align_corners=True)."""
    A = np.zeros((n_out, n_in), np.float32)
    if n_in == 1 or n_out == 1:
        A[:, 0] = 1.0
        return A
    scale = (n_in - 1) / (n_out - 1)
    for o in range(n_out):
        pos = o * scale
        i0 = min(int(np.floor(pos)), n_in - 1)
        i1 = min(i0 + 1, n_in - 1)
        frac = pos - i0
        A[o, i0] += 1.0 - frac
        A[o, i1] += frac
    return A


def _upsample_operator(ah, aw):
    """((H+2)(W+2), (Ho+2)(Wo+2)) operator: small canvas -> upsampled canvas."""
    Ho, H = ah.shape
    Wo, W = aw.shape
    K = np.einsum('oh,pw->hwop', ah, aw)                 # (H, W, Ho, Wo)
    U = np.zeros((H + 2, W + 2, Ho + 2, Wo + 2), np.float32)
    U[1:H + 1, 1:W + 1, 1:Ho + 1, 1:Wo + 1] = K
    return jnp.asarray(U.reshape((H + 2) * (W + 2), (Ho + 2) * (Wo + 2)))


def _interior_mask(H, W):
    m = np.zeros((H + 2, W + 2), np.float32)
    m[1:H + 1, 1:W + 1] = 1.0
    return jnp.asarray(m.reshape(1, -1))


def _to_canvas(x):
    """(B, C, H, W) -> zero-padded, flattened canvas (B, C, (H+2)*(W+2))."""
    B, C, H, W = x.shape
    xp = jnp.pad(x, ((0, 0), (0, 0), (1, 1), (1, 1)))
    return xp.reshape(B, C, (H + 2) * (W + 2))


def _pack_block(p, cin_pad=None):
    """Pack one residual block's params into a single (Cout, lanes) operand."""
    w1, b1 = p['w1'], p['b1']          # w1: (3, 3, Cin, Cout) HWIO
    w2, b2 = p['w2'], p['b2']
    wh, bh = p['wh'], p['bh']          # wh: (Cin, Cout)
    cin, cout = w1.shape[2], w1.shape[3]
    if cin_pad is not None and cin_pad > cin:
        w1 = jnp.pad(w1, ((0, 0), (0, 0), (0, cin_pad - cin), (0, 0)))
        wh = jnp.pad(wh, ((0, cin_pad - cin), (0, 0)))
        cin = cin_pad
    segs = [
        jnp.reshape(w1, (9 * cin, cout)).T,    # (Cout, 9*Cin)
        jnp.reshape(b1, (cout, 1)),
        jnp.reshape(w2, (9 * cout, cout)).T,   # (Cout, 9*Cout)
        jnp.reshape(b2, (cout, 1)),
        jnp.transpose(wh),                     # (Cout, Cin)
        jnp.reshape(bh, (cout, 1)),
    ]
    widths, _, _ = _seg_layout(cin, cout)
    cols = [jnp.pad(s, ((0, 0), (0, _round128(w) - w)))
            for s, w in zip(segs, widths)]
    return jnp.concatenate(cols, axis=1), (cin, cout)


# ----------------------------------------------------------------------------
# Forward pass (NCHW in, NCHW out) — one pallas_call
# ----------------------------------------------------------------------------
def vaegan_decoder_forward(params, z_mean, z_logvar, constant_field, noise,
                           relu_alpha=0.2):
    B, L, H, W = z_mean.shape
    Ho, Wo = int(H * 5.0), int(W * 7.0)
    Ns, Nb = (H + 2) * (W + 2), (Ho + 2) * (Wo + 2)
    n_res1, n_res2 = len(params['rb1']), len(params['rb2'])
    fg = params['rb1'][0]['w1'].shape[3]

    # constant operators (host precomputed)
    U = _upsample_operator(bilinear_matrix(H, Ho), bilinear_matrix(W, Wo))
    mask_s, mask_b = _interior_mask(H, W), _interior_mask(Ho, Wo)

    # embed inputs into zero-bordered canvases (one-time boundary pads)
    noise_c = _to_canvas(noise.astype(jnp.float32))
    logvar_c = _to_canvas(z_logvar.astype(jnp.float32))
    mean_c = _to_canvas(z_mean.astype(jnp.float32))
    cf_c = _to_canvas(constant_field.astype(jnp.float32))    # (B, 1, Nb)

    # pack weights (im2col layout, channels-first, one operand per block);
    # zero-pad the dummy input channels of the first residual_block2 block to
    # match the 8-channel-padded constant-field concat inside the kernel.
    blocks = list(params['rb1']) + [params['us_rb1'], params['us_rb2']] \
        + list(params['rb2'])
    packs, meta = [], []
    for i, p in enumerate(blocks):
        pad = fg + _CF_PAD if i == n_res1 + 2 else None
        pk, m = _pack_block(p, cin_pad=pad)
        packs.append(pk)
        meta.append(m)

    wo = jnp.transpose(params['wo'])           # (1, fg)
    bo = jnp.reshape(params['bo'], (1, 1))

    inputs = [noise_c, logvar_c, mean_c, cf_c, mask_s, mask_b, U] \
        + packs + [wo, bo]
    in_specs = [_batched_spec(a.shape) for a in inputs[:4]] + \
               [_const_spec(a.shape) for a in inputs[4:]]

    kernel = functools.partial(
        _decoder_kernel, alpha=relu_alpha, wp_s=W + 2, wp_b=Wo + 2,
        n_res1=n_res1, n_res2=n_res2, meta=tuple(meta), cf_pad=_CF_PAD)

    out_c = pl.pallas_call(
        kernel,
        grid=(B,),
        in_specs=in_specs,
        out_specs=_batched_spec((B, 1, Nb)),
        out_shape=jax.ShapeDtypeStruct((B, 1, Nb), jnp.float32),
        compiler_params=pltpu.CompilerParams(
            dimension_semantics=("parallel",)),
    )(*inputs)

    # strip the canvas border -> (B, 1, Ho, Wo)
    return out_c.reshape(B, 1, Ho + 2, Wo + 2)[:, :, 1:-1, 1:-1]


# ----------------------------------------------------------------------------
# Parameter initialization (canonical HWIO / (Cin,Cout) formats)
# ----------------------------------------------------------------------------
def init_conv3x3(key, cin, cout):
    kw, kb = jax.random.split(key)
    limit = (6.0 / (9 * cin + 9 * cout)) ** 0.5          # xavier_uniform_
    w = jax.random.uniform(kw, (3, 3, cin, cout), jnp.float32, -limit, limit)
    bound = 1.0 / ((9 * cin) ** 0.5)
    b = jax.random.uniform(kb, (cout,), jnp.float32, -bound, bound)
    return w, b


def init_conv1x1(key, cin, cout):
    kw, kb = jax.random.split(key)
    bound = 1.0 / (cin ** 0.5)
    w = jax.random.uniform(kw, (cin, cout), jnp.float32, -bound, bound)
    b = jax.random.uniform(kb, (cout,), jnp.float32, -bound, bound)
    return w, b


def init_residual_block(key, cin, cout):
    k1, k2, kh = jax.random.split(key, 3)
    w1, b1 = init_conv3x3(k1, cin, cout)
    w2, b2 = init_conv3x3(k2, cout, cout)
    wh, bh = init_conv1x1(kh, cin, cout)                 # forceconv=True highway
    return dict(w1=w1, b1=b1, w2=w2, b2=b2, wh=wh, bh=bh)


def init_decoder_params(key, filters_gen, latent_variables,
                        num_layers_res1=3, num_layers_res2=3):
    keys = jax.random.split(key, num_layers_res1 + num_layers_res2 + 3)
    params = {'rb1': [], 'rb2': []}
    cin = latent_variables
    for i in range(num_layers_res1):
        params['rb1'].append(init_residual_block(keys[i], cin, filters_gen))
        cin = filters_gen
    params['us_rb1'] = init_residual_block(
        keys[num_layers_res1], filters_gen, 2 * filters_gen)
    params['us_rb2'] = init_residual_block(
        keys[num_layers_res1 + 1], 2 * filters_gen, filters_gen)
    cin = filters_gen + 1
    for i in range(num_layers_res2):
        params['rb2'].append(
            init_residual_block(keys[num_layers_res1 + 2 + i], cin, filters_gen))
        cin = filters_gen
    wo, bo = init_conv1x1(keys[-1], filters_gen, 1)
    params['wo'], params['bo'] = wo, bo
    return params


# ----------------------------------------------------------------------------
# Pure-JAX reference (independent of the kernel's canvas/packing tricks)
# ----------------------------------------------------------------------------
def reference_forward(params, z_mean, z_logvar, constant_field, noise,
                      relu_alpha=0.2):
    hp = jax.lax.Precision.HIGHEST

    def lrelu(v):
        return jnp.where(v >= 0, v, relu_alpha * v)

    def conv3(v, w, b):
        y = jax.lax.conv_general_dilated(
            v, w, window_strides=(1, 1), padding='SAME',
            dimension_numbers=('NCHW', 'HWIO', 'NCHW'), precision=hp)
        return y + b[None, :, None, None]

    def conv1(v, w, b):
        return (jnp.einsum('io,bihw->bohw', w, v, precision=hp)
                + b[None, :, None, None])

    def block(v, p):
        y = conv3(lrelu(v), p['w1'], p['b1'])
        y = conv3(lrelu(y), p['w2'], p['b2'])
        return y + conv1(v, p['wh'], p['bh'])

    x = noise * jnp.exp(z_logvar * 0.5) + z_mean
    for p in params['rb1']:
        x = block(x, p)
    x = block(x, params['us_rb1'])
    B, C, H, W = x.shape
    Ho, Wo = int(H * 5.0), int(W * 7.0)
    ah = jnp.asarray(bilinear_matrix(H, Ho))
    aw = jnp.asarray(bilinear_matrix(W, Wo))
    x = jnp.einsum('oh,bchw->bcow', ah, x, precision=hp)
    x = jnp.einsum('pw,bcow->bcop', aw, x, precision=hp)
    x = block(x, params['us_rb2'])
    x = jnp.concatenate([x, constant_field], axis=1)
    for p in params['rb2']:
        x = block(x, p)
    y = (jnp.einsum('io,bihw->bohw', params['wo'], x, precision=hp)
         + params['bo'][None, :, None, None])
    return jnp.where(y > 20.0, y, jnp.log(1.0 + jnp.exp(jnp.minimum(y, 20.0))))


# ----------------------------------------------------------------------------
if __name__ == "__main__":
    key = jax.random.PRNGKey(0)
    kp, km, kv, kn, kc = jax.random.split(key, 5)

    B, L, H, W = 2, 8, 4, 4          # batch, latent_variables, latent spatial
    filters_gen = 8
    Ho, Wo = H * 5, W * 7

    params = init_decoder_params(kp, filters_gen, L)

    z_mean = jax.random.normal(km, (B, L, H, W), jnp.float32)
    z_logvar = 0.1 * jax.random.normal(kv, (B, L, H, W), jnp.float32)
    noise = jax.random.normal(kn, (B, L, H, W), jnp.float32)
    constant_field = jax.random.normal(kc, (B, 1, Ho, Wo), jnp.float32)

    fwd = jax.jit(vaegan_decoder_forward)
    out = jax.block_until_ready(
        fwd(params, z_mean, z_logvar, constant_field, noise))
    assert out.shape == (B, 1, Ho, Wo), out.shape
    assert bool(jnp.all(out >= 0.0))          # softplus output is non-negative

    ref = jax.block_until_ready(
        reference_forward(params, z_mean, z_logvar, constant_field, noise))
    np.testing.assert_allclose(np.asarray(out), np.asarray(ref),
                               rtol=5e-2, atol=5e-2)
    print("KERNEL_OK")
</pallas_src>

<mosaic_0001>
module attributes {stable_mosaic.version = 11 : i64} {
  func.func @_decoder_kernel(%arg0: i32, %arg1: memref<1x8x36xf32, #tpu.memory_space<vmem>>, %arg2: memref<1x8x36xf32, #tpu.memory_space<vmem>>, %arg3: memref<1x8x36xf32, #tpu.memory_space<vmem>>, %arg4: memref<1x1x660xf32, #tpu.memory_space<vmem>>, %arg5: memref<1x36xf32, #tpu.memory_space<vmem>>, %arg6: memref<1x660xf32, #tpu.memory_space<vmem>>, %arg7: memref<36x660xf32, #tpu.memory_space<vmem>>, %arg8: memref<8x768xf32, #tpu.memory_space<vmem>>, %arg9: memref<8x768xf32, #tpu.memory_space<vmem>>, %arg10: memref<8x768xf32, #tpu.memory_space<vmem>>, %arg11: memref<16x896xf32, #tpu.memory_space<vmem>>, %arg12: memref<8x896xf32, #tpu.memory_space<vmem>>, %arg13: memref<8x896xf32, #tpu.memory_space<vmem>>, %arg14: memref<8x768xf32, #tpu.memory_space<vmem>>, %arg15: memref<8x768xf32, #tpu.memory_space<vmem>>, %arg16: memref<1x8xf32, #tpu.memory_space<vmem>>, %arg17: memref<1x1xf32, #tpu.memory_space<vmem>>, %arg18: memref<1x1x660xf32, #tpu.memory_space<vmem>>) attributes {dimension_semantics = [#tpu.dimension_semantics<parallel>], iteration_bounds = array<i64: 2>, scalar_prefetch = 0 : i64, scratch_operands = 0 : i64, tpu.core_type = #tpu.core_type<tc>, window_params = [{transform_indices = @transform_0, window_bounds = array<i64: 1, 8, 36>}, {transform_indices = @transform_1, window_bounds = array<i64: 1, 8, 36>}, {transform_indices = @transform_2, window_bounds = array<i64: 1, 8, 36>}, {transform_indices = @transform_3, window_bounds = array<i64: 1, 1, 660>}, {pipeline_mode = #tpu.pipeline_mode<synchronous>, transform_indices = @transform_4, window_bounds = array<i64: 1, 36>}, {pipeline_mode = #tpu.pipeline_mode<synchronous>, transform_indices = @transform_5, window_bounds = array<i64: 1, 660>}, {pipeline_mode = #tpu.pipeline_mode<synchronous>, transform_indices = @transform_6, window_bounds = array<i64: 36, 660>}, {pipeline_mode = #tpu.pipeline_mode<synchronous>, transform_indices = @transform_7, window_bounds = array<i64: 8, 768>}, {pipeline_mode = #tpu.pipeline_mode<synchronous>, transform_indices = @transform_8, window_bounds = array<i64: 8, 768>}, {pipeline_mode = #tpu.pipeline_mode<synchronous>, transform_indices = @transform_9, window_bounds = array<i64: 8, 768>}, {pipeline_mode = #tpu.pipeline_mode<synchronous>, transform_indices = @transform_10, window_bounds = array<i64: 16, 896>}, {pipeline_mode = #tpu.pipeline_mode<synchronous>, transform_indices = @transform_11, window_bounds = array<i64: 8, 896>}, {pipeline_mode = #tpu.pipeline_mode<synchronous>, transform_indices = @transform_12, window_bounds = array<i64: 8, 896>}, {pipeline_mode = #tpu.pipeline_mode<synchronous>, transform_indices = @transform_13, window_bounds = array<i64: 8, 768>}, {pipeline_mode = #tpu.pipeline_mode<synchronous>, transform_indices = @transform_14, window_bounds = array<i64: 8, 768>}, {pipeline_mode = #tpu.pipeline_mode<synchronous>, transform_indices = @transform_15, window_bounds = array<i64: 1, 8>}, {pipeline_mode = #tpu.pipeline_mode<synchronous>, transform_indices = @transform_16, window_bounds = array<i64: 1, 1>}, {transform_indices = @transform_17, window_bounds = array<i64: 1, 1, 660>}]} {
    %c0 = arith.constant 0 : index
    %c0_0 = arith.constant 0 : index
    %0 = vector.load %arg5[%c0, %c0_0] : memref<1x36xf32, #tpu.memory_space<vmem>>, vector<1x36xf32>
    %c0_1 = arith.constant 0 : index
    %c0_2 = arith.constant 0 : index
    %1 = vector.load %arg6[%c0_1, %c0_2] : memref<1x660xf32, #tpu.memory_space<vmem>>, vector<1x660xf32>
    %c0_3 = arith.constant 0 : index
    %c0_4 = arith.constant 0 : index
    %c0_5 = arith.constant 0 : index
    %2 = vector.load %arg1[%c0_3, %c0_4, %c0_5] : memref<1x8x36xf32, #tpu.memory_space<vmem>>, vector<1x8x36xf32>
    %3 = vector.shape_cast %2 : vector<1x8x36xf32> to vector<8x36xf32>
    %c0_6 = arith.constant 0 : index
    %c0_7 = arith.constant 0 : index
    %c0_8 = arith.constant 0 : index
    %4 = vector.load %arg2[%c0_6, %c0_7, %c0_8] : memref<1x8x36xf32, #tpu.memory_space<vmem>>, vector<1x8x36xf32>
    %5 = vector.shape_cast %4 : vector<1x8x36xf32> to vector<8x36xf32>
    %cst = arith.constant 5.000000e-01 : f32
    %6 = vector.broadcast %cst : f32 to vector<8x36xf32>
    %7 = arith.mulf %5, %6 : vector<8x36xf32>
    %8 = math.exp %7 : vector<8x36xf32>
    %9 = arith.mulf %3, %8 : vector<8x36xf32>
    %c0_9 = arith.constant 0 : index
    %c0_10 = arith.constant 0 : index
    %c0_11 = arith.constant 0 : index
    %10 = vector.load %arg3[%c0_9, %c0_10, %c0_11] : memref<1x8x36xf32, #tpu.memory_space<vmem>>, vector<1x8x36xf32>
    %11 = vector.shape_cast %10 : vector<1x8x36xf32> to vector<8x36xf32>
    %12 = arith.addf %9, %11 : vector<8x36xf32>
    %c0_12 = arith.constant 0 : index
    %c0_13 = arith.constant 0 : index
    %13 = vector.load %arg8[%c0_12, %c0_13] : memref<8x768xf32, #tpu.memory_space<vmem>>, vector<8x72xf32>
    %c0_14 = arith.constant 0 : index
    %c128 = arith.constant 128 : index
    %14 = vector.load %arg8[%c0_14, %c128] : memref<8x768xf32, #tpu.memory_space<vmem>>, vector<8x1xf32>
    %c0_15 = arith.constant 0 : index
    %c256 = arith.constant 256 : index
    %15 = vector.load %arg8[%c0_15, %c256] : memref<8x768xf32, #tpu.memory_space<vmem>>, vector<8x72xf32>
    %c0_16 = arith.constant 0 : index
    %c384 = arith.constant 384 : index
    %16 = vector.load %arg8[%c0_16, %c384] : memref<8x768xf32, #tpu.memory_space<vmem>>, vector<8x1xf32>
    %c0_17 = arith.constant 0 : index
    %c512 = arith.constant 512 : index
    %17 = vector.load %arg8[%c0_17, %c512] : memref<8x768xf32, #tpu.memory_space<vmem>>, vector<8x8xf32>
    %c0_18 = arith.constant 0 : index
    %c640 = arith.constant 640 : index
    %18 = vector.load %arg8[%c0_18, %c640] : memref<8x768xf32, #tpu.memory_space<vmem>>, vector<8x1xf32>
    %cst_19 = arith.constant 0.000000e+00 : f32
    %19 = vector.broadcast %cst_19 : f32 to vector<8x36xf32>
    %20 = arith.cmpf oge, %12, %19 : vector<8x36xf32>
    %cst_20 = arith.constant 2.000000e-01 : f32
    %21 = vector.broadcast %cst_20 : f32 to vector<8x36xf32>
    %22 = arith.mulf %21, %12 : vector<8x36xf32>
    %23 = arith.select %20, %12, %22 : vector<8x36xi1>, vector<8x36xf32>
    %cst_21 = arith.constant 0.000000e+00 : f32
    %24 = vector.broadcast %cst_21 : f32 to vector<8x7xf32>
    %25 = vector.extract_strided_slice %23 {offsets = [0, 0], sizes = [8, 29], strides = [1, 1]} : vector<8x36xf32> to vector<8x29xf32>
    %26 = tpu.concatenate %24, %25 in 1 : vector<8x7xf32>, vector<8x29xf32> -> vector<8x36xf32>
    %cst_22 = arith.constant 0.000000e+00 : f32
    %27 = vector.broadcast %cst_22 : f32 to vector<8x6xf32>
    %28 = vector.extract_strided_slice %23 {offsets = [0, 0], sizes = [8, 30], strides = [1, 1]} : vector<8x36xf32> to vector<8x30xf32>
    %29 = tpu.concatenate %27, %28 in 1 : vector<8x6xf32>, vector<8x30xf32> -> vector<8x36xf32>
    %cst_23 = arith.constant 0.000000e+00 : f32
    %30 = vector.broadcast %cst_23 : f32 to vector<8x5xf32>
    %31 = vector.extract_strided_slice %23 {offsets = [0, 0], sizes = [8, 31], strides = [1, 1]} : vector<8x36xf32> to vector<8x31xf32>
    %32 = tpu.concatenate %30, %31 in 1 : vector<8x5xf32>, vector<8x31xf32> -> vector<8x36xf32>
    %cst_24 = arith.constant 0.000000e+00 : f32
    %33 = vector.broadcast %cst_24 : f32 to vector<8x1xf32>
    %34 = vector.extract_strided_slice %23 {offsets = [0, 0], sizes = [8, 35], strides = [1, 1]} : vector<8x36xf32> to vector<8x35xf32>
    %35 = tpu.concatenate %33, %34 in 1 : vector<8x1xf32>, vector<8x35xf32> -> vector<8x36xf32>
    %36 = vector.extract_strided_slice %23 {offsets = [0, 1], sizes = [8, 35], strides = [1, 1]} : vector<8x36xf32> to vector<8x35xf32>
    %cst_25 = arith.constant 0.000000e+00 : f32
    %37 = vector.broadcast %cst_25 : f32 to vector<8x1xf32>
    %38 = tpu.concatenate %36, %37 in 1 : vector<8x35xf32>, vector<8x1xf32> -> vector<8x36xf32>
    %39 = vector.extract_strided_slice %23 {offsets = [0, 5], sizes = [8, 31], strides = [1, 1]} : vector<8x36xf32> to vector<8x31xf32>
    %cst_26 = arith.constant 0.000000e+00 : f32
    %40 = vector.broadcast %cst_26 : f32 to vector<8x5xf32>
    %41 = tpu.concatenate %39, %40 in 1 : vector<8x31xf32>, vector<8x5xf32> -> vector<8x36xf32>
    %42 = vector.extract_strided_slice %23 {offsets = [0, 6], sizes = [8, 30], strides = [1, 1]} : vector<8x36xf32> to vector<8x30xf32>
    %cst_27 = arith.constant 0.000000e+00 : f32
    %43 = vector.broadcast %cst_27 : f32 to vector<8x6xf32>
    %44 = tpu.concatenate %42, %43 in 1 : vector<8x30xf32>, vector<8x6xf32> -> vector<8x36xf32>
    %45 = vector.extract_strided_slice %23 {offsets = [0, 7], sizes = [8, 29], strides = [1, 1]} : vector<8x36xf32> to vector<8x29xf32>
    %cst_28 = arith.constant 0.000000e+00 : f32
    %46 = vector.broadcast %cst_28 : f32 to vector<8x7xf32>
    %47 = tpu.concatenate %45, %46 in 1 : vector<8x29xf32>, vector<8x7xf32> -> vector<8x36xf32>
    %48 = tpu.concatenate %26, %29, %32, %35, %23, %38, %41, %44, %47 in 0 : vector<8x36xf32>, vector<8x36xf32>, vector<8x36xf32>, vector<8x36xf32>, vector<8x36xf32>, vector<8x36xf32>, vector<8x36xf32>, vector<8x36xf32>, vector<8x36xf32> -> vector<72x36xf32>
    %cst_29 = arith.constant dense<0.000000e+00> : vector<8x36xf32>
    %49 = tpu.matmul %13, %48, %cst_29 {dimension_numbers = #tpu.dot_dimension_numbers<[1], [0], [0], [1], [0, 0, 1, 1], [], []>} : vector<8x72xf32>, vector<72x36xf32>, vector<8x36xf32> -> vector<8x36xf32>
    %50 = vector.broadcast %14 : vector<8x1xf32> to vector<8x36xf32>
    %51 = arith.addf %49, %50 : vector<8x36xf32>
    %52 = vector.broadcast %0 : vector<1x36xf32> to vector<8x36xf32>
    %53 = arith.mulf %51, %52 : vector<8x36xf32>
    %cst_30 = arith.constant 0.000000e+00 : f32
    %54 = vector.broadcast %cst_30 : f32 to vector<8x36xf32>
    %55 = arith.cmpf oge, %53, %54 : vector<8x36xf32>
    %cst_31 = arith.constant 2.000000e-01 : f32
    %56 = vector.broadcast %cst_31 : f32 to vector<8x36xf32>
    %57 = arith.mulf %56, %53 : vector<8x36xf32>
    %58 = arith.select %55, %53, %57 : vector<8x36xi1>, vector<8x36xf32>
    %cst_32 = arith.constant 0.000000e+00 : f32
    %59 = vector.broadcast %cst_32 : f32 to vector<8x7xf32>
    %60 = vector.extract_strided_slice %58 {offsets = [0, 0], sizes = [8, 29], strides = [1, 1]} : vector<8x36xf32> to vector<8x29xf32>
    %61 = tpu.concatenate %59, %60 in 1 : vector<8x7xf32>, vector<8x29xf32> -> vector<8x36xf32>
    %cst_33 = arith.constant 0.000000e+00 : f32
    %62 = vector.broadcast %cst_33 : f32 to vector<8x6xf32>
    %63 = vector.extract_strided_slice %58 {offsets = [0, 0], sizes = [8, 30], strides = [1, 1]} : vector<8x36xf32> to vector<8x30xf32>
    %64 = tpu.concatenate %62, %63 in 1 : vector<8x6xf32>, vector<8x30xf32> -> vector<8x36xf32>
    %cst_34 = arith.constant 0.000000e+00 : f32
    %65 = vector.broadcast %cst_34 : f32 to vector<8x5xf32>
    %66 = vector.extract_strided_slice %58 {offsets = [0, 0], sizes = [8, 31], strides = [1, 1]} : vector<8x36xf32> to vector<8x31xf32>
    %67 = tpu.concatenate %65, %66 in 1 : vector<8x5xf32>, vector<8x31xf32> -> vector<8x36xf32>
    %cst_35 = arith.constant 0.000000e+00 : f32
    %68 = vector.broadcast %cst_35 : f32 to vector<8x1xf32>
    %69 = vector.extract_strided_slice %58 {offsets = [0, 0], sizes = [8, 35], strides = [1, 1]} : vector<8x36xf32> to vector<8x35xf32>
    %70 = tpu.concatenate %68, %69 in 1 : vector<8x1xf32>, vector<8x35xf32> -> vector<8x36xf32>
    %71 = vector.extract_strided_slice %58 {offsets = [0, 1], sizes = [8, 35], strides = [1, 1]} : vector<8x36xf32> to vector<8x35xf32>
    %cst_36 = arith.constant 0.000000e+00 : f32
    %72 = vector.broadcast %cst_36 : f32 to vector<8x1xf32>
    %73 = tpu.concatenate %71, %72 in 1 : vector<8x35xf32>, vector<8x1xf32> -> vector<8x36xf32>
    %74 = vector.extract_strided_slice %58 {offsets = [0, 5], sizes = [8, 31], strides = [1, 1]} : vector<8x36xf32> to vector<8x31xf32>
    %cst_37 = arith.constant 0.000000e+00 : f32
    %75 = vector.broadcast %cst_37 : f32 to vector<8x5xf32>
    %76 = tpu.concatenate %74, %75 in 1 : vector<8x31xf32>, vector<8x5xf32> -> vector<8x36xf32>
    %77 = vector.extract_strided_slice %58 {offsets = [0, 6], sizes = [8, 30], strides = [1, 1]} : vector<8x36xf32> to vector<8x30xf32>
    %cst_38 = arith.constant 0.000000e+00 : f32
    %78 = vector.broadcast %cst_38 : f32 to vector<8x6xf32>
    %79 = tpu.concatenate %77, %78 in 1 : vector<8x30xf32>, vector<8x6xf32> -> vector<8x36xf32>
    %80 = vector.extract_strided_slice %58 {offsets = [0, 7], sizes = [8, 29], strides = [1, 1]} : vector<8x36xf32> to vector<8x29xf32>
    %cst_39 = arith.constant 0.000000e+00 : f32
    %81 = vector.broadcast %cst_39 : f32 to vector<8x7xf32>
    %82 = tpu.concatenate %80, %81 in 1 : vector<8x29xf32>, vector<8x7xf32> -> vector<8x36xf32>
    %83 = tpu.concatenate %61, %64, %67, %70, %58, %73, %76, %79, %82 in 0 : vector<8x36xf32>, vector<8x36xf32>, vector<8x36xf32>, vector<8x36xf32>, vector<8x36xf32>, vector<8x36xf32>, vector<8x36xf32>, vector<8x36xf32>, vector<8x36xf32> -> vector<72x36xf32>
    %cst_40 = arith.constant dense<0.000000e+00> : vector<8x36xf32>
    %84 = tpu.matmul %15, %83, %cst_40 {dimension_numbers = #tpu.dot_dimension_numbers<[1], [0], [0], [1], [0, 0, 1, 1], [], []>} : vector<8x72xf32>, vector<72x36xf32>, vector<8x36xf32> -> vector<8x36xf32>
    %85 = vector.broadcast %16 : vector<8x1xf32> to vector<8x36xf32>
    %86 = arith.addf %84, %85 : vector<8x36xf32>
    %87 = vector.broadcast %0 : vector<1x36xf32> to vector<8x36xf32>
    %88 = arith.mulf %86, %87 : vector<8x36xf32>
    %cst_41 = arith.constant dense<0.000000e+00> : vector<8x36xf32>
    %89 = tpu.matmul %17, %12, %cst_41 {dimension_numbers = #tpu.dot_dimension_numbers<[1], [0], [0], [1], [0, 0, 1, 1], [], []>} : vector<8x8xf32>, vector<8x36xf32>, vector<8x36xf32> -> vector<8x36xf32>
    %90 = vector.broadcast %18 : vector<8x1xf32> to vector<8x36xf32>
    %91 = arith.addf %89, %90 : vector<8x36xf32>
    %92 = arith.addf %88, %91 : vector<8x36xf32>
    %93 = vector.broadcast %0 : vector<1x36xf32> to vector<8x36xf32>
    %94 = arith.mulf %92, %93 : vector<8x36xf32>
    %c0_42 = arith.constant 0 : index
    %c0_43 = arith.constant 0 : index
    %95 = vector.load %arg9[%c0_42, %c0_43] : memref<8x768xf32, #tpu.memory_space<vmem>>, vector<8x72xf32>
    %c0_44 = arith.constant 0 : index
    %c128_45 = arith.constant 128 : index
    %96 = vector.load %arg9[%c0_44, %c128_45] : memref<8x768xf32, #tpu.memory_space<vmem>>, vector<8x1xf32>
    %c0_46 = arith.constant 0 : index
    %c256_47 = arith.constant 256 : index
    %97 = vector.load %arg9[%c0_46, %c256_47] : memref<8x768xf32, #tpu.memory_space<vmem>>, vector<8x72xf32>
    %c0_48 = arith.constant 0 : index
    %c384_49 = arith.constant 384 : index
    %98 = vector.load %arg9[%c0_48, %c384_49] : memref<8x768xf32, #tpu.memory_space<vmem>>, vector<8x1xf32>
    %c0_50 = arith.constant 0 : index
    %c512_51 = arith.constant 512 : index
    %99 = vector.load %arg9[%c0_50, %c512_51] : memref<8x768xf32, #tpu.memory_space<vmem>>, vector<8x8xf32>
    %c0_52 = arith.constant 0 : index
    %c640_53 = arith.constant 640 : index
    %100 = vector.load %arg9[%c0_52, %c640_53] : memref<8x768xf32, #tpu.memory_space<vmem>>, vector<8x1xf32>
    %cst_54 = arith.constant 0.000000e+00 : f32
    %101 = vector.broadcast %cst_54 : f32 to vector<8x36xf32>
    %102 = arith.cmpf oge, %94, %101 : vector<8x36xf32>
    %cst_55 = arith.constant 2.000000e-01 : f32
    %103 = vector.broadcast %cst_55 : f32 to vector<8x36xf32>
    %104 = arith.mulf %103, %94 : vector<8x36xf32>
    %105 = arith.select %102, %94, %104 : vector<8x36xi1>, vector<8x36xf32>
    %cst_56 = arith.constant 0.000000e+00 : f32
    %106 = vector.broadcast %cst_56 : f32 to vector<8x7xf32>
    %107 = vector.extract_strided_slice %105 {offsets = [0, 0], sizes = [8, 29], strides = [1, 1]} : vector<8x36xf32> to vector<8x29xf32>
    %108 = tpu.concatenate %106, %107 in 1 : vector<8x7xf32>, vector<8x29xf32> -> vector<8x36xf32>
    %cst_57 = arith.constant 0.000000e+00 : f32
    %109 = vector.broadcast %cst_57 : f32 to vector<8x6xf32>
    %110 = vector.extract_strided_slice %105 {offsets = [0, 0], sizes = [8, 30], strides = [1, 1]} : vector<8x36xf32> to vector<8x30xf32>
    %111 = tpu.concatenate %109, %110 in 1 : vector<8x6xf32>, vector<8x30xf32> -> vector<8x36xf32>
    %cst_58 = arith.constant 0.000000e+00 : f32
    %112 = vector.broadcast %cst_58 : f32 to vector<8x5xf32>
    %113 = vector.extract_strided_slice %105 {offsets = [0, 0], sizes = [8, 31], strides = [1, 1]} : vector<8x36xf32> to vector<8x31xf32>
    %114 = tpu.concatenate %112, %113 in 1 : vector<8x5xf32>, vector<8x31xf32> -> vector<8x36xf32>
    %cst_59 = arith.constant 0.000000e+00 : f32
    %115 = vector.broadcast %cst_59 : f32 to vector<8x1xf32>
    %116 = vector.extract_strided_slice %105 {offsets = [0, 0], sizes = [8, 35], strides = [1, 1]} : vector<8x36xf32> to vector<8x35xf32>
    %117 = tpu.concatenate %115, %116 in 1 : vector<8x1xf32>, vector<8x35xf32> -> vector<8x36xf32>
    %118 = vector.extract_strided_slice %105 {offsets = [0, 1], sizes = [8, 35], strides = [1, 1]} : vector<8x36xf32> to vector<8x35xf32>
    %cst_60 = arith.constant 0.000000e+00 : f32
    %119 = vector.broadcast %cst_60 : f32 to vector<8x1xf32>
    %120 = tpu.concatenate %118, %119 in 1 : vector<8x35xf32>, vector<8x1xf32> -> vector<8x36xf32>
    %121 = vector.extract_strided_slice %105 {offsets = [0, 5], sizes = [8, 31], strides = [1, 1]} : vector<8x36xf32> to vector<8x31xf32>
    %cst_61 = arith.constant 0.000000e+00 : f32
    %122 = vector.broadcast %cst_61 : f32 to vector<8x5xf32>
    %123 = tpu.concatenate %121, %122 in 1 : vector<8x31xf32>, vector<8x5xf32> -> vector<8x36xf32>
    %124 = vector.extract_strided_slice %105 {offsets = [0, 6], sizes = [8, 30], strides = [1, 1]} : vector<8x36xf32> to vector<8x30xf32>
    %cst_62 = arith.constant 0.000000e+00 : f32
    %125 = vector.broadcast %cst_62 : f32 to vector<8x6xf32>
    %126 = tpu.concatenate %124, %125 in 1 : vector<8x30xf32>, vector<8x6xf32> -> vector<8x36xf32>
    %127 = vector.extract_strided_slice %105 {offsets = [0, 7], sizes = [8, 29], strides = [1, 1]} : vector<8x36xf32> to vector<8x29xf32>
    %cst_63 = arith.constant 0.000000e+00 : f32
    %128 = vector.broadcast %cst_63 : f32 to vector<8x7xf32>
    %129 = tpu.concatenate %127, %128 in 1 : vector<8x29xf32>, vector<8x7xf32> -> vector<8x36xf32>
    %130 = tpu.concatenate %108, %111, %114, %117, %105, %120, %123, %126, %129 in 0 : vector<8x36xf32>, vector<8x36xf32>, vector<8x36xf32>, vector<8x36xf32>, vector<8x36xf32>, vector<8x36xf32>, vector<8x36xf32>, vector<8x36xf32>, vector<8x36xf32> -> vector<72x36xf32>
    %cst_64 = arith.constant dense<0.000000e+00> : vector<8x36xf32>
    %131 = tpu.matmul %95, %130, %cst_64 {dimension_numbers = #tpu.dot_dimension_numbers<[1], [0], [0], [1], [0, 0, 1, 1], [], []>} : vector<8x72xf32>, vector<72x36xf32>, vector<8x36xf32> -> vector<8x36xf32>
    %132 = vector.broadcast %96 : vector<8x1xf32> to vector<8x36xf32>
    %133 = arith.addf %131, %132 : vector<8x36xf32>
    %134 = vector.broadcast %0 : vector<1x36xf32> to vector<8x36xf32>
    %135 = arith.mulf %133, %134 : vector<8x36xf32>
    %cst_65 = arith.constant 0.000000e+00 : f32
    %136 = vector.broadcast %cst_65 : f32 to vector<8x36xf32>
    %137 = arith.cmpf oge, %135, %136 : vector<8x36xf32>
    %cst_66 = arith.constant 2.000000e-01 : f32
    %138 = vector.broadcast %cst_66 : f32 to vector<8x36xf32>
    %139 = arith.mulf %138, %135 : vector<8x36xf32>
    %140 = arith.select %137, %135, %139 : vector<8x36xi1>, vector<8x36xf32>
    %cst_67 = arith.constant 0.000000e+00 : f32
    %141 = vector.broadcast %cst_67 : f32 to vector<8x7xf32>
    %142 = vector.extract_strided_slice %140 {offsets = [0, 0], sizes = [8, 29], strides = [1, 1]} : vector<8x36xf32> to vector<8x29xf32>
    %143 = tpu.concatenate %141, %142 in 1 : vector<8x7xf32>, vector<8x29xf32> -> vector<8x36xf32>
    %cst_68 = arith.constant 0.000000e+00 : f32
    %144 = vector.broadcast %cst_68 : f32 to vector<8x6xf32>
    %145 = vector.extract_strided_slice %140 {offsets = [0, 0], sizes = [8, 30], strides = [1, 1]} : vector<8x36xf32> to vector<8x30xf32>
    %146 = tpu.concatenate %144, %145 in 1 : vector<8x6xf32>, vector<8x30xf32> -> vector<8x36xf32>
    %cst_69 = arith.constant 0.000000e+00 : f32
    %147 = vector.broadcast %cst_69 : f32 to vector<8x5xf32>
    %148 = vector.extract_strided_slice %140 {offsets = [0, 0], sizes = [8, 31], strides = [1, 1]} : vector<8x36xf32> to vector<8x31xf32>
    %149 = tpu.concatenate %147, %148 in 1 : vector<8x5xf32>, vector<8x31xf32> -> vector<8x36xf32>
    %cst_70 = arith.constant 0.000000e+00 : f32
    %150 = vector.broadcast %cst_70 : f32 to vector<8x1xf32>
    %151 = vector.extract_strided_slice %140 {offsets = [0, 0], sizes = [8, 35], strides = [1, 1]} : vector<8x36xf32> to vector<8x35xf32>
    %152 = tpu.concatenate %150, %151 in 1 : vector<8x1xf32>, vector<8x35xf32> -> vector<8x36xf32>
    %153 = vector.extract_strided_slice %140 {offsets = [0, 1], sizes = [8, 35], strides = [1, 1]} : vector<8x36xf32> to vector<8x35xf32>
    %cst_71 = arith.constant 0.000000e+00 : f32
    %154 = vector.broadcast %cst_71 : f32 to vector<8x1xf32>
    %155 = tpu.concatenate %153, %154 in 1 : vector<8x35xf32>, vector<8x1xf32> -> vector<8x36xf32>
    %156 = vector.extract_strided_slice %140 {offsets = [0, 5], sizes = [8, 31], strides = [1, 1]} : vector<8x36xf32> to vector<8x31xf32>
    %cst_72 = arith.constant 0.000000e+00 : f32
    %157 = vector.broadcast %cst_72 : f32 to vector<8x5xf32>
    %158 = tpu.concatenate %156, %157 in 1 : vector<8x31xf32>, vector<8x5xf32> -> vector<8x36xf32>
    %159 = vector.extract_strided_slice %140 {offsets = [0, 6], sizes = [8, 30], strides = [1, 1]} : vector<8x36xf32> to vector<8x30xf32>
    %cst_73 = arith.constant 0.000000e+00 : f32
    %160 = vector.broadcast %cst_73 : f32 to vector<8x6xf32>
    %161 = tpu.concatenate %159, %160 in 1 : vector<8x30xf32>, vector<8x6xf32> -> vector<8x36xf32>
    %162 = vector.extract_strided_slice %140 {offsets = [0, 7], sizes = [8, 29], strides = [1, 1]} : vector<8x36xf32> to vector<8x29xf32>
    %cst_74 = arith.constant 0.000000e+00 : f32
    %163 = vector.broadcast %cst_74 : f32 to vector<8x7xf32>
    %164 = tpu.concatenate %162, %163 in 1 : vector<8x29xf32>, vector<8x7xf32> -> vector<8x36xf32>
    %165 = tpu.concatenate %143, %146, %149, %152, %140, %155, %158, %161, %164 in 0 : vector<8x36xf32>, vector<8x36xf32>, vector<8x36xf32>, vector<8x36xf32>, vector<8x36xf32>, vector<8x36xf32>, vector<8x36xf32>, vector<8x36xf32>, vector<8x36xf32> -> vector<72x36xf32>
    %cst_75 = arith.constant dense<0.000000e+00> : vector<8x36xf32>
    %166 = tpu.matmul %97, %165, %cst_75 {dimension_numbers = #tpu.dot_dimension_numbers<[1], [0], [0], [1], [0, 0, 1, 1], [], []>} : vector<8x72xf32>, vector<72x36xf32>, vector<8x36xf32> -> vector<8x36xf32>
    %167 = vector.broadcast %98 : vector<8x1xf32> to vector<8x36xf32>
    %168 = arith.addf %166, %167 : vector<8x36xf32>
    %169 = vector.broadcast %0 : vector<1x36xf32> to vector<8x36xf32>
    %170 = arith.mulf %168, %169 : vector<8x36xf32>
    %cst_76 = arith.constant dense<0.000000e+00> : vector<8x36xf32>
    %171 = tpu.matmul %99, %94, %cst_76 {dimension_numbers = #tpu.dot_dimension_numbers<[1], [0], [0], [1], [0, 0, 1, 1], [], []>} : vector<8x8xf32>, vector<8x36xf32>, vector<8x36xf32> -> vector<8x36xf32>
    %172 = vector.broadcast %100 : vector<8x1xf32> to vector<8x36xf32>
    %173 = arith.addf %171, %172 : vector<8x36xf32>
    %174 = arith.addf %170, %173 : vector<8x36xf32>
    %175 = vector.broadcast %0 : vector<1x36xf32> to vector<8x36xf32>
    %176 = arith.mulf %174, %175 : vector<8x36xf32>
    %c0_77 = arith.constant 0 : index
    %c0_78 = arith.constant 0 : index
    %177 = vector.load %arg10[%c0_77, %c0_78] : memref<8x768xf32, #tpu.memory_space<vmem>>, vector<8x72xf32>
    %c0_79 = arith.constant 0 : index
    %c128_80 = arith.constant 128 : index
    %178 = vector.load %arg10[%c0_79, %c128_80] : memref<8x768xf32, #tpu.memory_space<vmem>>, vector<8x1xf32>
    %c0_81 = arith.constant 0 : index
    %c256_82 = arith.constant 256 : index
    %179 = vector.load %arg10[%c0_81, %c256_82] : memref<8x768xf32, #tpu.memory_space<vmem>>, vector<8x72xf32>
    %c0_83 = arith.constant 0 : index
    %c384_84 = arith.constant 384 : index
    %180 = vector.load %arg10[%c0_83, %c384_84] : memref<8x768xf32, #tpu.memory_space<vmem>>, vector<8x1xf32>
    %c0_85 = arith.constant 0 : index
    %c512_86 = arith.constant 512 : index
    %181 = vector.load %arg10[%c0_85, %c512_86] : memref<8x768xf32, #tpu.memory_space<vmem>>, vector<8x8xf32>
    %c0_87 = arith.constant 0 : index
    %c640_88 = arith.constant 640 : index
    %182 = vector.load %arg10[%c0_87, %c640_88] : memref<8x768xf32, #tpu.memory_space<vmem>>, vector<8x1xf32>
    %cst_89 = arith.constant 0.000000e+00 : f32
    %183 = vector.broadcast %cst_89 : f32 to vector<8x36xf32>
    %184 = arith.cmpf oge, %176, %183 : vector<8x36xf32>
    %cst_90 = arith.constant 2.000000e-01 : f32
    %185 = vector.broadcast %cst_90 : f32 to vector<8x36xf32>
    %186 = arith.mulf %185, %176 : vector<8x36xf32>
    %187 = arith.select %184, %176, %186 : vector<8x36xi1>, vector<8x36xf32>
    %cst_91 = arith.constant 0.000000e+00 : f32
    %188 = vector.broadcast %cst_91 : f32 to vector<8x7xf32>
    %189 = vector.extract_strided_slice %187 {offsets = [0, 0], sizes = [8, 29], strides = [1, 1]} : vector<8x36xf32> to vector<8x29xf32>
    %190 = tpu.concatenate %188, %189 in 1 : vector<8x7xf32>, vector<8x29xf32> -> vector<8x36xf32>
    %cst_92 = arith.constant 0.000000e+00 : f32
    %191 = vector.broadcast %cst_92 : f32 to vector<8x6xf32>
    %192 = vector.extract_strided_slice %187 {offsets = [0, 0], sizes = [8, 30], strides = [1, 1]} : vector<8x36xf32> to vector<8x30xf32>
    %193 = tpu.concatenate %191, %192 in 1 : vector<8x6xf32>, vector<8x30xf32> -> vector<8x36xf32>
    %cst_93 = arith.constant 0.000000e+00 : f32
    %194 = vector.broadcast %cst_93 : f32 to vector<8x5xf32>
    %195 = vector.extract_strided_slice %187 {offsets = [0, 0], sizes = [8, 31], strides = [1, 1]} : vector<8x36xf32> to vector<8x31xf32>
    %196 = tpu.concatenate %194, %195 in 1 : vector<8x5xf32>, vector<8x31xf32> -> vector<8x36xf32>
    %cst_94 = arith.constant 0.000000e+00 : f32
    %197 = vector.broadcast %cst_94 : f32 to vector<8x1xf32>
    %198 = vector.extract_strided_slice %187 {offsets = [0, 0], sizes = [8, 35], strides = [1, 1]} : vector<8x36xf32> to vector<8x35xf32>
    %199 = tpu.concatenate %197, %198 in 1 : vector<8x1xf32>, vector<8x35xf32> -> vector<8x36xf32>
    %200 = vector.extract_strided_slice %187 {offsets = [0, 1], sizes = [8, 35], strides = [1, 1]} : vector<8x36xf32> to vector<8x35xf32>
    %cst_95 = arith.constant 0.000000e+00 : f32
    %201 = vector.broadcast %cst_95 : f32 to vector<8x1xf32>
    %202 = tpu.concatenate %200, %201 in 1 : vector<8x35xf32>, vector<8x1xf32> -> vector<8x36xf32>
    %203 = vector.extract_strided_slice %187 {offsets = [0, 5], sizes = [8, 31], strides = [1, 1]} : vector<8x36xf32> to vector<8x31xf32>
    %cst_96 = arith.constant 0.000000e+00 : f32
    %204 = vector.broadcast %cst_96 : f32 to vector<8x5xf32>
    %205 = tpu.concatenate %203, %204 in 1 : vector<8x31xf32>, vector<8x5xf32> -> vector<8x36xf32>
    %206 = vector.extract_strided_slice %187 {offsets = [0, 6], sizes = [8, 30], strides = [1, 1]} : vector<8x36xf32> to vector<8x30xf32>
    %cst_97 = arith.constant 0.000000e+00 : f32
    %207 = vector.broadcast %cst_97 : f32 to vector<8x6xf32>
    %208 = tpu.concatenate %206, %207 in 1 : vector<8x30xf32>, vector<8x6xf32> -> vector<8x36xf32>
    %209 = vector.extract_strided_slice %187 {offsets = [0, 7], sizes = [8, 29], strides = [1, 1]} : vector<8x36xf32> to vector<8x29xf32>
    %cst_98 = arith.constant 0.000000e+00 : f32
    %210 = vector.broadcast %cst_98 : f32 to vector<8x7xf32>
    %211 = tpu.concatenate %209, %210 in 1 : vector<8x29xf32>, vector<8x7xf32> -> vector<8x36xf32>
    %212 = tpu.concatenate %190, %193, %196, %199, %187, %202, %205, %208, %211 in 0 : vector<8x36xf32>, vector<8x36xf32>, vector<8x36xf32>, vector<8x36xf32>, vector<8x36xf32>, vector<8x36xf32>, vector<8x36xf32>, vector<8x36xf32>, vector<8x36xf32> -> vector<72x36xf32>
    %cst_99 = arith.constant dense<0.000000e+00> : vector<8x36xf32>
    %213 = tpu.matmul %177, %212, %cst_99 {dimension_numbers = #tpu.dot_dimension_numbers<[1], [0], [0], [1], [0, 0, 1, 1], [], []>} : vector<8x72xf32>, vector<72x36xf32>, vector<8x36xf32> -> vector<8x36xf32>
    %214 = vector.broadcast %178 : vector<8x1xf32> to vector<8x36xf32>
    %215 = arith.addf %213, %214 : vector<8x36xf32>
    %216 = vector.broadcast %0 : vector<1x36xf32> to vector<8x36xf32>
    %217 = arith.mulf %215, %216 : vector<8x36xf32>
    %cst_100 = arith.constant 0.000000e+00 : f32
    %218 = vector.broadcast %cst_100 : f32 to vector<8x36xf32>
    %219 = arith.cmpf oge, %217, %218 : vector<8x36xf32>
    %cst_101 = arith.constant 2.000000e-01 : f32
    %220 = vector.broadcast %cst_101 : f32 to vector<8x36xf32>
    %221 = arith.mulf %220, %217 : vector<8x36xf32>
    %222 = arith.select %219, %217, %221 : vector<8x36xi1>, vector<8x36xf32>
    %cst_102 = arith.constant 0.000000e+00 : f32
    %223 = vector.broadcast %cst_102 : f32 to vector<8x7xf32>
    %224 = vector.extract_strided_slice %222 {offsets = [0, 0], sizes = [8, 29], strides = [1, 1]} : vector<8x36xf32> to vector<8x29xf32>
    %225 = tpu.concatenate %223, %224 in 1 : vector<8x7xf32>, vector<8x29xf32> -> vector<8x36xf32>
    %cst_103 = arith.constant 0.000000e+00 : f32
    %226 = vector.broadcast %cst_103 : f32 to vector<8x6xf32>
    %227 = vector.extract_strided_slice %222 {offsets = [0, 0], sizes = [8, 30], strides = [1, 1]} : vector<8x36xf32> to vector<8x30xf32>
    %228 = tpu.concatenate %226, %227 in 1 : vector<8x6xf32>, vector<8x30xf32> -> vector<8x36xf32>
    %cst_104 = arith.constant 0.000000e+00 : f32
    %229 = vector.broadcast %cst_104 : f32 to vector<8x5xf32>
    %230 = vector.extract_strided_slice %222 {offsets = [0, 0], sizes = [8, 31], strides = [1, 1]} : vector<8x36xf32> to vector<8x31xf32>
    %231 = tpu.concatenate %229, %230 in 1 : vector<8x5xf32>, vector<8x31xf32> -> vector<8x36xf32>
    %cst_105 = arith.constant 0.000000e+00 : f32
    %232 = vector.broadcast %cst_105 : f32 to vector<8x1xf32>
    %233 = vector.extract_strided_slice %222 {offsets = [0, 0], sizes = [8, 35], strides = [1, 1]} : vector<8x36xf32> to vector<8x35xf32>
    %234 = tpu.concatenate %232, %233 in 1 : vector<8x1xf32>, vector<8x35xf32> -> vector<8x36xf32>
    %235 = vector.extract_strided_slice %222 {offsets = [0, 1], sizes = [8, 35], strides = [1, 1]} : vector<8x36xf32> to vector<8x35xf32>
    %cst_106 = arith.constant 0.000000e+00 : f32
    %236 = vector.broadcast %cst_106 : f32 to vector<8x1xf32>
    %237 = tpu.concatenate %235, %236 in 1 : vector<8x35xf32>, vector<8x1xf32> -> vector<8x36xf32>
    %238 = vector.extract_strided_slice %222 {offsets = [0, 5], sizes = [8, 31], strides = [1, 1]} : vector<8x36xf32> to vector<8x31xf32>
    %cst_107 = arith.constant 0.000000e+00 : f32
    %239 = vector.broadcast %cst_107 : f32 to vector<8x5xf32>
    %240 = tpu.concatenate %238, %239 in 1 : vector<8x31xf32>, vector<8x5xf32> -> vector<8x36xf32>
    %241 = vector.extract_strided_slice %222 {offsets = [0, 6], sizes = [8, 30], strides = [1, 1]} : vector<8x36xf32> to vector<8x30xf32>
    %cst_108 = arith.constant 0.000000e+00 : f32
    %242 = vector.broadcast %cst_108 : f32 to vector<8x6xf32>
    %243 = tpu.concatenate %241, %242 in 1 : vector<8x30xf32>, vector<8x6xf32> -> vector<8x36xf32>
    %244 = vector.extract_strided_slice %222 {offsets = [0, 7], sizes = [8, 29], strides = [1, 1]} : vector<8x36xf32> to vector<8x29xf32>
    %cst_109 = arith.constant 0.000000e+00 : f32
    %245 = vector.broadcast %cst_109 : f32 to vector<8x7xf32>
    %246 = tpu.concatenate %244, %245 in 1 : vector<8x29xf32>, vector<8x7xf32> -> vector<8x36xf32>
    %247 = tpu.concatenate %225, %228, %231, %234, %222, %237, %240, %243, %246 in 0 : vector<8x36xf32>, vector<8x36xf32>, vector<8x36xf32>, vector<8x36xf32>, vector<8x36xf32>, vector<8x36xf32>, vector<8x36xf32>, vector<8x36xf32>, vector<8x36xf32> -> vector<72x36xf32>
    %cst_110 = arith.constant dense<0.000000e+00> : vector<8x36xf32>
    %248 = tpu.matmul %179, %247, %cst_110 {dimension_numbers = #tpu.dot_dimension_numbers<[1], [0], [0], [1], [0, 0, 1, 1], [], []>} : vector<8x72xf32>, vector<72x36xf32>, vector<8x36xf32> -> vector<8x36xf32>
    %249 = vector.broadcast %180 : vector<8x1xf32> to vector<8x36xf32>
    %250 = arith.addf %248, %249 : vector<8x36xf32>
    %251 = vector.broadcast %0 : vector<1x36xf32> to vector<8x36xf32>
    %252 = arith.mulf %250, %251 : vector<8x36xf32>
    %cst_111 = arith.constant dense<0.000000e+00> : vector<8x36xf32>
    %253 = tpu.matmul %181, %176, %cst_111 {dimension_numbers = #tpu.dot_dimension_numbers<[1], [0], [0], [1], [0, 0, 1, 1], [], []>} : vector<8x8xf32>, vector<8x36xf32>, vector<8x36xf32> -> vector<8x36xf32>
    %254 = vector.broadcast %182 : vector<8x1xf32> to vector<8x36xf32>
    %255 = arith.addf %253, %254 : vector<8x36xf32>
    %256 = arith.addf %252, %255 : vector<8x36xf32>
    %257 = vector.broadcast %0 : vector<1x36xf32> to vector<8x36xf32>
    %258 = arith.mulf %256, %257 : vector<8x36xf32>
    %c0_112 = arith.constant 0 : index
    %c0_113 = arith.constant 0 : index
    %259 = vector.load %arg11[%c0_112, %c0_113] : memref<16x896xf32, #tpu.memory_space<vmem>>, vector<16x72xf32>
    %c0_114 = arith.constant 0 : index
    %c128_115 = arith.constant 128 : index
    %260 = vector.load %arg11[%c0_114, %c128_115] : memref<16x896xf32, #tpu.memory_space<vmem>>, vector<16x1xf32>
    %c0_116 = arith.constant 0 : index
    %c256_117 = arith.constant 256 : index
    %261 = vector.load %arg11[%c0_116, %c256_117] : memref<16x896xf32, #tpu.memory_space<vmem>>, vector<16x144xf32>
    %c0_118 = arith.constant 0 : index
    %c512_119 = arith.constant 512 : index
    %262 = vector.load %arg11[%c0_118, %c512_119] : memref<16x896xf32, #tpu.memory_space<vmem>>, vector<16x1xf32>
    %c0_120 = arith.constant 0 : index
    %c640_121 = arith.constant 640 : index
    %263 = vector.load %arg11[%c0_120, %c640_121] : memref<16x896xf32, #tpu.memory_space<vmem>>, vector<16x8xf32>
    %c0_122 = arith.constant 0 : index
    %c768 = arith.constant 768 : index
    %264 = vector.load %arg11[%c0_122, %c768] : memref<16x896xf32, #tpu.memory_space<vmem>>, vector<16x1xf32>
    %cst_123 = arith.constant 0.000000e+00 : f32
    %265 = vector.broadcast %cst_123 : f32 to vector<8x36xf32>
    %266 = arith.cmpf oge, %258, %265 : vector<8x36xf32>
    %cst_124 = arith.constant 2.000000e-01 : f32
    %267 = vector.broadcast %cst_124 : f32 to vector<8x36xf32>
    %268 = arith.mulf %267, %258 : vector<8x36xf32>
    %269 = arith.select %266, %258, %268 : vector<8x36xi1>, vector<8x36xf32>
    %cst_125 = arith.constant 0.000000e+00 : f32
    %270 = vector.broadcast %cst_125 : f32 to vector<8x7xf32>
    %271 = vector.extract_strided_slice %269 {offsets = [0, 0], sizes = [8, 29], strides = [1, 1]} : vector<8x36xf32> to vector<8x29xf32>
    %272 = tpu.concatenate %270, %271 in 1 : vector<8x7xf32>, vector<8x29xf32> -> vector<8x36xf32>
    %cst_126 = arith.constant 0.000000e+00 : f32
    %273 = vector.broadcast %cst_126 : f32 to vector<8x6xf32>
    %274 = vector.extract_strided_slice %269 {offsets = [0, 0], sizes = [8, 30], strides = [1, 1]} : vector<8x36xf32> to vector<8x30xf32>
    %275 = tpu.concatenate %273, %274 in 1 : vector<8x6xf32>, vector<8x30xf32> -> vector<8x36xf32>
    %cst_127 = arith.constant 0.000000e+00 : f32
    %276 = vector.broadcast %cst_127 : f32 to vector<8x5xf32>
    %277 = vector.extract_strided_slice %269 {offsets = [0, 0], sizes = [8, 31], strides = [1, 1]} : vector<8x36xf32> to vector<8x31xf32>
    %278 = tpu.concatenate %276, %277 in 1 : vector<8x5xf32>, vector<8x31xf32> -> vector<8x36xf32>
    %cst_128 = arith.constant 0.000000e+00 : f32
    %279 = vector.broadcast %cst_128 : f32 to vector<8x1xf32>
    %280 = vector.extract_strided_slice %269 {offsets = [0, 0], sizes = [8, 35], strides = [1, 1]} : vector<8x36xf32> to vector<8x35xf32>
    %281 = tpu.concatenate %279, %280 in 1 : vector<8x1xf32>, vector<8x35xf32> -> vector<8x36xf32>
    %282 = vector.extract_strided_slice %269 {offsets = [0, 1], sizes = [8, 35], strides = [1, 1]} : vector<8x36xf32> to vector<8x35xf32>
    %cst_129 = arith.constant 0.000000e+00 : f32
    %283 = vector.broadcast %cst_129 : f32 to vector<8x1xf32>
    %284 = tpu.concatenate %282, %283 in 1 : vector<8x35xf32>, vector<8x1xf32> -> vector<8x36xf32>
    %285 = vector.extract_strided_slice %269 {offsets = [0, 5], sizes = [8, 31], strides = [1, 1]} : vector<8x36xf32> to vector<8x31xf32>
    %cst_130 = arith.constant 0.000000e+00 : f32
    %286 = vector.broadcast %cst_130 : f32 to vector<8x5xf32>
    %287 = tpu.concatenate %285, %286 in 1 : vector<8x31xf32>, vector<8x5xf32> -> vector<8x36xf32>
    %288 = vector.extract_strided_slice %269 {offsets = [0, 6], sizes = [8, 30], strides = [1, 1]} : vector<8x36xf32> to vector<8x30xf32>
    %cst_131 = arith.constant 0.000000e+00 : f32
    %289 = vector.broadcast %cst_131 : f32 to vector<8x6xf32>
    %290 = tpu.concatenate %288, %289 in 1 : vector<8x30xf32>, vector<8x6xf32> -> vector<8x36xf32>
    %291 = vector.extract_strided_slice %269 {offsets = [0, 7], sizes = [8, 29], strides = [1, 1]} : vector<8x36xf32> to vector<8x29xf32>
    %cst_132 = arith.constant 0.000000e+00 : f32
    %292 = vector.broadcast %cst_132 : f32 to vector<8x7xf32>
    %293 = tpu.concatenate %291, %292 in 1 : vector<8x29xf32>, vector<8x7xf32> -> vector<8x36xf32>
    %294 = tpu.concatenate %272, %275, %278, %281, %269, %284, %287, %290, %293 in 0 : vector<8x36xf32>, vector<8x36xf32>, vector<8x36xf32>, vector<8x36xf32>, vector<8x36xf32>, vector<8x36xf32>, vector<8x36xf32>, vector<8x36xf32>, vector<8x36xf32> -> vector<72x36xf32>
    %cst_133 = arith.constant dense<0.000000e+00> : vector<16x36xf32>
    %295 = tpu.matmul %259, %294, %cst_133 {dimension_numbers = #tpu.dot_dimension_numbers<[1], [0], [0], [1], [0, 0, 1, 1], [], []>} : vector<16x72xf32>, vector<72x36xf32>, vector<16x36xf32> -> vector<16x36xf32>
    %296 = vector.broadcast %260 : vector<16x1xf32> to vector<16x36xf32>
    %297 = arith.addf %295, %296 : vector<16x36xf32>
    %298 = vector.broadcast %0 : vector<1x36xf32> to vector<16x36xf32>
    %299 = arith.mulf %297, %298 : vector<16x36xf32>
    %cst_134 = arith.constant 0.000000e+00 : f32
    %300 = vector.broadcast %cst_134 : f32 to vector<16x36xf32>
    %301 = arith.cmpf oge, %299, %300 : vector<16x36xf32>
    %cst_135 = arith.constant 2.000000e-01 : f32
    %302 = vector.broadcast %cst_135 : f32 to vector<16x36xf32>
    %303 = arith.mulf %302, %299 : vector<16x36xf32>
    %304 = arith.select %301, %299, %303 : vector<16x36xi1>, vector<16x36xf32>
    %cst_136 = arith.constant 0.000000e+00 : f32
    %305 = vector.broadcast %cst_136 : f32 to vector<16x7xf32>
    %306 = vector.extract_strided_slice %304 {offsets = [0, 0], sizes = [16, 29], strides = [1, 1]} : vector<16x36xf32> to vector<16x29xf32>
    %307 = tpu.concatenate %305, %306 in 1 : vector<16x7xf32>, vector<16x29xf32> -> vector<16x36xf32>
    %cst_137 = arith.constant 0.000000e+00 : f32
    %308 = vector.broadcast %cst_137 : f32 to vector<16x6xf32>
    %309 = vector.extract_strided_slice %304 {offsets = [0, 0], sizes = [16, 30], strides = [1, 1]} : vector<16x36xf32> to vector<16x30xf32>
    %310 = tpu.concatenate %308, %309 in 1 : vector<16x6xf32>, vector<16x30xf32> -> vector<16x36xf32>
    %cst_138 = arith.constant 0.000000e+00 : f32
    %311 = vector.broadcast %cst_138 : f32 to vector<16x5xf32>
    %312 = vector.extract_strided_slice %304 {offsets = [0, 0], sizes = [16, 31], strides = [1, 1]} : vector<16x36xf32> to vector<16x31xf32>
    %313 = tpu.concatenate %311, %312 in 1 : vector<16x5xf32>, vector<16x31xf32> -> vector<16x36xf32>
    %cst_139 = arith.constant 0.000000e+00 : f32
    %314 = vector.broadcast %cst_139 : f32 to vector<16x1xf32>
    %315 = vector.extract_strided_slice %304 {offsets = [0, 0], sizes = [16, 35], strides = [1, 1]} : vector<16x36xf32> to vector<16x35xf32>
    %316 = tpu.concatenate %314, %315 in 1 : vector<16x1xf32>, vector<16x35xf32> -> vector<16x36xf32>
    %317 = vector.extract_strided_slice %304 {offsets = [0, 1], sizes = [16, 35], strides = [1, 1]} : vector<16x36xf32> to vector<16x35xf32>
    %cst_140 = arith.constant 0.000000e+00 : f32
    %318 = vector.broadcast %cst_140 : f32 to vector<16x1xf32>
    %319 = tpu.concatenate %317, %318 in 1 : vector<16x35xf32>, vector<16x1xf32> -> vector<16x36xf32>
    %320 = vector.extract_strided_slice %304 {offsets = [0, 5], sizes = [16, 31], strides = [1, 1]} : vector<16x36xf32> to vector<16x31xf32>
    %cst_141 = arith.constant 0.000000e+00 : f32
    %321 = vector.broadcast %cst_141 : f32 to vector<16x5xf32>
    %322 = tpu.concatenate %320, %321 in 1 : vector<16x31xf32>, vector<16x5xf32> -> vector<16x36xf32>
    %323 = vector.extract_strided_slice %304 {offsets = [0, 6], sizes = [16, 30], strides = [1, 1]} : vector<16x36xf32> to vector<16x30xf32>
    %cst_142 = arith.constant 0.000000e+00 : f32
    %324 = vector.broadcast %cst_142 : f32 to vector<16x6xf32>
    %325 = tpu.concatenate %323, %324 in 1 : vector<16x30xf32>, vector<16x6xf32> -> vector<16x36xf32>
    %326 = vector.extract_strided_slice %304 {offsets = [0, 7], sizes = [16, 29], strides = [1, 1]} : vector<16x36xf32> to vector<16x29xf32>
    %cst_143 = arith.constant 0.000000e+00 : f32
    %327 = vector.broadcast %cst_143 : f32 to vector<16x7xf32>
    %328 = tpu.concatenate %326, %327 in 1 : vector<16x29xf32>, vector<16x7xf32> -> vector<16x36xf32>
    %329 = tpu.concatenate %307, %310, %313, %316, %304, %319, %322, %325, %328 in 0 : vector<16x36xf32>, vector<16x36xf32>, vector<16x36xf32>, vector<16x36xf32>, vector<16x36xf32>, vector<16x36xf32>, vector<16x36xf32>, vector<16x36xf32>, vector<16x36xf32> -> vector<144x36xf32>
    %cst_144 = arith.constant dense<0.000000e+00> : vector<16x36xf32>
    %330 = tpu.matmul %261, %329, %cst_144 {dimension_numbers = #tpu.dot_dimension_numbers<[1], [0], [0], [1], [0, 0, 1, 1], [], []>} : vector<16x144xf32>, vector<144x36xf32>, vector<16x36xf32> -> vector<16x36xf32>
    %331 = vector.broadcast %262 : vector<16x1xf32> to vector<16x36xf32>
    %332 = arith.addf %330, %331 : vector<16x36xf32>
    %333 = vector.broadcast %0 : vector<1x36xf32> to vector<16x36xf32>
    %334 = arith.mulf %332, %333 : vector<16x36xf32>
    %cst_145 = arith.constant dense<0.000000e+00> : vector<16x36xf32>
    %335 = tpu.matmul %263, %258, %cst_145 {dimension_numbers = #tpu.dot_dimension_numbers<[1], [0], [0], [1], [0, 0, 1, 1], [], []>} : vector<16x8xf32>, vector<8x36xf32>, vector<16x36xf32> -> vector<16x36xf32>
    %336 = vector.broadcast %264 : vector<16x1xf32> to vector<16x36xf32>
    %337 = arith.addf %335, %336 : vector<16x36xf32>
    %338 = arith.addf %334, %337 : vector<16x36xf32>
    %339 = vector.broadcast %0 : vector<1x36xf32> to vector<16x36xf32>
    %340 = arith.mulf %338, %339 : vector<16x36xf32>
    %c0_146 = arith.constant 0 : index
    %c0_147 = arith.constant 0 : index
    %341 = vector.load %arg7[%c0_146, %c0_147] : memref<36x660xf32, #tpu.memory_space<vmem>>, vector<36x660xf32>
    %cst_148 = arith.constant dense<0.000000e+00> : vector<16x660xf32>
    %342 = tpu.matmul %340, %341, %cst_148 {dimension_numbers = #tpu.dot_dimension_numbers<[1], [0], [0], [1], [0, 0, 1, 1], [], []>} : vector<16x36xf32>, vector<36x660xf32>, vector<16x660xf32> -> vector<16x660xf32>
    %c0_149 = arith.constant 0 : index
    %c0_150 = arith.constant 0 : index
    %343 = vector.load %arg12[%c0_149, %c0_150] : memref<8x896xf32, #tpu.memory_space<vmem>>, vector<8x144xf32>
    %c0_151 = arith.constant 0 : index
    %c256_152 = arith.constant 256 : index
    %344 = vector.load %arg12[%c0_151, %c256_152] : memref<8x896xf32, #tpu.memory_space<vmem>>, vector<8x1xf32>
    %c0_153 = arith.constant 0 : index
    %c384_154 = arith.constant 384 : index
    %345 = vector.load %arg12[%c0_153, %c384_154] : memref<8x896xf32, #tpu.memory_space<vmem>>, vector<8x72xf32>
    %c0_155 = arith.constant 0 : index
    %c512_156 = arith.constant 512 : index
    %346 = vector.load %arg12[%c0_155, %c512_156] : memref<8x896xf32, #tpu.memory_space<vmem>>, vector<8x1xf32>
    %c0_157 = arith.constant 0 : index
    %c640_158 = arith.constant 640 : index
    %347 = vector.load %arg12[%c0_157, %c640_158] : memref<8x896xf32, #tpu.memory_space<vmem>>, vector<8x16xf32>
    %c0_159 = arith.constant 0 : index
    %c768_160 = arith.constant 768 : index
    %348 = vector.load %arg12[%c0_159, %c768_160] : memref<8x896xf32, #tpu.memory_space<vmem>>, vector<8x1xf32>
    %cst_161 = arith.constant 0.000000e+00 : f32
    %349 = vector.broadcast %cst_161 : f32 to vector<16x660xf32>
    %350 = arith.cmpf oge, %342, %349 : vector<16x660xf32>
    %cst_162 = arith.constant 2.000000e-01 : f32
    %351 = vector.broadcast %cst_162 : f32 to vector<16x660xf32>
    %352 = arith.mulf %351, %342 : vector<16x660xf32>
    %353 = arith.select %350, %342, %352 : vector<16x660xi1>, vector<16x660xf32>
    %cst_163 = arith.constant 0.000000e+00 : f32
    %354 = vector.broadcast %cst_163 : f32 to vector<16x31xf32>
    %355 = vector.extract_strided_slice %353 {offsets = [0, 0], sizes = [16, 629], strides = [1, 1]} : vector<16x660xf32> to vector<16x629xf32>
    %356 = tpu.concatenate %354, %355 in 1 : vector<16x31xf32>, vector<16x629xf32> -> vector<16x660xf32>
    %cst_164 = arith.constant 0.000000e+00 : f32
    %357 = vector.broadcast %cst_164 : f32 to vector<16x30xf32>
    %358 = vector.extract_strided_slice %353 {offsets = [0, 0], sizes = [16, 630], strides = [1, 1]} : vector<16x660xf32> to vector<16x630xf32>
    %359 = tpu.concatenate %357, %358 in 1 : vector<16x30xf32>, vector<16x630xf32> -> vector<16x660xf32>
    %cst_165 = arith.constant 0.000000e+00 : f32
    %360 = vector.broadcast %cst_165 : f32 to vector<16x29xf32>
    %361 = vector.extract_strided_slice %353 {offsets = [0, 0], sizes = [16, 631], strides = [1, 1]} : vector<16x660xf32> to vector<16x631xf32>
    %362 = tpu.concatenate %360, %361 in 1 : vector<16x29xf32>, vector<16x631xf32> -> vector<16x660xf32>
    %cst_166 = arith.constant 0.000000e+00 : f32
    %363 = vector.broadcast %cst_166 : f32 to vector<16x1xf32>
    %364 = vector.extract_strided_slice %353 {offsets = [0, 0], sizes = [16, 659], strides = [1, 1]} : vector<16x660xf32> to vector<16x659xf32>
    %365 = tpu.concatenate %363, %364 in 1 : vector<16x1xf32>, vector<16x659xf32> -> vector<16x660xf32>
    %366 = vector.extract_strided_slice %353 {offsets = [0, 1], sizes = [16, 659], strides = [1, 1]} : vector<16x660xf32> to vector<16x659xf32>
    %cst_167 = arith.constant 0.000000e+00 : f32
    %367 = vector.broadcast %cst_167 : f32 to vector<16x1xf32>
    %368 = tpu.concatenate %366, %367 in 1 : vector<16x659xf32>, vector<16x1xf32> -> vector<16x660xf32>
    %369 = vector.extract_strided_slice %353 {offsets = [0, 29], sizes = [16, 631], strides = [1, 1]} : vector<16x660xf32> to vector<16x631xf32>
    %cst_168 = arith.constant 0.000000e+00 : f32
    %370 = vector.broadcast %cst_168 : f32 to vector<16x29xf32>
    %371 = tpu.concatenate %369, %370 in 1 : vector<16x631xf32>, vector<16x29xf32> -> vector<16x660xf32>
    %372 = vector.extract_strided_slice %353 {offsets = [0, 30], sizes = [16, 630], strides = [1, 1]} : vector<16x660xf32> to vector<16x630xf32>
    %cst_169 = arith.constant 0.000000e+00 : f32
    %373 = vector.broadcast %cst_169 : f32 to vector<16x30xf32>
    %374 = tpu.concatenate %372, %373 in 1 : vector<16x630xf32>, vector<16x30xf32> -> vector<16x660xf32>
    %375 = vector.extract_strided_slice %353 {offsets = [0, 31], sizes = [16, 629], strides = [1, 1]} : vector<16x660xf32> to vector<16x629xf32>
    %cst_170 = arith.constant 0.000000e+00 : f32
    %376 = vector.broadcast %cst_170 : f32 to vector<16x31xf32>
    %377 = tpu.concatenate %375, %376 in 1 : vector<16x629xf32>, vector<16x31xf32> -> vector<16x660xf32>
    %378 = tpu.concatenate %356, %359, %362, %365, %353, %368, %371, %374, %377 in 0 : vector<16x660xf32>, vector<16x660xf32>, vector<16x660xf32>, vector<16x660xf32>, vector<16x660xf32>, vector<16x660xf32>, vector<16x660xf32>, vector<16x660xf32>, vector<16x660xf32> -> vector<144x660xf32>
    %cst_171 = arith.constant dense<0.000000e+00> : vector<8x660xf32>
    %379 = tpu.matmul %343, %378, %cst_171 {dimension_numbers = #tpu.dot_dimension_numbers<[1], [0], [0], [1], [0, 0, 1, 1], [], []>} : vector<8x144xf32>, vector<144x660xf32>, vector<8x660xf32> -> vector<8x660xf32>
    %380 = vector.broadcast %344 : vector<8x1xf32> to vector<8x660xf32>
    %381 = arith.addf %379, %380 : vector<8x660xf32>
    %382 = vector.broadcast %1 : vector<1x660xf32> to vector<8x660xf32>
    %383 = arith.mulf %381, %382 : vector<8x660xf32>
    %cst_172 = arith.constant 0.000000e+00 : f32
    %384 = vector.broadcast %cst_172 : f32 to vector<8x660xf32>
    %385 = arith.cmpf oge, %383, %384 : vector<8x660xf32>
    %cst_173 = arith.constant 2.000000e-01 : f32
    %386 = vector.broadcast %cst_173 : f32 to vector<8x660xf32>
    %387 = arith.mulf %386, %383 : vector<8x660xf32>
    %388 = arith.select %385, %383, %387 : vector<8x660xi1>, vector<8x660xf32>
    %cst_174 = arith.constant 0.000000e+00 : f32
    %389 = vector.broadcast %cst_174 : f32 to vector<8x31xf32>
    %390 = vector.extract_strided_slice %388 {offsets = [0, 0], sizes = [8, 629], strides = [1, 1]} : vector<8x660xf32> to vector<8x629xf32>
    %391 = tpu.concatenate %389, %390 in 1 : vector<8x31xf32>, vector<8x629xf32> -> vector<8x660xf32>
    %cst_175 = arith.constant 0.000000e+00 : f32
    %392 = vector.broadcast %cst_175 : f32 to vector<8x30xf32>
    %393 = vector.extract_strided_slice %388 {offsets = [0, 0], sizes = [8, 630], strides = [1, 1]} : vector<8x660xf32> to vector<8x630xf32>
    %394 = tpu.concatenate %392, %393 in 1 : vector<8x30xf32>, vector<8x630xf32> -> vector<8x660xf32>
    %cst_176 = arith.constant 0.000000e+00 : f32
    %395 = vector.broadcast %cst_176 : f32 to vector<8x29xf32>
    %396 = vector.extract_strided_slice %388 {offsets = [0, 0], sizes = [8, 631], strides = [1, 1]} : vector<8x660xf32> to vector<8x631xf32>
    %397 = tpu.concatenate %395, %396 in 1 : vector<8x29xf32>, vector<8x631xf32> -> vector<8x660xf32>
    %cst_177 = arith.constant 0.000000e+00 : f32
    %398 = vector.broadcast %cst_177 : f32 to vector<8x1xf32>
    %399 = vector.extract_strided_slice %388 {offsets = [0, 0], sizes = [8, 659], strides = [1, 1]} : vector<8x660xf32> to vector<8x659xf32>
    %400 = tpu.concatenate %398, %399 in 1 : vector<8x1xf32>, vector<8x659xf32> -> vector<8x660xf32>
    %401 = vector.extract_strided_slice %388 {offsets = [0, 1], sizes = [8, 659], strides = [1, 1]} : vector<8x660xf32> to vector<8x659xf32>
    %cst_178 = arith.constant 0.000000e+00 : f32
    %402 = vector.broadcast %cst_178 : f32 to vector<8x1xf32>
    %403 = tpu.concatenate %401, %402 in 1 : vector<8x659xf32>, vector<8x1xf32> -> vector<8x660xf32>
    %404 = vector.extract_strided_slice %388 {offsets = [0, 29], sizes = [8, 631], strides = [1, 1]} : vector<8x660xf32> to vector<8x631xf32>
    %cst_179 = arith.constant 0.000000e+00 : f32
    %405 = vector.broadcast %cst_179 : f32 to vector<8x29xf32>
    %406 = tpu.concatenate %404, %405 in 1 : vector<8x631xf32>, vector<8x29xf32> -> vector<8x660xf32>
    %407 = vector.extract_strided_slice %388 {offsets = [0, 30], sizes = [8, 630], strides = [1, 1]} : vector<8x660xf32> to vector<8x630xf32>
    %cst_180 = arith.constant 0.000000e+00 : f32
    %408 = vector.broadcast %cst_180 : f32 to vector<8x30xf32>
    %409 = tpu.concatenate %407, %408 in 1 : vector<8x630xf32>, vector<8x30xf32> -> vector<8x660xf32>
    %410 = vector.extract_strided_slice %388 {offsets = [0, 31], sizes = [8, 629], strides = [1, 1]} : vector<8x660xf32> to vector<8x629xf32>
    %cst_181 = arith.constant 0.000000e+00 : f32
    %411 = vector.broadcast %cst_181 : f32 to vector<8x31xf32>
    %412 = tpu.concatenate %410, %411 in 1 : vector<8x629xf32>, vector<8x31xf32> -> vector<8x660xf32>
    %413 = tpu.concatenate %391, %394, %397, %400, %388, %403, %406, %409, %412 in 0 : vector<8x660xf32>, vector<8x660xf32>, vector<8x660xf32>, vector<8x660xf32>, vector<8x660xf32>, vector<8x660xf32>, vector<8x660xf32>, vector<8x660xf32>, vector<8x660xf32> -> vector<72x660xf32>
    %cst_182 = arith.constant dense<0.000000e+00> : vector<8x660xf32>
    %414 = tpu.matmul %345, %413, %cst_182 {dimension_numbers = #tpu.dot_dimension_numbers<[1], [0], [0], [1], [0, 0, 1, 1], [], []>} : vector<8x72xf32>, vector<72x660xf32>, vector<8x660xf32> -> vector<8x660xf32>
    %415 = vector.broadcast %346 : vector<8x1xf32> to vector<8x660xf32>
    %416 = arith.addf %414, %415 : vector<8x660xf32>
    %417 = vector.broadcast %1 : vector<1x660xf32> to vector<8x660xf32>
    %418 = arith.mulf %416, %417 : vector<8x660xf32>
    %cst_183 = arith.constant dense<0.000000e+00> : vector<8x660xf32>
    %419 = tpu.matmul %347, %342, %cst_183 {dimension_numbers = #tpu.dot_dimension_numbers<[1], [0], [0], [1], [0, 0, 1, 1], [], []>} : vector<8x16xf32>, vector<16x660xf32>, vector<8x660xf32> -> vector<8x660xf32>
    %420 = vector.broadcast %348 : vector<8x1xf32> to vector<8x660xf32>
    %421 = arith.addf %419, %420 : vector<8x660xf32>
    %422 = arith.addf %418, %421 : vector<8x660xf32>
    %423 = vector.broadcast %1 : vector<1x660xf32> to vector<8x660xf32>
    %424 = arith.mulf %422, %423 : vector<8x660xf32>
    %c0_184 = arith.constant 0 : index
    %c0_185 = arith.constant 0 : index
    %c0_186 = arith.constant 0 : index
    %425 = vector.load %arg4[%c0_184, %c0_185, %c0_186] : memref<1x1x660xf32, #tpu.memory_space<vmem>>, vector<1x1x660xf32>
    %426 = vector.shape_cast %425 : vector<1x1x660xf32> to vector<1x660xf32>
    %cst_187 = arith.constant 0.000000e+00 : f32
    %427 = vector.broadcast %cst_187 : f32 to vector<7x660xf32>
    %428 = tpu.concatenate %424, %426, %427 in 0 : vector<8x660xf32>, vector<1x660xf32>, vector<7x660xf32> -> vector<16x660xf32>
    %c0_188 = arith.constant 0 : index
    %c0_189 = arith.constant 0 : index
    %429 = vector.load %arg13[%c0_188, %c0_189] : memref<8x896xf32, #tpu.memory_space<vmem>>, vector<8x144xf32>
    %c0_190 = arith.constant 0 : index
    %c256_191 = arith.constant 256 : index
    %430 = vector.load %arg13[%c0_190, %c256_191] : memref<8x896xf32, #tpu.memory_space<vmem>>, vector<8x1xf32>
    %c0_192 = arith.constant 0 : index
    %c384_193 = arith.constant 384 : index
    %431 = vector.load %arg13[%c0_192, %c384_193] : memref<8x896xf32, #tpu.memory_space<vmem>>, vector<8x72xf32>
    %c0_194 = arith.constant 0 : index
    %c512_195 = arith.constant 512 : index
    %432 = vector.load %arg13[%c0_194, %c512_195] : memref<8x896xf32, #tpu.memory_space<vmem>>, vector<8x1xf32>
    %c0_196 = arith.constant 0 : index
    %c640_197 = arith.constant 640 : index
    %433 = vector.load %arg13[%c0_196, %c640_197] : memref<8x896xf32, #tpu.memory_space<vmem>>, vector<8x16xf32>
    %c0_198 = arith.constant 0 : index
    %c768_199 = arith.constant 768 : index
    %434 = vector.load %arg13[%c0_198, %c768_199] : memref<8x896xf32, #tpu.memory_space<vmem>>, vector<8x1xf32>
    %cst_200 = arith.constant 0.000000e+00 : f32
    %435 = vector.broadcast %cst_200 : f32 to vector<16x660xf32>
    %436 = arith.cmpf oge, %428, %435 : vector<16x660xf32>
    %cst_201 = arith.constant 2.000000e-01 : f32
    %437 = vector.broadcast %cst_201 : f32 to vector<16x660xf32>
    %438 = arith.mulf %437, %428 : vector<16x660xf32>
    %439 = arith.select %436, %428, %438 : vector<16x660xi1>, vector<16x660xf32>
    %cst_202 = arith.constant 0.000000e+00 : f32
    %440 = vector.broadcast %cst_202 : f32 to vector<16x31xf32>
    %441 = vector.extract_strided_slice %439 {offsets = [0, 0], sizes = [16, 629], strides = [1, 1]} : vector<16x660xf32> to vector<16x629xf32>
    %442 = tpu.concatenate %440, %441 in 1 : vector<16x31xf32>, vector<16x629xf32> -> vector<16x660xf32>
    %cst_203 = arith.constant 0.000000e+00 : f32
    %443 = vector.broadcast %cst_203 : f32 to vector<16x30xf32>
    %444 = vector.extract_strided_slice %439 {offsets = [0, 0], sizes = [16, 630], strides = [1, 1]} : vector<16x660xf32> to vector<16x630xf32>
    %445 = tpu.concatenate %443, %444 in 1 : vector<16x30xf32>, vector<16x630xf32> -> vector<16x660xf32>
    %cst_204 = arith.constant 0.000000e+00 : f32
    %446 = vector.broadcast %cst_204 : f32 to vector<16x29xf32>
    %447 = vector.extract_strided_slice %439 {offsets = [0, 0], sizes = [16, 631], strides = [1, 1]} : vector<16x660xf32> to vector<16x631xf32>
    %448 = tpu.concatenate %446, %447 in 1 : vector<16x29xf32>, vector<16x631xf32> -> vector<16x660xf32>
    %cst_205 = arith.constant 0.000000e+00 : f32
    %449 = vector.broadcast %cst_205 : f32 to vector<16x1xf32>
    %450 = vector.extract_strided_slice %439 {offsets = [0, 0], sizes = [16, 659], strides = [1, 1]} : vector<16x660xf32> to vector<16x659xf32>
    %451 = tpu.concatenate %449, %450 in 1 : vector<16x1xf32>, vector<16x659xf32> -> vector<16x660xf32>
    %452 = vector.extract_strided_slice %439 {offsets = [0, 1], sizes = [16, 659], strides = [1, 1]} : vector<16x660xf32> to vector<16x659xf32>
    %cst_206 = arith.constant 0.000000e+00 : f32
    %453 = vector.broadcast %cst_206 : f32 to vector<16x1xf32>
    %454 = tpu.concatenate %452, %453 in 1 : vector<16x659xf32>, vector<16x1xf32> -> vector<16x660xf32>
    %455 = vector.extract_strided_slice %439 {offsets = [0, 29], sizes = [16, 631], strides = [1, 1]} : vector<16x660xf32> to vector<16x631xf32>
    %cst_207 = arith.constant 0.000000e+00 : f32
    %456 = vector.broadcast %cst_207 : f32 to vector<16x29xf32>
    %457 = tpu.concatenate %455, %456 in 1 : vector<16x631xf32>, vector<16x29xf32> -> vector<16x660xf32>
    %458 = vector.extract_strided_slice %439 {offsets = [0, 30], sizes = [16, 630], strides = [1, 1]} : vector<16x660xf32> to vector<16x630xf32>
    %cst_208 = arith.constant 0.000000e+00 : f32
    %459 = vector.broadcast %cst_208 : f32 to vector<16x30xf32>
    %460 = tpu.concatenate %458, %459 in 1 : vector<16x630xf32>, vector<16x30xf32> -> vector<16x660xf32>
    %461 = vector.extract_strided_slice %439 {offsets = [0, 31], sizes = [16, 629], strides = [1, 1]} : vector<16x660xf32> to vector<16x629xf32>
    %cst_209 = arith.constant 0.000000e+00 : f32
    %462 = vector.broadcast %cst_209 : f32 to vector<16x31xf32>
    %463 = tpu.concatenate %461, %462 in 1 : vector<16x629xf32>, vector<16x31xf32> -> vector<16x660xf32>
    %464 = tpu.concatenate %442, %445, %448, %451, %439, %454, %457, %460, %463 in 0 : vector<16x660xf32>, vector<16x660xf32>, vector<16x660xf32>, vector<16x660xf32>, vector<16x660xf32>, vector<16x660xf32>, vector<16x660xf32>, vector<16x660xf32>, vector<16x660xf32> -> vector<144x660xf32>
    %cst_210 = arith.constant dense<0.000000e+00> : vector<8x660xf32>
    %465 = tpu.matmul %429, %464, %cst_210 {dimension_numbers = #tpu.dot_dimension_numbers<[1], [0], [0], [1], [0, 0, 1, 1], [], []>} : vector<8x144xf32>, vector<144x660xf32>, vector<8x660xf32> -> vector<8x660xf32>
    %466 = vector.broadcast %430 : vector<8x1xf32> to vector<8x660xf32>
    %467 = arith.addf %465, %466 : vector<8x660xf32>
    %468 = vector.broadcast %1 : vector<1x660xf32> to vector<8x660xf32>
    %469 = arith.mulf %467, %468 : vector<8x660xf32>
    %cst_211 = arith.constant 0.000000e+00 : f32
    %470 = vector.broadcast %cst_211 : f32 to vector<8x660xf32>
    %471 = arith.cmpf oge, %469, %470 : vector<8x660xf32>
    %cst_212 = arith.constant 2.000000e-01 : f32
    %472 = vector.broadcast %cst_212 : f32 to vector<8x660xf32>
    %473 = arith.mulf %472, %469 : vector<8x660xf32>
    %474 = arith.select %471, %469, %473 : vector<8x660xi1>, vector<8x660xf32>
    %cst_213 = arith.constant 0.000000e+00 : f32
    %475 = vector.broadcast %cst_213 : f32 to vector<8x31xf32>
    %476 = vector.extract_strided_slice %474 {offsets = [0, 0], sizes = [8, 629], strides = [1, 1]} : vector<8x660xf32> to vector<8x629xf32>
    %477 = tpu.concatenate %475, %476 in 1 : vector<8x31xf32>, vector<8x629xf32> -> vector<8x660xf32>
    %cst_214 = arith.constant 0.000000e+00 : f32
    %478 = vector.broadcast %cst_214 : f32 to vector<8x30xf32>
    %479 = vector.extract_strided_slice %474 {offsets = [0, 0], sizes = [8, 630], strides = [1, 1]} : vector<8x660xf32> to vector<8x630xf32>
    %480 = tpu.concatenate %478, %479 in 1 : vector<8x30xf32>, vector<8x630xf32> -> vector<8x660xf32>
    %cst_215 = arith.constant 0.000000e+00 : f32
    %481 = vector.broadcast %cst_215 : f32 to vector<8x29xf32>
    %482 = vector.extract_strided_slice %474 {offsets = [0, 0], sizes = [8, 631], strides = [1, 1]} : vector<8x660xf32> to vector<8x631xf32>
    %483 = tpu.concatenate %481, %482 in 1 : vector<8x29xf32>, vector<8x631xf32> -> vector<8x660xf32>
    %cst_216 = arith.constant 0.000000e+00 : f32
    %484 = vector.broadcast %cst_216 : f32 to vector<8x1xf32>
    %485 = vector.extract_strided_slice %474 {offsets = [0, 0], sizes = [8, 659], strides = [1, 1]} : vector<8x660xf32> to vector<8x659xf32>
    %486 = tpu.concatenate %484, %485 in 1 : vector<8x1xf32>, vector<8x659xf32> -> vector<8x660xf32>
    %487 = vector.extract_strided_slice %474 {offsets = [0, 1], sizes = [8, 659], strides = [1, 1]} : vector<8x660xf32> to vector<8x659xf32>
    %cst_217 = arith.constant 0.000000e+00 : f32
    %488 = vector.broadcast %cst_217 : f32 to vector<8x1xf32>
    %489 = tpu.concatenate %487, %488 in 1 : vector<8x659xf32>, vector<8x1xf32> -> vector<8x660xf32>
    %490 = vector.extract_strided_slice %474 {offsets = [0, 29], sizes = [8, 631], strides = [1, 1]} : vector<8x660xf32> to vector<8x631xf32>
    %cst_218 = arith.constant 0.000000e+00 : f32
    %491 = vector.broadcast %cst_218 : f32 to vector<8x29xf32>
    %492 = tpu.concatenate %490, %491 in 1 : vector<8x631xf32>, vector<8x29xf32> -> vector<8x660xf32>
    %493 = vector.extract_strided_slice %474 {offsets = [0, 30], sizes = [8, 630], strides = [1, 1]} : vector<8x660xf32> to vector<8x630xf32>
    %cst_219 = arith.constant 0.000000e+00 : f32
    %494 = vector.broadcast %cst_219 : f32 to vector<8x30xf32>
    %495 = tpu.concatenate %493, %494 in 1 : vector<8x630xf32>, vector<8x30xf32> -> vector<8x660xf32>
    %496 = vector.extract_strided_slice %474 {offsets = [0, 31], sizes = [8, 629], strides = [1, 1]} : vector<8x660xf32> to vector<8x629xf32>
    %cst_220 = arith.constant 0.000000e+00 : f32
    %497 = vector.broadcast %cst_220 : f32 to vector<8x31xf32>
    %498 = tpu.concatenate %496, %497 in 1 : vector<8x629xf32>, vector<8x31xf32> -> vector<8x660xf32>
    %499 = tpu.concatenate %477, %480, %483, %486, %474, %489, %492, %495, %498 in 0 : vector<8x660xf32>, vector<8x660xf32>, vector<8x660xf32>, vector<8x660xf32>, vector<8x660xf32>, vector<8x660xf32>, vector<8x660xf32>, vector<8x660xf32>, vector<8x660xf32> -> vector<72x660xf32>
    %cst_221 = arith.constant dense<0.000000e+00> : vector<8x660xf32>
    %500 = tpu.matmul %431, %499, %cst_221 {dimension_numbers = #tpu.dot_dimension_numbers<[1], [0], [0], [1], [0, 0, 1, 1], [], []>} : vector<8x72xf32>, vector<72x660xf32>, vector<8x660xf32> -> vector<8x660xf32>
    %501 = vector.broadcast %432 : vector<8x1xf32> to vector<8x660xf32>
    %502 = arith.addf %500, %501 : vector<8x660xf32>
    %503 = vector.broadcast %1 : vector<1x660xf32> to vector<8x660xf32>
    %504 = arith.mulf %502, %503 : vector<8x660xf32>
    %cst_222 = arith.constant dense<0.000000e+00> : vector<8x660xf32>
    %505 = tpu.matmul %433, %428, %cst_222 {dimension_numbers = #tpu.dot_dimension_numbers<[1], [0], [0], [1], [0, 0, 1, 1], [], []>} : vector<8x16xf32>, vector<16x660xf32>, vector<8x660xf32> -> vector<8x660xf32>
    %506 = vector.broadcast %434 : vector<8x1xf32> to vector<8x660xf32>
    %507 = arith.addf %505, %506 : vector<8x660xf32>
    %508 = arith.addf %504, %507 : vector<8x660xf32>
    %509 = vector.broadcast %1 : vector<1x660xf32> to vector<8x660xf32>
    %510 = arith.mulf %508, %509 : vector<8x660xf32>
    %c0_223 = arith.constant 0 : index
    %c0_224 = arith.constant 0 : index
    %511 = vector.load %arg14[%c0_223, %c0_224] : memref<8x768xf32, #tpu.memory_space<vmem>>, vector<8x72xf32>
    %c0_225 = arith.constant 0 : index
    %c128_226 = arith.constant 128 : index
    %512 = vector.load %arg14[%c0_225, %c128_226] : memref<8x768xf32, #tpu.memory_space<vmem>>, vector<8x1xf32>
    %c0_227 = arith.constant 0 : index
    %c256_228 = arith.constant 256 : index
    %513 = vector.load %arg14[%c0_227, %c256_228] : memref<8x768xf32, #tpu.memory_space<vmem>>, vector<8x72xf32>
    %c0_229 = arith.constant 0 : index
    %c384_230 = arith.constant 384 : index
    %514 = vector.load %arg14[%c0_229, %c384_230] : memref<8x768xf32, #tpu.memory_space<vmem>>, vector<8x1xf32>
    %c0_231 = arith.constant 0 : index
    %c512_232 = arith.constant 512 : index
    %515 = vector.load %arg14[%c0_231, %c512_232] : memref<8x768xf32, #tpu.memory_space<vmem>>, vector<8x8xf32>
    %c0_233 = arith.constant 0 : index
    %c640_234 = arith.constant 640 : index
    %516 = vector.load %arg14[%c0_233, %c640_234] : memref<8x768xf32, #tpu.memory_space<vmem>>, vector<8x1xf32>
    %cst_235 = arith.constant 0.000000e+00 : f32
    %517 = vector.broadcast %cst_235 : f32 to vector<8x660xf32>
    %518 = arith.cmpf oge, %510, %517 : vector<8x660xf32>
    %cst_236 = arith.constant 2.000000e-01 : f32
    %519 = vector.broadcast %cst_236 : f32 to vector<8x660xf32>
    %520 = arith.mulf %519, %510 : vector<8x660xf32>
    %521 = arith.select %518, %510, %520 : vector<8x660xi1>, vector<8x660xf32>
    %cst_237 = arith.constant 0.000000e+00 : f32
    %522 = vector.broadcast %cst_237 : f32 to vector<8x31xf32>
    %523 = vector.extract_strided_slice %521 {offsets = [0, 0], sizes = [8, 629], strides = [1, 1]} : vector<8x660xf32> to vector<8x629xf32>
    %524 = tpu.concatenate %522, %523 in 1 : vector<8x31xf32>, vector<8x629xf32> -> vector<8x660xf32>
    %cst_238 = arith.constant 0.000000e+00 : f32
    %525 = vector.broadcast %cst_238 : f32 to vector<8x30xf32>
    %526 = vector.extract_strided_slice %521 {offsets = [0, 0], sizes = [8, 630], strides = [1, 1]} : vector<8x660xf32> to vector<8x630xf32>
    %527 = tpu.concatenate %525, %526 in 1 : vector<8x30xf32>, vector<8x630xf32> -> vector<8x660xf32>
    %cst_239 = arith.constant 0.000000e+00 : f32
    %528 = vector.broadcast %cst_239 : f32 to vector<8x29xf32>
    %529 = vector.extract_strided_slice %521 {offsets = [0, 0], sizes = [8, 631], strides = [1, 1]} : vector<8x660xf32> to vector<8x631xf32>
    %530 = tpu.concatenate %528, %529 in 1 : vector<8x29xf32>, vector<8x631xf32> -> vector<8x660xf32>
    %cst_240 = arith.constant 0.000000e+00 : f32
    %531 = vector.broadcast %cst_240 : f32 to vector<8x1xf32>
    %532 = vector.extract_strided_slice %521 {offsets = [0, 0], sizes = [8, 659], strides = [1, 1]} : vector<8x660xf32> to vector<8x659xf32>
    %533 = tpu.concatenate %531, %532 in 1 : vector<8x1xf32>, vector<8x659xf32> -> vector<8x660xf32>
    %534 = vector.extract_strided_slice %521 {offsets = [0, 1], sizes = [8, 659], strides = [1, 1]} : vector<8x660xf32> to vector<8x659xf32>
    %cst_241 = arith.constant 0.000000e+00 : f32
    %535 = vector.broadcast %cst_241 : f32 to vector<8x1xf32>
    %536 = tpu.concatenate %534, %535 in 1 : vector<8x659xf32>, vector<8x1xf32> -> vector<8x660xf32>
    %537 = vector.extract_strided_slice %521 {offsets = [0, 29], sizes = [8, 631], strides = [1, 1]} : vector<8x660xf32> to vector<8x631xf32>
    %cst_242 = arith.constant 0.000000e+00 : f32
    %538 = vector.broadcast %cst_242 : f32 to vector<8x29xf32>
    %539 = tpu.concatenate %537, %538 in 1 : vector<8x631xf32>, vector<8x29xf32> -> vector<8x660xf32>
    %540 = vector.extract_strided_slice %521 {offsets = [0, 30], sizes = [8, 630], strides = [1, 1]} : vector<8x660xf32> to vector<8x630xf32>
    %cst_243 = arith.constant 0.000000e+00 : f32
    %541 = vector.broadcast %cst_243 : f32 to vector<8x30xf32>
    %542 = tpu.concatenate %540, %541 in 1 : vector<8x630xf32>, vector<8x30xf32> -> vector<8x660xf32>
    %543 = vector.extract_strided_slice %521 {offsets = [0, 31], sizes = [8, 629], strides = [1, 1]} : vector<8x660xf32> to vector<8x629xf32>
    %cst_244 = arith.constant 0.000000e+00 : f32
    %544 = vector.broadcast %cst_244 : f32 to vector<8x31xf32>
    %545 = tpu.concatenate %543, %544 in 1 : vector<8x629xf32>, vector<8x31xf32> -> vector<8x660xf32>
    %546 = tpu.concatenate %524, %527, %530, %533, %521, %536, %539, %542, %545 in 0 : vector<8x660xf32>, vector<8x660xf32>, vector<8x660xf32>, vector<8x660xf32>, vector<8x660xf32>, vector<8x660xf32>, vector<8x660xf32>, vector<8x660xf32>, vector<8x660xf32> -> vector<72x660xf32>
    %cst_245 = arith.constant dense<0.000000e+00> : vector<8x660xf32>
    %547 = tpu.matmul %511, %546, %cst_245 {dimension_numbers = #tpu.dot_dimension_numbers<[1], [0], [0], [1], [0, 0, 1, 1], [], []>} : vector<8x72xf32>, vector<72x660xf32>, vector<8x660xf32> -> vector<8x660xf32>
    %548 = vector.broadcast %512 : vector<8x1xf32> to vector<8x660xf32>
    %549 = arith.addf %547, %548 : vector<8x660xf32>
    %550 = vector.broadcast %1 : vector<1x660xf32> to vector<8x660xf32>
    %551 = arith.mulf %549, %550 : vector<8x660xf32>
    %cst_246 = arith.constant 0.000000e+00 : f32
    %552 = vector.broadcast %cst_246 : f32 to vector<8x660xf32>
    %553 = arith.cmpf oge, %551, %552 : vector<8x660xf32>
    %cst_247 = arith.constant 2.000000e-01 : f32
    %554 = vector.broadcast %cst_247 : f32 to vector<8x660xf32>
    %555 = arith.mulf %554, %551 : vector<8x660xf32>
    %556 = arith.select %553, %551, %555 : vector<8x660xi1>, vector<8x660xf32>
    %cst_248 = arith.constant 0.000000e+00 : f32
    %557 = vector.broadcast %cst_248 : f32 to vector<8x31xf32>
    %558 = vector.extract_strided_slice %556 {offsets = [0, 0], sizes = [8, 629], strides = [1, 1]} : vector<8x660xf32> to vector<8x629xf32>
    %559 = tpu.concatenate %557, %558 in 1 : vector<8x31xf32>, vector<8x629xf32> -> vector<8x660xf32>
    %cst_249 = arith.constant 0.000000e+00 : f32
    %560 = vector.broadcast %cst_249 : f32 to vector<8x30xf32>
    %561 = vector.extract_strided_slice %556 {offsets = [0, 0], sizes = [8, 630], strides = [1, 1]} : vector<8x660xf32> to vector<8x630xf32>
    %562 = tpu.concatenate %560, %561 in 1 : vector<8x30xf32>, vector<8x630xf32> -> vector<8x660xf32>
    %cst_250 = arith.constant 0.000000e+00 : f32
    %563 = vector.broadcast %cst_250 : f32 to vector<8x29xf32>
    %564 = vector.extract_strided_slice %556 {offsets = [0, 0], sizes = [8, 631], strides = [1, 1]} : vector<8x660xf32> to vector<8x631xf32>
    %565 = tpu.concatenate %563, %564 in 1 : vector<8x29xf32>, vector<8x631xf32> -> vector<8x660xf32>
    %cst_251 = arith.constant 0.000000e+00 : f32
    %566 = vector.broadcast %cst_251 : f32 to vector<8x1xf32>
    %567 = vector.extract_strided_slice %556 {offsets = [0, 0], sizes = [8, 659], strides = [1, 1]} : vector<8x660xf32> to vector<8x659xf32>
    %568 = tpu.concatenate %566, %567 in 1 : vector<8x1xf32>, vector<8x659xf32> -> vector<8x660xf32>
    %569 = vector.extract_strided_slice %556 {offsets = [0, 1], sizes = [8, 659], strides = [1, 1]} : vector<8x660xf32> to vector<8x659xf32>
    %cst_252 = arith.constant 0.000000e+00 : f32
    %570 = vector.broadcast %cst_252 : f32 to vector<8x1xf32>
    %571 = tpu.concatenate %569, %570 in 1 : vector<8x659xf32>, vector<8x1xf32> -> vector<8x660xf32>
    %572 = vector.extract_strided_slice %556 {offsets = [0, 29], sizes = [8, 631], strides = [1, 1]} : vector<8x660xf32> to vector<8x631xf32>
    %cst_253 = arith.constant 0.000000e+00 : f32
    %573 = vector.broadcast %cst_253 : f32 to vector<8x29xf32>
    %574 = tpu.concatenate %572, %573 in 1 : vector<8x631xf32>, vector<8x29xf32> -> vector<8x660xf32>
    %575 = vector.extract_strided_slice %556 {offsets = [0, 30], sizes = [8, 630], strides = [1, 1]} : vector<8x660xf32> to vector<8x630xf32>
    %cst_254 = arith.constant 0.000000e+00 : f32
    %576 = vector.broadcast %cst_254 : f32 to vector<8x30xf32>
    %577 = tpu.concatenate %575, %576 in 1 : vector<8x630xf32>, vector<8x30xf32> -> vector<8x660xf32>
    %578 = vector.extract_strided_slice %556 {offsets = [0, 31], sizes = [8, 629], strides = [1, 1]} : vector<8x660xf32> to vector<8x629xf32>
    %cst_255 = arith.constant 0.000000e+00 : f32
    %579 = vector.broadcast %cst_255 : f32 to vector<8x31xf32>
    %580 = tpu.concatenate %578, %579 in 1 : vector<8x629xf32>, vector<8x31xf32> -> vector<8x660xf32>
    %581 = tpu.concatenate %559, %562, %565, %568, %556, %571, %574, %577, %580 in 0 : vector<8x660xf32>, vector<8x660xf32>, vector<8x660xf32>, vector<8x660xf32>, vector<8x660xf32>, vector<8x660xf32>, vector<8x660xf32>, vector<8x660xf32>, vector<8x660xf32> -> vector<72x660xf32>
    %cst_256 = arith.constant dense<0.000000e+00> : vector<8x660xf32>
    %582 = tpu.matmul %513, %581, %cst_256 {dimension_numbers = #tpu.dot_dimension_numbers<[1], [0], [0], [1], [0, 0, 1, 1], [], []>} : vector<8x72xf32>, vector<72x660xf32>, vector<8x660xf32> -> vector<8x660xf32>
    %583 = vector.broadcast %514 : vector<8x1xf32> to vector<8x660xf32>
    %584 = arith.addf %582, %583 : vector<8x660xf32>
    %585 = vector.broadcast %1 : vector<1x660xf32> to vector<8x660xf32>
    %586 = arith.mulf %584, %585 : vector<8x660xf32>
    %cst_257 = arith.constant dense<0.000000e+00> : vector<8x660xf32>
    %587 = tpu.matmul %515, %510, %cst_257 {dimension_numbers = #tpu.dot_dimension_numbers<[1], [0], [0], [1], [0, 0, 1, 1], [], []>} : vector<8x8xf32>, vector<8x660xf32>, vector<8x660xf32> -> vector<8x660xf32>
    %588 = vector.broadcast %516 : vector<8x1xf32> to vector<8x660xf32>
    %589 = arith.addf %587, %588 : vector<8x660xf32>
    %590 = arith.addf %586, %589 : vector<8x660xf32>
    %591 = vector.broadcast %1 : vector<1x660xf32> to vector<8x660xf32>
    %592 = arith.mulf %590, %591 : vector<8x660xf32>
    %c0_258 = arith.constant 0 : index
    %c0_259 = arith.constant 0 : index
    %593 = vector.load %arg15[%c0_258, %c0_259] : memref<8x768xf32, #tpu.memory_space<vmem>>, vector<8x72xf32>
    %c0_260 = arith.constant 0 : index
    %c128_261 = arith.constant 128 : index
    %594 = vector.load %arg15[%c0_260, %c128_261] : memref<8x768xf32, #tpu.memory_space<vmem>>, vector<8x1xf32>
    %c0_262 = arith.constant 0 : index
    %c256_263 = arith.constant 256 : index
    %595 = vector.load %arg15[%c0_262, %c256_263] : memref<8x768xf32, #tpu.memory_space<vmem>>, vector<8x72xf32>
    %c0_264 = arith.constant 0 : index
    %c384_265 = arith.constant 384 : index
    %596 = vector.load %arg15[%c0_264, %c384_265] : memref<8x768xf32, #tpu.memory_space<vmem>>, vector<8x1xf32>
    %c0_266 = arith.constant 0 : index
    %c512_267 = arith.constant 512 : index
    %597 = vector.load %arg15[%c0_266, %c512_267] : memref<8x768xf32, #tpu.memory_space<vmem>>, vector<8x8xf32>
    %c0_268 = arith.constant 0 : index
    %c640_269 = arith.constant 640 : index
    %598 = vector.load %arg15[%c0_268, %c640_269] : memref<8x768xf32, #tpu.memory_space<vmem>>, vector<8x1xf32>
    %cst_270 = arith.constant 0.000000e+00 : f32
    %599 = vector.broadcast %cst_270 : f32 to vector<8x660xf32>
    %600 = arith.cmpf oge, %592, %599 : vector<8x660xf32>
    %cst_271 = arith.constant 2.000000e-01 : f32
    %601 = vector.broadcast %cst_271 : f32 to vector<8x660xf32>
    %602 = arith.mulf %601, %592 : vector<8x660xf32>
    %603 = arith.select %600, %592, %602 : vector<8x660xi1>, vector<8x660xf32>
    %cst_272 = arith.constant 0.000000e+00 : f32
    %604 = vector.broadcast %cst_272 : f32 to vector<8x31xf32>
    %605 = vector.extract_strided_slice %603 {offsets = [0, 0], sizes = [8, 629], strides = [1, 1]} : vector<8x660xf32> to vector<8x629xf32>
    %606 = tpu.concatenate %604, %605 in 1 : vector<8x31xf32>, vector<8x629xf32> -> vector<8x660xf32>
    %cst_273 = arith.constant 0.000000e+00 : f32
    %607 = vector.broadcast %cst_273 : f32 to vector<8x30xf32>
    %608 = vector.extract_strided_slice %603 {offsets = [0, 0], sizes = [8, 630], strides = [1, 1]} : vector<8x660xf32> to vector<8x630xf32>
    %609 = tpu.concatenate %607, %608 in 1 : vector<8x30xf32>, vector<8x630xf32> -> vector<8x660xf32>
    %cst_274 = arith.constant 0.000000e+00 : f32
    %610 = vector.broadcast %cst_274 : f32 to vector<8x29xf32>
    %611 = vector.extract_strided_slice %603 {offsets = [0, 0], sizes = [8, 631], strides = [1, 1]} : vector<8x660xf32> to vector<8x631xf32>
    %612 = tpu.concatenate %610, %611 in 1 : vector<8x29xf32>, vector<8x631xf32> -> vector<8x660xf32>
    %cst_275 = arith.constant 0.000000e+00 : f32
    %613 = vector.broadcast %cst_275 : f32 to vector<8x1xf32>
    %614 = vector.extract_strided_slice %603 {offsets = [0, 0], sizes = [8, 659], strides = [1, 1]} : vector<8x660xf32> to vector<8x659xf32>
    %615 = tpu.concatenate %613, %614 in 1 : vector<8x1xf32>, vector<8x659xf32> -> vector<8x660xf32>
    %616 = vector.extract_strided_slice %603 {offsets = [0, 1], sizes = [8, 659], strides = [1, 1]} : vector<8x660xf32> to vector<8x659xf32>
    %cst_276 = arith.constant 0.000000e+00 : f32
    %617 = vector.broadcast %cst_276 : f32 to vector<8x1xf32>
    %618 = tpu.concatenate %616, %617 in 1 : vector<8x659xf32>, vector<8x1xf32> -> vector<8x660xf32>
    %619 = vector.extract_strided_slice %603 {offsets = [0, 29], sizes = [8, 631], strides = [1, 1]} : vector<8x660xf32> to vector<8x631xf32>
    %cst_277 = arith.constant 0.000000e+00 : f32
    %620 = vector.broadcast %cst_277 : f32 to vector<8x29xf32>
    %621 = tpu.concatenate %619, %620 in 1 : vector<8x631xf32>, vector<8x29xf32> -> vector<8x660xf32>
    %622 = vector.extract_strided_slice %603 {offsets = [0, 30], sizes = [8, 630], strides = [1, 1]} : vector<8x660xf32> to vector<8x630xf32>
    %cst_278 = arith.constant 0.000000e+00 : f32
    %623 = vector.broadcast %cst_278 : f32 to vector<8x30xf32>
    %624 = tpu.concatenate %622, %623 in 1 : vector<8x630xf32>, vector<8x30xf32> -> vector<8x660xf32>
    %625 = vector.extract_strided_slice %603 {offsets = [0, 31], sizes = [8, 629], strides = [1, 1]} : vector<8x660xf32> to vector<8x629xf32>
    %cst_279 = arith.constant 0.000000e+00 : f32
    %626 = vector.broadcast %cst_279 : f32 to vector<8x31xf32>
    %627 = tpu.concatenate %625, %626 in 1 : vector<8x629xf32>, vector<8x31xf32> -> vector<8x660xf32>
    %628 = tpu.concatenate %606, %609, %612, %615, %603, %618, %621, %624, %627 in 0 : vector<8x660xf32>, vector<8x660xf32>, vector<8x660xf32>, vector<8x660xf32>, vector<8x660xf32>, vector<8x660xf32>, vector<8x660xf32>, vector<8x660xf32>, vector<8x660xf32> -> vector<72x660xf32>
    %cst_280 = arith.constant dense<0.000000e+00> : vector<8x660xf32>
    %629 = tpu.matmul %593, %628, %cst_280 {dimension_numbers = #tpu.dot_dimension_numbers<[1], [0], [0], [1], [0, 0, 1, 1], [], []>} : vector<8x72xf32>, vector<72x660xf32>, vector<8x660xf32> -> vector<8x660xf32>
    %630 = vector.broadcast %594 : vector<8x1xf32> to vector<8x660xf32>
    %631 = arith.addf %629, %630 : vector<8x660xf32>
    %632 = vector.broadcast %1 : vector<1x660xf32> to vector<8x660xf32>
    %633 = arith.mulf %631, %632 : vector<8x660xf32>
    %cst_281 = arith.constant 0.000000e+00 : f32
    %634 = vector.broadcast %cst_281 : f32 to vector<8x660xf32>
    %635 = arith.cmpf oge, %633, %634 : vector<8x660xf32>
    %cst_282 = arith.constant 2.000000e-01 : f32
    %636 = vector.broadcast %cst_282 : f32 to vector<8x660xf32>
    %637 = arith.mulf %636, %633 : vector<8x660xf32>
    %638 = arith.select %635, %633, %637 : vector<8x660xi1>, vector<8x660xf32>
    %cst_283 = arith.constant 0.000000e+00 : f32
    %639 = vector.broadcast %cst_283 : f32 to vector<8x31xf32>
    %640 = vector.extract_strided_slice %638 {offsets = [0, 0], sizes = [8, 629], strides = [1, 1]} : vector<8x660xf32> to vector<8x629xf32>
    %641 = tpu.concatenate %639, %640 in 1 : vector<8x31xf32>, vector<8x629xf32> -> vector<8x660xf32>
    %cst_284 = arith.constant 0.000000e+00 : f32
    %642 = vector.broadcast %cst_284 : f32 to vector<8x30xf32>
    %643 = vector.extract_strided_slice %638 {offsets = [0, 0], sizes = [8, 630], strides = [1, 1]} : vector<8x660xf32> to vector<8x630xf32>
    %644 = tpu.concatenate %642, %643 in 1 : vector<8x30xf32>, vector<8x630xf32> -> vector<8x660xf32>
    %cst_285 = arith.constant 0.000000e+00 : f32
    %645 = vector.broadcast %cst_285 : f32 to vector<8x29xf32>
    %646 = vector.extract_strided_slice %638 {offsets = [0, 0], sizes = [8, 631], strides = [1, 1]} : vector<8x660xf32> to vector<8x631xf32>
    %647 = tpu.concatenate %645, %646 in 1 : vector<8x29xf32>, vector<8x631xf32> -> vector<8x660xf32>
    %cst_286 = arith.constant 0.000000e+00 : f32
    %648 = vector.broadcast %cst_286 : f32 to vector<8x1xf32>
    %649 = vector.extract_strided_slice %638 {offsets = [0, 0], sizes = [8, 659], strides = [1, 1]} : vector<8x660xf32> to vector<8x659xf32>
    %650 = tpu.concatenate %648, %649 in 1 : vector<8x1xf32>, vector<8x659xf32> -> vector<8x660xf32>
    %651 = vector.extract_strided_slice %638 {offsets = [0, 1], sizes = [8, 659], strides = [1, 1]} : vector<8x660xf32> to vector<8x659xf32>
    %cst_287 = arith.constant 0.000000e+00 : f32
    %652 = vector.broadcast %cst_287 : f32 to vector<8x1xf32>
    %653 = tpu.concatenate %651, %652 in 1 : vector<8x659xf32>, vector<8x1xf32> -> vector<8x660xf32>
    %654 = vector.extract_strided_slice %638 {offsets = [0, 29], sizes = [8, 631], strides = [1, 1]} : vector<8x660xf32> to vector<8x631xf32>
    %cst_288 = arith.constant 0.000000e+00 : f32
    %655 = vector.broadcast %cst_288 : f32 to vector<8x29xf32>
    %656 = tpu.concatenate %654, %655 in 1 : vector<8x631xf32>, vector<8x29xf32> -> vector<8x660xf32>
    %657 = vector.extract_strided_slice %638 {offsets = [0, 30], sizes = [8, 630], strides = [1, 1]} : vector<8x660xf32> to vector<8x630xf32>
    %cst_289 = arith.constant 0.000000e+00 : f32
    %658 = vector.broadcast %cst_289 : f32 to vector<8x30xf32>
    %659 = tpu.concatenate %657, %658 in 1 : vector<8x630xf32>, vector<8x30xf32> -> vector<8x660xf32>
    %660 = vector.extract_strided_slice %638 {offsets = [0, 31], sizes = [8, 629], strides = [1, 1]} : vector<8x660xf32> to vector<8x629xf32>
    %cst_290 = arith.constant 0.000000e+00 : f32
    %661 = vector.broadcast %cst_290 : f32 to vector<8x31xf32>
    %662 = tpu.concatenate %660, %661 in 1 : vector<8x629xf32>, vector<8x31xf32> -> vector<8x660xf32>
    %663 = tpu.concatenate %641, %644, %647, %650, %638, %653, %656, %659, %662 in 0 : vector<8x660xf32>, vector<8x660xf32>, vector<8x660xf32>, vector<8x660xf32>, vector<8x660xf32>, vector<8x660xf32>, vector<8x660xf32>, vector<8x660xf32>, vector<8x660xf32> -> vector<72x660xf32>
    %cst_291 = arith.constant dense<0.000000e+00> : vector<8x660xf32>
    %664 = tpu.matmul %595, %663, %cst_291 {dimension_numbers = #tpu.dot_dimension_numbers<[1], [0], [0], [1], [0, 0, 1, 1], [], []>} : vector<8x72xf32>, vector<72x660xf32>, vector<8x660xf32> -> vector<8x660xf32>
    %665 = vector.broadcast %596 : vector<8x1xf32> to vector<8x660xf32>
    %666 = arith.addf %664, %665 : vector<8x660xf32>
    %667 = vector.broadcast %1 : vector<1x660xf32> to vector<8x660xf32>
    %668 = arith.mulf %666, %667 : vector<8x660xf32>
    %cst_292 = arith.constant dense<0.000000e+00> : vector<8x660xf32>
    %669 = tpu.matmul %597, %592, %cst_292 {dimension_numbers = #tpu.dot_dimension_numbers<[1], [0], [0], [1], [0, 0, 1, 1], [], []>} : vector<8x8xf32>, vector<8x660xf32>, vector<8x660xf32> -> vector<8x660xf32>
    %670 = vector.broadcast %598 : vector<8x1xf32> to vector<8x660xf32>
    %671 = arith.addf %669, %670 : vector<8x660xf32>
    %672 = arith.addf %668, %671 : vector<8x660xf32>
    %673 = vector.broadcast %1 : vector<1x660xf32> to vector<8x660xf32>
    %674 = arith.mulf %672, %673 : vector<8x660xf32>
    %c0_293 = arith.constant 0 : index
    %c0_294 = arith.constant 0 : index
    %675 = vector.load %arg16[%c0_293, %c0_294] : memref<1x8xf32, #tpu.memory_space<vmem>>, vector<1x8xf32>
    %cst_295 = arith.constant dense<0.000000e+00> : vector<1x660xf32>
    %676 = tpu.matmul %675, %674, %cst_295 {dimension_numbers = #tpu.dot_dimension_numbers<[1], [0], [0], [1], [0, 0, 1, 1], [], []>} : vector<1x8xf32>, vector<8x660xf32>, vector<1x660xf32> -> vector<1x660xf32>
    %c0_296 = arith.constant 0 : index
    %c0_297 = arith.constant 0 : index
    %677 = vector.load %arg17[%c0_296, %c0_297] : memref<1x1xf32, #tpu.memory_space<vmem>>, vector<1x1xf32>
    %678 = vector.broadcast %677 : vector<1x1xf32> to vector<1x660xf32>
    %679 = arith.addf %676, %678 : vector<1x660xf32>
    %cst_298 = arith.constant 2.000000e+01 : f32
    %680 = vector.broadcast %cst_298 : f32 to vector<1x660xf32>
    %681 = arith.cmpf ogt, %679, %680 : vector<1x660xf32>
    %cst_299 = arith.constant 2.000000e+01 : f32
    %682 = vector.broadcast %cst_299 : f32 to vector<1x660xf32>
    %683 = arith.minimumf %679, %682 : vector<1x660xf32>
    %684 = math.exp %683 : vector<1x660xf32>
    %cst_300 = arith.constant 1.000000e+00 : f32
    %685 = vector.broadcast %cst_300 : f32 to vector<1x660xf32>
    %686 = arith.addf %685, %684 : vector<1x660xf32>
    %687 = math.log %686 : vector<1x660xf32>
    %688 = arith.select %681, %679, %687 : vector<1x660xi1>, vector<1x660xf32>
    %689 = vector.shape_cast %688 : vector<1x660xf32> to vector<1x1x660xf32>
    %c0_301 = arith.constant 0 : index
    %c0_302 = arith.constant 0 : index
    %c0_303 = arith.constant 0 : index
    %690 = vector.load %arg18[%c0_301, %c0_302, %c0_303] : memref<1x1x660xf32, #tpu.memory_space<vmem>>, vector<1x1x660xf32>
    tpu.vector_store %arg18[%c0_301, %c0_302, %c0_303], %689 {strides = array<i32>} : memref<1x1x660xf32, #tpu.memory_space<vmem>>, vector<1x1x660xf32>,
    return
  }
  func.func @transform_0(%arg0: i32) -> (i32, i32, i32) {
    %c0_i32 = arith.constant 0 : i32
    %c0_i32_0 = arith.constant 0 : i32
    %c0_i32_1 = arith.constant 0 : i32
    return %arg0, %c0_i32, %c0_i32_0 : i32, i32, i32
  }
  func.func @transform_1(%arg0: i32) -> (i32, i32, i32) {
    %c0_i32 = arith.constant 0 : i32
    %c0_i32_0 = arith.constant 0 : i32
    %c0_i32_1 = arith.constant 0 : i32
    return %arg0, %c0_i32, %c0_i32_0 : i32, i32, i32
  }
  func.func @transform_2(%arg0: i32) -> (i32, i32, i32) {
    %c0_i32 = arith.constant 0 : i32
    %c0_i32_0 = arith.constant 0 : i32
    %c0_i32_1 = arith.constant 0 : i32
    return %arg0, %c0_i32, %c0_i32_0 : i32, i32, i32
  }
  func.func @transform_3(%arg0: i32) -> (i32, i32, i32) {
    %c0_i32 = arith.constant 0 : i32
    %c0_i32_0 = arith.constant 0 : i32
    %c0_i32_1 = arith.constant 0 : i32
    return %arg0, %c0_i32, %c0_i32_0 : i32, i32, i32
  }
  func.func @transform_4(%arg0: i32) -> (i32, i32) {
    %c0_i32 = arith.constant 0 : i32
    %c0_i32_0 = arith.constant 0 : i32
    %c0_i32_1 = arith.constant 0 : i32
    return %c0_i32, %c0_i32_0 : i32, i32
  }
  func.func @transform_5(%arg0: i32) -> (i32, i32) {
    %c0_i32 = arith.constant 0 : i32
    %c0_i32_0 = arith.constant 0 : i32
    %c0_i32_1 = arith.constant 0 : i32
    return %c0_i32, %c0_i32_0 : i32, i32
  }
  func.func @transform_6(%arg0: i32) -> (i32, i32) {
    %c0_i32 = arith.constant 0 : i32
    %c0_i32_0 = arith.constant 0 : i32
    %c0_i32_1 = arith.constant 0 : i32
    return %c0_i32, %c0_i32_0 : i32, i32
  }
  func.func @transform_7(%arg0: i32) -> (i32, i32) {
    %c0_i32 = arith.constant 0 : i32
    %c0_i32_0 = arith.constant 0 : i32
    %c0_i32_1 = arith.constant 0 : i32
    return %c0_i32, %c0_i32_0 : i32, i32
  }
  func.func @transform_8(%arg0: i32) -> (i32, i32) {
    %c0_i32 = arith.constant 0 : i32
    %c0_i32_0 = arith.constant 0 : i32
    %c0_i32_1 = arith.constant 0 : i32
    return %c0_i32, %c0_i32_0 : i32, i32
  }
  func.func @transform_9(%arg0: i32) -> (i32, i32) {
    %c0_i32 = arith.constant 0 : i32
    %c0_i32_0 = arith.constant 0 : i32
    %c0_i32_1 = arith.constant 0 : i32
    return %c0_i32, %c0_i32_0 : i32, i32
  }
  func.func @transform_10(%arg0: i32) -> (i32, i32) {
    %c0_i32 = arith.constant 0 : i32
    %c0_i32_0 = arith.constant 0 : i32
    %c0_i32_1 = arith.constant 0 : i32
    return %c0_i32, %c0_i32_0 : i32, i32
  }
  func.func @transform_11(%arg0: i32) -> (i32, i32) {
    %c0_i32 = arith.constant 0 : i32
    %c0_i32_0 = arith.constant 0 : i32
    %c0_i32_1 = arith.constant 0 : i32
    return %c0_i32, %c0_i32_0 : i32, i32
  }
  func.func @transform_12(%arg0: i32) -> (i32, i32) {
    %c0_i32 = arith.constant 0 : i32
    %c0_i32_0 = arith.constant 0 : i32
    %c0_i32_1 = arith.constant 0 : i32
    return %c0_i32, %c0_i32_0 : i32, i32
  }
  func.func @transform_13(%arg0: i32) -> (i32, i32) {
    %c0_i32 = arith.constant 0 : i32
    %c0_i32_0 = arith.constant 0 : i32
    %c0_i32_1 = arith.constant 0 : i32
    return %c0_i32, %c0_i32_0 : i32, i32
  }
  func.func @transform_14(%arg0: i32) -> (i32, i32) {
    %c0_i32 = arith.constant 0 : i32
    %c0_i32_0 = arith.constant 0 : i32
    %c0_i32_1 = arith.constant 0 : i32
    return %c0_i32, %c0_i32_0 : i32, i32
  }
  func.func @transform_15(%arg0: i32) -> (i32, i32) {
    %c0_i32 = arith.constant 0 : i32
    %c0_i32_0 = arith.constant 0 : i32
    %c0_i32_1 = arith.constant 0 : i32
    return %c0_i32, %c0_i32_0 : i32, i32
  }
  func.func @transform_16(%arg0: i32) -> (i32, i32) {
    %c0_i32 = arith.constant 0 : i32
    %c0_i32_0 = arith.constant 0 : i32
    %c0_i32_1 = arith.constant 0 : i32
    return %c0_i32, %c0_i32_0 : i32, i32
  }
  func.func @transform_17(%arg0: i32) -> (i32, i32, i32) {
    %c0_i32 = arith.constant 0 : i32
    %c0_i32_0 = arith.constant 0 : i32
    %c0_i32_1 = arith.constant 0 : i32
    return %arg0, %c0_i32, %c0_i32_0 : i32, i32, i32
  }
}

</mosaic_0001>

<bundles_post_ra>
// kernel: vaegan_decoder_forward.1
= control target key start
LH: loop header
LB: loop body
LE: loop exit
PB: predicated region body
PF: predicated region fallthrough
CT: control target
= control target key end

     0   :  { %s9987_s26 = smov 0   ;;  %s13283_s0 = inlined_call_operand.vmem [shape: f32[2,8,36], index: 0, kind: input, shape index: {}]   ;;  %s13284_s1 = inlined_call_operand.vmem [shape: f32[2,8,36], index: 1, kind: input, shape index: {}]   ;;  %s13285_s2 = inlined_call_operand.vmem [shape: f32[2,8,36], index: 2, kind: input, shape index: {}]   ;;  %s13286_s3 = inlined_call_operand.vmem [shape: f32[2,1,660], index: 3, kind: input, shape index: {}]   ;;  %s13287_s4 = inlined_call_operand.vmem [shape: f32[1,36], index: 4, kind: input, shape index: {}]   ;;  %s13288_s5 = inlined_call_operand.vmem [shape: f32[1,660], index: 5, kind: input, shape index: {}]   ;;  %s13289_s6 = inlined_call_operand.vmem [shape: f32[36,660], index: 6, kind: input, shape index: {}]   ;;  %s13290_s7 = inlined_call_operand.vmem [shape: f32[8,768], index: 7, kind: input, shape index: {}]   ;;  %s13291_s8 = inlined_call_operand.vmem [shape: f32[8,768], index: 8, kind: input, shape index: {}]   ;;  %s13292_s9 = inlined_call_operand.vmem [shape: f32[8,768], index: 9, kind: input, shape index: {}]   ;;  %s13293_s10 = inlined_call_operand.vmem [shape: f32[16,896], index: 10, kind: input, shape index: {}]   ;;  %s13294_s11 = inlined_call_operand.vmem [shape: f32[8,896], index: 11, kind: input, shape index: {}]   ;;  %s13295_s12 = inlined_call_operand.vmem [shape: f32[8,896], index: 12, kind: input, shape index: {}]   ;;  %s13296_s13 = inlined_call_operand.vmem [shape: f32[8,768], index: 13, kind: input, shape index: {}]   ;;  %s13297_s14 = inlined_call_operand.vmem [shape: f32[8,768], index: 14, kind: input, shape index: {}]   ;;  %s13298_s15 = inlined_call_operand.vmem [shape: f32[1,8], index: 15, kind: input, shape index: {}]   ;;  %s13299_s16 = inlined_call_operand.<no memory space> [shape: f32[1,1], index: 16, kind: input, shape index: {}]   ;;  %s13300_s17 = inlined_call_operand.vmem [shape: f32[2,1,660], index: 17, kind: output, shape index: {}]  }
   0x1   :  { %13397 = sst [smem:[#allocation31_spill]] %s13283_s0  ;;  %v22_v0 = vstv %s13299_s16 }
   0x2   :  { %13398 = sst [smem:[#allocation32_spill]] %s13284_s1  ;;  %23 = vst [vmem:[#allocation2] sm:$0x1] %v22_v0 }
   0x3 LB: > { %s7570_s27 = sadd.s32 4294967295, %s9872_s26   ;;  %p7574_p0 = scmp.ge.s32.totalorder %s9872_s26, 1  ;;  %s9872_s26 = sphi %s9987_s26, %s29_s26  }
   0x4   : > { %p515_p1 = scmp.lt.s32.totalorder %s9872_s26, 3 }
   0x6   : > { %p516_p2 = pnand %p7574_p0, %p515_p1 }
   0x8   : > { %519 = sbr.rel (%p516_p2) target bundleno = 6530 (0x1982), region = 88 }
   0xf   : > { %p577_p3 = scmp.lt.s32.totalorder %s7570_s27, 1  ;;  %s13399_s0 = sld [smem:[#allocation32_spill]]  ;;  %v13308_v7 = vmov 0.0|0.0   ;;  %vm9881_vm1 = vmmov 0   ;;  %v13306_v12 = vmov 0.0   ;;  %v9883_v13 = vmov 0  }
  0x10   : > { %s13400_s1 = sld [smem:[#allocation31_spill]]  ;;  %8128 = vmatprep.subr.bf16.mxu0 %v13308_v7  ;;  %8144 = vmatprep.subr.bf16.mxu1 %v13308_v7  ;;  %s9875_s24 = smov 5   ;;  %v608_v14 = vld [vmem:[%s13290_s7 + $0x8] sm:$0xff]  ;;  %vm620_vm2 = vcmask 56320   ;;  %vm625_vm3 = vcmask 48128   ;;  %vm630_vm6 = vcmask 39936  }
  0x11   : > { %s13927_s27 = smov (!%p577_p3, %s7570_s27), 1  ;;  %s9876_s25 = smov 7   ;;  %7979 = vmatprep.mubr.msk.f32.mxu0 %vm9881_vm1, %v13306_v12  ;;  %8000 = vmatprep.mubr.msk.f32.mxu1 %vm9881_vm1, %v13306_v12  ;;  %vm10029_vm4 = vmneg %vm620_vm2  ;;  %vm13303_vm7 = vcmask 7168   ;;  %vm640_vm12 = vcmask 285696   ;;  %vm13301_vm13 = vmmov 1   ;;  %vm13337_vm15 = vcmask 252928  }
  0x12   : > { %s7575_s16 = sshll.u32 %s13927_s27, 3  ;;  %s9878_s28 = smov 6   ;;  %8898 = vset.pattern.permute.xlu0 %v9883_v13  ;;  %8899 = vset.pattern.permute.xlu1 %v9883_v13  ;;  %vm10033_vm5 = vmneg %vm625_vm3  ;;  %vm13345_vm3 = vcmask 236544   ;;  %v607_v35 = vld [vmem:[%s13290_s7] sm:$0xff]  ;;  %v610_v44 = vld [vmem:[%s13290_s7 + $0x18] sm:$0xff]  ;;  %v13417_v18 = vmov 0 }
  0x13   : > { %s588_s23 = scalar_lea.vmem %s13285_s2, %s7575_s16  ;;  %s9879_s29 = smov 127   ;;  %vm10041_vm8 = vmpackc.low %vm10033_vm5, %vm10029_vm4  ;;  %v10099_v38 = vld [vmem:[%s13287_s4] ss:$0 sm:$0xff]  ;;  %v612_v46 = vld [vmem:[%s13290_s7 + $0x28] sm:$0xff] }
  0x14   : > { %v605_v6 = vld [vmem:[%s588_s23] sm:$0xff]  ;;  %s9885_s18 = smov 121   ;;  %vm10045_vm9 = vmneg %vm630_vm6  ;;  %vm13311_vm6 = vcmask 588800   ;;  %v609_v58 = vld [vmem:[%s13290_s7 + $0x10] sm:$0xff]  ;;  %s9891_s22 = smov 98  }
  0x15   : > { %s584_s30 = scalar_lea.vmem %s13399_s0, %s7575_s16  ;;  %s9880_s0 = smov 123   ;;  %vm10050_vm10 = vmneg %vm13303_vm7  ;;  %v611_v45 = vld [vmem:[%s13290_s7 + $0x20] sm:$0xff]  ;;  %v1572_v25 = vld [vmem:[%s13293_s10 + $0x38] sm:$0xff] }
  0x16   : > { %v600_v1 = vld [vmem:[%s584_s30] sm:$0xff]  ;;  %s580_s20 = scalar_lea.vmem %s13400_s1, %s7575_s16  ;;  %s9877_s16 = smov 1   ;;  %vm10061_vm11 = vmpackc.low %vm10050_vm10, %vm10045_vm9  ;;  %v1581_v29 = vld [vmem:[%s13293_s10 + $0x28] sm:$0xff] }
  0x17   : > { %v601_v2 = vmul.f32 0.5, %v600_v1  ;;  %v599_v4 = vld [vmem:[%s580_s20] sm:$0xff]  ;;  %s9884_s30 = smov 122   ;;  %vm10070_vm14 = vmpackc.low %vm640_vm12, %vm13301_vm13  ;;  %s9892_s23 = smov 97  }
  0x18   : > { %v1582_v33 = vld [vmem:[%s13293_s10 + $0x60] sm:$0xff] }
  0x19   : > { %v602_v3 = vmul.f32 1.442695, %v601_v2 }
  0x1b   : > { %9840 = vpow2.f32 %v602_v3 }
  0x25   : > { %v9841_v5 = vpop.eup %9840 }
  0x26   : > { %v604_v8 = vmul.f32 %v9841_v5, %v599_v4 }
  0x28   : > { %v10009_v9 = vadd.f32 %v605_v6, %v604_v8 }
  0x2a   : > { %vm613_vm0 = vcmp.ge.f32.partialorder %v10009_v9, 0.0  ;;  %v614_v10 = vmul.f32 0.2, %v10009_v9 }
  0x2c   : > { %v615_v11 = vsel %vm613_vm0, %v10009_v9, %v614_v10  ;;  %vm13351_vm0 = vcmask 244736   ;;  %v940_v10 = vld [vmem:[%s13291_s8 + $0x8] sm:$0xff] }
  0x2d   : > { %627 = vrot.lane.b32.xlu1 %v615_v11, %s9875_s24  ;;  %617 = vrot.lane.b32.xlu0 %v615_v11, %s9876_s25  ;;  %vm10079_vm2 = vmpackc.low %vm13351_vm0, %vm13337_vm15 }
  0x31   : > { %632 = vrot.lane.b32.xlu1 %v615_v11, %s9877_s16  ;;  %622 = vrot.lane.b32.xlu0 %v615_v11, %s9878_s28 }
  0x35   : > { %637 = vrot.lane.b32.xlu0 %v615_v11, %s9879_s29  ;;  %642 = vrot.lane.b32.xlu1 %v615_v11, %s9880_s0 }
  0x39   : > { %647 = vrot.lane.b32.xlu0 %v615_v11, %s9884_s30  ;;  %652 = vrot.lane.b32.xlu1 %v615_v11, %s9885_s18 }
  0x3d   : > { %659 = vperm.xlu0 %8898, %v608_v14  }
  0x9f   : > { %v628_v16 = vpop.permute.xlu1 %627  ;;  %v618_v17 = vpop.permute.xlu0 %617 }
  0xa3   : > { %v623_v20 = vpop.permute.xlu0 %622  ;;  %v633_v24 = vpop.permute.xlu1 %632 }
  0xa4   : > { %v8129_v22 = vpack.c.bf16 %v623_v20, %v618_v17  ;;  %v8133_v27 = vpack.c.bf16 %v633_v24, %v628_v16 }
  0xa6   : > { %8131 = vmatpush3.bf16.msk.msra.mxu0 %vm10041_vm8, %v8129_v22 }
  0xa7   : > { %8132 = vmatprep.subr.bf16.mxu0 %v13308_v7  ;;  %v638_v26 = vpop.permute.xlu0 %637  ;;  %v643_v30 = vpop.permute.xlu1 %642 }
  0xa8   : > { %v8137_v28 = vpack.c.bf16 %v638_v26, %v615_v11 }
  0xaa   : > { %8135 = vmatpush3.bf16.msk.msra.mxu0 %vm10061_vm11, %v8133_v27 }
  0xab   : > { %8136 = vmatprep.subr.bf16.mxu0 %v13308_v7  ;;  %v648_v31 = vpop.permute.xlu0 %647  ;;  %v653_v34 = vpop.permute.xlu1 %652 }
  0xac   : > { %v8141_v32 = vpack.c.bf16 %v648_v31, %v643_v30  ;;  %v939_v30 = vld [vmem:[%s13291_s8] sm:$0xff] }
  0xae   : > { %8139 = vmatpush3.bf16.msk.msra.mxu0 %vm10070_vm14, %v8137_v28 }
  0xaf   : > { %8140 = vmatprep.subr.bf16.mxu0 %v13308_v7 }
  0xb2   : > { %8143 = vmatpush3.bf16.msk.msra.mxu0 %vm10079_vm2, %v8141_v32  ;;  %v943_v32 = vld [vmem:[%s13291_s8 + $0x20] sm:$0xff] }
  0xb3   : > { %7977 = vmatprep.subr.mxu0 %v13306_v12 }
  0xb6   : > { %7978 = vmatpush3.msk.msra.mxu0 %vm13345_vm3, %v653_v34 }
  0xb7   : > { %7980 = vmatmul.mubr.msk.f32.vlgmr.msra.gmra.mrb[0].mxu0 %vm13311_vm6, %v607_v35  ;;  %8003 = vmatprep.subr.mxu0 %v13306_v12 }
  0xb8   : > { %8004 = vmatpush3.msra.mxu0 %v10009_v9  ;;  %8005 = vmatprep.mubr.msk.f32.mxu0 %vm9881_vm1, %v13306_v12 }
  0xb9   : > { %8176 = vmatprep.subr.bf16.mxu0 %v13308_v7 }
  0xbc   : > { %v660_v36 = vpop.permute.xlu0 %659 }
 0x18a   : > { %v732_v37 = vpop.f32.mrb[0].mxu0 }
 0x18b   : > { %v733_v39 = vadd.f32 %v732_v37, %v660_v36  ;;  %v7981_v40 = vpop.f32.mrb[1].mxu0 }
 0x18d   : > { %v742_v41 = vmul.f32 %v10099_v38, %v733_v39 }
 0x18f   : > { %vm743_vm13 = vcmp.ge.f32.partialorder %v742_v41, 0.0  ;;  %v744_v42 = vmul.f32 0.2, %v742_v41 }
 0x191   : > { %v745_v43 = vsel %vm743_vm13, %v742_v41, %v744_v42  ;;  %vm13304_vm13 = vcmask 64512  }
 0x192   : > { %755 = vrot.lane.b32.xlu0 %v745_v43, %s9875_s24  ;;  %747 = vrot.lane.b32.xlu1 %v745_v43, %s9876_s25 }
 0x193   : > { %8006 = vmatmul.mubr.msk.f32.vlgmr.msra.gmra.mrb[2].mxu0 %vm13304_vm13, %v611_v45  ;;  %v942_v45 = vld [vmem:[%s13291_s8 + $0x18] sm:$0xff] }
 0x194   : > { %8047 = vmatprep.mubr.msk.f32.mxu0 %vm9881_vm1, %v13306_v12 }
 0x196   : > { %763 = vrot.lane.b32.xlu0 %v745_v43, %s9879_s29  ;;  %751 = vrot.lane.b32.xlu1 %v745_v43, %s9878_s28 }
 0x19a   : > { %771 = vrot.lane.b32.xlu0 %v745_v43, %s9884_s30  ;;  %759 = vrot.lane.b32.xlu1 %v745_v43, %s9877_s16 }
 0x19e   : > { %781 = vperm.xlu0 %8898, %v610_v44   ;;  %767 = vrot.lane.b32.xlu1 %v745_v43, %s9880_s0  ;;  %v944_v44 = vld [vmem:[%s13291_s8 + $0x28] sm:$0xff] }
 0x1a2   : > { %775 = vrot.lane.b32.xlu1 %v745_v43, %s9885_s18 }
 0x1a6   : > { %860 = vperm.xlu1 %8899, %v612_v46  }
 0x204   : > { %v748_v47 = vpop.permute.xlu1 %747  ;;  %v756_v48 = vpop.permute.xlu0 %755 }
 0x208   : > { %v752_v49 = vpop.permute.xlu1 %751  ;;  %v764_v53 = vpop.permute.xlu0 %763 }
 0x209   : > { %v8145_v50 = vpack.c.bf16 %v752_v49, %v748_v47  ;;  %v8153_v54 = vpack.c.bf16 %v764_v53, %v745_v43 }
 0x20b   : > { %8147 = vmatpush3.bf16.msk.msra.mxu1 %vm10041_vm8, %v8145_v50 }
 0x20c   : > { %v760_v51 = vpop.permute.xlu1 %759  ;;  %8148 = vmatprep.subr.bf16.mxu1 %v13308_v7  ;;  %v772_v56 = vpop.permute.xlu0 %771 }
 0x20d   : > { %v8149_v52 = vpack.c.bf16 %v760_v51, %v756_v48 }
 0x20f   : > { %8151 = vmatpush3.bf16.msk.msra.mxu1 %vm10061_vm11, %v8149_v52 }
 0x210   : > { %8152 = vmatprep.subr.bf16.mxu1 %v13308_v7  ;;  %v768_v55 = vpop.permute.xlu1 %767 }
 0x211   : > { %v8157_v57 = vpack.c.bf16 %v772_v56, %v768_v55 }
 0x213   : > { %8155 = vmatpush3.bf16.msk.msra.mxu1 %vm10070_vm14, %v8153_v54 }
 0x214   : > { %8156 = vmatprep.subr.bf16.mxu1 %v13308_v7  ;;  %v776_v59 = vpop.permute.xlu1 %775 }
 0x217   : > { %8159 = vmatpush3.bf16.msk.msra.mxu1 %vm10079_vm2, %v8157_v57  ;;  %v941_v57 = vld [vmem:[%s13291_s8 + $0x10] sm:$0xff] }
 0x218   : > { %7998 = vmatprep.subr.mxu1 %v13306_v12 }
 0x21b   : > { %7999 = vmatpush3.msk.msra.mxu1 %vm13345_vm3, %v776_v59 }
 0x21c   : > { %8001 = vmatmul.mubr.msk.f32.vlgmr.msra.gmra.mrb[0].mxu1 %vm13311_vm6, %v609_v58  ;;  %8160 = vmatprep.subr.bf16.mxu1 %v13308_v7 }
 0x21d   : > { %8026 = vmatprep.mubr.msk.f32.mxu1 %vm9881_vm1, %v13306_v12  ;;  %v782_v63 = vpop.permute.xlu0 %781 }
 0x225   : > { %v861_v62 = vpop.permute.xlu1 %860 }
 0x266   : > { %v933_v60 = vpop.f32.mrb[2].mxu0 }
 0x267   : > { %v8007_v61 = vpop.f32.mrb[3].mxu0  ;;  %v934_v3 = vadd.f32 %v933_v60, %v861_v62 }
 0x2ef   : > { %v853_v0 = vpop.f32.mrb[0].mxu1 }
 0x2f0   : > { %v854_v1 = vadd.f32 %v853_v0, %v782_v63  ;;  %v8002_v2 = vpop.f32.mrb[1].mxu1 }
 0x2f2   : > { %v857_v4 = vmul.f32 %v10099_v38, %v854_v1 }
 0x2f4   : > { %v937_v5 = vadd.f32 %v934_v3, %v857_v4 }
 0x2f6   : > { %v938_v6 = vmul.f32 %v10099_v38, %v937_v5 }
 0x2f8   : > { %vm945_vm7 = vcmp.ge.f32.partialorder %v938_v6, 0.0  ;;  %v946_v8 = vmul.f32 0.2, %v938_v6 }
 0x2fa   : > { %v947_v9 = vsel %vm945_vm7, %v938_v6, %v946_v8 }
 0x2fb   : > { %953 = vrot.lane.b32.xlu1 %v947_v9, %s9878_s28  ;;  %949 = vrot.lane.b32.xlu0 %v947_v9, %s9876_s25 }
 0x2ff   : > { %961 = vrot.lane.b32.xlu1 %v947_v9, %s9877_s16  ;;  %957 = vrot.lane.b32.xlu0 %v947_v9, %s9875_s24 }
 0x303   : > { %969 = vrot.lane.b32.xlu1 %v947_v9, %s9880_s0  ;;  %965 = vrot.lane.b32.xlu0 %v947_v9, %s9879_s29 }
 0x307   : > { %977 = vrot.lane.b32.xlu1 %v947_v9, %s9885_s18  ;;  %973 = vrot.lane.b32.xlu0 %v947_v9, %s9884_s30 }
 0x30b   : > { %983 = vperm.xlu0 %8898, %v940_v10  }
 0x36d   : > { %v954_v11 = vpop.permute.xlu1 %953  ;;  %v950_v13 = vpop.permute.xlu0 %949 }
 0x36e   : > { %v8161_v14 = vpack.c.bf16 %v954_v11, %v950_v13 }
 0x370   : > { %8163 = vmatpush3.bf16.msk.msra.mxu1 %vm10041_vm8, %v8161_v14 }
 0x371   : > { %v962_v16 = vpop.permute.xlu1 %961  ;;  %v958_v17 = vpop.permute.xlu0 %957  ;;  %8164 = vmatprep.subr.bf16.mxu1 %v13308_v7 }
 0x372   : > { %v8165_v20 = vpack.c.bf16 %v962_v16, %v958_v17 }
 0x374   : > { %8167 = vmatpush3.bf16.msk.msra.mxu1 %vm10061_vm11, %v8165_v20 }
 0x375   : > { %v966_v22 = vpop.permute.xlu0 %965  ;;  %8168 = vmatprep.subr.bf16.mxu1 %v13308_v7  ;;  %v970_v26 = vpop.permute.xlu1 %969 }
 0x376   : > { %v8169_v24 = vpack.c.bf16 %v966_v22, %v947_v9 }
 0x378   : > { %8171 = vmatpush3.bf16.msk.msra.mxu1 %vm10070_vm14, %v8169_v24 }
 0x379   : > { %v974_v27 = vpop.permute.xlu0 %973  ;;  %8172 = vmatprep.subr.bf16.mxu1 %v13308_v7  ;;  %v978_v31 = vpop.permute.xlu1 %977 }
 0x37a   : > { %v8173_v28 = vpack.c.bf16 %v974_v27, %v970_v26  ;;  %v1255_v26 = vld [vmem:[%s13292_s9] sm:$0xff] }
 0x37c   : > { %8175 = vmatpush3.bf16.msk.msra.mxu1 %vm10079_vm2, %v8173_v28  ;;  %v1259_v28 = vld [vmem:[%s13292_s9 + $0x20] sm:$0xff] }
 0x37d   : > { %8024 = vmatprep.subr.mxu1 %v13306_v12 }
 0x380   : > { %8025 = vmatpush3.msk.msra.mxu1 %vm13345_vm3, %v978_v31 }
 0x381   : > { %8027 = vmatmul.mubr.msk.f32.vlgmr.msra.gmra.mrb[2].mxu1 %vm13311_vm6, %v939_v30  ;;  %8050 = vmatprep.subr.mxu1 %v13306_v12 }
 0x382   : > { %8051 = vmatpush3.msra.mxu1 %v938_v6  ;;  %8052 = vmatprep.mubr.msk.f32.mxu1 %vm9881_vm1, %v13306_v12  ;;  %v1256_v6 = vld [vmem:[%s13292_s9 + $0x8] sm:$0xff] }
 0x383   : > { %8208 = vmatprep.subr.bf16.mxu1 %v13308_v7 }
 0x385   : > { %8053 = vmatmul.mubr.msk.f32.vlgmr.msra.gmra.mrb[4].mxu1 %vm13304_vm13, %v943_v32 }
 0x386   : > { %8094 = vmatprep.mubr.msk.f32.mxu1 %vm9881_vm1, %v13306_v12 }
 0x38a   : > { %v984_v34 = vpop.permute.xlu0 %983 }
 0x454   : > { %v1055_v35 = vpop.f32.mrb[2].mxu1 }
 0x455   : > { %v1056_v36 = vadd.f32 %v1055_v35, %v984_v34  ;;  %v8028_v37 = vpop.f32.mrb[3].mxu1 }
 0x457   : > { %v1059_v39 = vmul.f32 %v10099_v38, %v1056_v36 }
 0x458   : > { %v1249_v42 = vpop.f32.mrb[4].mxu1 }
 0x459   : > { %vm1060_vm7 = vcmp.ge.f32.partialorder %v1059_v39, 0.0  ;;  %v1061_v40 = vmul.f32 0.2, %v1059_v39  ;;  %v8054_v43 = vpop.f32.mrb[5].mxu1 }
 0x45b   : > { %v1062_v41 = vsel %vm1060_vm7, %v1059_v39, %v1061_v40 }
 0x45c   : > { %1068 = vrot.lane.b32.xlu0 %v1062_v41, %s9878_s28  ;;  %1064 = vrot.lane.b32.xlu1 %v1062_v41, %s9876_s25 }
 0x460   : > { %1076 = vrot.lane.b32.xlu0 %v1062_v41, %s9877_s16  ;;  %1072 = vrot.lane.b32.xlu1 %v1062_v41, %s9875_s24 }
 0x464   : > { %1084 = vrot.lane.b32.xlu0 %v1062_v41, %s9880_s0  ;;  %1080 = vrot.lane.b32.xlu1 %v1062_v41, %s9879_s29 }
 0x468   : > { %1092 = vrot.lane.b32.xlu0 %v1062_v41, %s9885_s18  ;;  %1088 = vrot.lane.b32.xlu1 %v1062_v41, %s9884_s30 }
 0x46c   : > { %1177 = vperm.xlu0 %8898, %v944_v44   ;;  %1098 = vperm.xlu1 %8899, %v942_v45  }
 0x4ce   : > { %v1069_v46 = vpop.permute.xlu0 %1068  ;;  %v1065_v47 = vpop.permute.xlu1 %1064 }
 0x4cf   : > { %v8177_v48 = vpack.c.bf16 %v1069_v46, %v1065_v47 }
 0x4d1   : > { %8179 = vmatpush3.bf16.msk.msra.mxu0 %vm10041_vm8, %v8177_v48 }
 0x4d2   : > { %v1077_v49 = vpop.permute.xlu0 %1076  ;;  %v1073_v50 = vpop.permute.xlu1 %1072  ;;  %8180 = vmatprep.subr.bf16.mxu0 %v13308_v7 }
 0x4d3   : > { %v8181_v51 = vpack.c.bf16 %v1077_v49, %v1073_v50 }
 0x4d5   : > { %8183 = vmatpush3.bf16.msk.msra.mxu0 %vm10061_vm11, %v8181_v51 }
 0x4d6   : > { %v1081_v52 = vpop.permute.xlu1 %1080  ;;  %8184 = vmatprep.subr.bf16.mxu0 %v13308_v7  ;;  %v1085_v54 = vpop.permute.xlu0 %1084 }
 0x4d7   : > { %v8185_v53 = vpack.c.bf16 %v1081_v52, %v1062_v41  ;;  %v1260_v41 = vld [vmem:[%s13292_s9 + $0x28] sm:$0xff] }
 0x4d9   : > { %8187 = vmatpush3.bf16.msk.msra.mxu0 %vm10070_vm14, %v8185_v53 }
 0x4da   : > { %v1089_v55 = vpop.permute.xlu1 %1088  ;;  %8188 = vmatprep.subr.bf16.mxu0 %v13308_v7  ;;  %v1093_v58 = vpop.permute.xlu0 %1092 }
 0x4db   : > { %v8189_v56 = vpack.c.bf16 %v1089_v55, %v1085_v54  ;;  %v1257_v54 = vld [vmem:[%s13292_s9 + $0x10] sm:$0xff] }
 0x4dd   : > { %8191 = vmatpush3.bf16.msk.msra.mxu0 %vm10079_vm2, %v8189_v56 }
 0x4de   : > { %8045 = vmatprep.subr.mxu0 %v13306_v12 }
 0x4e1   : > { %8046 = vmatpush3.msk.msra.mxu0 %vm13345_vm3, %v1093_v58 }
 0x4e2   : > { %8048 = vmatmul.mubr.msk.f32.vlgmr.msra.gmra.mrb[4].mxu0 %vm13311_vm6, %v941_v57  ;;  %8192 = vmatprep.subr.bf16.mxu0 %v13308_v7 }
 0x4e3   : > { %8073 = vmatprep.mubr.msk.f32.mxu0 %vm9881_vm1, %v13306_v12 }
 0x4eb   : > { %v1178_v59 = vpop.permute.xlu0 %1177  ;;  %v1099_v60 = vpop.permute.xlu1 %1098 }
 0x4ec   : > { %v1250_v0 = vadd.f32 %v1249_v42, %v1178_v59  ;;  %v1258_v42 = vld [vmem:[%s13292_s9 + $0x18] sm:$0xff] }
 0x5b5   : > { %v1170_v61 = vpop.f32.mrb[4].mxu0 }
 0x5b6   : > { %v1171_v62 = vadd.f32 %v1170_v61, %v1099_v60  ;;  %v8049_v63 = vpop.f32.mrb[5].mxu0 }
 0x5b8   : > { %v1174_v1 = vmul.f32 %v10099_v38, %v1171_v62 }
 0x5ba   : > { %v1253_v2 = vadd.f32 %v1250_v0, %v1174_v1 }
 0x5bc   : > { %v1254_v3 = vmul.f32 %v10099_v38, %v1253_v2 }
 0x5be   : > { %vm1261_vm7 = vcmp.ge.f32.partialorder %v1254_v3, 0.0  ;;  %v1262_v4 = vmul.f32 0.2, %v1254_v3 }
 0x5c0   : > { %v1263_v5 = vsel %vm1261_vm7, %v1254_v3, %v1262_v4  ;;  %v1574_v4 = vld [vmem:[%s13293_s10 + $0x40] sm:$0xff] }
 0x5c1   : > { %1269 = vrot.lane.b32.xlu0 %v1263_v5, %s9878_s28  ;;  %1265 = vrot.lane.b32.xlu1 %v1263_v5, %s9876_s25 }
 0x5c5   : > { %1277 = vrot.lane.b32.xlu0 %v1263_v5, %s9877_s16  ;;  %1273 = vrot.lane.b32.xlu1 %v1263_v5, %s9875_s24 }
 0x5c9   : > { %1285 = vrot.lane.b32.xlu0 %v1263_v5, %s9880_s0  ;;  %1281 = vrot.lane.b32.xlu1 %v1263_v5, %s9879_s29 }
 0x5cd   : > { %1293 = vrot.lane.b32.xlu0 %v1263_v5, %s9885_s18  ;;  %1289 = vrot.lane.b32.xlu1 %v1263_v5, %s9884_s30 }
 0x5d1   : > { %1299 = vperm.xlu1 %8899, %v1256_v6  }
 0x633   : > { %v1270_v8 = vpop.permute.xlu0 %1269  ;;  %v1266_v9 = vpop.permute.xlu1 %1265 }
 0x634   : > { %v8193_v10 = vpack.c.bf16 %v1270_v8, %v1266_v9 }
 0x636   : > { %8195 = vmatpush3.bf16.msk.msra.mxu0 %vm10041_vm8, %v8193_v10 }
 0x637   : > { %v1278_v11 = vpop.permute.xlu0 %1277  ;;  %v1274_v13 = vpop.permute.xlu1 %1273  ;;  %8196 = vmatprep.subr.bf16.mxu0 %v13308_v7 }
 0x638   : > { %v8197_v14 = vpack.c.bf16 %v1278_v11, %v1274_v13 }
 0x63a   : > { %8199 = vmatpush3.bf16.msk.msra.mxu0 %vm10061_vm11, %v8197_v14 }
 0x63b   : > { %v1282_v16 = vpop.permute.xlu1 %1281  ;;  %8200 = vmatprep.subr.bf16.mxu0 %v13308_v7  ;;  %v1286_v20 = vpop.permute.xlu0 %1285 }
 0x63c   : > { %v8201_v17 = vpack.c.bf16 %v1282_v16, %v1263_v5  ;;  %v1573_v5 = vld [vmem:[%s13293_s10 + $0x8] sm:$0xff] }
 0x63e   : > { %8203 = vmatpush3.bf16.msk.msra.mxu0 %vm10070_vm14, %v8201_v17 }
 0x63f   : > { %v1290_v22 = vpop.permute.xlu1 %1289  ;;  %8204 = vmatprep.subr.bf16.mxu0 %v13308_v7  ;;  %v1294_v27 = vpop.permute.xlu0 %1293 }
 0x640   : > { %v8205_v24 = vpack.c.bf16 %v1290_v22, %v1286_v20 }
 0x642   : > { %8207 = vmatpush3.bf16.msk.msra.mxu0 %vm10079_vm2, %v8205_v24 }
 0x643   : > { %8071 = vmatprep.subr.mxu0 %v13306_v12 }
 0x646   : > { %8072 = vmatpush3.msk.msra.mxu0 %vm13345_vm3, %v1294_v27 }
 0x647   : > { %8074 = vmatmul.mubr.msk.f32.vlgmr.msra.gmra.mrb[6].mxu0 %vm13311_vm6, %v1255_v26  ;;  %8097 = vmatprep.subr.mxu0 %v13306_v12 }
 0x648   : > { %8098 = vmatpush3.msra.mxu0 %v1254_v3  ;;  %8099 = vmatprep.mubr.msk.f32.mxu0 %vm9881_vm1, %v13306_v12  ;;  %v1571_v3 = vld [vmem:[%s13293_s10] sm:$0xff] }
 0x649   : > { %8248 = vmatprep.subr.bf16.mxu0 %v13308_v7 }
 0x64b   : > { %8100 = vmatmul.mubr.msk.f32.vlgmr.msra.gmra.mrb[8].mxu0 %vm13304_vm13, %v1259_v28 }
 0x650   : > { %v1300_v30 = vpop.permute.xlu1 %1299 }
 0x71a   : > { %v1371_v31 = vpop.f32.mrb[6].mxu0 }
 0x71b   : > { %v1372_v32 = vadd.f32 %v1371_v31, %v1300_v30  ;;  %v8075_v34 = vpop.f32.mrb[7].mxu0 }
 0x71d   : > { %v1375_v35 = vmul.f32 %v10099_v38, %v1372_v32 }
 0x71e   : > { %v1565_v39 = vpop.f32.mrb[8].mxu0 }
 0x71f   : > { %vm1376_vm7 = vcmp.ge.f32.partialorder %v1375_v35, 0.0  ;;  %v1377_v36 = vmul.f32 0.2, %v1375_v35  ;;  %v8101_v40 = vpop.f32.mrb[9].mxu0 }
 0x721   : > { %v1378_v37 = vsel %vm1376_vm7, %v1375_v35, %v1377_v36  ;;  %vm8254_vm7 = vmpackc.low %vm10033_vm5, %vm10033_vm5 }
 0x722   : > { %1384 = vrot.lane.b32.xlu1 %v1378_v37, %s9878_s28  ;;  %1380 = vrot.lane.b32.xlu0 %v1378_v37, %s9876_s25  ;;  %vm10403_vm5 = vmpackc.low %vm10050_vm10, %vm10050_vm10 }
 0x723   : > { %v13418_v18 = vsel %vm10403_vm5, 4294967295, %v13417_v18 }
 0x724   : > { %13419 = vst [vmem:[#allocation3_spill] sm:$0xff] %v13418_v18 }
 0x726   : > { %1392 = vrot.lane.b32.xlu1 %v1378_v37, %s9877_s16  ;;  %1388 = vrot.lane.b32.xlu0 %v1378_v37, %s9875_s24 }
 0x72a   : > { %1400 = vrot.lane.b32.xlu1 %v1378_v37, %s9880_s0  ;;  %1396 = vrot.lane.b32.xlu0 %v1378_v37, %s9879_s29 }
 0x72e   : > { %1408 = vrot.lane.b32.xlu1 %v1378_v37, %s9885_s18  ;;  %1404 = vrot.lane.b32.xlu0 %v1378_v37, %s9884_s30 }
 0x732   : > { %1493 = vperm.xlu1 %8899, %v1260_v41   ;;  %1414 = vperm.xlu0 %8898, %v1258_v42  }
 0x794   : > { %v1385_v43 = vpop.permute.xlu1 %1384  ;;  %v1381_v44 = vpop.permute.xlu0 %1380 }
 0x795   : > { %v8209_v45 = vpack.c.bf16 %v1385_v43, %v1381_v44  ;;  %v1583_v43 = vld [vmem:[%s13293_s10 + $0x30] sm:$0xff]  ;;  %v1579_v44 = vld [vmem:[%s13293_s10 + $0x20] sm:$0xff] }
 0x797   : > { %8211 = vmatpush3.bf16.msk.msra.mxu1 %vm10041_vm8, %v8209_v45 }
 0x798   : > { %v1393_v46 = vpop.permute.xlu1 %1392  ;;  %v1389_v47 = vpop.permute.xlu0 %1388  ;;  %8212 = vmatprep.subr.bf16.mxu1 %v13308_v7 }
 0x799   : > { %v8213_v48 = vpack.c.bf16 %v1393_v46, %v1389_v47  ;;  %v1584_v46 = vld [vmem:[%s13293_s10 + $0x68] sm:$0xff]  ;;  %v1580_v47 = vld [vmem:[%s13293_s10 + $0x58] sm:$0xff] }
 0x79b   : > { %8215 = vmatpush3.bf16.msk.msra.mxu1 %vm10061_vm11, %v8213_v48  ;;  %v1576_v48 = vld [vmem:[%s13293_s10 + $0x18] sm:$0xff] }
 0x79c   : > { %v1397_v49 = vpop.permute.xlu0 %1396  ;;  %8216 = vmatprep.subr.bf16.mxu1 %v13308_v7  ;;  %v1401_v51 = vpop.permute.xlu1 %1400 }
 0x79d   : > { %v8217_v50 = vpack.c.bf16 %v1397_v49, %v1378_v37  ;;  %v1976_v49 = vld [vmem:[%s13289_s6 + $0x8] sm:$0xff] }
 0x79f   : > { %8219 = vmatpush3.bf16.msk.msra.mxu1 %vm10070_vm14, %v8217_v50  ;;  %v1982_v50 = vld [vmem:[%s13289_s6 + $0x38] sm:$0xff] }
 0x7a0   : > { %v1405_v52 = vpop.permute.xlu0 %1404  ;;  %8220 = vmatprep.subr.bf16.mxu1 %v13308_v7  ;;  %v1409_v55 = vpop.permute.xlu1 %1408 }
 0x7a1   : > { %v8221_v53 = vpack.c.bf16 %v1405_v52, %v1401_v51  ;;  %v1975_v51 = vld [vmem:[%s13289_s6] sm:$0xff]  ;;  %v8283_v52 = vpack.c.bf16 %v1982_v50, %v1976_v49 }
 0x7a3   : > { %8223 = vmatpush3.bf16.msk.msra.mxu1 %vm10079_vm2, %v8221_v53  ;;  %v1981_v53 = vld [vmem:[%s13289_s6 + $0x30] sm:$0xff] }
 0x7a4   : > { %8092 = vmatprep.subr.mxu1 %v13306_v12 }
 0x7a7   : > { %8093 = vmatpush3.msk.msra.mxu1 %vm13345_vm3, %v1409_v55 }
 0x7a8   : > { %8095 = vmatmul.mubr.msk.f32.vlgmr.msra.gmra.mrb[6].mxu1 %vm13311_vm6, %v1257_v54  ;;  %v8285_v54 = vpack.c.bf16 %v1981_v53, %v1975_v51  ;;  %v2000_v51 = vld [vmem:[%s13289_s6 + $0xc8] sm:$0xf] }
 0x7a9   : > { %8120 = vmatprep.mubr.msk.f32.mxu1 %vm13311_vm6, %v1571_v3  ;;  %v1984_v53 = vld [vmem:[%s13289_s6 + $0x48] sm:$0xff] }
 0x7b1   : > { %v1494_v56 = vpop.permute.xlu1 %1493  ;;  %v1415_v57 = vpop.permute.xlu0 %1414 }
 0x7b2   : > { %v1566_v61 = vadd.f32 %v1565_v39, %v1494_v56 }
 0x87b   : > { %v1486_v58 = vpop.f32.mrb[6].mxu1 }
 0x87c   : > { %v1487_v59 = vadd.f32 %v1486_v58, %v1415_v57  ;;  %v8096_v60 = vpop.f32.mrb[7].mxu1 }
 0x87e   : > { %v1490_v62 = vmul.f32 %v10099_v38, %v1487_v59 }
 0x880   : > { %v1569_v63 = vadd.f32 %v1566_v61, %v1490_v62 }
 0x882   : > { %v1570_v0 = vmul.f32 %v10099_v38, %v1569_v63 }
 0x884   : > { %vm1585_vm1 = vcmp.ge.f32.partialorder %v1570_v0, 0.0  ;;  %v1586_v1 = vmul.f32 0.2, %v1570_v0 }
 0x886   : > { %v1587_v2 = vsel %vm1585_vm1, %v1570_v0, %v1586_v1  ;;  %vm8273_vm1 = vmpackc.low %vm13337_vm15, %vm13337_vm15 }
 0x887   : > { %1593 = vrot.lane.b32.xlu1 %v1587_v2, %s9878_s28  ;;  %1589 = vrot.lane.b32.xlu0 %v1587_v2, %s9876_s25 }
 0x88b   : > { %1601 = vrot.lane.b32.xlu1 %v1587_v2, %s9877_s16  ;;  %1597 = vrot.lane.b32.xlu0 %v1587_v2, %s9875_s24 }
 0x88f   : > { %1609 = vrot.lane.b32.xlu1 %v1587_v2, %s9880_s0  ;;  %1605 = vrot.lane.b32.xlu0 %v1587_v2, %s9879_s29 }
 0x893   : > { %1617 = vrot.lane.b32.xlu1 %v1587_v2, %s9885_s18  ;;  %1613 = vrot.lane.b32.xlu0 %v1587_v2, %s9884_s30 }
 0x897   : > { %1628 = vperm.xlu1 %8899, %v1574_v4   ;;  %1623 = vperm.xlu0 %8898, %v1573_v5  }
 0x8f9   : > { %v1594_v6 = vpop.permute.xlu1 %1593  ;;  %v1590_v8 = vpop.permute.xlu0 %1589 }
 0x8fa   : > { %v8224_v9 = vpack.c.bf16 %v1594_v6, %v1590_v8 }
 0x8fc   : > { %8226 = vmatprep.subr.msk.bf16.mxu1 %vm10041_vm8, %v8224_v9 }
 0x8fd   : > { %v1602_v10 = vpop.permute.xlu1 %1601  ;;  %8229 = vmatpush3.bf16.msk.msra.mxu1 %vm10041_vm8, %v8224_v9  ;;  %v1598_v11 = vpop.permute.xlu0 %1597 }
 0x8fe   : > { %v8230_v13 = vpack.c.bf16 %v1602_v10, %v1598_v11 }
 0x900   : > { %8232 = vmatprep.subr.msk.bf16.mxu1 %vm10061_vm11, %v8230_v13 }
 0x901   : > { %8235 = vmatpush3.bf16.msk.msra.mxu1 %vm10061_vm11, %v8230_v13  ;;  %v1606_v14 = vpop.permute.xlu0 %1605  ;;  %v1610_v17 = vpop.permute.xlu1 %1609 }
 0x902   : > { %v8236_v16 = vpack.c.bf16 %v1606_v14, %v1587_v2 }
 0x904   : > { %8238 = vmatprep.subr.msk.bf16.mxu1 %vm10070_vm14, %v8236_v16 }
 0x905   : > { %8241 = vmatpush3.bf16.msk.msra.mxu1 %vm10070_vm14, %v8236_v16  ;;  %v1614_v20 = vpop.permute.xlu0 %1613  ;;  %v1618_v22 = vpop.permute.xlu1 %1617  ;;  %vm13340_vm14 = vcmask 130048  }
 0x906   : > { %v8242_v19 = vpack.c.bf16 %v1614_v20, %v1610_v17  ;;  %7698 = vmatprep.mubr.msk.f32.mxu0 %vm13340_vm14, %v1576_v48  ;;  %v1997_v48 = vld [vmem:[%s13289_s6 + $0xb0] sm:$0xff] }
 0x908   : > { %8244 = vmatprep.subr.msk.bf16.mxu1 %vm10079_vm2, %v8242_v19 }
 0x909   : > { %8247 = vmatpush3.bf16.msk.msra.mxu1 %vm10079_vm2, %v8242_v19  ;;  %vm8250_vm2 = vmpackc.low %vm10029_vm4, %vm10029_vm4 }
 0x90a   : > { %8118 = vmatprep.subr.msk.mxu1 %vm13345_vm3, %v1618_v22  ;;  %vm8258_vm4 = vmpackc.low %vm10045_vm9, %vm10045_vm9 }
 0x90b   : > { %vm8269_vm9 = vmpackc.low %vm640_vm12, %vm640_vm12 }
 0x90c   : > { %vm8277_vm12 = vmpackc.low %vm13351_vm0, %vm13351_vm0 }
 0x90d   : > { %8119 = vmatpush3.msk.msra.mxu1 %vm13345_vm3, %v1618_v22 }
 0x90e   : > { %8121 = vmatmul.mubr.msk.f32.vlgmr.msra.gmra.mrb[8].mxu1 %vm13311_vm6, %v1572_v25  ;;  %8123 = vmatprep.subr.mxu1 %v1570_v0 }
 0x90f   : > { %8124 = vmatpush3.msra.mxu1 %v1570_v0  ;;  %8125 = vmatprep.mubr.msk.f32.mxu1 %vm13304_vm13, %v1581_v29 }
 0x910   : > { %8284 = vmatprep.subr.bf16.mxu1 %v8283_v52  ;;  %v1978_v52 = vld [vmem:[%s13289_s6 + $0x18] sm:$0xff] }
 0x912   : > { %8126 = vmatmul.mubr.msk.f32.vlgmr.msra.gmra.mrb[10].mxu1 %vm13304_vm13, %v1582_v33  ;;  %v1980_v33 = vld [vmem:[%s13289_s6 + $0x28] sm:$0xff]  ;;  %vm10811_vm13 = vmneg %vm13345_vm3 }
 0x913   : > { %2095 = vmatprep.mubr.f32.mxu1 %v13306_v12  ;;  %8286 = vmatpush1.bf16.msra.mxu1 %v8285_v54  ;;  %v1999_v54 = vld [vmem:[%s13289_s6 + $0xc0] sm:$0xf] }
 0x916   : > { %v1629_v24 = vpop.permute.xlu1 %1628  ;;  %v1624_v27 = vpop.permute.xlu0 %1623 }
 0x9e1   : > { %v8122_v26 = vpop.f32.mrb[8].mxu1 }
 0x9e2   : > { %v1709_v28 = vadd.f32 %v8122_v26, %v1629_v24  ;;  %v1703_v30 = vpop.f32.mrb[9].mxu1  ;;  %v1986_v24 = vld [vmem:[%s13289_s6 + $0x58] sm:$0xff] }
 0x9e3   : > { %v1704_v31 = vadd.f32 %v1703_v30, %v1624_v27  ;;  %v8299_v26 = vpack.c.bf16 %v1986_v24, %v1980_v33  ;;  %v1578_v30 = vld [vmem:[%s13293_s10 + $0x50] sm:$0xff] }
 0x9e4   : > { %v1713_v32 = vmul.f32 %v10099_v38, %v1709_v28  ;;  %v1575_v28 = vld [vmem:[%s13293_s10 + $0x10] sm:$0xff] }
 0x9e5   : > { %v1712_v34 = vmul.f32 %v10099_v38, %v1704_v31  ;;  %v10356_v42 = vpop.f32.mrb[10].mxu1  ;;  %v1577_v31 = vld [vmem:[%s13293_s10 + $0x48] sm:$0xff] }
 0x9e6   : > { %vm1715_vm8 = vcmp.ge.f32.partialorder %v1713_v32, 0.0  ;;  %v1717_v35 = vmul.f32 0.2, %v1713_v32  ;;  %v10364_v45 = vpop.f32.mrb[11].mxu1 }
 0x9e7   : > { %vm1714_vm11 = vcmp.ge.f32.partialorder %v1712_v34, 0.0  ;;  %v1716_v36 = vmul.f32 0.2, %v1712_v34 }
 0x9e8   : > { %v10340_v37 = vsel %vm1715_vm8, %v1713_v32, %v1717_v35  ;;  %vm8281_vm8 = vmpackc.low %vm13345_vm3, %vm13345_vm3  ;;  %v1979_v32 = vld [vmem:[%s13289_s6 + $0x20] sm:$0xff] }
 0x9e9   : > { %v10342_v39 = vsel %vm1714_vm11, %v1712_v34, %v1716_v36  ;;  %v1985_v34 = vld [vmem:[%s13289_s6 + $0x50] sm:$0xff]  ;;  %v1988_v36 = vld [vmem:[%s13289_s6 + $0x68] sm:$0xff]  ;;  %vm2012_vm11 = vcmask 1043456  }
 0x9ea   : > { %v8905_v40 = vpack.i.bf16 %v10340_v37, %v10342_v39  ;;  %v8265_v41 = vpack.c.bf16 %v10340_v37, %v10342_v39  ;;  %v8301_v35 = vpack.c.bf16 %v1985_v34, %v1979_v32  ;;  %v1994_v37 = vld [vmem:[%s13289_s6 + $0x98] sm:$0xff] }
 0x9eb   : > { %v8287_v39 = vpack.c.bf16 %v1994_v37, %v1988_v36 }
 0x9ec   : > { %8906 = vrot.lane.b32.xlu1 %v8905_v40, %s9878_s28  ;;  %8901 = vrot.lane.b32.xlu0 %v8905_v40, %s9876_s25  ;;  %s8869_s25 = smul.u32 6, %s13927_s27 }
 0x9ed   : > { %8288 = vmatprep.subr.bf16.mxu1 %v8287_v39 }
 0x9ee   : > { %s592_s1 = scalar_lea.vmem %s13286_s3, %s8869_s25 }
 0x9f0   : > { %8916 = vrot.lane.b32.xlu1 %v8905_v40, %s9877_s16  ;;  %8911 = vrot.lane.b32.xlu0 %v8905_v40, %s9875_s24  ;;  %s9887_s24 = smov 31  }
 0x9f4   : > { %8926 = vrot.lane.b32.xlu1 %v8905_v40, %s9880_s0  ;;  %8921 = vrot.lane.b32.xlu0 %v8905_v40, %s9879_s29  ;;  %s9888_s0 = smov 99  }
 0x9f8   : > { %8936 = vrot.lane.b32.xlu1 %v8905_v40, %s9885_s18  ;;  %8931 = vrot.lane.b32.xlu0 %v8905_v40, %s9884_s30  ;;  %v1987_v40 = vld [vmem:[%s13289_s6 + $0x60] sm:$0xff]  ;;  %s9889_s18 = smov 30   ;;  %s9890_s30 = smov 29  }
 0x9fc   : > { %1882 = vperm.xlu1 %8899, %v1583_v43   ;;  %1788 = vperm.xlu0 %8898, %v1579_v44   ;;  %v1992_v43 = vld [vmem:[%s13289_s6 + $0x88] sm:$0xff] }
 0xa00   : > { %1887 = vperm.xlu1 %8899, %v1584_v46   ;;  %1793 = vperm.xlu0 %8898, %v1580_v47   ;;  %v1998_v46 = vld [vmem:[%s13289_s6 + $0xb8] sm:$0xff]  ;;  %v1991_v47 = vld [vmem:[%s13289_s6 + $0x80] sm:$0xff] }
 0xa01   : > { %v8303_v49 = vpack.c.bf16 %v1998_v46, %v1992_v43  ;;  %v8305_v50 = vpack.c.bf16 %v1997_v48, %v1991_v47 }
 0xa5e   : > { %v8907_v55 = vpop.permute.xlu1 %8906  ;;  %v8902_v56 = vpop.permute.xlu0 %8901 }
 0xa5f   : > { %v8904_v57 = vunpack.i.h.bf16 %v8902_v56  ;;  %v8903_v58 = vunpack.i.l.bf16 %v8902_v56  ;;  %v8909_v59 = vunpack.i.h.bf16 %v8907_v55  ;;  %v8908_v60 = vunpack.i.l.bf16 %v8907_v55  ;;  %v2004_v55 = vld [vmem:[%s13289_s6 + $0xe8] sm:$0xf] }
 0xa60   : > { %v8291_v56 = vpack.c.bf16 %v1984_v53, %v1978_v52 }
 0xa61   : > { %v8249_v61 = vpack.c.bf16 %v8904_v57, %v8903_v58  ;;  %v8253_v63 = vpack.c.bf16 %v8909_v59, %v8908_v60  ;;  %v2003_v57 = vld [vmem:[%s13289_s6 + $0xe0] sm:$0xf] }
 0xa62   : > { %v8912_v62 = vpop.permute.xlu0 %8911  ;;  %v8917_v2 = vpop.permute.xlu1 %8916 }
 0xa63   : > { %8251 = vmatpush1.bf16.msk.msra.mxu0 %vm8250_vm2, %v8249_v61  ;;  %v8914_v0 = vunpack.i.h.bf16 %v8912_v62  ;;  %v8913_v1 = vunpack.i.l.bf16 %v8912_v62  ;;  %v8919_v15 = vunpack.i.h.bf16 %v8917_v2  ;;  %v8918_v3 = vunpack.i.l.bf16 %v8917_v2  ;;  %v1977_v2 = vld [vmem:[%s13289_s6 + $0x10] sm:$0xff] }
 0xa64   : > { %8252 = vmatprep.subr.bf16.mxu0 %v13308_v7  ;;  %vm2005_vm2 = vcmask 293888  }
 0xa65   : > { %v8257_v4 = vpack.c.bf16 %v8914_v0, %v8913_v1  ;;  %v8261_v5 = vpack.c.bf16 %v8919_v15, %v8918_v3  ;;  %v1983_v15 = vld [vmem:[%s13289_s6 + $0x40] sm:$0xff] }
 0xa66   : > { %v8922_v6 = vpop.permute.xlu0 %8921  ;;  %v8927_v9 = vpop.permute.xlu1 %8926 }
 0xa67   : > { %8255 = vmatpush1.bf16.msk.msra.mxu0 %vm8254_vm7, %v8253_v63  ;;  %v8924_v21 = vunpack.i.h.bf16 %v8922_v6  ;;  %v8923_v8 = vunpack.i.l.bf16 %v8922_v6  ;;  %v8929_v10 = vunpack.i.h.bf16 %v8927_v9  ;;  %v8928_v11 = vunpack.i.l.bf16 %v8927_v9 }
 0xa68   : > { %8256 = vmatprep.subr.bf16.mxu0 %v13308_v7  ;;  %v8293_v9 = vpack.c.bf16 %v1983_v15, %v1977_v2  ;;  %v13427_v2 = vmov 0 }
 0xa69   : > { %v8268_v13 = vpack.c.bf16 %v8924_v21, %v8923_v8  ;;  %v8272_v16 = vpack.c.bf16 %v8929_v10, %v8928_v11 }
 0xa6a   : > { %v8932_v14 = vpop.permute.xlu0 %8931  ;;  %v8937_v19 = vpop.permute.xlu1 %8936 }
 0xa6b   : > { %8259 = vmatpush1.bf16.msk.msra.mxu0 %vm8258_vm4, %v8257_v4  ;;  %v8934_v17 = vunpack.i.h.bf16 %v8932_v14  ;;  %v8933_v20 = vunpack.i.l.bf16 %v8932_v14  ;;  %v8939_v22 = vunpack.i.h.bf16 %v8937_v19  ;;  %v8938_v25 = vunpack.i.l.bf16 %v8937_v19 }
 0xa6c   : > { %8260 = vmatprep.subr.bf16.mxu0 %v13308_v7 }
 0xa6d   : > { %v8276_v29 = vpack.c.bf16 %v8934_v17, %v8933_v20  ;;  %v8280_v27 = vpack.c.bf16 %v8939_v22, %v8938_v25  ;;  %v1995_v17 = vld [vmem:[%s13289_s6 + $0xa0] sm:$0xff]  ;;  %v2002_v22 = vld [vmem:[%s13289_s6 + $0xd8] sm:$0xf] }
 0xa6f   : > { %8263 = vmatpush1.bf16.msk.msra.mxu0 %vm10403_vm5, %v8261_v5  ;;  %v1990_v5 = vld [vmem:[%s13289_s6 + $0x78] sm:$0xff] }
 0xa70   : > { %8264 = vmatprep.subr.bf16.mxu0 %v13308_v7 }
 0xa73   : > { %8266 = vmatpush1.bf16.msra.mxu0 %v8265_v41  ;;  %v1993_v41 = vld [vmem:[%s13289_s6 + $0x90] sm:$0xff] }
 0xa74   : > { %8267 = vmatprep.subr.bf16.mxu0 %v13308_v7  ;;  %v8289_v44 = vpack.c.bf16 %v1993_v41, %v1987_v40 }
 0xa76   : > { %8290 = vmatpush1.bf16.msra.mxu1 %v8289_v44 }
 0xa77   : > { %8270 = vmatpush1.bf16.msk.msra.mxu0 %vm8269_vm9, %v8268_v13  ;;  %7702 = vmatprep.subr.msk.mxu1 %vm2012_vm11, %v2000_v51 }
 0xa78   : > { %8271 = vmatprep.subr.bf16.mxu0 %v13308_v7 }
 0xa7a   : > { %7703 = vmatpush1.msk.msra.mxu1 %vm2012_vm11, %v1999_v54 }
 0xa7b   : > { %8274 = vmatpush1.bf16.msk.msra.mxu0 %vm8273_vm1, %v8272_v16  ;;  %8292 = vmatprep.subr.bf16.mxu1 %v8291_v56  ;;  %v1883_v58 = vpop.permute.xlu1 %1882  ;;  %v1789_v59 = vpop.permute.xlu0 %1788  ;;  %v1989_v16 = vld [vmem:[%s13289_s6 + $0x70] sm:$0xff] }
 0xa7c   : > { %8275 = vmatprep.subr.bf16.mxu0 %v13308_v7  ;;  %v1963_v63 = vadd.f32 %v10364_v45, %v1883_v58  ;;  %v1996_v45 = vld [vmem:[%s13289_s6 + $0xa8] sm:$0xff] }
 0xa7d   : > { %v8295_v14 = vpack.c.bf16 %v1996_v45, %v1990_v5  ;;  %v13430_v5 = vmov 0 }
 0xa7f   : > { %8278 = vmatpush1.bf16.msk.msra.mxu0 %vm8277_vm12, %v8276_v29  ;;  %v1888_v0 = vpop.permute.xlu1 %1887  ;;  %v1794_v3 = vpop.permute.xlu0 %1793 }
 0xa80   : > { %8279 = vmatprep.subr.bf16.mxu0 %v13308_v7  ;;  %v1968_v10 = vadd.f32 %v10356_v42, %v1888_v0  ;;  %v8297_v42 = vpack.c.bf16 %v1995_v17, %v1989_v16 }
 0xa83   : > { %8282 = vmatpush1.bf16.msk.msra.mxu0 %vm8281_vm8, %v8280_v27 }
 0xa84   : > { %8300 = vmatprep.subr.bf16.mxu0 %v8299_v26 }
 0xa86   : > { %1868 = vmatmul.mubr.f32.vlgmr.msra.gmra.mrb[10].mxu0 %v1575_v28 }
 0xa87   : > { %7699 = vmatprep.mubr.msk.f32.mxu0 %vm13340_vm14, %v1578_v30  ;;  %8302 = vmatpush1.bf16.msra.mxu0 %v8301_v35 }
 0xa88   : > { %8304 = vmatprep.subr.bf16.mxu0 %v8303_v49 }
 0xa8a   : > { %1873 = vmatmul.mubr.f32.gmra.mrb[12].mxu0 %v1577_v31 }
 0xa8b   : > { %2249 = vmatprep.mubr.f32.mxu0 %v13306_v12  ;;  %8306 = vmatpush1.bf16.msra.mxu0 %v8305_v50 }
 0xa8c   : > { %7710 = vmatprep.subr.msk.mxu0 %vm2012_vm11, %v2004_v55 }
 0xa8f   : > { %7711 = vmatpush1.msk.msra.mxu0 %vm2012_vm11, %v2003_v57 }
 0xb59   : > { %v1869_v60 = vpop.f32.mrb[10].mxu0 }
 0xb5a   : > { %v1870_v61 = vadd.f32 %v1869_v60, %v1789_v59  ;;  %v1871_v62 = vpop.f32.mrb[11].mxu0 }
 0xb5b   : > { %v13424_v62 = vmov 0 }
 0xb5c   : > { %v1878_v1 = vmul.f32 %v10099_v38, %v1870_v61 }
 0xb5d   : > { %v1874_v4 = vpop.f32.mrb[12].mxu0 }
 0xb5e   : > { %v1971_v6 = vadd.f32 %v1963_v63, %v1878_v1  ;;  %v1875_v21 = vadd.f32 %v1874_v4, %v1794_v3  ;;  %v1876_v8 = vpop.f32.mrb[13].mxu0 }
 0xb60   : > { %v1973_v11 = vmul.f32 %v10099_v38, %v1971_v6  ;;  %v1879_v13 = vmul.f32 %v10099_v38, %v1875_v21 }
 0xb62   : > { %v1972_v20 = vadd.f32 %v1968_v10, %v1879_v13  ;;  %7704 = vmatmul.mubr.msk.f32.vlgmr.msra.gmra.mrb[12].mxu1 %vm2005_vm2, %v1973_v11  ;;  %7712 = vmatmul.mubr.msk.f32.vlgmr.msra.gmra.mrb[14].mxu0 %vm2005_vm2, %v1973_v11 }
 0xb63   : > { %8294 = vmatpush1.bf16.msra.mxu1 %v8293_v9  ;;  %2101 = vmatprep.mubr.f32.mxu1 %v13306_v12 }
 0xb64   : > { %v1974_v19 = vmul.f32 %v10099_v38, %v1972_v20  ;;  %8296 = vmatprep.subr.bf16.mxu1 %v8295_v14  ;;  %2255 = vmatprep.mubr.f32.mxu0 %v13306_v12  ;;  %v2001_v38 = vld [vmem:[%s13289_s6 + $0xd0] sm:$0xf] }
 0xb66   : > { %7705 = vmatmul.mubr.msk.f32.gmra.mrb[14].mxu1 %vm2005_vm2, %v1974_v19  ;;  %7713 = vmatmul.mubr.msk.f32.gmra.mrb[16].mxu0 %vm2005_vm2, %v1974_v19 }
 0xb67   : > { %8298 = vmatpush1.bf16.msra.mxu1 %v8297_v42  ;;  %2172 = vmatprep.mubr.f32.mxu1 %v13306_v12 }
 0xb68   : > { %7706 = vmatprep.subr.msk.mxu1 %vm2012_vm11, %v2002_v22 }
 0xb6b   : > { %7707 = vmatpush1.msk.msra.mxu1 %vm2012_vm11, %v2001_v38 }
 0xb6c   : > { %7708 = vmatmul.mubr.msk.f32.vlgmr.msra.gmra.mrb[16].mxu1 %vm2005_vm2, %v1973_v11 }
 0xb6d   : > { %2178 = vmatprep.mubr.f32.mxu1 %v13306_v12 }
 0xb70   : > { %7709 = vmatmul.mubr.msk.f32.gmra.mrb[18].mxu1 %vm2005_vm2, %v1974_v19 }
 0xc35   : > { %v10533_v25 = vpop.f32.mrb[12].mxu1  ;;  %v10535_v29 = vpop.f32.mrb[14].mxu0 }
 0xc36   : > { %13420 = vst [vmem:[#allocation4_spill] sm:$0xff] %v10535_v29  ;;  %vm2269_vm7 = vcmp.ge.f32.partialorder %v10533_v25, 0.0  ;;  %v2281_v33 = vmul.f32 0.2, %v10533_v25  ;;  %vm2273_vm4 = vcmp.ge.f32.partialorder %v10535_v29, 0.0  ;;  %v10541_v26 = vpop.f32.mrb[13].mxu1 }
 0xc37   : > { %v2285_v24 = vmul.f32 0.2, %v10535_v29  ;;  %v10543_v27 = vpop.f32.mrb[15].mxu0  ;;  %vm2270_vm9 = vcmp.ge.f32.partialorder %v10541_v26, 0.0  ;;  %v2282_v28 = vmul.f32 0.2, %v10541_v26 }
 0xc38   : > { %13421 = vst [vmem:[#allocation5_spill] sm:$0xff] %v10543_v27  ;;  %v10548_v30 = vsel %vm2269_vm7, %v10533_v25, %v2281_v33  ;;  %vm2274_vm1 = vcmp.ge.f32.partialorder %v10543_v27, 0.0  ;;  %v2286_v32 = vmul.f32 0.2, %v10543_v27 }
 0xc39   : > { %v10551_v31 = vsel %vm2273_vm4, %v10535_v29, %v2285_v24  ;;  %v10555_v34 = vpop.f32.mrb[14].mxu1  ;;  %v10557_v35 = vpop.f32.mrb[16].mxu0  ;;  %v10560_v36 = vsel %vm2270_vm9, %v10541_v26, %v2282_v28  ;;  %vm10620_vm9 = vmneg %vm13337_vm15 }
 0xc3a   : > { %13422 = vst [vmem:[#allocation6_spill] sm:$0xff] %v10557_v35  ;;  %vm2275_vm12 = vcmp.ge.f32.partialorder %v10555_v34, 0.0  ;;  %v2287_v37 = vmul.f32 0.2, %v10555_v34  ;;  %v10566_v40 = vpop.f32.mrb[15].mxu1  ;;  %v10568_v41 = vpop.f32.mrb[17].mxu0  ;;  %v10571_v43 = vsel %vm2274_vm1, %v10543_v27, %v2286_v32  ;;  %v8940_v51 = vpack.i.bf16 %v10560_v36, %v10548_v30  ;;  %vm10634_vm1 = vmneg %vm13351_vm0 }
 0xc3b   : > { %13423 = vst [vmem:[#allocation7_spill] sm:$0xff] %v10568_v41  ;;  %vm2279_vm8 = vcmp.ge.f32.partialorder %v10557_v35, 0.0  ;;  %v2291_v44 = vmul.f32 0.2, %v10557_v35  ;;  %vm2276_vm11 = vcmp.ge.f32.partialorder %v10566_v40, 0.0  ;;  %vm2280_vm2 = vcmp.ge.f32.partialorder %v10568_v41, 0.0 }
 0xc3c   : > { %v10578_v47 = vsel %vm2275_vm12, %v10555_v34, %v2287_v37  ;;  %v2288_v48 = vmul.f32 0.2, %v10566_v40  ;;  %v2292_v50 = vmul.f32 0.2, %v10568_v41  ;;  %8941 = vrot.lane.b32.xlu0 %v8940_v51, %s9887_s24  ;;  %v13425_v62 = vsel %vm10620_vm9, 4294967295, %v13424_v62  ;;  %v10719_v37 = vld [vmem:[%s13294_s11 + $0x8] sm:$0xff] }
 0xc3d   : > { %v10584_v49 = vsel %vm2279_vm8, %v10557_v35, %v2291_v44  ;;  %v10591_v52 = vpack.i.bf16 %v10578_v47, %v10548_v30  ;;  %13426 = vst [vmem:[#allocation8_spill] sm:$0xff] %v13425_v62  ;;  %v13428_v2 = vsel %vm10634_vm1, 4294967295, %v13427_v2  ;;  %vm10648_vm8 = vmpackc.low %vm10634_vm1, %vm10620_vm9  ;;  %v9120_v16 = vpack.i.bf16 %v10571_v43, %v10551_v31  ;;  %7730 = vmatprep.mubr.msk.f32.mxu1 %vm13340_vm14, %v10719_v37 }
 0xc3e   : > { %v10594_v53 = vsel %vm2276_vm11, %v10566_v40, %v2288_v48  ;;  %v10597_v54 = vsel %vm2280_vm2, %v10568_v41, %v2292_v50  ;;  %v10617_v61 = vpack.i.bf16 %v10584_v49, %v10551_v31  ;;  %13429 = vst [vmem:[#allocation9_spill] sm:$0xff] %v13428_v2  ;;  %v13431_v5 = vsel %vm10648_vm8, 4294967295, %v13430_v5  ;;  %7731 = vmatprep.mubr.msk.f32.mxu0 %vm13340_vm14, %v10719_v37  ;;  %v2264_v48 = vld [vmem:[%s13294_s11 + $0x10] sm:$0xff] }
 0xc3f   : > { %v10600_v55 = vpop.f32.mrb[16].mxu1  ;;  %8966 = vrot.lane.b32.xlu1 %v10591_v52, %s9888_s0  ;;  %v8975_v56 = vpack.i.bf16 %v10594_v53, %v10578_v47  ;;  %13432 = vst [vmem:[#allocation10_spill] sm:$0xff] %v13431_v5  ;;  %v9125_v14 = vpack.i.bf16 %v10597_v54, %v10584_v49  ;;  %v9145_v17 = vpack.i.bf16 %v10597_v54, %v10571_v43  ;;  %vm13338_vm2 = vcmask 973824  }
 0xc40   : > { %vm2271_vm7 = vcmp.ge.f32.partialorder %v10600_v55, 0.0  ;;  %v2283_v57 = vmul.f32 0.2, %v10600_v55  ;;  %v10608_v58 = vpop.f32.mrb[17].mxu1  ;;  %8946 = vrot.lane.b32.xlu0 %v8940_v51, %s9889_s18  ;;  %v8327_v20 = vpack.c.bf16 %v10594_v53, %v10560_v36  ;;  %v8329_v42 = vpack.c.bf16 %v10578_v47, %v10548_v30 }
 0xc41   : > { %vm2272_vm4 = vcmp.ge.f32.partialorder %v10608_v58, 0.0  ;;  %v2284_v59 = vmul.f32 0.2, %v10608_v58  ;;  %v13433_v44 = vmov 0 }
 0xc42   : > { %v10613_v60 = vsel %vm2271_vm7, %v10600_v55, %v2283_v57  ;;  %vm13316_vm7 = vcmask 965632  }
 0xc43   : > { %v10625_v63 = vsel %vm2272_vm4, %v10608_v58, %v2284_v59  ;;  %v10628_v0 = vpop.f32.mrb[18].mxu1  ;;  %8976 = vrot.lane.b32.xlu1 %v8975_v56, %s9887_s24  ;;  %v9000_v1 = vpack.i.bf16 %v10613_v60, %v10560_v36  ;;  %vm10749_vm4 = vmpackc.low %vm13316_vm7, %vm13338_vm2  ;;  %vm13339_vm7 = vcmask 793600  }
 0xc44   : > { %vm2277_vm12 = vcmp.ge.f32.partialorder %v10628_v0, 0.0  ;;  %v2289_v15 = vmul.f32 0.2, %v10628_v0  ;;  %v10642_v4 = vpop.f32.mrb[19].mxu1  ;;  %v9020_v6 = vpack.i.bf16 %v10625_v63, %v10613_v60  ;;  %8951 = vrot.lane.b32.xlu0 %v8940_v51, %s9890_s30  ;;  %v9090_v11 = vpack.i.bf16 %v10551_v31, %v10625_v63 }
 0xc45   : > { %vm2278_vm11 = vcmp.ge.f32.partialorder %v10642_v4, 0.0  ;;  %v2290_v45 = vmul.f32 0.2, %v10642_v4  ;;  %v13434_v44 = vsel %vm10749_vm4, 4294967295, %v13433_v44 }
 0xc46   : > { %v10657_v21 = vsel %vm2277_vm12, %v10628_v0, %v2289_v15  ;;  %13435 = vst [vmem:[#allocation11_spill] sm:$0xff] %v13434_v44  ;;  %vm13305_vm12 = vmpackc.low %vm10620_vm9, %vm10620_vm9 }
 0xc47   : > { %v10660_v8 = vsel %vm2278_vm11, %v10642_v4, %v2290_v45  ;;  %8981 = vrot.lane.b32.xlu1 %v8975_v56, %s9889_s18  ;;  %v9035_v9 = vpack.i.bf16 %v10657_v21, %v10594_v53  ;;  %vm13310_vm11 = vmpackc.low %vm10634_vm1, %vm10634_vm1 }
 0xc48   : > { %v9055_v10 = vpack.i.bf16 %v10660_v8, %v10657_v21  ;;  %v9110_v13 = vpack.i.bf16 %v10584_v49, %v10660_v8  ;;  %8956 = vrot.lane.b32.xlu0 %v8940_v51, %s9877_s16 }
 0xc4b   : > { %8986 = vrot.lane.b32.xlu1 %v8975_v56, %s9890_s30 }
 0xc4c   : > { %8961 = vrot.lane.b32.xlu0 %v10591_v52, %s9879_s29 }
 0xc4f   : > { %8991 = vrot.lane.b32.xlu1 %v8975_v56, %s9877_s16 }
 0xc50   : > { %8971 = vrot.lane.b32.xlu0 %v10591_v52, %s9891_s22 }
 0xc53   : > { %9001 = vrot.lane.b32.xlu1 %v9000_v1, %s9888_s0 }
 0xc54   : > { %8996 = vrot.lane.b32.xlu0 %v9000_v1, %s9879_s29 }
 0xc57   : > { %9011 = vrot.lane.b32.xlu1 %v9000_v1, %s9892_s23 }
 0xc58   : > { %9006 = vrot.lane.b32.xlu0 %v9000_v1, %s9891_s22 }
 0xc5b   : > { %9021 = vrot.lane.b32.xlu1 %v9020_v6, %s9889_s18 }
 0xc5c   : > { %9016 = vrot.lane.b32.xlu0 %v9020_v6, %s9887_s24 }
 0xc5f   : > { %9031 = vrot.lane.b32.xlu1 %v9020_v6, %s9877_s16 }
 0xc60   : > { %9026 = vrot.lane.b32.xlu0 %v9020_v6, %s9890_s30 }
 0xc63   : > { %9036 = vrot.lane.b32.xlu1 %v9035_v9, %s9879_s29 }
 0xc64   : > { %9041 = vrot.lane.b32.xlu0 %v9035_v9, %s9888_s0 }
 0xc67   : > { %9046 = vrot.lane.b32.xlu1 %v9035_v9, %s9891_s22 }
 0xc68   : > { %9051 = vrot.lane.b32.xlu0 %v9035_v9, %s9892_s23 }
 0xc6b   : > { %9056 = vrot.lane.b32.xlu1 %v9055_v10, %s9887_s24 }
 0xc6c   : > { %9066 = vrot.lane.b32.xlu0 %v10617_v61, %s9887_s24 }
 0xc6f   : > { %9061 = vrot.lane.b32.xlu1 %v10591_v52, %s9892_s23 }
 0xc70   : > { %9071 = vrot.lane.b32.xlu0 %v9055_v10, %s9889_s18 }
 0xc73   : > { %9076 = vrot.lane.b32.xlu1 %v9055_v10, %s9890_s30 }
 0xc74   : > { %9091 = vrot.lane.b32.xlu0 %v9090_v11, %s9888_s0 }
 0xc77   : > { %9081 = vrot.lane.b32.xlu1 %v9090_v11, %s9879_s29 }
 0xc78   : > { %9096 = vrot.lane.b32.xlu0 %v9055_v10, %s9877_s16 }
 0xc7b   : > { %9086 = vrot.lane.b32.xlu1 %v10617_v61, %s9889_s18 }
 0xc7c   : > { %9101 = vrot.lane.b32.xlu0 %v10617_v61, %s9890_s30 }
 0xc7f   : > { %9106 = vrot.lane.b32.xlu1 %v9090_v11, %s9891_s22 }
 0xc80   : > { %9111 = vrot.lane.b32.xlu0 %v9110_v13, %s9879_s29 }
 0xc83   : > { %9116 = vrot.lane.b32.xlu1 %v9110_v13, %s9888_s0 }
 0xc84   : > { %9126 = vrot.lane.b32.xlu0 %v9125_v14, %s9877_s16 }
 0xc87   : > { %9121 = vrot.lane.b32.xlu1 %v9120_v16, %s9877_s16 }
 0xc88   : > { %9136 = vrot.lane.b32.xlu0 %v9110_v13, %s9891_s22 }
 0xc8b   : > { %9131 = vrot.lane.b32.xlu1 %v9090_v11, %s9892_s23 }
 0xc8c   : > { %9141 = vrot.lane.b32.xlu0 %v9110_v13, %s9892_s23 }
 0xc8f   : > { %9146 = vrot.lane.b32.xlu1 %v9145_v17, %s9879_s29 }
 0xc90   : > { %9151 = vrot.lane.b32.xlu0 %v9145_v17, %s9888_s0 }
 0xc93   : > { %9156 = vrot.lane.b32.xlu1 %v9145_v17, %s9891_s22 }
 0xc94   : > { %9161 = vrot.lane.b32.xlu0 %v9145_v17, %s9892_s23 }
 0xc97   : > { %2687 = vperm.xlu1 %8899, %v2264_v48  }
 0xcae   : > { %v10759_v50 = vpop.permute.xlu0 %8941 }
 0xcaf   : > { %v13321_v52 = vunpack.i.h.bf16 %v10759_v50  ;;  %v8943_v56 = vunpack.i.l.bf16 %v10759_v50 }
 0xcb1   : > { %v10761_v51 = vpop.permute.xlu1 %8966  ;;  %v2335_v6 = vsel %vm13337_vm15, %v8943_v56, %v13321_v52 }
 0xcb2   : > { %v10765_v57 = vpop.permute.xlu0 %8946  ;;  %v8969_v36 = vunpack.i.h.bf16 %v10761_v51  ;;  %v8968_v19 = vunpack.i.l.bf16 %v10761_v51 }
 0xcb3   : > { %v13319_v15 = vunpack.i.h.bf16 %v10765_v57  ;;  %v8948_v45 = vunpack.i.l.bf16 %v10765_v57 }
 0xcb5   : > { %v10767_v59 = vpop.permute.xlu1 %8976 }
 0xcb6   : > { %v13320_v61 = vunpack.i.h.bf16 %v10767_v59  ;;  %v8978_v1 = vunpack.i.l.bf16 %v10767_v59  ;;  %v10779_v10 = vpop.permute.xlu0 %8951 }
 0xcb7   : > { %v13315_v48 = vunpack.i.h.bf16 %v10779_v10  ;;  %v8953_v46 = vunpack.i.l.bf16 %v10779_v10 }
 0xcb8   : > { %v2339_v9 = vsel %vm13337_vm15, %v8978_v1, %v13320_v61  ;;  %v8309_v14 = vpack.c.bf16 %v8978_v1, %v8943_v56 }
 0xcb9   : > { %v10781_v11 = vpop.permute.xlu1 %8981  ;;  %v8307_v13 = vpack.c.bf16 %v2339_v9, %v2335_v6  ;;  %v2377_v6 = vsel %vm13351_vm0, %v8948_v45, %v13319_v15 }
 0xcba   : > { %v13318_v16 = vunpack.i.h.bf16 %v10781_v11  ;;  %v8983_v17 = vunpack.i.l.bf16 %v10781_v11  ;;  %v10801_v1 = vpop.permute.xlu0 %8956 }
 0xcbb   : > { %8308 = vmatprep.subr.bf16.mxu1 %v8307_v13  ;;  %v13314_v39 = vunpack.i.h.bf16 %v10801_v1  ;;  %v8958_v24 = vunpack.i.l.bf16 %v10801_v1 }
 0xcbc   : > { %8311 = vmatpush1.bf16.msk.msra.mxu1 %vm13305_vm12, %v8309_v14  ;;  %v2381_v56 = vsel %vm13351_vm0, %v8983_v17, %v13318_v16  ;;  %v8314_v32 = vpack.c.bf16 %v8983_v17, %v8948_v45  ;;  %v2419_v45 = vsel %vm13345_vm3, %v8953_v46, %v13315_v48  ;;  %vm13312_vm12 = vmpackc.low %vm10811_vm13, %vm10811_vm13 }
 0xcbd   : > { %v10803_v9 = vpop.permute.xlu1 %8986  ;;  %v8312_v13 = vpack.c.bf16 %v2381_v56, %v2377_v6 }
 0xcbe   : > { %v13317_v14 = vunpack.i.h.bf16 %v10803_v9  ;;  %v8988_v3 = vunpack.i.l.bf16 %v10803_v9  ;;  %v8962_v6 = vpop.permute.xlu0 %8961 }
 0xcbf   : > { %8313 = vmatprep.subr.bf16.mxu1 %v8312_v13  ;;  %v8964_v47 = vunpack.i.h.bf16 %v8962_v6 }
 0xcc0   : > { %8316 = vmatpush1.bf16.msk.msra.mxu1 %vm13310_vm11, %v8314_v32  ;;  %v2423_v17 = vsel %vm13345_vm3, %v8988_v3, %v13317_v14  ;;  %v8319_v12 = vpack.c.bf16 %v8988_v3, %v8953_v46  ;;  %vm13438_vm11 = vcmask 7168  }
 0xcc1   : > { %v10828_v56 = vpop.permute.xlu1 %8991  ;;  %v8317_v13 = vpack.c.bf16 %v2423_v17, %v2419_v45  ;;  %v2467_v45 = vsel %vm13438_vm11, %v8958_v24, %v13314_v39  ;;  %vm13439_vm6 = vmmov %vm13438_vm11  ;;  %vm13344_vm11 = vcmask 1039360  }
 0xcc2   : > { %v13313_v7 = vunpack.i.h.bf16 %v10828_v56  ;;  %v8993_v32 = vunpack.i.l.bf16 %v10828_v56  ;;  %v10846_v46 = vpop.permute.xlu0 %8971 }
 0xcc3   : > { %8318 = vmatprep.subr.bf16.mxu1 %v8317_v13  ;;  %v8973_v35 = vunpack.i.l.bf16 %v10846_v46 }
 0xcc4   : > { %8321 = vmatpush1.bf16.msk.msra.mxu1 %vm13312_vm12, %v8319_v12  ;;  %v2472_v17 = vsel %vm13439_vm6, %v8993_v32, %v13313_v7  ;;  %v8324_v13 = vpack.c.bf16 %v8993_v32, %v8958_v24  ;;  %vm13342_vm6 = vcmask 809984   ;;  %vm13343_vm12 = vcmask 801792  }
 0xcc5   : > { %v10848_v3 = vpop.permute.xlu1 %9001  ;;  %v8322_v33 = vpack.c.bf16 %v2472_v17, %v2467_v45  ;;  %v8974_v7 = vunpack.i.h.bf16 %v10846_v46 }
 0xcc6   : > { %v10852_v38 = vpop.permute.xlu0 %8996  ;;  %v9003_v48 = vunpack.i.l.bf16 %v10848_v3  ;;  %v13440_v62 = vunpack.i.h.bf16 %v10848_v3 }
 0xcc7   : > { %8323 = vmatprep.subr.bf16.mxu1 %v8322_v33  ;;  %v13325_v32 = vunpack.i.h.bf16 %v10852_v38  ;;  %v8998_v17 = vunpack.i.l.bf16 %v10852_v38 }
 0xcc8   : > { %8326 = vmatpush1.bf16.msk.msra.mxu1 %vm10403_vm5, %v8324_v13 }
 0xcc9   : > { %8328 = vmatprep.subr.bf16.mxu1 %v8327_v20  ;;  %v10857_v12 = vpop.permute.xlu1 %9011  ;;  %v8963_v20 = vunpack.i.l.bf16 %v8962_v6  ;;  %v2517_v6 = vsel %vm13344_vm11, %v8998_v17, %v13325_v32 }
 0xcca   : > { %v10862_v22 = vpop.permute.xlu0 %9006 }
 0xccb   : > { %v2516_v14 = vsel %vm13344_vm11, %v8963_v20, %v8998_v17  ;;  %v9008_v61 = vunpack.i.l.bf16 %v10862_v22 }
 0xccc   : > { %8330 = vmatpush1.bf16.msra.mxu1 %v8329_v42 }
 0xccd   : > { %v10864_v45 = vpop.permute.xlu1 %9021 }
 0xcce   : > { %v10866_v33 = vpop.permute.xlu0 %9016 }
 0xccf   : > { %v9018_v51 = vunpack.i.l.bf16 %v10866_v33 }
 0xcd1   : > { %v10868_v24 = vpop.permute.xlu1 %9031 }
 0xcd2   : > { %v10873_v53 = vpop.permute.xlu0 %9026 }
 0xcd5   : > { %v10875_v30 = vpop.permute.xlu1 %9036 }
 0xcd6   : > { %v13326_v42 = vunpack.i.h.bf16 %v10875_v30  ;;  %v9038_v13 = vunpack.i.l.bf16 %v10875_v30  ;;  %v10893_v52 = vpop.permute.xlu0 %9041 }
 0xcd7   : > { %v9043_v2 = vunpack.i.l.bf16 %v10893_v52 }
 0xcd8   : > { %v2521_v16 = vsel %vm13344_vm11, %v8964_v47, %v9038_v13  ;;  %v2522_v15 = vsel %vm13344_vm11, %v9038_v13, %v13326_v42  ;;  %v13332_v47 = vunpack.i.h.bf16 %v10893_v52  ;;  %v2566_v13 = vsel %vm13342_vm6, %v8968_v19, %v9003_v48 }
 0xcd9   : > { %v10895_v39 = vpop.permute.xlu1 %9046  ;;  %v8331_v18 = vpack.c.bf16 %v2522_v15, %v2517_v6  ;;  %v8333_v20 = vpack.c.bf16 %v2521_v16, %v2516_v14  ;;  %v2567_v15 = vsel %vm13342_vm6, %v9003_v48, %v13440_v62  ;;  %v9019_v16 = vunpack.i.h.bf16 %v10866_v33 }
 0xcda   : > { %v13334_v17 = vunpack.i.h.bf16 %v10895_v39  ;;  %v9048_v32 = vunpack.i.l.bf16 %v10895_v39  ;;  %v2571_v14 = vsel %vm13342_vm6, %v8969_v36, %v9043_v2  ;;  %v2572_v6 = vsel %vm13342_vm6, %v9043_v2, %v13332_v47 }
 0xcdb   : > { %8332 = vmatprep.subr.bf16.mxu1 %v8331_v18  ;;  %v9013_v42 = vunpack.i.l.bf16 %v10857_v12  ;;  %v10916_v18 = vpop.permute.xlu0 %9051  ;;  %v8335_v44 = vpack.c.bf16 %v2572_v6, %v2567_v15  ;;  %v8337_v62 = vpack.c.bf16 %v2571_v14, %v2566_v13  ;;  %v13441_v48 = vunpack.i.h.bf16 %v10862_v22 }
 0xcdc   : > { %8334 = vmatpush1.bf16.msra.mxu1 %v8333_v20  ;;  %v2620_v19 = vsel %vm13343_vm12, %v9048_v32, %v13334_v17  ;;  %v9053_v20 = vunpack.i.l.bf16 %v10916_v18  ;;  %v13442_v17 = vunpack.i.h.bf16 %v10759_v50  ;;  %v2619_v15 = vsel %vm13343_vm12, %v8974_v7, %v9048_v32 }
 0xcdd   : > { %v9057_v29 = vpop.permute.xlu1 %9056  ;;  %v2615_v33 = vsel %vm13343_vm12, %v9008_v61, %v13441_v48  ;;  %8336 = vmatprep.subr.bf16.mxu1 %v8335_v44  ;;  %v13443_v14 = vunpack.i.h.bf16 %v10767_v59  ;;  %v2337_v48 = vsel %vm13337_vm15, %v9018_v51, %v9019_v16  ;;  %v2614_v50 = vsel %vm13343_vm12, %v8973_v35, %v9008_v61 }
 0xcde   : > { %v9059_v2 = vunpack.i.h.bf16 %v9057_v29  ;;  %v9058_v47 = vunpack.i.l.bf16 %v9057_v29  ;;  %v2336_v27 = vsel %vm13337_vm15, %v13442_v17, %v9018_v51  ;;  %v8339_v13 = vpack.c.bf16 %v2620_v19, %v2615_v33 }
 0xcdf   : > { %v13444_v29 = vunpack.i.h.bf16 %v10916_v18  ;;  %v9023_v17 = vunpack.i.l.bf16 %v10864_v45  ;;  %v9067_v7 = vpop.permute.xlu0 %9066  ;;  %v13445_v51 = vunpack.i.h.bf16 %v10857_v12  ;;  %v9029_v61 = vunpack.i.h.bf16 %v10873_v53 }
 0xce0   : > { %v2340_v6 = vsel %vm13337_vm15, %v13443_v14, %v9058_v47  ;;  %8338 = vmatpush1.bf16.msra.mxu1 %v8337_v62  ;;  %v2341_v36 = vsel %vm13337_vm15, %v9058_v47, %v9059_v2  ;;  %v8341_v62 = vpack.c.bf16 %v2619_v15, %v2614_v50  ;;  %v9024_v14 = vunpack.i.h.bf16 %v10864_v45 }
 0xce1   : > { %v2668_v46 = vsel %vm13339_vm7, %v9053_v20, %v13444_v29  ;;  %8340 = vmatprep.subr.bf16.mxu1 %v8339_v13  ;;  %v9062_v44 = vpop.permute.xlu1 %9061  ;;  %v8347_v32 = vpack.c.bf16 %v2341_v36, %v2337_v48  ;;  %v8349_v59 = vpack.c.bf16 %v2340_v6, %v2336_v27  ;;  %v2663_v47 = vsel %vm13339_vm7, %v9013_v42, %v13445_v51 }
 0xce2   : > { %v9064_v19 = vunpack.i.h.bf16 %v9062_v44  ;;  %v9063_v33 = vunpack.i.l.bf16 %v9062_v44  ;;  %v9069_v41 = vunpack.i.h.bf16 %v9067_v7  ;;  %v9068_v29 = vunpack.i.l.bf16 %v9067_v7 }
 0xce3   : > { %8348 = vmatprep.subr.bf16.mxu0 %v8347_v32  ;;  %v8343_v35 = vpack.c.bf16 %v2668_v46, %v2663_v47  ;;  %v9028_v13 = vunpack.i.l.bf16 %v10873_v53  ;;  %v13446_v15 = vunpack.i.h.bf16 %v10765_v57  ;;  %v9072_v48 = vpop.permute.xlu0 %9071  ;;  %v13447_v57 = vunpack.i.h.bf16 %v10781_v11 }
 0xce4   : > { %v2667_v36 = vsel %vm13339_vm7, %v9064_v19, %v9053_v20  ;;  %v2662_v27 = vsel %vm13339_vm7, %v9063_v33, %v9013_v42  ;;  %8342 = vmatpush1.bf16.msra.mxu1 %v8341_v62  ;;  %8350 = vmatpush1.bf16.msra.mxu0 %v8349_v59  ;;  %v9074_v7 = vunpack.i.h.bf16 %v9072_v48  ;;  %v9073_v46 = vunpack.i.l.bf16 %v9072_v48  ;;  %v10959_v62 = vld [vmem:[%s13294_s11] sm:$0xff] }
 0xce5   : > { %v2378_v6 = vsel %vm13351_vm0, %v13446_v15, %v9023_v17  ;;  %8344 = vmatprep.subr.bf16.mxu1 %v8343_v35  ;;  %v9077_v45 = vpop.permute.xlu1 %9076  ;;  %v8345_v50 = vpack.c.bf16 %v2667_v36, %v2662_v27  ;;  %v2338_v51 = vsel %vm13337_vm15, %v9019_v16, %v9068_v29  ;;  %v2342_v20 = vsel %vm13337_vm15, %v9059_v2, %v9069_v41 }
 0xce6   : > { %v9079_v44 = vunpack.i.h.bf16 %v9077_v45  ;;  %v9078_v32 = vunpack.i.l.bf16 %v9077_v45  ;;  %v2379_v42 = vsel %vm13351_vm0, %v9023_v17, %v9024_v14  ;;  %v8383_v19 = vpack.c.bf16 %v9069_v41, %v9068_v29 }
 0xce7   : > { %v2382_v33 = vsel %vm13351_vm0, %v13447_v57, %v9073_v46  ;;  %v2383_v59 = vsel %vm13351_vm0, %v9073_v46, %v9074_v7  ;;  %v2421_v16 = vsel %vm13345_vm3, %v9028_v13, %v9029_v61  ;;  %v10965_v17 = vpop.permute.xlu0 %9091  ;;  %v13448_v35 = vunpack.i.h.bf16 %v10803_v9 }
 0xce8   : > { %8346 = vmatpush1.bf16.msra.mxu1 %v8345_v50  ;;  %v2425_v2 = vsel %vm13345_vm3, %v9078_v32, %v9079_v44  ;;  %v8351_v41 = vpack.c.bf16 %v2383_v59, %v2379_v42  ;;  %v8353_v47 = vpack.c.bf16 %v2382_v33, %v2378_v6  ;;  %v8385_v27 = vpack.c.bf16 %v2342_v20, %v2338_v51 }
 0xce9   : > { %v10967_v11 = vpop.permute.xlu1 %9081  ;;  %8384 = vmatprep.subr.bf16.mxu1 %v8383_v19  ;;  %v8355_v29 = vpack.c.bf16 %v2425_v2, %v2421_v16  ;;  %v2424_v36 = vsel %vm13345_vm3, %v13448_v35, %v9078_v32  ;;  %v9034_v15 = vunpack.i.h.bf16 %v10868_v24  ;;  %v9033_v48 = vunpack.i.l.bf16 %v10868_v24 }
 0xcea   : > { %8352 = vmatprep.subr.bf16.mxu0 %v8351_v41  ;;  %v13449_v45 = vunpack.i.h.bf16 %v10779_v10  ;;  %v13450_v10 = vunpack.i.h.bf16 %v10801_v1  ;;  %vm13451_vm15 = vcmask 7168   ;;  %v13453_v57 = vunpack.i.h.bf16 %v10828_v56 }
 0xceb   : > { %2758 = vmatmul.mubr.f32.vlgmr.msra.gmra.mrb[20].mxu1 %v10959_v62  ;;  %8354 = vmatpush1.bf16.msra.mxu0 %v8353_v47  ;;  %v10978_v6 = vpop.permute.xlu0 %9096  ;;  %vm13452_vm2 = vmmov %vm13451_vm15  ;;  %v9083_v56 = vunpack.i.l.bf16 %v10967_v11 }
 0xcec   : > { %v2420_v50 = vsel %vm13345_vm3, %v13449_v45, %v9028_v13  ;;  %8386 = vmatpush1.bf16.msra.mxu1 %v8385_v27  ;;  %8356 = vmatprep.subr.bf16.mxu0 %v8355_v29  ;;  %v9099_v32 = vunpack.i.h.bf16 %v10978_v6  ;;  %v9098_v51 = vunpack.i.l.bf16 %v10978_v6  ;;  %v2468_v13 = vsel %vm13451_vm15, %v13450_v10, %v9033_v48  ;;  %vm13454_vm7 = vmmov %vm13452_vm2 }
 0xced   : > { %v9087_v9 = vpop.permute.xlu1 %9086  ;;  %v8357_v46 = vpack.c.bf16 %v2424_v36, %v2420_v50  ;;  %7740 = vmatprep.mubr.msk.f32.mxu1 %vm13340_vm14, %v10719_v37  ;;  %v2469_v19 = vsel %vm13452_vm2, %v9033_v48, %v9034_v15  ;;  %vm13455_vm14 = vmmov %vm13452_vm2  ;;  %v9094_v45 = vunpack.i.h.bf16 %v10965_v17  ;;  %v9093_v50 = vunpack.i.l.bf16 %v10965_v17 }
 0xcee   : > { %v9089_v20 = vunpack.i.h.bf16 %v9087_v9  ;;  %v9088_v42 = vunpack.i.l.bf16 %v9087_v9  ;;  %v2473_v33 = vsel %vm13454_vm7, %v13453_v57, %v9098_v51  ;;  %v2474_v16 = vsel %vm13455_vm14, %v9098_v51, %v9099_v32  ;;  %vm13461_vm15 = vmmov %vm13452_vm2 }
 0xcef   : > { %8358 = vmatpush1.bf16.msra.mxu0 %v8357_v46  ;;  %v9102_v2 = vpop.permute.xlu0 %9101  ;;  %v8359_v41 = vpack.c.bf16 %v2474_v16, %v2469_v19  ;;  %v8361_v47 = vpack.c.bf16 %v2473_v33, %v2468_v13  ;;  %v13456_v9 = vpack.c.bf16 %v10660_v8, %v10625_v63  ;;  %v13457_v10 = vunpack.i.h.bf16 %v10852_v38  ;;  %vm13462_vm14 = vmmov %vm13452_vm2 }
 0xcf0   : > { %v2384_v37 = vsel %vm13351_vm0, %v9074_v7, %v9089_v20  ;;  %v2380_v59 = vsel %vm13351_vm0, %v9024_v14, %v9088_v42  ;;  %v8387_v29 = vpack.c.bf16 %v9089_v20, %v9088_v42  ;;  %v9104_v36 = vunpack.i.h.bf16 %v9102_v2  ;;  %vm13463_vm7 = vmmov %vm13452_vm2 }
 0xcf1   : > { %v10996_v1 = vpop.permute.xlu1 %9106  ;;  %v8389_v35 = vpack.c.bf16 %v2384_v37, %v2380_v59  ;;  %v9103_v27 = vunpack.i.l.bf16 %v9102_v2  ;;  %8360 = vmatprep.subr.bf16.mxu0 %v8359_v41  ;;  %v9084_v7 = vunpack.i.h.bf16 %v10967_v11  ;;  %v2518_v13 = vsel %vm13344_vm11, %v13457_v10, %v9083_v56 }
 0xcf2   : > { %8388 = vmatprep.subr.bf16.mxu1 %v8387_v29  ;;  %v2426_v48 = vsel %vm13345_vm3, %v9079_v44, %v9104_v36  ;;  %v13458_v63 = vunpack.i.h.bf16 %v10875_v30  ;;  %v13459_v19 = vpack.c.bf16 %v10657_v21, %v10613_v60  ;;  %v2569_v30 = vsel %vm13342_vm6, %v9093_v50, %v9094_v45 }
 0xcf3   : > { %v2422_v14 = vsel %vm13345_vm3, %v9029_v61, %v9103_v27  ;;  %8362 = vmatpush1.bf16.msra.mxu0 %v8361_v47  ;;  %8390 = vmatpush1.bf16.msra.mxu1 %v8389_v35  ;;  %v11006_v6 = vpop.permute.xlu0 %9111  ;;  %v8391_v46 = vpack.c.bf16 %v9104_v36, %v9103_v27  ;;  %v2519_v57 = vsel %vm13344_vm11, %v9083_v56, %v9084_v7  ;;  %v9109_v29 = vunpack.i.h.bf16 %v10996_v1 }
 0xcf4   : > { %8364 = vmatprep.subr.bf16.mxu0 %v13456_v9  ;;  %v8393_v53 = vpack.c.bf16 %v2426_v48, %v2422_v14  ;;  %v9114_v61 = vunpack.i.h.bf16 %v11006_v6  ;;  %v9113_v44 = vunpack.i.l.bf16 %v11006_v6  ;;  %v9108_v35 = vunpack.i.l.bf16 %v10996_v1 }
 0xcf5   : > { %v11011_v51 = vpop.permute.xlu1 %9116  ;;  %8392 = vmatprep.subr.bf16.mxu1 %v8391_v46  ;;  %v13460_v36 = vunpack.i.h.bf16 %v10893_v52 }
 0xcf6   : > { %v9119_v20 = vunpack.i.h.bf16 %v11011_v51  ;;  %v9118_v42 = vunpack.i.l.bf16 %v11011_v51  ;;  %v2523_v8 = vsel %vm13344_vm11, %v13458_v63, %v9113_v44  ;;  %v2524_v38 = vsel %vm13344_vm11, %v9113_v44, %v9114_v61 }
 0xcf7   : > { %8366 = vmatpush1.bf16.msra.mxu0 %v13459_v19  ;;  %8394 = vmatpush1.bf16.msra.mxu1 %v8393_v53  ;;  %v9127_v33 = vpop.permute.xlu0 %9126  ;;  %v8367_v37 = vpack.c.bf16 %v2524_v38, %v2519_v57  ;;  %v8369_v16 = vpack.c.bf16 %v2523_v8, %v2518_v13  ;;  %v13464_v53 = vunpack.i.h.bf16 %v10848_v3  ;;  %v13465_v8 = vunpack.i.h.bf16 %v10862_v22 }
 0xcf8   : > { %v2574_v60 = vsel %vm13342_vm6, %v9118_v42, %v9119_v20  ;;  %v9129_v21 = vunpack.i.h.bf16 %v9127_v33  ;;  %v9128_v2 = vunpack.i.l.bf16 %v9127_v33  ;;  %v2573_v27 = vsel %vm13342_vm6, %v13460_v36, %v9118_v42 }
 0xcf9   : > { %v9122_v59 = vpop.permute.xlu1 %9121  ;;  %8368 = vmatprep.subr.bf16.mxu0 %v8367_v37  ;;  %v8371_v56 = vpack.c.bf16 %v2574_v60, %v2569_v30  ;;  %v2568_v44 = vsel %vm13342_vm6, %v13464_v53, %v9093_v50  ;;  %v2616_v19 = vsel %vm13343_vm12, %v13465_v8, %v9108_v35  ;;  %v13466_v3 = vunpack.i.h.bf16 %v10895_v39 }
 0xcfa   : > { %v9124_v41 = vunpack.i.h.bf16 %v9122_v59  ;;  %v9123_v47 = vunpack.i.l.bf16 %v9122_v59  ;;  %v2475_v14 = vsel %vm13461_vm15, %v9099_v32, %v9128_v2  ;;  %v2476_v46 = vsel %vm13463_vm7, %v9128_v2, %v9129_v21 }
 0xcfb   : > { %8370 = vmatpush1.bf16.msra.mxu0 %v8369_v16  ;;  %v9137_v52 = vpop.permute.xlu0 %9136  ;;  %v2617_v38 = vsel %vm13343_vm12, %v9108_v35, %v9109_v29  ;;  %vm13341_vm15 = vcmask 154624   ;;  %v13467_v22 = vunpack.i.h.bf16 %v10857_v12  ;;  %v13469_v39 = vpack.c.bf16 %v10597_v54, %v10571_v43 }
 0xcfc   : > { %v2470_v48 = vsel %vm13462_vm14, %v9034_v15, %v9123_v47  ;;  %v2471_v9 = vsel %vm13452_vm2, %v9123_v47, %v9124_v41  ;;  %8372 = vmatprep.subr.bf16.mxu0 %v8371_v56  ;;  %v9139_v32 = vunpack.i.h.bf16 %v9137_v52  ;;  %v9138_v63 = vunpack.i.l.bf16 %v9137_v52  ;;  %vm11075_vm7 = vmpackc.low %vm13341_vm15, %vm13341_vm15 }
 0xcfd   : > { %v11052_v42 = vpop.permute.xlu1 %9131  ;;  %v8395_v10 = vpack.c.bf16 %v2476_v46, %v2471_v9  ;;  %v8397_v13 = vpack.c.bf16 %v2475_v14, %v2470_v48  ;;  %v8373_v15 = vpack.c.bf16 %v2573_v27, %v2568_v44  ;;  %vm13468_vm14 = vcmask 793600  }
 0xcfe   : > { %v9133_v24 = vunpack.i.l.bf16 %v11052_v42  ;;  %v9134_v57 = vunpack.i.h.bf16 %v11052_v42  ;;  %v2621_v50 = vsel %vm13343_vm12, %v13466_v3, %v9138_v63  ;;  %v2622_v33 = vsel %vm13343_vm12, %v9138_v63, %v9139_v32  ;;  %vm13470_vm2 = vmmov %vm13468_vm14 }
 0xcff   : > { %8396 = vmatprep.subr.bf16.mxu1 %v8395_v10  ;;  %8374 = vmatpush1.bf16.msra.mxu0 %v8373_v15  ;;  %v9142_v59 = vpop.permute.xlu0 %9141  ;;  %v8375_v16 = vpack.c.bf16 %v2622_v33, %v2617_v38  ;;  %v8377_v60 = vpack.c.bf16 %v2621_v50, %v2616_v19  ;;  %v13473_v36 = vunpack.i.h.bf16 %v10916_v18  ;;  %v13475_v9 = vpack.c.bf16 %v10584_v49, %v10551_v31  ;;  %v11146_v50 = vld [vmem:[%s13288_s5] sm:$0x3f] }
 0xd00   : > { %8398 = vmatpush1.bf16.msra.mxu1 %v8397_v13  ;;  %v2664_v37 = vsel %vm13468_vm14, %v13467_v22, %v9133_v24  ;;  %v9144_v21 = vunpack.i.h.bf16 %v9142_v59  ;;  %v9143_v2 = vunpack.i.l.bf16 %v9142_v59  ;;  %v2665_v35 = vsel %vm13470_vm2, %v9133_v24, %v9134_v57  ;;  %vm13474_vm14 = vmmov %vm13470_vm2 }
 0xd01   : > { %v9147_v30 = vpop.permute.xlu1 %9146  ;;  %8400 = vmatprep.subr.bf16.mxu1 %v13469_v39  ;;  %8376 = vmatprep.subr.bf16.mxu0 %v8375_v16  ;;  %v13476_v42 = vmov 0.0|0.0   ;;  %v13480_v63 = vmov 0.0   ;;  %v13486_v15 = vmov 0  ;;  %v13347_v19 = vlaneseq }
 0xd02   : > { %v9149_v41 = vunpack.i.h.bf16 %v9147_v30  ;;  %v9148_v47 = vunpack.i.l.bf16 %v9147_v30  ;;  %v2669_v27 = vsel %vm13474_vm14, %v13473_v36, %v9143_v2  ;;  %v2670_v48 = vsel %vm13470_vm2, %v9143_v2, %v9144_v21 }
 0xd03   : > { %8378 = vmatpush1.bf16.msra.mxu0 %v8377_v60  ;;  %v9152_v14 = vpop.permute.xlu0 %9151  ;;  %v8381_v46 = vpack.c.bf16 %v2669_v27, %v2664_v37  ;;  %v8379_v52 = vpack.c.bf16 %v2670_v48, %v2665_v35  ;;  %vm13477_vm14 = vcmask 973824  }
 0xd04   : > { %v2525_v43 = vsel %vm13344_vm11, %v9114_v61, %v9149_v41  ;;  %v2520_v54 = vsel %vm13344_vm11, %v9084_v7, %v9148_v47  ;;  %v8403_v56 = vpack.c.bf16 %v9149_v41, %v9148_v47  ;;  %8402 = vmatpush1.bf16.msra.mxu1 %v13475_v9  ;;  %v9154_v44 = vunpack.i.h.bf16 %v9152_v14  ;;  %vm11103_vm2 = vmpackc.low %vm13477_vm14, %vm13477_vm14 }
 0xd05   : > { %v9157_v18 = vpop.permute.xlu1 %9156  ;;  %v8406_v53 = vpack.c.bf16 %v2525_v43, %v2520_v54  ;;  %v9153_v6 = vunpack.i.l.bf16 %v9152_v14  ;;  %8380 = vmatprep.subr.bf16.mxu0 %v8379_v52  ;;  %vm13481_vm14 = vcmask 965632  }
 0xd06   : > { %8405 = vmatprep.subr.msk.bf16.mxu1 %vm11075_vm7, %v8403_v56  ;;  %v2575_v7 = vsel %vm13342_vm6, %v9119_v20, %v9154_v44  ;;  %v9159_v31 = vunpack.i.h.bf16 %v9157_v18  ;;  %v9158_v49 = vunpack.i.l.bf16 %v9157_v18  ;;  %vm11118_vm15 = vmpackc.low %vm13481_vm14, %vm13481_vm14 }
 0xd07   : > { %v2570_v11 = vsel %vm13342_vm6, %v9094_v45, %v9153_v6  ;;  %8382 = vmatpush1.bf16.msra.mxu0 %v8381_v46  ;;  %v9162_v61 = vpop.permute.xlu0 %9161  ;;  %vm13346_vm6 = vcmask 957440  }
 0xd08   : > { %8407 = vmatpush1.bf16.msra.mxu1 %v8406_v53  ;;  %v8409_v17 = vpack.c.bf16 %v2575_v7, %v2570_v11  ;;  %v2623_v45 = vsel %vm13343_vm12, %v9139_v32, %v9159_v31  ;;  %v2618_v51 = vsel %vm13343_vm12, %v9109_v29, %v9158_v49  ;;  %v9164_v20 = vunpack.i.h.bf16 %v9162_v61  ;;  %vm11129_vm3 = vmpackc.low %vm13346_vm6, %vm13346_vm6 }
 0xd09   : > { %8408 = vmatprep.subr.bf16.mxu1 %v13476_v42  ;;  %v9163_v13 = vunpack.i.l.bf16 %v9162_v61  ;;  %v8413_v1 = vpack.c.bf16 %v2623_v45, %v2618_v51  ;;  %vm13484_vm12 = vcmask 793600   ;;  %v13487_v15 = vsel %vm11129_vm3, 4294967295, %v13486_v15 }
 0xd0a   : > { %2829 = vmatmul.mubr.f32.vlgmr.msra.gmra.mrb[18].mxu0 %v10959_v62  ;;  %vm13485_vm11 = vmmov %vm13484_vm12  ;;  %13488 = vst [vmem:[#allocation12_spill] sm:$0xff] %v13487_v15 }
 0xd0b   : > { %3219 = vmatprep.mubr.f32.mxu0 %v13480_v63  ;;  %v2666_v29 = vsel %vm13484_vm12, %v9134_v57, %v9163_v13  ;;  %v2671_v32 = vsel %vm13485_vm11, %v9144_v21, %v9164_v20  ;;  %v11138_v57 = vshrl.u32 %v13347_v19, 7 }
 0xd0c   : > { %8411 = vmatpush1.bf16.msk.msra.mxu1 %vm11103_vm2, %v8409_v17  ;;  %v8417_v8 = vpack.c.bf16 %v2671_v32, %v2666_v29 }
 0xd0d   : > { %8412 = vmatprep.subr.bf16.mxu1 %v13476_v42  ;;  %13489 = vst [vmem:[#allocation13_spill] sm:$0xff] %v11138_v57  ;;  %v11141_v3 = vsub.s32 0, %v11138_v57  ;;  %v2913_v38 = vsub.s32 1, %v11138_v57  ;;  %v2917_v36 = vsub.s32 2, %v11138_v57  ;;  %v13350_v27 = vsub.s32 3, %v11138_v57 }
 0xd0e   : > { %v13349_v6 = vsub.s32 4, %v11138_v57 }
 0xd0f   : > { %13490 = vst [vmem:[#allocation14_spill] sm:$0xff] %v11141_v3  ;;  %v11151_v33 = vrot.slane %v11146_v50, %v11141_v3  ;;  %v11156_v37 = vrot.slane %v11146_v50, %v2913_v38  ;;  %v11183_v43 = vrot.slane %v11146_v50, %v2917_v36  ;;  %v11188_v48 = vrot.slane %v11146_v50, %v13350_v27 }
 0xd10   : > { %8415 = vmatpush1.bf16.msk.msra.mxu1 %vm11118_vm15, %v8413_v1  ;;  %v11202_v7 = vrot.slane %v11146_v50, %v13349_v6  ;;  %v13348_v1 = vsub.s32 5, %v11138_v57 }
 0xd11   : > { %8416 = vmatprep.subr.bf16.mxu1 %v13476_v42  ;;  %13491 = vst [vmem:[#allocation15_spill] sm:$0xff] %v11151_v33  ;;  %13492 = vst [vmem:[#allocation16_spill] sm:$0xff] %v11156_v37 }
 0xd12   : > { %13493 = vst [vmem:[#allocation17_spill] sm:$0xff] %v11183_v43  ;;  %13494 = vst [vmem:[#allocation18_spill] sm:$0xff] %v11188_v48 }
 0xd13   : > { %13495 = vst [vmem:[#allocation19_spill] sm:$0xff] %v11202_v7 }
 0xd14   : > { %8419 = vmatpush1.bf16.msk.msra.mxu1 %vm11129_vm3, %v8417_v8  ;;  %v11225_v8 = vrot.slane %v11146_v50, %v13348_v1 }
 0xd16   : > { %13496 = vst [vmem:[#allocation20_spill] sm:$0xff] %v11225_v8 }
 0xd17   : > { %2900 = vmatmul.mubr.f32.vlgmr.msra.gmra.mrb[22].mxu1 %v10959_v62  ;;  %v2688_v62 = vpop.permute.xlu1 %2687 }
 0xd18   : > { %3361 = vmatprep.mubr.f32.mxu1 %v13480_v63 }
 0xdbe   : > { %v2759_v22 = vpop.f32.mrb[20].mxu1 }
 0xdbf   : > { %v2760_v59 = vadd.f32 %v2759_v22, %v2688_v62  ;;  %v2761_v16 = vpop.f32.mrb[21].mxu1 }
 0xdc0   : > { %v2762_v30 = vadd.f32 %v2761_v16, %v2688_v62  ;;  %v2268_v16 = vld [vmem:[%s13294_s11 + $0x30] sm:$0xff] }
 0xdc1   : > { %v2937_v60 = vmul.f32 %v11151_v33, %v2760_v59 }
 0xdc2   : > { %v2938_v39 = vmul.f32 %v11156_v37, %v2762_v30  ;;  %v2266_v30 = vld [vmem:[%s13294_s11 + $0x20] sm:$0xff] }
 0xdc3   : > { %vm2943_vm12 = vcmp.ge.f32.partialorder %v2937_v60, 0.0  ;;  %v2949_v21 = vmul.f32 0.2, %v2937_v60 }
 0xdc4   : > { %vm2944_vm11 = vcmp.ge.f32.partialorder %v2938_v39, 0.0  ;;  %v2950_v2 = vmul.f32 0.2, %v2938_v39 }
 0xdc5   : > { %v11160_v41 = vsel %vm2943_vm12, %v2937_v60, %v2949_v21 }
 0xdc6   : > { %v11162_v47 = vsel %vm2944_vm11, %v2938_v39, %v2950_v2  ;;  %3078 = vrot.lane.b32.xlu0 %v11160_v41, %s9888_s0  ;;  %3054 = vrot.lane.b32.xlu1 %v11160_v41, %s9879_s29 }
 0xdc7   : > { %v9165_v35 = vpack.i.bf16 %v11162_v47, %v11160_v41 }
 0xdca   : > { %9166 = vrot.lane.b32.xlu0 %v9165_v35, %s9887_s24  ;;  %9171 = vrot.lane.b32.xlu1 %v9165_v35, %s9889_s18 }
 0xdce   : > { %9176 = vrot.lane.b32.xlu0 %v9165_v35, %s9890_s30  ;;  %9181 = vrot.lane.b32.xlu1 %v9165_v35, %s9877_s16 }
 0xdd2   : > { %3126 = vrot.lane.b32.xlu0 %v11162_v47, %s9892_s23  ;;  %3101 = vrot.lane.b32.xlu1 %v11160_v41, %s9891_s22 }
 0xddd   : > { %v2830_v54 = vpop.f32.mrb[18].mxu0 }
 0xdde   : > { %v2831_v56 = vadd.f32 %v2830_v54, %v2688_v62  ;;  %v2832_v14 = vpop.f32.mrb[19].mxu0 }
 0xddf   : > { %v2833_v9 = vadd.f32 %v2832_v14, %v2688_v62 }
 0xde0   : > { %v2939_v18 = vmul.f32 %v11183_v43, %v2831_v56 }
 0xde1   : > { %v2940_v53 = vmul.f32 %v11188_v48, %v2833_v9 }
 0xde2   : > { %vm2945_vm14 = vcmp.ge.f32.partialorder %v2939_v18, 0.0  ;;  %v2951_v46 = vmul.f32 0.2, %v2939_v18 }
 0xde3   : > { %v2952_v11 = vmul.f32 0.2, %v2940_v53  ;;  %vm2946_vm12 = vcmp.ge.f32.partialorder %v2940_v53, 0.0 }
 0xde4   : > { %v11192_v44 = vsel %vm2945_vm14, %v2939_v18, %v2951_v46 }
 0xde5   : > { %v9195_v52 = vpack.i.bf16 %v11192_v44, %v11162_v47  ;;  %v11204_v49 = vsel %vm2946_vm12, %v2940_v53, %v2952_v11  ;;  %vm13497_vm12 = vcmask 252928  }
 0xde6   : > { %v9205_v51 = vpack.i.bf16 %v11204_v49, %v11192_v44 }
 0xde7   : > { %9196 = vrot.lane.b32.xlu1 %v9195_v52, %s9891_s22  ;;  %9186 = vrot.lane.b32.xlu0 %v9195_v52, %s9879_s29 }
 0xdea   : > { %v2901_v31 = vpop.f32.mrb[22].mxu1 }
 0xdeb   : > { %v2902_v61 = vadd.f32 %v2901_v31, %v2688_v62  ;;  %v2903_v17 = vpop.f32.mrb[23].mxu1  ;;  %3128 = vrot.lane.b32.xlu1 %v11192_v44, %s9892_s23  ;;  %9191 = vrot.lane.b32.xlu0 %v9195_v52, %s9888_s0 }
 0xdec   : > { %v2904_v32 = vadd.f32 %v2903_v17, %v2688_v62 }
 0xded   : > { %v2941_v45 = vmul.f32 %v11202_v7, %v2902_v61 }
 0xdee   : > { %v2942_v22 = vmul.f32 %v11225_v8, %v2904_v32 }
 0xdef   : > { %vm2947_vm11 = vcmp.ge.f32.partialorder %v2941_v45, 0.0  ;;  %v2953_v20 = vmul.f32 0.2, %v2941_v45  ;;  %9206 = vrot.lane.b32.xlu1 %v9205_v51, %s9889_s18  ;;  %3124 = vrot.lane.b32.xlu0 %v11160_v41, %s9892_s23 }
 0xdf0   : > { %v2954_v59 = vmul.f32 0.2, %v2942_v22  ;;  %vm2948_vm14 = vcmp.ge.f32.partialorder %v2942_v22, 0.0 }
 0xdf1   : > { %v11215_v13 = vsel %vm2947_vm11, %v2941_v45, %v2953_v20  ;;  %vm13498_vm11 = vcmask 236544  }
 0xdf2   : > { %v9220_v29 = vpack.i.bf16 %v11215_v13, %v11204_v49  ;;  %v11236_v50 = vsel %vm2948_vm14, %v2942_v22, %v2954_v59  ;;  %vm13499_vm14 = vcmask 7168  }
 0xdf3   : > { %9211 = vrot.lane.b32.xlu1 %v9205_v51, %s9890_s30  ;;  %9201 = vrot.lane.b32.xlu0 %v9205_v51, %s9887_s24  ;;  %v9235_v62 = vpack.i.bf16 %v11236_v50, %v11215_v13 }
 0xdf7   : > { %9221 = vrot.lane.b32.xlu1 %v9220_v29, %s9879_s29  ;;  %9216 = vrot.lane.b32.xlu0 %v9205_v51, %s9877_s16 }
 0xdfb   : > { %9231 = vrot.lane.b32.xlu1 %v9220_v29, %s9891_s22  ;;  %9226 = vrot.lane.b32.xlu0 %v9220_v29, %s9888_s0  ;;  %v13500_v29 = vmov 0 }
 0xdff   : > { %3132 = vrot.lane.b32.xlu1 %v11215_v13, %s9892_s23  ;;  %3130 = vrot.lane.b32.xlu0 %v11204_v49, %s9892_s23 }
 0xe03   : > { %2995 = vrot.lane.b32.xlu1 %v11215_v13, %s9889_s18  ;;  %2974 = vrot.lane.b32.xlu0 %v11215_v13, %s9887_s24 }
 0xe07   : > { %3016 = vrot.lane.b32.xlu1 %v11215_v13, %s9890_s30  ;;  %9236 = vrot.lane.b32.xlu0 %v9235_v62, %s9877_s16 }
 0xe0b   : > { %3088 = vrot.lane.b32.xlu1 %v11236_v50, %s9888_s0  ;;  %3064 = vrot.lane.b32.xlu0 %v11236_v50, %s9879_s29 }
 0xe0f   : > { %3134 = vrot.lane.b32.xlu1 %v11236_v50, %s9892_s23  ;;  %3111 = vrot.lane.b32.xlu0 %v11236_v50, %s9891_s22 }
 0xe13   : > { %3376 = vperm.xlu1 %8899, %v2268_v16   ;;  %3149 = vperm.xlu0 %8898, %v2266_v30  }
 0xe38   : > { %v3079_v60 = vpop.permute.xlu0 %3078  ;;  %v3055_v39 = vpop.permute.xlu1 %3054 }
 0xe3c   : > { %v11261_v21 = vpop.permute.xlu0 %9166  ;;  %v11263_v2 = vpop.permute.xlu1 %9171 }
 0xe3d   : > { %v9169_v35 = vunpack.i.h.bf16 %v11261_v21  ;;  %v9168_v54 = vunpack.i.l.bf16 %v11261_v21  ;;  %v9174_v56 = vunpack.i.h.bf16 %v11263_v2  ;;  %v9173_v14 = vunpack.i.l.bf16 %v11263_v2 }
 0xe3f   : > { %v2976_v9 = vsel %vm13497_vm12, %v9168_v54, %v9169_v35  ;;  %v2997_v18 = vsel %vm13351_vm0, %v9173_v14, %v9174_v56  ;;  %v8422_v46 = vpack.c.bf16 %v9173_v14, %v9168_v54  ;;  %vm11293_vm12 = vmpackc.low %vm10050_vm10, %vm10811_vm13  ;;  %vm13503_vm10 = vcmask 1039360  }
 0xe40   : > { %v11273_v53 = vpop.permute.xlu0 %9176  ;;  %v11275_v52 = vpop.permute.xlu1 %9181  ;;  %v8420_v11 = vpack.c.bf16 %v2997_v18, %v2976_v9  ;;  %v13501_v29 = vsel %vm11293_vm12, 4294967295, %v13500_v29 }
 0xe41   : > { %v9179_v31 = vunpack.i.h.bf16 %v11273_v53  ;;  %v9178_v61 = vunpack.i.l.bf16 %v11273_v53  ;;  %v9184_v17 = vunpack.i.h.bf16 %v11275_v52  ;;  %v9183_v45 = vunpack.i.l.bf16 %v11275_v52  ;;  %13502 = vst [vmem:[#allocation21_spill] sm:$0xff] %v13501_v29 }
 0xe42   : > { %8421 = vmatprep.subr.bf16.mxu0 %v8420_v11 }
 0xe43   : > { %8424 = vmatpush1.bf16.msk.msra.mxu0 %vm10648_vm8, %v8422_v46  ;;  %v3018_v51 = vsel %vm13498_vm11, %v9178_v61, %v9179_v31  ;;  %v3042_v20 = vsel %vm13499_vm14, %v9183_v45, %v9184_v17  ;;  %v8427_v22 = vpack.c.bf16 %v9183_v45, %v9178_v61  ;;  %vm13504_vm11 = vmmov %vm13503_vm10  ;;  %vm13505_vm14 = vcmask 801792  }
 0xe44   : > { %v8425_v32 = vpack.c.bf16 %v3042_v20, %v3018_v51  ;;  %v3127_v59 = vpop.permute.xlu0 %3126  ;;  %v3102_v62 = vpop.permute.xlu1 %3101  ;;  %vm13508_vm6 = vmmov %vm13505_vm14 }
 0xe46   : > { %8426 = vmatprep.subr.bf16.mxu0 %v8425_v32 }
 0xe47   : > { %8429 = vmatpush1.bf16.msk.msra.mxu0 %vm11293_vm12, %v8427_v22  ;;  %vm13534_vm12 = vcmask 154624  }
 0xe59   : > { %v11299_v16 = vpop.permute.xlu1 %9196  ;;  %v11301_v30 = vpop.permute.xlu0 %9186 }
 0xe5a   : > { %v9189_v2 = vunpack.i.h.bf16 %v11301_v30  ;;  %v9188_v23 = vunpack.i.l.bf16 %v11301_v30  ;;  %v9199_v54 = vunpack.i.h.bf16 %v11299_v16  ;;  %v9198_v14 = vunpack.i.l.bf16 %v11299_v16 }
 0xe5c   : > { %v3066_v9 = vsel %vm13503_vm10, %v3055_v39, %v9188_v23  ;;  %v3067_v18 = vsel %vm13504_vm11, %v9188_v23, %v9189_v2  ;;  %v3113_v32 = vsel %vm13505_vm14, %v3102_v62, %v9198_v14  ;;  %vm13506_vm10 = vcmask 809984  }
 0xe5d   : > { %v11311_v46 = vpop.permute.xlu1 %3128  ;;  %v11313_v11 = vpop.permute.xlu0 %9191  ;;  %v8430_v61 = vpack.c.bf16 %v3067_v18, %v11162_v47  ;;  %v8432_v45 = vpack.c.bf16 %v3066_v9, %v11160_v41  ;;  %vm13507_vm11 = vmmov %vm13506_vm10  ;;  %v3114_v47 = vsel %vm13508_vm6, %v9198_v14, %v9199_v54  ;;  %vm13509_vm14 = vcmask 793600  }
 0xe5e   : > { %v9194_v51 = vunpack.i.h.bf16 %v11313_v11  ;;  %v9193_v20 = vunpack.i.l.bf16 %v11313_v11  ;;  %vm13510_vm6 = vmmov %vm13509_vm14 }
 0xe5f   : > { %8431 = vmatprep.subr.bf16.mxu0 %v8430_v61 }
 0xe60   : > { %v3090_v39 = vsel %vm13506_vm10, %v3079_v60, %v9193_v20  ;;  %8433 = vmatpush1.bf16.msra.mxu0 %v8432_v45  ;;  %v3091_v22 = vsel %vm13507_vm11, %v9193_v20, %v9194_v51  ;;  %v3137_v60 = vsel %vm13509_vm14, %v3127_v59, %v11311_v46  ;;  %vm13511_vm10 = vcmask 252928  }
 0xe61   : > { %v11327_v23 = vpop.permute.xlu1 %9206  ;;  %v3125_v41 = vpop.permute.xlu0 %3124  ;;  %v8434_v9 = vpack.c.bf16 %v3114_v47, %v3091_v22  ;;  %v8436_v18 = vpack.c.bf16 %v3113_v32, %v3090_v39  ;;  %v11338_v22 = vld [vmem:[%s13294_s11 + $0x18] sm:$0xff]  ;;  %vm13512_vm11 = vmmov %vm13511_vm10  ;;  %vm13513_vm14 = vcmask 588800  }
 0xe62   : > { %v9208_v61 = vunpack.i.l.bf16 %v11327_v23  ;;  %v9209_v62 = vunpack.i.h.bf16 %v11327_v23  ;;  %v3136_v39 = vsel %vm13510_vm6, %v3125_v41, %v3127_v59  ;;  %vm13514_vm6 = vcmask 236544  }
 0xe63   : > { %8435 = vmatprep.subr.bf16.mxu0 %v8434_v9 }
 0xe64   : > { %8437 = vmatpush1.bf16.msra.mxu0 %v8436_v18  ;;  %v2998_v32 = vsel %vm13351_vm0, %v9174_v56, %v9208_v61 }
 0xe65   : > { %v11333_v45 = vpop.permute.xlu1 %9211  ;;  %v9202_v20 = vpop.permute.xlu0 %9201  ;;  %3171 = vmatprep.subr.mxu0 %v3137_v60  ;;  %v2999_v60 = vsel %vm13351_vm0, %v9208_v61, %v9209_v62  ;;  %vm13518_vm0 = vcmask 1039360  }
 0xe66   : > { %v9204_v19 = vunpack.i.h.bf16 %v9202_v20  ;;  %v9203_v14 = vunpack.i.l.bf16 %v9202_v20  ;;  %v9213_v47 = vunpack.i.l.bf16 %v11333_v45  ;;  %v9214_v23 = vunpack.i.h.bf16 %v11333_v45 }
 0xe68   : > { %v2977_v9 = vsel %vm13511_vm10, %v9169_v35, %v9203_v14  ;;  %3172 = vmatpush1.msra.mxu0 %v3136_v39  ;;  %v2978_v18 = vsel %vm13512_vm11, %v9203_v14, %v9204_v19  ;;  %v3019_v35 = vsel %vm13514_vm6, %v9179_v31, %v9213_v47  ;;  %vm13515_vm10 = vcmask 7168   ;;  %vm13516_vm11 = vmmov %vm13514_vm6 }
 0xe69   : > { %v11349_v20 = vpop.permute.xlu1 %9221  ;;  %v9217_v1 = vpop.permute.xlu0 %9216  ;;  %7749 = vmatmul.mubr.msk.f32.vlgmr.msra.gmra.mrb[20].mxu0 %vm13513_vm14, %v11338_v22  ;;  %v8438_v56 = vpack.c.bf16 %v2999_v60, %v2978_v18  ;;  %v8440_v59 = vpack.c.bf16 %v2998_v32, %v2977_v9  ;;  %v3020_v14 = vsel %vm13516_vm11, %v9213_v47, %v9214_v23  ;;  %vm13517_vm14 = vmmov %vm13515_vm10 }
 0xe6a   : > { %v9224_v41 = vunpack.i.h.bf16 %v11349_v20  ;;  %v9223_v6 = vunpack.i.l.bf16 %v11349_v20  ;;  %v9219_v21 = vunpack.i.h.bf16 %v9217_v1  ;;  %v9218_v27 = vunpack.i.l.bf16 %v9217_v1  ;;  %3290 = vmatprep.mubr.f32.mxu0 %v13480_v63  ;;  %vm13519_vm6 = vmmov %vm13518_vm0 }
 0xe6b   : > { %8439 = vmatprep.subr.bf16.mxu0 %v8438_v56  ;;  %v13542_v20 = vpack.c.bf16 %v10628_v0, %v10600_v55  ;;  %v13549_v0 = vld [vmem:[#allocation6_spill] sm:$0xff] }
 0xe6c   : > { %v3043_v61 = vsel %vm13515_vm10, %v9184_v17, %v9218_v27  ;;  %8441 = vmatpush1.bf16.msra.mxu0 %v8440_v59  ;;  %v3044_v32 = vsel %vm13517_vm14, %v9218_v27, %v9219_v21  ;;  %v3069_v1 = vsel %vm13518_vm0, %v9223_v6, %v9224_v41  ;;  %v3068_v27 = vsel %vm13519_vm6, %v9189_v2, %v9223_v6 }
 0xe6d   : > { %v11369_v39 = vpop.permute.xlu1 %9231  ;;  %v11371_v53 = vpop.permute.xlu0 %9226  ;;  %v8442_v31 = vpack.c.bf16 %v3044_v32, %v3020_v14  ;;  %v8444_v9 = vpack.c.bf16 %v3043_v61, %v3019_v35  ;;  %v8446_v60 = vpack.c.bf16 %v3069_v1, %v11204_v49  ;;  %vm13520_vm0 = vcmask 809984  }
 0xe6e   : > { %v9234_v52 = vunpack.i.h.bf16 %v11369_v39  ;;  %v9233_v17 = vunpack.i.l.bf16 %v11369_v39  ;;  %v9229_v18 = vunpack.i.h.bf16 %v11371_v53  ;;  %v9228_v47 = vunpack.i.l.bf16 %v11371_v53  ;;  %vm13523_vm14 = vmmov %vm13520_vm0 }
 0xe6f   : > { %8443 = vmatprep.subr.bf16.mxu0 %v8442_v31  ;;  %vm13521_vm10 = vcmask 801792   ;;  %v8448_v14 = vpack.c.bf16 %v3068_v27, %v11192_v44  ;;  %vm13524_vm6 = vcmask 244736  }
 0xe70   : > { %8445 = vmatpush1.bf16.msra.mxu0 %v8444_v9  ;;  %v3093_v56 = vsel %vm13520_vm0, %v9228_v47, %v9229_v18  ;;  %v3116_v59 = vsel %vm13521_vm10, %v9233_v17, %v9234_v52  ;;  %vm13522_vm11 = vmmov %vm13521_vm10  ;;  %v3092_v49 = vsel %vm13523_vm14, %v9194_v51, %v9228_v47  ;;  %vm13525_vm0 = vcmask 252928  }
 0xe71   : > { %v11385_v35 = vpop.permute.xlu1 %3132  ;;  %v3131_v61 = vpop.permute.xlu0 %3130  ;;  %8447 = vmatprep.subr.bf16.mxu0 %v8446_v60  ;;  %v3115_v6 = vsel %vm13522_vm11, %v9199_v54, %v9233_v17  ;;  %v8450_v30 = vpack.c.bf16 %v3116_v59, %v3093_v56  ;;  %vm13526_vm10 = vcmask 793600   ;;  %vm13528_vm14 = vcmask 236544  }
 0xe72   : > { %v8452_v9 = vpack.c.bf16 %v3115_v6, %v3092_v49  ;;  %v3139_v16 = vsel %vm13526_vm10, %v3131_v61, %v11385_v35  ;;  %vm13527_vm11 = vmmov %vm13526_vm10  ;;  %vm13531_vm10 = vcmask 588800   ;;  %v13532_v56 = vpack.c.bf16 %v10566_v40, %v10541_v26  ;;  %v2267_v26 = vld [vmem:[%s13294_s11 + $0x28] sm:$0xff] }
 0xe73   : > { %v3138_v47 = vsel %vm13527_vm11, %v11311_v46, %v3131_v61  ;;  %vm13533_vm11 = vmmov 1   ;;  %v13535_v46 = vmov 0 }
 0xe74   : > { %8449 = vmatpush1.bf16.msra.mxu0 %v8448_v14  ;;  %vm11412_vm8 = vmpackc.low %vm13534_vm12, %vm13533_vm11  ;;  %vm13541_vm12 = vcmask 130048  }
 0xe75   : > { %v2996_v2 = vpop.permute.xlu1 %2995  ;;  %v2975_v32 = vpop.permute.xlu0 %2974  ;;  %8451 = vmatprep.subr.bf16.mxu0 %v8450_v30  ;;  %v13536_v46 = vsel %vm11412_vm8, 4294967295, %v13535_v46 }
 0xe76   : > { %v3000_v1 = vsel %vm13524_vm6, %v9209_v62, %v2996_v2  ;;  %v2979_v39 = vsel %vm13525_vm0, %v9204_v19, %v2975_v32  ;;  %v8454_v31 = vpack.c.bf16 %v2996_v2, %v2975_v32  ;;  %vm13529_vm6 = vcmask 7168   ;;  %13537 = vst [vmem:[#allocation22_spill] sm:$0xff] %v13536_v46 }
 0xe77   : > { %v8456_v44 = vpack.c.bf16 %v3000_v1, %v2979_v39  ;;  %vm13530_vm0 = vmmov %vm13529_vm6  ;;  %v13560_v32 = vsub.s32 3, %v11138_v57 }
 0xe78   : > { %8453 = vmatpush1.bf16.msra.mxu0 %v8452_v9  ;;  %8455 = vmatprep.subr.bf16.mxu1 %v8454_v31 }
 0xe79   : > { %v3017_v54 = vpop.permute.xlu1 %3016  ;;  %v9237_v11 = vpop.permute.xlu0 %9236  ;;  %3242 = vmatprep.subr.mxu0 %v3139_v16  ;;  %8457 = vmatpush1.bf16.msra.mxu1 %v8456_v44 }
 0xe7a   : > { %v9239_v51 = vunpack.i.h.bf16 %v9237_v11  ;;  %v9238_v17 = vunpack.i.l.bf16 %v9237_v11  ;;  %v3021_v19 = vsel %vm13528_vm14, %v9214_v23, %v3017_v54  ;;  %v13538_v23 = vpack.c.bf16 %v10555_v34, %v10533_v25 }
 0xe7b   : > { %vm13539_vm14 = vcmask 1039360  }
 0xe7c   : > { %v3045_v62 = vsel %vm13529_vm6, %v9219_v21, %v9238_v17  ;;  %3243 = vmatpush1.msra.mxu0 %v3138_v47  ;;  %v3046_v27 = vsel %vm13530_vm0, %v9238_v17, %v9239_v51  ;;  %v13540_v21 = vpack.c.bf16 %v10642_v4, %v10608_v58  ;;  %vm13543_vm6 = vcmask 801792   ;;  %v13544_v58 = vld [vmem:[#allocation7_spill] sm:$0xff]  ;;  %v13545_v4 = vld [vmem:[#allocation5_spill] sm:$0xff] }
 0xe7d   : > { %v3065_v60 = vpop.permute.xlu0 %3064  ;;  %7750 = vmatmul.mubr.msk.f32.vlgmr.msra.gmra.mrb[22].mxu0 %vm13531_vm10, %v11338_v22  ;;  %8472 = vmatprep.subr.bf16.mxu0 %v13532_v56  ;;  %v8458_v59 = vpack.c.bf16 %v3046_v27, %v3017_v54  ;;  %v8460_v14 = vpack.c.bf16 %v3045_v62, %v3021_v19  ;;  %v3089_v25 = vpop.permute.xlu1 %3088  ;;  %v13546_v61 = vpack.c.bf16 %v13544_v58, %v13545_v4  ;;  %vm13547_vm0 = vcmask 809984   ;;  %vm13548_vm10 = vmmov %vm13541_vm12 }
 0xe7e   : > { %v8462_v45 = vpack.c.bf16 %v3065_v60, %v11236_v50  ;;  %8474 = vmatpush1.bf16.msra.mxu0 %v13538_v23  ;;  %3446 = vmatprep.mubr.f32.mxu0 %v13480_v63  ;;  %v3070_v40 = vsel %vm13539_vm14, %v9224_v41, %v3065_v60  ;;  %v3094_v6 = vsel %vm13547_vm0, %v9229_v18, %v3089_v25  ;;  %vm13553_vm14 = vmmov %vm13548_vm10  ;;  %vm13556_vm0 = vcmask 588800   ;;  %v11466_v18 = vld [vmem:[%s592_s1] sm:$0x3f]  ;;  %s596_s1 = scalar_lea.vmem %s13300_s17, %s8869_s25 }
 0xe7f   : > { %8459 = vmatprep.subr.bf16.mxu1 %v8458_v59  ;;  %8476 = vmatprep.subr.bf16.mxu0 %v13540_v21  ;;  %v8465_v34 = vpack.c.bf16 %v3070_v40, %v11215_v13  ;;  %v13550_v13 = vld [vmem:[#allocation4_spill] sm:$0xff]  ;;  %v11470_v2 = vrot.slane %v11466_v18, %v11141_v3  ;;  %v11485_v1 = vrot.slane %v11466_v18, %v13560_v32 }
 0xe80   : > { %8461 = vmatpush1.bf16.msra.mxu1 %v8460_v14  ;;  %v13551_v49 = vpack.c.bf16 %v13549_v0, %v13550_v13 }
 0xe81   : > { %v3112_v50 = vpop.permute.xlu0 %3111  ;;  %8464 = vmatprep.subr.msk.bf16.mxu1 %vm11412_vm8, %v8462_v45  ;;  %7756 = vmatmul.mubr.msk.f32.vlgmr.msra.gmra.mrb[24].mxu0 %vm13541_vm12, %v2267_v26  ;;  %vm13554_vm12 = vcmask 793600   ;;  %13557 = vst [vmem:[#allocation7_spill] sm:$0xff] %v11470_v2  ;;  %13561 = vst [vmem:[#allocation4_spill] sm:$0xff] %v11485_v1 }
 0xe82   : > { %8478 = vmatpush1.bf16.msra.mxu0 %v13542_v20  ;;  %3517 = vmatprep.mubr.f32.mxu0 %v13480_v63  ;;  %v3117_v41 = vsel %vm13543_vm6, %v9234_v52, %v3112_v50  ;;  %v3135_v52 = vpop.permute.xlu1 %3134  ;;  %vm13555_vm6 = vcmask 957440  }
 0xe83   : > { %8480 = vmatprep.subr.bf16.mxu0 %v13546_v61  ;;  %v8468_v55 = vpack.c.bf16 %v3117_v41, %v3094_v6  ;;  %v3140_v53 = vsel %vm13554_vm12, %v11385_v35, %v3135_v52  ;;  %v11475_v35 = vrot.slane %v11466_v18, %v2913_v38 }
 0xe84   : > { %8466 = vmatpush1.bf16.msra.mxu1 %v8465_v34 }
 0xe85   : > { %7757 = vmatmul.mubr.msk.f32.vlgmr.msra.gmra.mrb[26].mxu0 %vm13548_vm10, %v2267_v26  ;;  %8467 = vmatprep.subr.bf16.mxu1 %v13476_v42  ;;  %13558 = vst [vmem:[#allocation5_spill] sm:$0xff] %v11475_v35  ;;  %vm3639_vm10 = vcmask 1040384  }
 0xe86   : > { %8482 = vmatpush1.bf16.msra.mxu0 %v13551_v49  ;;  %3588 = vmatprep.mubr.f32.mxu0 %v13480_v63  ;;  %v3640_v39 = vsel %vm3639_vm10, %v11470_v2, 0.0  ;;  %v3641_v31 = vsel %vm3639_vm10, %v11475_v35, 0.0 }
 0xe87   : > { %vm3660_vm12 = vcmp.ge.f32.partialorder %v3641_v31, 0.0  ;;  %v3671_v9 = vmul.f32 0.2, %v3640_v39  ;;  %v3672_v44 = vmul.f32 0.2, %v3641_v31 }
 0xe88   : > { %8470 = vmatpush1.bf16.msk.msra.mxu1 %vm10749_vm4, %v8468_v55 }
 0xe89   : > { %7758 = vmatmul.mubr.msk.f32.vlgmr.msra.gmra.mrb[28].mxu0 %vm13553_vm14, %v2267_v26  ;;  %3313 = vmatprep.subr.mxu1 %v13480_v63  ;;  %vm3659_vm14 = vcmp.ge.f32.partialorder %v3640_v39, 0.0  ;;  %v11497_v11 = vsel %vm3660_vm12, %v3641_v31, %v3672_v44 }
 0xe8a   : > { %v11495_v54 = vsel %vm3659_vm14, %v3640_v39, %v3671_v9 }
 0xe8b   : > { %v9240_v17 = vpack.i.bf16 %v11497_v11, %v11495_v54 }
 0xe8c   : > { %7754 = vmatpush1.msk.msra.mxu1 %vm13555_vm6, %v3140_v53 }
 0xe8d   : > { %7755 = vmatmul.mubr.msk.f32.vlgmr.msra.gmra.mrb[24].mxu1 %vm13556_vm0, %v11338_v22  ;;  %v11480_v22 = vrot.slane %v11466_v18, %v2917_v36  ;;  %v3643_v36 = vsel %vm3639_vm10, %v11485_v1, 0.0  ;;  %9241 = vrot.lane.b32.xlu1 %v9240_v17, %s9887_s24 }
 0xe8e   : > { %vm3662_vm0 = vcmp.ge.f32.partialorder %v3643_v36, 0.0  ;;  %v3674_v51 = vmul.f32 0.2, %v3643_v36 }
 0xe8f   : > { %13559 = vst [vmem:[#allocation6_spill] sm:$0xff] %v11480_v22  ;;  %v3642_v38 = vsel %vm3639_vm10, %v11480_v22, 0.0 }
 0xe90   : > { %vm3661_vm6 = vcmp.ge.f32.partialorder %v3642_v38, 0.0  ;;  %v3673_v16 = vmul.f32 0.2, %v3642_v38  ;;  %v11503_v19 = vsel %vm3662_vm0, %v3643_v36, %v3674_v51 }
 0xe91   : > { %9246 = vrot.lane.b32.xlu1 %v9240_v17, %s9889_s18 }
 0xe92   : > { %v11501_v47 = vsel %vm3661_vm6, %v3642_v38, %v3673_v16  ;;  %v3150_v59 = vpop.permute.xlu0 %3149  ;;  %v3377_v40 = vpop.permute.xlu1 %3376 }
 0xe93   : > { %v9270_v62 = vpack.i.bf16 %v11503_v19, %v11501_v47  ;;  %v9275_v27 = vpack.i.bf16 %v11501_v47, %v11497_v11 }
 0xe95   : > { %9271 = vrot.lane.b32.xlu0 %v9270_v62, %s9889_s18  ;;  %9251 = vrot.lane.b32.xlu1 %v9240_v17, %s9890_s30 }
 0xe99   : > { %9256 = vrot.lane.b32.xlu1 %v9240_v17, %s9877_s16  ;;  %9276 = vrot.lane.b32.xlu0 %v9275_v27, %s9888_s0 }
 0xe9d   : > { %9261 = vrot.lane.b32.xlu1 %v9270_v62, %s9887_s24  ;;  %9291 = vrot.lane.b32.xlu0 %v9270_v62, %s9877_s16 }
 0xea1   : > { %9266 = vrot.lane.b32.xlu1 %v9275_v27, %s9879_s29  ;;  %9296 = vrot.lane.b32.xlu0 %v9275_v27, %s9892_s23 }
 0xea5   : > { %9281 = vrot.lane.b32.xlu1 %v9270_v62, %s9890_s30 }
 0xea9   : > { %9286 = vrot.lane.b32.xlu1 %v9275_v27, %s9891_s22  ;;  %v13565_v27 = vsub.s32 4, %v11138_v57 }
 0xf3c   : > { %v3221_v60 = vpop.f32.mrb[20].mxu0 }
 0xf3d   : > { %v3223_v56 = vpop.f32.mrb[21].mxu0  ;;  %v3222_v45 = vadd.f32 %v3221_v60, %v3150_v59  ;;  %v11544_v60 = vrot.slane %v11466_v18, %v13565_v27 }
 0xf3e   : > { %v3224_v26 = vadd.f32 %v3223_v56, %v3150_v59 }
 0xf3f   : > { %v3368_v50 = vmul.f32 %v3222_v45, %v11151_v33  ;;  %13566 = vst [vmem:[#allocation26_spill] sm:$0xff] %v11544_v60 }
 0xf40   : > { %v3369_v41 = vmul.f32 %v3224_v26, %v11156_v37 }
 0xf50   : > { %v3292_v14 = vpop.f32.mrb[22].mxu0 }
 0xf51   : > { %v3294_v23 = vpop.f32.mrb[23].mxu0  ;;  %v3293_v25 = vadd.f32 %v3292_v14, %v3150_v59 }
 0xf52   : > { %v3295_v58 = vadd.f32 %v3294_v23, %v3150_v59 }
 0xf53   : > { %v3370_v0 = vmul.f32 %v3293_v25, %v11183_v43 }
 0xf54   : > { %v3448_v21 = vpop.f32.mrb[24].mxu0  ;;  %v3371_v53 = vmul.f32 %v3295_v58, %v11188_v48 }
 0xf55   : > { %v3449_v34 = vadd.f32 %v3448_v21, %v3377_v40  ;;  %v3450_v20 = vpop.f32.mrb[25].mxu0 }
 0xf56   : > { %v3451_v4 = vadd.f32 %v3450_v20, %v3377_v40 }
 0xf57   : > { %v3595_v61 = vadd.f32 %v3449_v34, %v3368_v50 }
 0xf58   : > { %v3596_v6 = vadd.f32 %v3451_v4, %v3369_v41  ;;  %v3519_v55 = vpop.f32.mrb[26].mxu0 }
 0xf59   : > { %v11525_v13 = vmul.f32 %v3595_v61, %v11151_v33  ;;  %v3520_v49 = vadd.f32 %v3519_v55, %v3377_v40  ;;  %v3521_v52 = vpop.f32.mrb[27].mxu0 }
 0xf5a   : > { %v11529_v32 = vmul.f32 %v3596_v6, %v11156_v37  ;;  %v3522_v39 = vadd.f32 %v3521_v52, %v3377_v40 }
 0xf5b   : > { %13562 = vst [vmem:[#allocation23_spill] sm:$0xff] %v11525_v13  ;;  %vm3653_vm14 = vcmp.ge.f32.partialorder %v11525_v13, 0.0  ;;  %v3665_v31 = vmul.f32 0.2, %v11525_v13  ;;  %v3597_v38 = vadd.f32 %v3520_v49, %v3370_v0 }
 0xf5c   : > { %13563 = vst [vmem:[#allocation24_spill] sm:$0xff] %v11529_v32  ;;  %vm3654_vm12 = vcmp.ge.f32.partialorder %v11529_v32, 0.0  ;;  %v3666_v9 = vmul.f32 0.2, %v11529_v32  ;;  %v3598_v44 = vadd.f32 %v3522_v39, %v3371_v53  ;;  %v3590_v36 = vpop.f32.mrb[28].mxu0  ;;  %v3644_v53 = vsel %vm3639_vm10, %v11544_v60, 0.0 }
 0xf5d   : > { %v11536_v16 = vsel %vm3653_vm14, %v11525_v13, %v3665_v31  ;;  %v11539_v51 = vmul.f32 %v3597_v38, %v11183_v43  ;;  %v3591_v17 = vadd.f32 %v3590_v36, %v3377_v40  ;;  %v3592_v62 = vpop.f32.mrb[29].mxu0 }
 0xf5e   : > { %v11547_v56 = vsel %vm3654_vm12, %v11529_v32, %v3666_v9  ;;  %v11550_v14 = vmul.f32 %v3598_v44, %v11188_v48  ;;  %v3593_v45 = vadd.f32 %v3592_v62, %v3377_v40  ;;  %v9305_v23 = vpack.i.bf16 %v11495_v54, %v11536_v16 }
 0xf5f   : > { %13564 = vst [vmem:[#allocation25_spill] sm:$0xff] %v11539_v51  ;;  %vm3655_vm6 = vcmp.ge.f32.partialorder %v11539_v51, 0.0  ;;  %v3667_v26 = vmul.f32 0.2, %v11539_v51  ;;  %v9320_v25 = vpack.i.bf16 %v11547_v56, %v11536_v16  ;;  %v3675_v9 = vmul.f32 0.2, %v3644_v53 }
 0xf60   : > { %13567 = vst [vmem:[#allocation27_spill] sm:$0xff] %v11550_v14  ;;  %vm3656_vm0 = vcmp.ge.f32.partialorder %v11550_v14, 0.0  ;;  %v3668_v21 = vmul.f32 0.2, %v11550_v14  ;;  %v3363_v50 = vpop.f32.mrb[24].mxu1  ;;  %9306 = vrot.lane.b32.xlu1 %v9305_v23, %s9888_s0  ;;  %9301 = vrot.lane.b32.xlu0 %v9305_v23, %s9879_s29 }
 0xf61   : > { %v11562_v34 = vsel %vm3655_vm6, %v11539_v51, %v3667_v26  ;;  %v3364_v40 = vadd.f32 %v3363_v50, %v3150_v59  ;;  %v3365_v20 = vpop.f32.mrb[25].mxu1  ;;  %vm3663_vm6 = vcmp.ge.f32.partialorder %v3644_v53, 0.0  ;;  %v11630_v50 = vld [vmem:[%s13295_s12 + $0x8] sm:$0xff] }
 0xf62   : > { %v11566_v41 = vsel %vm3656_vm0, %v11550_v14, %v3668_v21  ;;  %v3366_v58 = vadd.f32 %v3365_v20, %v3150_v59  ;;  %v9345_v4 = vpack.i.bf16 %v11562_v34, %v11547_v56  ;;  %v11602_v62 = vsel %vm3663_vm6, %v3644_v53, %v3675_v9  ;;  %v3648_v20 = vld [vmem:[%s13295_s12 + $0x10] sm:$0xff] }
 0xf63   : > { %v3372_v61 = vmul.f32 %v3364_v40, %v11202_v7  ;;  %v9370_v6 = vpack.i.bf16 %v11566_v41, %v11562_v34  ;;  %v9375_v27 = vpack.i.bf16 %v11602_v62, %v11503_v19  ;;  %vm13572_vm0 = vcmask 130048  }
 0xf64   : > { %v3373_v55 = vmul.f32 %v3366_v58, %v11225_v8  ;;  %9316 = vrot.lane.b32.xlu1 %v9305_v23, %s9892_s23  ;;  %9311 = vrot.lane.b32.xlu0 %v9305_v23, %s9891_s22  ;;  %v13570_v23 = vsub.s32 5, %v11138_v57  ;;  %vm13574_vm6 = vcmask 252928  }
 0xf65   : > { %v3599_v0 = vadd.f32 %v3591_v17, %v3372_v61  ;;  %7775 = vmatprep.mubr.msk.f32.mxu1 %vm13572_vm0, %v11630_v50 }
 0xf66   : > { %v3600_v49 = vadd.f32 %v3593_v45, %v3373_v55  ;;  %v11620_v26 = vrot.slane %v11466_v18, %v13570_v23 }
 0xf67   : > { %v11577_v52 = vmul.f32 %v3599_v0, %v11202_v7 }
 0xf68   : > { %v11580_v59 = vmul.f32 %v3600_v49, %v11225_v8  ;;  %9346 = vrot.lane.b32.xlu1 %v9345_v4, %s9888_s0  ;;  %9321 = vrot.lane.b32.xlu0 %v9320_v25, %s9887_s24  ;;  %13571 = vst [vmem:[#allocation30_spill] sm:$0xff] %v11620_v26  ;;  %v3645_v21 = vsel %vm3639_vm10, %v11620_v26, 0.0  ;;  %v11666_v49 = vpop.permute.xlu0 %9271 }
 0xf69   : > { %13568 = vst [vmem:[#allocation28_spill] sm:$0xff] %v11577_v52  ;;  %vm3657_vm14 = vcmp.ge.f32.partialorder %v11577_v52, 0.0  ;;  %v3669_v39 = vmul.f32 0.2, %v11577_v52  ;;  %v13585_v5 = vunpack.i.l.bf16 %v11666_v49 }
 0xf6a   : > { %13569 = vst [vmem:[#allocation29_spill] sm:$0xff] %v11580_v59  ;;  %vm3658_vm12 = vcmp.ge.f32.partialorder %v11580_v59, 0.0  ;;  %v3670_v31 = vmul.f32 0.2, %v11580_v59 }
 0xf6b   : > { %v11591_v38 = vsel %vm3657_vm14, %v11577_v52, %v3669_v39  ;;  %vm13573_vm14 = vmmov %vm13572_vm0 }
 0xf6c   : > { %v11594_v44 = vsel %vm3658_vm12, %v11580_v59, %v3670_v31  ;;  %9356 = vrot.lane.b32.xlu1 %v9345_v4, %s9892_s23  ;;  %v9400_v36 = vpack.i.bf16 %v11591_v38, %v11566_v41  ;;  %9326 = vrot.lane.b32.xlu0 %v9320_v25, %s9889_s18  ;;  %v9405_v45 = vpack.i.bf16 %v11602_v62, %v11591_v38  ;;  %vm3664_vm12 = vcmp.ge.f32.partialorder %v3645_v21, 0.0  ;;  %v11670_v39 = vpop.permute.xlu0 %9276  ;;  %vm13575_vm0 = vmmov %vm13574_vm6 }
 0xf6d   : > { %v9430_v17 = vpack.i.bf16 %v11594_v44, %v11591_v38  ;;  %7776 = vmatprep.mubr.msk.f32.mxu0 %vm13573_vm14, %v11630_v50  ;;  %vm13577_vm14 = vmpackc.low %vm10620_vm9, %vm10620_vm9 }
 0xf6e   : > { %vm13581_vm9 = vmpackc.low %vm10634_vm1, %vm10634_vm1 }
 0xf70   : > { %9371 = vrot.lane.b32.xlu1 %v9370_v6, %s9889_s18  ;;  %9331 = vrot.lane.b32.xlu0 %v9320_v25, %s9890_s30  ;;  %v11674_v9 = vpop.permute.xlu0 %9291 }
 0xf74   : > { %9376 = vrot.lane.b32.xlu1 %v9375_v27, %s9888_s0  ;;  %9336 = vrot.lane.b32.xlu0 %v9320_v25, %s9877_s16  ;;  %v3676_v25 = vmul.f32 0.2, %v3645_v21 }
 0xf76   : > { %v11638_v18 = vsel %vm3664_vm12, %v3645_v21, %v3676_v25  ;;  %vm13578_vm12 = vcmask 244736  }
 0xf77   : > { %v9445_v40 = vpack.i.bf16 %v11638_v18, %v11594_v44  ;;  %v9420_v58 = vpack.i.bf16 %v11638_v18, %v11602_v62 }
 0xf78   : > { %9391 = vrot.lane.b32.xlu1 %v9370_v6, %s9877_s16  ;;  %9341 = vrot.lane.b32.xlu0 %v9345_v4, %s9879_s29 }
 0xf7c   : > { %9401 = vrot.lane.b32.xlu1 %v9400_v36, %s9879_s29  ;;  %9351 = vrot.lane.b32.xlu0 %v9345_v4, %s9891_s22  ;;  %v11656_v4 = vpop.permute.xlu1 %9241 }
 0xf7d   : > { %v9244_v25 = vunpack.i.h.bf16 %v11656_v4 }
 0xf80   : > { %9406 = vrot.lane.b32.xlu1 %v9405_v45, %s9889_s18  ;;  %9361 = vrot.lane.b32.xlu0 %v9370_v6, %s9887_s24  ;;  %v9247_v61 = vpop.permute.xlu1 %9246 }
 0xf81   : > { %v9248_v30 = vunpack.i.l.bf16 %v9247_v61  ;;  %v9249_v46 = vunpack.i.h.bf16 %v9247_v61 }
 0xf84   : > { %9426 = vrot.lane.b32.xlu1 %v9400_v36, %s9891_s22  ;;  %9366 = vrot.lane.b32.xlu0 %v9375_v27, %s9879_s29 }
 0xf88   : > { %9431 = vrot.lane.b32.xlu1 %v9430_v17, %s9877_s16  ;;  %9381 = vrot.lane.b32.xlu0 %v9370_v6, %s9890_s30  ;;  %v11660_v6 = vpop.permute.xlu1 %9251  ;;  %v11678_v17 = vpop.permute.xlu0 %9296 }
 0xf89   : > { %v9253_v2 = vunpack.i.l.bf16 %v11660_v6 }
 0xf8c   : > { %9436 = vrot.lane.b32.xlu1 %v9400_v36, %s9892_s23  ;;  %9386 = vrot.lane.b32.xlu0 %v9375_v27, %s9891_s22  ;;  %v11662_v55 = vpop.permute.xlu1 %9256 }
 0xf8d   : > { %v9258_v13 = vunpack.i.l.bf16 %v11662_v55 }
 0xf90   : > { %9446 = vrot.lane.b32.xlu1 %v9445_v40, %s9879_s29  ;;  %9396 = vrot.lane.b32.xlu0 %v9405_v45, %s9887_s24  ;;  %v11664_v0 = vpop.permute.xlu1 %9261 }
 0xf91   : > { %v9263_v29 = vunpack.i.l.bf16 %v11664_v0 }
 0xf94   : > { %9456 = vrot.lane.b32.xlu1 %v9445_v40, %s9891_s22  ;;  %9411 = vrot.lane.b32.xlu0 %v9400_v36, %s9888_s0  ;;  %v11668_v53 = vpop.permute.xlu1 %9266 }
 0xf98   : > { %4063 = vperm.xlu1 %8899, %v3648_v20   ;;  %9416 = vrot.lane.b32.xlu0 %v9405_v45, %s9890_s30  ;;  %v11672_v31 = vpop.permute.xlu1 %9281 }
 0xf9c   : > { %9421 = vrot.lane.b32.xlu0 %v9420_v58, %s9877_s16  ;;  %v11676_v36 = vpop.permute.xlu1 %9286 }
 0xfa0   : > { %9441 = vrot.lane.b32.xlu0 %v9375_v27, %s9892_s23 }
 0xfa4   : > { %9451 = vrot.lane.b32.xlu0 %v9445_v40, %s9888_s0 }
 0xfa8   : > { %9461 = vrot.lane.b32.xlu0 %v9445_v40, %s9892_s23  ;;  %v9243_v40 = vunpack.i.l.bf16 %v11656_v4 }
 0xfaa   : > { %v3723_v26 = vsel %vm13575_vm0, %v9243_v40, %v9244_v25  ;;  %vm13582_vm0 = vcmask 236544  }
 0xfd2   : > { %v11680_v27 = vpop.permute.xlu1 %9306  ;;  %v11682_v45 = vpop.permute.xlu0 %9301 }
 0xfd3   : > { %v9304_v7 = vunpack.i.h.bf16 %v11682_v45  ;;  %v9309_v28 = vunpack.i.h.bf16 %v11680_v27 }
 0xfd6   : > { %v11684_v23 = vpop.permute.xlu1 %9316  ;;  %v11686_v21 = vpop.permute.xlu0 %9311 }
 0xfda   : > { %v11690_v20 = vpop.permute.xlu1 %9346  ;;  %v11692_v58 = vpop.permute.xlu0 %9321 }
 0xfdb   : > { %v13370_v57 = vunpack.i.h.bf16 %v11692_v58  ;;  %v9323_v3 = vunpack.i.l.bf16 %v11692_v58 }
 0xfdd   : > { %v3719_v52 = vsel %vm13574_vm6, %v9323_v3, %v13370_v57  ;;  %v8485_v22 = vpack.c.bf16 %v9243_v40, %v9323_v3  ;;  %vm13579_vm6 = vmmov %vm13578_vm12 }
 0xfde   : > { %v11696_v60 = vpop.permute.xlu1 %9356  ;;  %v11702_v59 = vpop.permute.xlu0 %9326  ;;  %v8483_v4 = vpack.c.bf16 %v3723_v26, %v3719_v52  ;;  %v3765_v52 = vsel %vm13579_vm6, %v9248_v30, %v9249_v46  ;;  %vm13586_vm1 = vmmov %vm13579_vm6  ;;  %vm13588_vm6 = vcmask 7168  }
 0xfdf   : > { %v13372_v51 = vunpack.i.h.bf16 %v11702_v59  ;;  %v9328_v1 = vunpack.i.l.bf16 %v11702_v59  ;;  %v13396_v37 = vunpack.i.h.bf16 %v11696_v60 }
 0xfe0   : > { %8484 = vmatprep.subr.bf16.mxu1 %v8483_v4 }
 0xfe1   : > { %8487 = vmatpush1.bf16.msk.msra.mxu1 %vm13577_vm14, %v8485_v22  ;;  %v3761_v3 = vsel %vm13578_vm12, %v9328_v1, %v13372_v51  ;;  %v8490_v40 = vpack.c.bf16 %v9248_v30, %v9328_v1  ;;  %v13583_v30 = vunpack.i.h.bf16 %v11660_v6  ;;  %vm13584_vm14 = vmmov %vm13582_vm0  ;;  %v13382_v22 = vunpack.i.h.bf16 %v11662_v55 }
 0xfe2   : > { %v11713_v57 = vpop.permute.xlu1 %9371  ;;  %v11719_v26 = vpop.permute.xlu0 %9331  ;;  %v8488_v61 = vpack.c.bf16 %v3765_v52, %v3761_v3  ;;  %vm13587_vm12 = vmpackc.low %vm10811_vm13, %vm10811_vm13  ;;  %vm13590_vm13 = vcmask 252928  }
 0xfe3   : > { %v13376_v4 = vunpack.i.h.bf16 %v11719_v26  ;;  %v9333_v14 = vunpack.i.l.bf16 %v11719_v26  ;;  %v3807_v1 = vsel %vm13584_vm14, %v9253_v2, %v13583_v30  ;;  %v11748_v30 = vsel %vm13586_vm1, %v9249_v46, %v13585_v5 }
 0xfe4   : > { %8489 = vmatprep.subr.bf16.mxu1 %v8488_v61  ;;  %v9278_v5 = vunpack.i.l.bf16 %v11670_v39  ;;  %v11770_v8 = vsel %vm13590_vm13, %v9244_v25, %v9263_v29  ;;  %vm13597_vm1 = vcmask 809984   ;;  %v9373_v43 = vunpack.i.l.bf16 %v11713_v57 }
 0xfe5   : > { %8492 = vmatpush1.bf16.msk.msra.mxu1 %vm13581_vm9, %v8490_v40  ;;  %v3803_v3 = vsel %vm13582_vm0, %v9333_v14, %v13376_v4  ;;  %v8495_v32 = vpack.c.bf16 %v9253_v2, %v9333_v14  ;;  %vm13589_vm9 = vmmov %vm13588_vm6  ;;  %v9348_v14 = vunpack.i.l.bf16 %v11690_v20  ;;  %vm13592_vm0 = vcmask 1039360  }
 0xfe6   : > { %v11736_v52 = vpop.permute.xlu1 %9376  ;;  %v11738_v61 = vpop.permute.xlu0 %9336  ;;  %v8493_v51 = vpack.c.bf16 %v3807_v1, %v3803_v3  ;;  %vm13595_vm14 = vmmov %vm13592_vm0 }
 0xfe7   : > { %v13379_v35 = vunpack.i.h.bf16 %v11738_v61  ;;  %v9338_v40 = vunpack.i.l.bf16 %v11738_v61 }
 0xfe8   : > { %8494 = vmatprep.subr.bf16.mxu1 %v8493_v51  ;;  %v3856_v51 = vsel %vm13589_vm9, %v9258_v13, %v13382_v22  ;;  %vm13602_vm9 = vmmov %vm13590_vm13 }
 0xfe9   : > { %8497 = vmatpush1.bf16.msk.msra.mxu1 %vm13587_vm12, %v8495_v32  ;;  %v3851_v2 = vsel %vm13588_vm6, %v9338_v40, %v13379_v35  ;;  %v8500_v32 = vpack.c.bf16 %v9258_v13, %v9338_v40  ;;  %vm13598_vm12 = vmmov %vm13592_vm0 }
 0xfea   : > { %v11764_v46 = vpop.permute.xlu0 %9341  ;;  %v8498_v1 = vpack.c.bf16 %v3856_v51, %v3851_v2  ;;  %v11774_v3 = vpop.permute.xlu1 %9391  ;;  %v8503_v2 = vpack.c.bf16 %v11497_v11, %v11547_v56  ;;  %v9268_v51 = vunpack.i.l.bf16 %v11668_v53  ;;  %v9303_v11 = vunpack.i.l.bf16 %v11682_v45  ;;  %vm13600_vm6 = vmmov %vm13597_vm1 }
 0xfeb   : > { %v13385_v4 = vunpack.i.h.bf16 %v11764_v46  ;;  %v9343_v35 = vunpack.i.l.bf16 %v11764_v46  ;;  %v13596_v45 = vunpack.i.h.bf16 %v11690_v20  ;;  %vm13603_vm13 = vmmov %vm13597_vm1 }
 0xfec   : > { %8499 = vmatprep.subr.bf16.mxu1 %v8498_v1  ;;  %v3952_v13 = vsel %vm13603_vm13, %v9309_v28, %v9278_v5 }
 0xfed   : > { %8502 = vmatpush1.bf16.msk.msra.mxu1 %vm10403_vm5, %v8500_v32  ;;  %v3900_v25 = vsel %vm13592_vm0, %v9343_v35, %v13385_v4  ;;  %v8505_v32 = vpack.c.bf16 %v11495_v54, %v11536_v16  ;;  %v13593_v4 = vunpack.i.h.bf16 %v11668_v53  ;;  %vm13594_vm5 = vmmov %vm13592_vm0  ;;  %v3899_v22 = vsel %vm13595_vm14, %v9303_v11, %v9343_v35 }
 0xfee   : > { %v11790_v56 = vpop.permute.xlu0 %9351  ;;  %8504 = vmatprep.subr.bf16.mxu1 %v8503_v2  ;;  %v3948_v2 = vsel %vm13597_vm1, %v9348_v14, %v13596_v45  ;;  %v9308_v16 = vunpack.i.l.bf16 %v11680_v27  ;;  %v11810_v1 = vpop.permute.xlu1 %9401  ;;  %v13601_v11 = vunpack.i.h.bf16 %v11664_v0  ;;  %vm13604_vm0 = vmmov %vm13597_vm1  ;;  %vm13609_vm1 = vcmask 801792  }
 0xfef   : > { %v3905_v40 = vsel %vm13594_vm5, %v9268_v51, %v13593_v4  ;;  %v9353_v54 = vunpack.i.l.bf16 %v11790_v56  ;;  %v3904_v4 = vsel %vm13598_vm12, %v9304_v7, %v9268_v51  ;;  %vm13606_vm5 = vmmov %vm13602_vm9  ;;  %vm13611_vm12 = vcmask 244736  }
 0xff0   : > { %v8507_v48 = vpack.c.bf16 %v3905_v40, %v3900_v25  ;;  %v13599_v40 = vunpack.i.h.bf16 %v11670_v39  ;;  %v3725_v45 = vsel %vm13602_vm9, %v9263_v29, %v13601_v11  ;;  %v8509_v7 = vpack.c.bf16 %v3904_v4, %v3899_v22  ;;  %vm13607_vm14 = vmmov %vm13606_vm5 }
 0xff1   : > { %8506 = vmatpush1.bf16.msra.mxu1 %v8505_v32  ;;  %v3947_v51 = vsel %vm13604_vm0, %v9308_v16, %v9348_v14  ;;  %v13610_v14 = vunpack.i.h.bf16 %v11713_v57  ;;  %v9314_v16 = vunpack.i.h.bf16 %v11686_v21  ;;  %v9294_v11 = vunpack.i.h.bf16 %v11674_v9  ;;  %vm13617_vm9 = vmmov %vm13611_vm12 }
 0xff2   : > { %v11812_v35 = vpop.permute.xlu0 %9361  ;;  %8508 = vmatprep.subr.bf16.mxu1 %v8507_v48  ;;  %v3953_v25 = vsel %vm13600_vm6, %v9278_v5, %v13599_v40  ;;  %v9358_v48 = vunpack.i.l.bf16 %v11696_v60  ;;  %v13605_v40 = vunpack.i.h.bf16 %v11692_v58  ;;  %v13608_v5 = vunpack.i.h.bf16 %v11790_v56  ;;  %vm13614_vm6 = vmmov %vm13609_vm1 }
 0xff3   : > { %v13395_v32 = vunpack.i.h.bf16 %v11812_v35  ;;  %v9363_v27 = vunpack.i.l.bf16 %v11812_v35  ;;  %v8511_v33 = vpack.c.bf16 %v3953_v25, %v3948_v2  ;;  %v3763_v28 = vsel %vm13611_vm12, %v9373_v43, %v13610_v14  ;;  %vm13619_vm13 = vmmov %vm13617_vm9 }
 0xff4   : > { %v3994_v22 = vsel %vm13609_vm1, %v9353_v54, %v13608_v5  ;;  %v9313_v2 = vunpack.i.l.bf16 %v11686_v21  ;;  %v13615_v14 = vunpack.i.h.bf16 %v11666_v49  ;;  %vm13620_vm0 = vmmov %vm13609_vm1  ;;  %vm13629_vm12 = vcmask 236544  }
 0xff5   : > { %v3720_v15 = vsel %vm13606_vm5, %v13605_v40, %v9363_v27  ;;  %8510 = vmatpush1.bf16.msra.mxu1 %v8509_v7  ;;  %v3721_v29 = vsel %vm13607_vm14, %v9363_v27, %v13395_v32  ;;  %v8513_v27 = vpack.c.bf16 %v3952_v13, %v3947_v51  ;;  %v13612_v7 = vunpack.i.h.bf16 %v11676_v36  ;;  %vm13623_vm14 = vmmov %vm13620_vm0 }
 0xff6   : > { %v11840_v58 = vpop.permute.xlu0 %9366  ;;  %8512 = vmatprep.subr.bf16.mxu1 %v8511_v33  ;;  %v8523_v4 = vpack.c.bf16 %v3725_v45, %v3721_v29  ;;  %v8525_v25 = vpack.c.bf16 %v11770_v8, %v3720_v15  ;;  %v13613_v40 = vunpack.i.l.bf16 %v11676_v36  ;;  %v13616_v32 = vunpack.i.l.bf16 %v11666_v49  ;;  %v11858_v8 = vpop.permute.xlu1 %9406 }
 0xff7   : > { %v13618_v33 = vunpack.i.h.bf16 %v11702_v59  ;;  %v3993_v15 = vsel %vm13620_vm0, %v9313_v2, %v9353_v54  ;;  %v9293_v29 = vunpack.i.l.bf16 %v11674_v9  ;;  %vm13621_vm5 = vcmask 793600  }
 0xff8   : > { %v3999_v5 = vsel %vm13614_vm6, %v13613_v40, %v13612_v7  ;;  %v3767_v21 = vsel %vm13617_vm9, %v13616_v32, %v13615_v14  ;;  %8524 = vmatprep.subr.bf16.mxu0 %v8523_v4  ;;  %v9394_v7 = vunpack.i.h.bf16 %v11774_v3  ;;  %v9393_v40 = vunpack.i.l.bf16 %v11774_v3  ;;  %vm13626_vm1 = vmmov %vm13621_vm5 }
 0xff9   : > { %v3762_v45 = vsel %vm13619_vm13, %v13618_v33, %v9373_v43  ;;  %v8515_v13 = vpack.c.bf16 %v3999_v5, %v3994_v22  ;;  %v8527_v51 = vpack.c.bf16 %v3767_v21, %v3763_v28  ;;  %8514 = vmatpush1.bf16.msra.mxu1 %v8513_v27  ;;  %8526 = vmatpush1.bf16.msra.mxu0 %v8525_v25  ;;  %v9319_v43 = vunpack.i.h.bf16 %v11684_v23  ;;  %vm13630_vm6 = vmmov %vm13626_vm1 }
 0xffa   : > { %v4040_v59 = vsel %vm13621_vm5, %v9358_v48, %v13396_v37  ;;  %v9318_v54 = vunpack.i.l.bf16 %v11684_v23  ;;  %v13622_v32 = vunpack.i.l.bf16 %v11676_v36  ;;  %v11871_v28 = vpop.permute.xlu0 %9381  ;;  %v13624_v2 = vunpack.i.h.bf16 %v11678_v17  ;;  %vm13633_vm9 = vmmov %vm13629_vm12 }
 0xffb   : > { %8516 = vmatprep.subr.bf16.mxu1 %v8515_v13  ;;  %8528 = vmatprep.subr.bf16.mxu0 %v8527_v51  ;;  %v13625_v4 = vunpack.i.l.bf16 %v11678_v17  ;;  %v9384_v27 = vunpack.i.h.bf16 %v11871_v28  ;;  %v9383_v5 = vunpack.i.l.bf16 %v11871_v28  ;;  %v8529_v23 = vpack.c.bf16 %v11748_v30, %v3762_v45  ;;  %vm13635_vm13 = vmmov %vm13633_vm9 }
 0xffc   : > { %v3998_v22 = vsel %vm13623_vm14, %v9314_v16, %v13622_v32  ;;  %v13627_v21 = vunpack.i.l.bf16 %v11672_v31  ;;  %v13628_v16 = vunpack.i.h.bf16 %v11660_v6  ;;  %v4039_v13 = vsel %vm13630_vm6, %v9318_v54, %v9358_v48  ;;  %vm13636_vm0 = vmmov %vm13633_vm9 }
 0xffd   : > { %v4045_v25 = vsel %vm13626_vm1, %v13625_v4, %v13624_v2  ;;  %v8517_v14 = vpack.c.bf16 %v3998_v22, %v3993_v15  ;;  %v13631_v32 = vunpack.i.h.bf16 %v11672_v31  ;;  %v13634_v37 = vunpack.i.h.bf16 %v11719_v26  ;;  %8530 = vmatpush1.bf16.msra.mxu0 %v8529_v23  ;;  %vm13639_vm14 = vmmov %vm13626_vm1 }
 0xffe   : > { %v3808_v33 = vsel %vm13629_vm12, %v13628_v16, %v13627_v21  ;;  %v8519_v51 = vpack.c.bf16 %v4045_v25, %v4040_v59  ;;  %v13632_v2 = vmov %v13627_v21  ;;  %v3805_v6 = vsel %vm13636_vm0, %v9383_v5, %v9384_v27  ;;  %v11904_v59 = vpop.permute.xlu1 %9426  ;;  %v11906_v54 = vpop.permute.xlu0 %9386  ;;  %v11919_v16 = vld [vmem:[%s13295_s12] sm:$0xff] }
 0xfff   : > { %v3809_v4 = vsel %vm13633_vm9, %v13632_v2, %v13631_v32  ;;  %v3804_v15 = vsel %vm13635_vm13, %v13634_v37, %v9383_v5  ;;  %8518 = vmatpush1.bf16.msra.mxu1 %v8517_v14  ;;  %vm13637_vm5 = vcmask 7168   ;;  %v13638_v48 = vunpack.i.l.bf16 %v11678_v17 }
0x1000   : > { %v3853_v30 = vsel %vm13637_vm5, %v9393_v40, %v9394_v7  ;;  %8520 = vmatprep.subr.bf16.mxu1 %v8519_v51  ;;  %v8531_v37 = vpack.c.bf16 %v3809_v4, %v3805_v6  ;;  %v8533_v26 = vpack.c.bf16 %v3808_v33, %v3804_v15  ;;  %vm13640_vm1 = vmmov %vm13637_vm5  ;;  %v13641_v5 = vunpack.i.h.bf16 %v11738_v61 }
0x1001   : > { %v4044_v45 = vsel %vm13639_vm14, %v9319_v43, %v13638_v48  ;;  %v3858_v25 = vsel %vm13640_vm1, %v9293_v29, %v9294_v11  ;;  %vm13642_vm12 = vmmov %vm13640_vm1  ;;  %v9369_v43 = vunpack.i.h.bf16 %v11840_v58  ;;  %v9368_v21 = vunpack.i.l.bf16 %v11840_v58 }
0x1002   : > { %v8521_v22 = vpack.c.bf16 %v4044_v45, %v4039_v13  ;;  %v3852_v14 = vsel %vm13642_vm12, %v13641_v5, %v9393_v40  ;;  %8532 = vmatprep.subr.bf16.mxu0 %v8531_v37  ;;  %v8535_v23 = vpack.c.bf16 %v3858_v25, %v3853_v30  ;;  %v13643_v33 = vunpack.i.h.bf16 %v11662_v55  ;;  %vm13644_vm6 = vmmov %vm13640_vm1  ;;  %v9397_v32 = vpop.permute.xlu0 %9396  ;;  %v11928_v30 = vpop.permute.xlu1 %9431 }
0x1003   : > { %8534 = vmatpush1.bf16.msra.mxu0 %v8533_v26  ;;  %v9404_v61 = vunpack.i.h.bf16 %v11810_v1  ;;  %v9403_v40 = vunpack.i.l.bf16 %v11810_v1  ;;  %v9409_v51 = vunpack.i.h.bf16 %v11858_v8  ;;  %v9408_v2 = vunpack.i.l.bf16 %v11858_v8 }
0x1004   : > { %8522 = vmatpush1.bf16.msra.mxu1 %v8521_v22  ;;  %v3857_v13 = vsel %vm13644_vm6, %v13643_v33, %v9293_v29  ;;  %8536 = vmatprep.subr.bf16.mxu0 %v8535_v23  ;;  %v9399_v4 = vunpack.i.h.bf16 %v9397_v32  ;;  %v9398_v15 = vunpack.i.l.bf16 %v9397_v32  ;;  %v8539_v55 = vpack.c.bf16 %v11503_v19, %v11566_v41 }
0x1005   : > { %v8537_v6 = vpack.c.bf16 %v3857_v13, %v3852_v14  ;;  %v8541_v29 = vpack.c.bf16 %v11501_v47, %v11562_v34  ;;  %v13645_v48 = vunpack.i.h.bf16 %v11664_v0  ;;  %vm13646_vm9 = vcmask 252928  }
0x1006   : > { %v13647_v37 = vunpack.i.h.bf16 %v11812_v35  ;;  %vm13648_vm13 = vmmov %vm13646_vm9  ;;  %v8559_v26 = vpack.c.bf16 %v9399_v4, %v9398_v15  ;;  %vm13649_vm0 = vcmask 1039360   ;;  %v9379_v25 = vunpack.i.h.bf16 %v11736_v52  ;;  %v11948_v34 = vpop.permute.xlu0 %9411 }
0x1007   : > { %4134 = vmatmul.mubr.f32.vlgmr.msra.gmra.mrb[26].mxu1 %v11919_v16  ;;  %v3726_v45 = vsel %vm13646_vm9, %v13645_v48, %v9399_v4  ;;  %8538 = vmatpush1.bf16.msra.mxu0 %v8537_v6  ;;  %v3907_v22 = vsel %vm13649_vm0, %v9368_v21, %v9369_v43  ;;  %v13650_v19 = vunpack.i.h.bf16 %v11666_v49  ;;  %vm13651_vm5 = vcmask 244736   ;;  %vm13652_vm14 = vmmov %vm13649_vm0  ;;  %v11973_v6 = vpop.permute.xlu1 %9436 }
0x1008   : > { %v3722_v8 = vsel %vm13648_vm13, %v13647_v37, %v9398_v15  ;;  %8540 = vmatprep.subr.bf16.mxu0 %v8539_v55  ;;  %v3902_v0 = vsel %vm13652_vm14, %v9403_v40, %v9404_v61  ;;  %vm13653_vm1 = vcmask 130048   ;;  %v13654_v35 = vunpack.i.h.bf16 %v11713_v57  ;;  %vm13655_vm12 = vmmov %vm13651_vm5  ;;  %8560 = vmatprep.subr.bf16.mxu1 %v8559_v26 }
0x1009   : > { %v3768_v47 = vsel %vm13651_vm5, %v13650_v19, %v9409_v51  ;;  %v8561_v41 = vpack.c.bf16 %v3726_v45, %v3722_v8  ;;  %7785 = vmatprep.mubr.msk.f32.mxu1 %vm13653_vm1, %v11630_v50  ;;  %v9414_v14 = vunpack.i.h.bf16 %v11948_v34  ;;  %v9413_v49 = vunpack.i.l.bf16 %v11948_v34  ;;  %vm13657_vm6 = vmmov %vm13649_vm0 }
0x100a   : > { %v3764_v5 = vsel %vm13655_vm12, %v13654_v35, %v9408_v2  ;;  %v8563_v23 = vpack.c.bf16 %v9409_v51, %v9408_v2  ;;  %v9378_v33 = vunpack.i.l.bf16 %v11736_v52  ;;  %v13656_v13 = vunpack.i.h.bf16 %v11668_v53  ;;  %vm13660_vm13 = vmmov %vm13649_vm0 }
0x100b   : > { %8562 = vmatpush1.bf16.msra.mxu1 %v8561_v41  ;;  %v8543_v4 = vpack.c.bf16 %v3907_v22, %v3902_v0  ;;  %v9389_v50 = vunpack.i.h.bf16 %v11906_v54  ;;  %v9388_v57 = vunpack.i.l.bf16 %v11906_v54  ;;  %8542 = vmatpush1.bf16.msra.mxu0 %v8541_v29  ;;  %vm13658_vm9 = vcmask 809984  }
0x100c   : > { %v3906_v32 = vsel %vm13657_vm6, %v13656_v13, %v9368_v21  ;;  %8564 = vmatprep.subr.bf16.mxu1 %v8563_v23  ;;  %v3950_v15 = vsel %vm13658_vm9, %v9413_v49, %v9414_v14  ;;  %v13659_v51 = vunpack.i.h.bf16 %v11764_v46  ;;  %v9429_v53 = vunpack.i.h.bf16 %v11904_v59  ;;  %v9417_v21 = vpop.permute.xlu0 %9416  ;;  %vm13661_vm0 = vmmov %vm13658_vm9 }
0x100d   : > { %8544 = vmatprep.subr.bf16.mxu0 %v8543_v4  ;;  %v8565_v55 = vpack.c.bf16 %v3768_v47, %v3764_v5  ;;  %v3955_v29 = vsel %vm13661_vm0, %v9378_v33, %v9379_v25  ;;  %v9428_v48 = vunpack.i.l.bf16 %v11904_v59  ;;  %v9419_v45 = vunpack.i.h.bf16 %v9417_v21  ;;  %vm13663_vm5 = vmmov %vm13661_vm0 }
0x100e   : > { %v3901_v2 = vsel %vm13660_vm13, %v13659_v51, %v9403_v40  ;;  %v9418_v37 = vunpack.i.l.bf16 %v9417_v21  ;;  %v9434_v46 = vunpack.i.h.bf16 %v11928_v30  ;;  %v9433_v40 = vunpack.i.l.bf16 %v11928_v30  ;;  %vm13669_vm6 = vmmov %vm13661_vm0 }
0x100f   : > { %v8545_v8 = vpack.c.bf16 %v3906_v32, %v3901_v2  ;;  %v13662_v26 = vunpack.i.h.bf16 %v11690_v20  ;;  %8566 = vmatpush1.bf16.msra.mxu1 %v8565_v55  ;;  %v8547_v19 = vpack.c.bf16 %v3955_v29, %v3950_v15  ;;  %v13664_v47 = vunpack.i.h.bf16 %v11672_v31  ;;  %v9447_v15 = vpop.permute.xlu1 %9446 }
0x1010   : > { %vm13665_vm14 = vcmask 236544   ;;  %v8567_v35 = vpack.c.bf16 %v9419_v45, %v9418_v37  ;;  %vm13667_vm12 = vcmask 801792   ;;  %v13668_v20 = vunpack.i.h.bf16 %v11670_v39 }
0x1011   : > { %v3949_v22 = vsel %vm13663_vm5, %v13662_v26, %v9413_v49  ;;  %v3810_v41 = vsel %vm13665_vm14, %v13664_v47, %v9419_v45  ;;  %vm13666_vm1 = vmmov %vm13665_vm14  ;;  %8546 = vmatpush1.bf16.msra.mxu0 %v8545_v8  ;;  %v4001_v30 = vsel %vm13667_vm12, %v9388_v57, %v9389_v50  ;;  %v9422_v49 = vpop.permute.xlu0 %9421  ;;  %vm13671_vm13 = vcmask 7168  }
0x1012   : > { %v3806_v0 = vsel %vm13666_vm1, %v9384_v27, %v9418_v37  ;;  %v3954_v5 = vsel %vm13669_vm6, %v13668_v20, %v9378_v33  ;;  %8548 = vmatprep.subr.bf16.mxu0 %v8547_v19  ;;  %v9424_v31 = vunpack.i.h.bf16 %v9422_v49  ;;  %v9423_v13 = vunpack.i.l.bf16 %v9422_v49  ;;  %8568 = vmatprep.subr.bf16.mxu1 %v8567_v35  ;;  %vm13670_vm9 = vmmov %vm13667_vm12 }
0x1013   : > { %v8569_v23 = vpack.c.bf16 %v3810_v41, %v3806_v0  ;;  %v8549_v32 = vpack.c.bf16 %v3954_v5, %v3949_v22  ;;  %v3996_v28 = vsel %vm13670_vm9, %v9428_v48, %v9429_v53  ;;  %v3854_v27 = vsel %vm13671_vm13, %v9394_v7, %v9433_v40  ;;  %vm13673_vm0 = vmmov %vm13670_vm9  ;;  %v9457_v20 = vpop.permute.xlu1 %9456 }
0x1014   : > { %v9438_v4 = vunpack.i.l.bf16 %v11973_v6  ;;  %v13672_v39 = vunpack.i.h.bf16 %v11676_v36  ;;  %v8551_v51 = vpack.c.bf16 %v4001_v30, %v3996_v28  ;;  %v9439_v2 = vunpack.i.h.bf16 %v11973_v6  ;;  %vm13674_vm5 = vmmov %vm13671_vm13 }
0x1015   : > { %8570 = vmatpush1.bf16.msra.mxu1 %v8569_v23  ;;  %v3859_v21 = vsel %vm13674_vm5, %v9294_v11, %v9423_v13  ;;  %8550 = vmatpush1.bf16.msra.mxu0 %v8549_v32  ;;  %vm13675_vm14 = vmmov %vm13674_vm5  ;;  %v13677_v55 = vunpack.i.h.bf16 %v11790_v56  ;;  %v9442_v29 = vpop.permute.xlu0 %9441  ;;  %v9448_v37 = vunpack.i.l.bf16 %v9447_v15  ;;  %v13679_v9 = vunpack.i.h.bf16 %v11696_v60  ;;  %v13694_v32 = vld [vmem:[#allocation15_spill] sm:$0xff] }
0x1016   : > { %v4000_v33 = vsel %vm13673_vm0, %v13672_v39, %v9388_v57  ;;  %v3855_v3 = vsel %vm13675_vm14, %v9433_v40, %v9434_v46  ;;  %vm13676_vm1 = vmmov %vm13674_vm5  ;;  %8552 = vmatprep.subr.bf16.mxu0 %v8551_v51  ;;  %v8573_v45 = vpack.c.bf16 %v3859_v21, %v3854_v27  ;;  %v9444_v8 = vunpack.i.h.bf16 %v9442_v29  ;;  %v13695_v27 = vld [vmem:[#allocation16_spill] sm:$0xff] }
0x1017   : > { %v3860_v7 = vsel %vm13676_vm1, %v9423_v13, %v9424_v31  ;;  %vm13678_vm12 = vmmov %vm13673_vm0  ;;  %v9443_v6 = vunpack.i.l.bf16 %v9442_v29  ;;  %vm13680_vm6 = vcmask 793600   ;;  %v9449_v22 = vunpack.i.h.bf16 %v9447_v15  ;;  %v4064_v10 = vpop.permute.xlu1 %4063  ;;  %v13697_v29 = vld [vmem:[#allocation18_spill] sm:$0xff] }
0x1018   : > { %v3995_v36 = vsel %vm13678_vm12, %v13677_v55, %v9428_v48  ;;  %v8571_v57 = vpack.c.bf16 %v3860_v7, %v3855_v3  ;;  %v4041_v11 = vsel %vm13680_vm6, %v13679_v9, %v9438_v4  ;;  %v8575_v46 = vpack.c.bf16 %v11638_v18, %v11594_v44  ;;  %vm13682_vm9 = vmmov %vm13680_vm6  ;;  %v13696_v7 = vld [vmem:[#allocation17_spill] sm:$0xff] }
0x1019   : > { %v8553_v26 = vpack.c.bf16 %v4000_v33, %v3995_v36  ;;  %v13681_v56 = vunpack.i.h.bf16 %v11678_v17  ;;  %vm13683_vm13 = vmmov %vm13680_vm6  ;;  %v9452_v47 = vpop.permute.xlu0 %9451  ;;  %vm13685_vm5 = vcmask 1039360   ;;  %v8577_v44 = vpack.c.bf16 %v11602_v62, %v11591_v38 }
0x101a   : > { %8572 = vmatprep.subr.bf16.mxu1 %v8571_v57  ;;  %v4042_v40 = vsel %vm13683_vm13, %v9438_v4, %v9439_v2  ;;  %vm13684_vm0 = vmmov %vm13680_vm6  ;;  %v3903_v0 = vsel %vm13685_vm5, %v9404_v61, %v9448_v37  ;;  %v8579_v17 = vpack.c.bf16 %v9449_v22, %v9448_v37  ;;  %v9454_v35 = vunpack.i.h.bf16 %v9452_v47 }
0x101b   : > { %v4046_v48 = vsel %vm13682_vm9, %v13681_v56, %v9443_v6  ;;  %8554 = vmatpush1.bf16.msra.mxu0 %v8553_v26  ;;  %8574 = vmatpush1.bf16.msra.mxu1 %v8573_v45  ;;  %v4047_v19 = vsel %vm13684_vm0, %v9443_v6, %v9444_v8  ;;  %vm13686_vm14 = vmmov %vm13685_vm5  ;;  %v9453_v30 = vunpack.i.l.bf16 %v9452_v47  ;;  %v9459_v5 = vunpack.i.h.bf16 %v9457_v20 }
0x101c   : > { %8576 = vmatprep.subr.bf16.mxu1 %v8575_v46  ;;  %v8555_v60 = vpack.c.bf16 %v4047_v19, %v4042_v40  ;;  %v8557_v41 = vpack.c.bf16 %v4046_v48, %v4041_v11  ;;  %v3908_v18 = vsel %vm13686_vm14, %v9369_v43, %v9449_v22  ;;  %v9458_v61 = vunpack.i.l.bf16 %v9457_v20  ;;  %vm13691_vm9 = vmmov %vm13684_vm0  ;;  %v13698_v46 = vld [vmem:[#allocation19_spill] sm:$0xff] }
0x101d   : > { %v8582_v1 = vpack.c.bf16 %v3908_v18, %v3903_v0  ;;  %vm13687_vm1 = vcmask 809984   ;;  %v9462_v58 = vpop.permute.xlu0 %9461  ;;  %vm13692_vm13 = vmmov %vm13684_vm0 }
0x101e   : > { %8556 = vmatprep.subr.bf16.mxu0 %v8555_v60  ;;  %v3956_v38 = vsel %vm13687_vm1, %v9379_v25, %v9454_v35  ;;  %vm13688_vm12 = vmmov %vm13687_vm1  ;;  %v9464_v25 = vunpack.i.h.bf16 %v9462_v58  ;;  %v9463_v34 = vunpack.i.l.bf16 %v9462_v58  ;;  %v13699_v60 = vld [vmem:[#allocation20_spill] sm:$0xff]  ;;  %vm13700_vm1 = vcmask 252928  }
0x101f   : > { %8558 = vmatpush1.bf16.msra.mxu0 %v8557_v41  ;;  %8578 = vmatpush1.bf16.msra.mxu1 %v8577_v44  ;;  %v3951_v62 = vsel %vm13688_vm12, %v9414_v14, %v9453_v30  ;;  %v3652_v35 = vld [vmem:[%s13295_s12 + $0x30] sm:$0xff]  ;;  %vm13701_vm12 = vcmask 244736  }
0x1020   : > { %8581 = vmatprep.subr.msk.bf16.mxu1 %vm11075_vm7, %v8579_v17  ;;  %v8585_v12 = vpack.c.bf16 %v3956_v38, %v3951_v62  ;;  %vm13689_vm7 = vcmask 801792   ;;  %v4043_v49 = vsel %vm13691_vm9, %v9439_v2, %v9463_v34  ;;  %v4048_v23 = vsel %vm13692_vm13, %v9444_v8, %v9464_v25  ;;  %v3650_v17 = vld [vmem:[%s13295_s12 + $0x20] sm:$0xff] }
0x1021   : > { %v3997_v43 = vsel %vm13689_vm7, %v9429_v53, %v9458_v61  ;;  %vm13690_vm6 = vmmov %vm13689_vm7  ;;  %v8593_v59 = vpack.c.bf16 %v4048_v23, %v4043_v49  ;;  %vm13705_vm9 = vcmask 7168  }
0x1022   : > { %4205 = vmatmul.mubr.f32.vlgmr.msra.gmra.mrb[30].mxu0 %v11919_v16  ;;  %v4002_v52 = vsel %vm13690_vm6, %v9389_v50, %v9459_v5  ;;  %vm13704_vm6 = vcmask 236544  }
0x1023   : > { %8583 = vmatpush1.bf16.msra.mxu1 %v8582_v1  ;;  %4564 = vmatprep.mubr.f32.mxu0 %v13480_v63  ;;  %v8589_v14 = vpack.c.bf16 %v4002_v52, %v3997_v43 }
0x1024   : > { %8584 = vmatprep.subr.bf16.mxu1 %v13476_v42 }
0x1027   : > { %8587 = vmatpush1.bf16.msk.msra.mxu1 %vm11103_vm2, %v8585_v12 }
0x1028   : > { %8588 = vmatprep.subr.bf16.mxu1 %v13476_v42 }
0x102b   : > { %8591 = vmatpush1.bf16.msk.msra.mxu1 %vm11118_vm15, %v8589_v14 }
0x102c   : > { %8592 = vmatprep.subr.bf16.mxu1 %v13476_v42 }
0x102f   : > { %8595 = vmatpush1.bf16.msk.msra.mxu1 %vm11129_vm3, %v8593_v59 }
0x1032   : > { %4276 = vmatmul.mubr.f32.vlgmr.msra.gmra.mrb[28].mxu1 %v11919_v16 }
0x1033   : > { %4706 = vmatprep.mubr.f32.mxu1 %v13480_v63 }
0x10da   : > { %v4135_v50 = vpop.f32.mrb[26].mxu1 }
0x10db   : > { %v4136_v53 = vadd.f32 %v4135_v50, %v4064_v10  ;;  %v4137_v31 = vpop.f32.mrb[27].mxu1 }
0x10dc   : > { %v4138_v13 = vadd.f32 %v4137_v31, %v4064_v10 }
0x10dd   : > { %v4282_v28 = vmul.f32 %v4136_v53, %v13694_v32 }
0x10de   : > { %v4283_v24 = vmul.f32 %v4138_v13, %v13695_v27 }
0x10df   : > { %vm4288_vm15 = vcmp.ge.f32.partialorder %v4282_v28, 0.0  ;;  %v4294_v4 = vmul.f32 0.2, %v4282_v28 }
0x10e0   : > { %vm4289_vm2 = vcmp.ge.f32.partialorder %v4283_v24, 0.0  ;;  %v4295_v39 = vmul.f32 0.2, %v4283_v24 }
0x10e1   : > { %v12064_v33 = vsel %vm4288_vm15, %v4282_v28, %v4294_v4  ;;  %v13706_v28 = vld [vmem:[#allocation21_spill] sm:$0xff]  ;;  %vm13708_vm15 = vcmask 1039360  }
0x10e2   : > { %v12066_v15 = vsel %vm4289_vm2, %v4283_v24, %v4295_v39  ;;  %4423 = vrot.lane.b32.xlu0 %v12064_v33, %s9888_s0  ;;  %4399 = vrot.lane.b32.xlu1 %v12064_v33, %s9879_s29  ;;  %vm13707_vm13 = vnez %v13706_v28  ;;  %vm13709_vm2 = vmmov %vm13708_vm15 }
0x10e3   : > { %v9465_v16 = vpack.i.bf16 %v12066_v15, %v12064_v33 }
0x10e6   : > { %9466 = vrot.lane.b32.xlu0 %v9465_v16, %s9887_s24  ;;  %9471 = vrot.lane.b32.xlu1 %v9465_v16, %s9889_s18 }
0x10ea   : > { %9476 = vrot.lane.b32.xlu0 %v9465_v16, %s9890_s30  ;;  %9481 = vrot.lane.b32.xlu1 %v9465_v16, %s9877_s16 }
0x10ee   : > { %4471 = vrot.lane.b32.xlu0 %v12066_v15, %s9892_s23  ;;  %4446 = vrot.lane.b32.xlu1 %v12064_v33, %s9891_s22 }
0x10f5   : > { %v4206_v51 = vpop.f32.mrb[30].mxu0 }
0x10f6   : > { %v4207_v2 = vadd.f32 %v4206_v51, %v4064_v10  ;;  %v4208_v21 = vpop.f32.mrb[31].mxu0 }
0x10f7   : > { %v4209_v3 = vadd.f32 %v4208_v21, %v4064_v10 }
0x10f8   : > { %v4284_v55 = vmul.f32 %v4207_v2, %v13696_v7 }
0x10f9   : > { %v4285_v57 = vmul.f32 %v4209_v3, %v13697_v29 }
0x10fa   : > { %vm4290_vm3 = vcmp.ge.f32.partialorder %v4284_v55, 0.0  ;;  %v4296_v36 = vmul.f32 0.2, %v4284_v55 }
0x10fb   : > { %v4297_v8 = vmul.f32 0.2, %v4285_v57  ;;  %vm4291_vm0 = vcmp.ge.f32.partialorder %v4285_v57, 0.0 }
0x10fc   : > { %v12084_v45 = vsel %vm4290_vm3, %v4284_v55, %v4296_v36  ;;  %vm13710_vm3 = vcmask 801792  }
0x10fd   : > { %v9485_v37 = vpack.i.bf16 %v12084_v45, %v12066_v15  ;;  %v12090_v6 = vsel %vm4291_vm0, %v4285_v57, %v4297_v8  ;;  %vm13711_vm0 = vcmask 809984  }
0x10fe   : > { %v9505_v9 = vpack.i.bf16 %v12090_v6, %v12084_v45 }
0x10ff   : > { %9486 = vrot.lane.b32.xlu0 %v9485_v37, %s9879_s29  ;;  %9496 = vrot.lane.b32.xlu1 %v9485_v37, %s9891_s22 }
0x1103   : > { %9491 = vrot.lane.b32.xlu0 %v9485_v37, %s9888_s0  ;;  %4473 = vrot.lane.b32.xlu1 %v12084_v45, %s9892_s23 }
0x1105   : > { %v4277_v26 = vpop.f32.mrb[28].mxu1 }
0x1106   : > { %v4278_v11 = vadd.f32 %v4277_v26, %v4064_v10  ;;  %v4279_v22 = vpop.f32.mrb[29].mxu1 }
0x1107   : > { %4469 = vrot.lane.b32.xlu0 %v12064_v33, %s9892_s23  ;;  %9506 = vrot.lane.b32.xlu1 %v9505_v9, %s9889_s18  ;;  %v4280_v47 = vadd.f32 %v4279_v22, %v4064_v10  ;;  %v13702_v10 = vld [vmem:[#allocation10_spill] sm:$0xff] }
0x1108   : > { %v4286_v56 = vmul.f32 %v4278_v11, %v13698_v46  ;;  %vm13703_vm7 = vnez %v13702_v10 }
0x1109   : > { %v4287_v41 = vmul.f32 %v4280_v47, %v13699_v60 }
0x110a   : > { %vm4292_vm5 = vcmp.ge.f32.partialorder %v4286_v56, 0.0  ;;  %v4298_v48 = vmul.f32 0.2, %v4286_v56 }
0x110b   : > { %9501 = vrot.lane.b32.xlu0 %v9505_v9, %s9887_s24  ;;  %9511 = vrot.lane.b32.xlu1 %v9505_v9, %s9890_s30  ;;  %v4299_v0 = vmul.f32 0.2, %v4287_v41  ;;  %vm4293_vm14 = vcmp.ge.f32.partialorder %v4287_v41, 0.0 }
0x110c   : > { %v12103_v40 = vsel %vm4292_vm5, %v4286_v56, %v4298_v48  ;;  %vm13712_vm5 = vmmov %vm13711_vm0 }
0x110d   : > { %v9520_v19 = vpack.i.bf16 %v12103_v40, %v12090_v6  ;;  %v12116_v44 = vsel %vm4293_vm14, %v4287_v41, %v4299_v0  ;;  %vm13713_vm14 = vmmov %vm13710_vm3 }
0x110e   : > { %v9535_v18 = vpack.i.bf16 %v12116_v44, %v12103_v40 }
0x110f   : > { %9516 = vrot.lane.b32.xlu0 %v9505_v9, %s9877_s16  ;;  %9521 = vrot.lane.b32.xlu1 %v9520_v19, %s9879_s29 }
0x1113   : > { %9526 = vrot.lane.b32.xlu0 %v9520_v19, %s9888_s0  ;;  %9531 = vrot.lane.b32.xlu1 %v9520_v19, %s9891_s22 }
0x1117   : > { %4475 = vrot.lane.b32.xlu0 %v12090_v6, %s9892_s23  ;;  %4477 = vrot.lane.b32.xlu1 %v12103_v40, %s9892_s23 }
0x111b   : > { %4319 = vrot.lane.b32.xlu0 %v12103_v40, %s9887_s24  ;;  %4340 = vrot.lane.b32.xlu1 %v12103_v40, %s9889_s18 }
0x111f   : > { %9536 = vrot.lane.b32.xlu0 %v9535_v18, %s9877_s16  ;;  %4361 = vrot.lane.b32.xlu1 %v12103_v40, %s9890_s30 }
0x1123   : > { %4409 = vrot.lane.b32.xlu0 %v12116_v44, %s9879_s29  ;;  %4433 = vrot.lane.b32.xlu1 %v12116_v44, %s9888_s0 }
0x1127   : > { %4456 = vrot.lane.b32.xlu0 %v12116_v44, %s9891_s22  ;;  %4479 = vrot.lane.b32.xlu1 %v12116_v44, %s9892_s23 }
0x112b   : > { %4494 = vperm.xlu0 %8898, %v3650_v17   ;;  %4721 = vperm.xlu1 %8899, %v3652_v35  }
0x1154   : > { %v4424_v30 = vpop.permute.xlu0 %4423  ;;  %v4400_v20 = vpop.permute.xlu1 %4399 }
0x1158   : > { %v12141_v1 = vpop.permute.xlu0 %9466  ;;  %v12143_v5 = vpop.permute.xlu1 %9471 }
0x1159   : > { %v9469_v61 = vunpack.i.h.bf16 %v12141_v1  ;;  %v9468_v38 = vunpack.i.l.bf16 %v12141_v1  ;;  %v9474_v62 = vunpack.i.h.bf16 %v12143_v5  ;;  %v9473_v58 = vunpack.i.l.bf16 %v12143_v5 }
0x115b   : > { %v4321_v12 = vsel %vm13700_vm1, %v9468_v38, %v9469_v61  ;;  %v4342_v43 = vsel %vm13701_vm12, %v9473_v58, %v9474_v62  ;;  %v8598_v52 = vpack.c.bf16 %v9473_v58, %v9468_v38  ;;  %vm13714_vm1 = vcmask 793600   ;;  %v12210_v38 = vld [vmem:[%s13295_s12 + $0x18] sm:$0xff] }
0x115c   : > { %v12153_v25 = vpop.permute.xlu0 %9476  ;;  %v12155_v34 = vpop.permute.xlu1 %9481  ;;  %v8596_v14 = vpack.c.bf16 %v4342_v43, %v4321_v12  ;;  %vm13715_vm12 = vmmov %vm13714_vm1 }
0x115d   : > { %v9479_v49 = vunpack.i.h.bf16 %v12153_v25  ;;  %v9478_v23 = vunpack.i.l.bf16 %v12153_v25  ;;  %v9484_v59 = vunpack.i.h.bf16 %v12155_v34  ;;  %v9483_v54 = vunpack.i.l.bf16 %v12155_v34 }
0x115e   : > { %8597 = vmatprep.subr.bf16.mxu0 %v8596_v14 }
0x115f   : > { %8600 = vmatpush1.bf16.msk.msra.mxu0 %vm13703_vm7, %v8598_v52  ;;  %v4363_v50 = vsel %vm13704_vm6, %v9478_v23, %v9479_v49  ;;  %v4387_v53 = vsel %vm13705_vm9, %v9483_v54, %v9484_v59  ;;  %v8603_v13 = vpack.c.bf16 %v9483_v54, %v9478_v23  ;;  %vm13716_vm6 = vcmask 244736  }
0x1160   : > { %v8601_v31 = vpack.c.bf16 %v4387_v53, %v4363_v50  ;;  %v4472_v24 = vpop.permute.xlu0 %4471  ;;  %v4447_v4 = vpop.permute.xlu1 %4446  ;;  %vm13717_vm9 = vcmask 252928  }
0x1162   : > { %8602 = vmatprep.subr.bf16.mxu0 %v8601_v31 }
0x1163   : > { %8605 = vmatpush1.bf16.msk.msra.mxu0 %vm13707_vm13, %v8603_v13 }
0x1171   : > { %v12171_v39 = vpop.permute.xlu0 %9486  ;;  %v12173_v16 = vpop.permute.xlu1 %9496 }
0x1172   : > { %v9489_v51 = vunpack.i.h.bf16 %v12171_v39  ;;  %v9488_v2 = vunpack.i.l.bf16 %v12171_v39  ;;  %v9499_v3 = vunpack.i.h.bf16 %v12173_v16  ;;  %v9498_v55 = vunpack.i.l.bf16 %v12173_v16 }
0x1174   : > { %v4411_v21 = vsel %vm13708_vm15, %v4400_v20, %v9488_v2  ;;  %v4412_v36 = vsel %vm13709_vm2, %v9488_v2, %v9489_v51  ;;  %v4458_v22 = vsel %vm13710_vm3, %v4447_v4, %v9498_v55  ;;  %vm13718_vm15 = vmmov %vm13717_vm9  ;;  %vm13720_vm3 = vcmask 588800  }
0x1175   : > { %v12183_v57 = vpop.permute.xlu0 %9491  ;;  %v12185_v37 = vpop.permute.xlu1 %4473  ;;  %v8606_v8 = vpack.c.bf16 %v4412_v36, %v12066_v15  ;;  %v8608_v26 = vpack.c.bf16 %v4411_v21, %v12064_v33  ;;  %v4459_v15 = vsel %vm13713_vm14, %v9498_v55, %v9499_v3  ;;  %vm13719_vm2 = vmmov %vm13716_vm6 }
0x1176   : > { %v9494_v9 = vunpack.i.h.bf16 %v12183_v57  ;;  %v9493_v11 = vunpack.i.l.bf16 %v12183_v57  ;;  %v4482_v17 = vsel %vm13714_vm1, %v4472_v24, %v12185_v37 }
0x1177   : > { %8607 = vmatprep.subr.bf16.mxu0 %v8606_v8 }
0x1178   : > { %v4435_v56 = vsel %vm13711_vm0, %v4424_v30, %v9493_v11  ;;  %8609 = vmatpush1.bf16.msra.mxu0 %v8608_v26  ;;  %v4436_v48 = vsel %vm13712_vm5, %v9493_v11, %v9494_v9  ;;  %vm13721_vm0 = vcmask 236544   ;;  %vm13722_vm5 = vcmask 7168  }
0x1179   : > { %v4470_v19 = vpop.permute.xlu0 %4469  ;;  %v12199_v33 = vpop.permute.xlu1 %9506  ;;  %v8610_v47 = vpack.c.bf16 %v4459_v15, %v4436_v48  ;;  %v8612_v41 = vpack.c.bf16 %v4458_v22, %v4435_v56  ;;  %vm13723_vm14 = vmmov %vm13721_vm0 }
0x117a   : > { %v9508_v0 = vunpack.i.l.bf16 %v12199_v33  ;;  %v9509_v18 = vunpack.i.h.bf16 %v12199_v33  ;;  %v4481_v58 = vsel %vm13715_vm12, %v4470_v19, %v4472_v24  ;;  %vm13724_vm1 = vmmov %vm13722_vm5  ;;  %vm13725_vm12 = vcmask 1039360  }
0x117b   : > { %8611 = vmatprep.subr.bf16.mxu0 %v8610_v47 }
0x117c   : > { %8613 = vmatpush1.bf16.msra.mxu0 %v8612_v41  ;;  %v4343_v12 = vsel %vm13716_vm6, %v9474_v62, %v9508_v0  ;;  %v4344_v54 = vsel %vm13719_vm2, %v9508_v0, %v9509_v18  ;;  %vm13726_vm6 = vmmov %vm13725_vm12 }
0x117d   : > { %v9502_v35 = vpop.permute.xlu0 %9501  ;;  %v12205_v30 = vpop.permute.xlu1 %9511  ;;  %4516 = vmatprep.subr.mxu0 %v4482_v17 }
0x117e   : > { %v9504_v20 = vunpack.i.h.bf16 %v9502_v35  ;;  %v9503_v5 = vunpack.i.l.bf16 %v9502_v35  ;;  %v9513_v43 = vunpack.i.l.bf16 %v12205_v30  ;;  %v9514_v14 = vunpack.i.h.bf16 %v12205_v30 }
0x1180   : > { %v4322_v52 = vsel %vm13717_vm9, %v9469_v61, %v9503_v5  ;;  %4517 = vmatpush1.msra.mxu0 %v4481_v58  ;;  %v4323_v23 = vsel %vm13718_vm15, %v9503_v5, %v9504_v20  ;;  %v4364_v4 = vsel %vm13721_vm0, %v9479_v49, %v9513_v43  ;;  %v4365_v21 = vsel %vm13723_vm14, %v9513_v43, %v9514_v14 }
0x1181   : > { %v9517_v50 = vpop.permute.xlu0 %9516  ;;  %v12221_v53 = vpop.permute.xlu1 %9521  ;;  %7794 = vmatmul.mubr.msk.f32.vlgmr.msra.gmra.mrb[32].mxu0 %vm13720_vm3, %v12210_v38  ;;  %v8614_v62 = vpack.c.bf16 %v4344_v54, %v4323_v23  ;;  %v8616_v31 = vpack.c.bf16 %v4343_v12, %v4322_v52  ;;  %vm13727_vm9 = vcmask 809984   ;;  %vm13728_vm15 = vcmask 801792   ;;  %v13737_v52 = vld [vmem:[#allocation24_spill] sm:$0xff]  ;;  %v13738_v23 = vld [vmem:[#allocation5_spill] sm:$0xff] }
0x1182   : > { %v9519_v13 = vunpack.i.h.bf16 %v9517_v50  ;;  %v9518_v24 = vunpack.i.l.bf16 %v9517_v50  ;;  %v9524_v1 = vunpack.i.h.bf16 %v12221_v53  ;;  %v9523_v61 = vunpack.i.l.bf16 %v12221_v53  ;;  %4635 = vmatprep.mubr.f32.mxu0 %v13480_v63  ;;  %vm13729_vm2 = vmmov %vm13727_vm9 }
0x1183   : > { %8615 = vmatprep.subr.bf16.mxu0 %v8614_v62  ;;  %vm13730_vm3 = vmmov %vm13728_vm15  ;;  %vm13731_vm0 = vcmask 252928   ;;  %vm13733_vm14 = vcmask 793600   ;;  %v8647_v54 = vpack.c.bf16 %v13738_v23, %v13737_v52 }
0x1184   : > { %v4388_v2 = vsel %vm13722_vm5, %v9484_v59, %v9518_v24  ;;  %8617 = vmatpush1.bf16.msra.mxu0 %v8616_v31  ;;  %v4389_v55 = vsel %vm13724_vm1, %v9518_v24, %v9519_v13  ;;  %v4414_v36 = vsel %vm13725_vm12, %v9523_v61, %v9524_v1  ;;  %v4413_v56 = vsel %vm13726_vm6, %v9489_v51, %v9523_v61  ;;  %vm12274_vm1 = vmpackc.low %vm3639_vm10, %vm13533_vm11  ;;  %v13742_v24 = vld [vmem:[#allocation23_spill] sm:$0xff] }
0x1185   : > { %v12241_v8 = vpop.permute.xlu0 %9526  ;;  %v12243_v25 = vpop.permute.xlu1 %9531  ;;  %v8618_v49 = vpack.c.bf16 %v4389_v55, %v4365_v21  ;;  %v8620_v26 = vpack.c.bf16 %v4388_v2, %v4364_v4  ;;  %v8622_v48 = vpack.c.bf16 %v4414_v36, %v12090_v6  ;;  %v8624_v39 = vpack.c.bf16 %v4413_v56, %v12084_v45  ;;  %vm13736_vm12 = vmmov %vm13733_vm14  ;;  %v13743_v61 = vld [vmem:[#allocation7_spill] sm:$0xff] }
0x1186   : > { %v9529_v34 = vunpack.i.h.bf16 %v12241_v8  ;;  %v9528_v59 = vunpack.i.l.bf16 %v12241_v8  ;;  %v9534_v11 = vunpack.i.h.bf16 %v12243_v25  ;;  %v9533_v22 = vunpack.i.l.bf16 %v12243_v25 }
0x1187   : > { %8619 = vmatprep.subr.bf16.mxu0 %v8618_v49  ;;  %vm13732_vm5 = vcmask 244736   ;;  %vm13739_vm6 = vcmask 7168   ;;  %v8650_v4 = vpack.c.bf16 %v13743_v61, %v13742_v24  ;;  %vm13744_vm11 = vcmask 588800  }
0x1188   : > { %8621 = vmatpush1.bf16.msra.mxu0 %v8620_v26  ;;  %v4438_v15 = vsel %vm13727_vm9, %v9528_v59, %v9529_v34  ;;  %v4461_v19 = vsel %vm13728_vm15, %v9533_v22, %v9534_v11  ;;  %v4437_v51 = vsel %vm13729_vm2, %v9494_v9, %v9528_v59  ;;  %v4460_v6 = vsel %vm13730_vm3, %v9499_v3, %v9533_v22  ;;  %vm13740_vm9 = vmmov %vm13739_vm6  ;;  %v13748_v26 = vld [vmem:[#allocation25_spill] sm:$0xff] }
0x1189   : > { %v4476_v33 = vpop.permute.xlu0 %4475  ;;  %v12259_v47 = vpop.permute.xlu1 %4477  ;;  %8623 = vmatprep.subr.bf16.mxu0 %v8622_v48  ;;  %v8626_v41 = vpack.c.bf16 %v4461_v19, %v4438_v15  ;;  %v8628_v12 = vpack.c.bf16 %v4460_v6, %v4437_v51  ;;  %vm13741_vm15 = vcmask 236544   ;;  %vm13747_vm10 = vcmask 1039360   ;;  %v13752_v48 = vld [vmem:[#allocation29_spill] sm:$0xff]  ;;  %v13753_v15 = vld [vmem:[#allocation30_spill] sm:$0xff] }
0x118a   : > { %v4484_v57 = vsel %vm13733_vm14, %v4476_v33, %v12259_v47  ;;  %vm13751_vm2 = vcmask 130048   ;;  %v8659_v19 = vpack.c.bf16 %v13753_v15, %v13752_v48  ;;  %v13755_v51 = vld [vmem:[#allocation26_spill] sm:$0xff] }
0x118b   : > { %vm13759_vm14 = vmmov %vm13751_vm2 }
0x118c   : > { %8625 = vmatpush1.bf16.msra.mxu0 %v8624_v39  ;;  %v13754_v39 = vld [vmem:[#allocation28_spill] sm:$0xff] }
0x118d   : > { %v4320_v0 = vpop.permute.xlu0 %4319  ;;  %v4341_v17 = vpop.permute.xlu1 %4340  ;;  %8627 = vmatprep.subr.bf16.mxu0 %v8626_v41  ;;  %v8662_v6 = vpack.c.bf16 %v13755_v51, %v13754_v39 }
0x118e   : > { %v4324_v35 = vsel %vm13731_vm0, %v9504_v20, %v4320_v0  ;;  %v4345_v5 = vsel %vm13732_vm5, %v9509_v18, %v4341_v17  ;;  %v8630_v58 = vpack.c.bf16 %v4341_v17, %v4320_v0  ;;  %v4483_v18 = vsel %vm13736_vm12, %v12185_v37, %v4476_v33  ;;  %v13745_v37 = vld [vmem:[#allocation27_spill] sm:$0xff]  ;;  %vm13757_vm5 = vmmov %vm13751_vm2 }
0x118f   : > { %v8632_v45 = vpack.c.bf16 %v4345_v5, %v4324_v35  ;;  %vm13756_vm0 = vcmask 809984  }
0x1190   : > { %8629 = vmatpush1.bf16.msra.mxu0 %v8628_v12  ;;  %8631 = vmatprep.subr.bf16.mxu1 %v8630_v58 }
0x1191   : > { %v9537_v16 = vpop.permute.xlu0 %9536  ;;  %v4362_v9 = vpop.permute.xlu1 %4361  ;;  %4587 = vmatprep.subr.mxu0 %v4484_v57  ;;  %8633 = vmatpush1.bf16.msra.mxu1 %v8632_v45 }
0x1192   : > { %v9539_v3 = vunpack.i.h.bf16 %v9537_v16  ;;  %v9538_v43 = vunpack.i.l.bf16 %v9537_v16  ;;  %v4366_v31 = vsel %vm13741_vm15, %v9514_v14, %v4362_v9  ;;  %v3651_v14 = vld [vmem:[%s13295_s12 + $0x28] sm:$0xff] }
0x1194   : > { %v4390_v50 = vsel %vm13739_vm6, %v9519_v13, %v9538_v43  ;;  %v4391_v62 = vsel %vm13740_vm9, %v9538_v43, %v9539_v3  ;;  %4588 = vmatpush1.msra.mxu0 %v4483_v18  ;;  %v13746_v13 = vld [vmem:[#allocation4_spill] sm:$0xff]  ;;  %vm13760_vm6 = vcmask 957440   ;;  %vm13761_vm9 = vmmov %vm13744_vm11 }
0x1195   : > { %v8634_v2 = vpack.c.bf16 %v4391_v62, %v4362_v9  ;;  %v8636_v21 = vpack.c.bf16 %v4390_v50, %v4366_v31  ;;  %v4410_v55 = vpop.permute.xlu0 %4409  ;;  %7795 = vmatmul.mubr.msk.f32.vlgmr.msra.gmra.mrb[34].mxu0 %vm13744_vm11, %v12210_v38  ;;  %8649 = vmatprep.subr.msk.bf16.mxu0 %vm12274_vm1, %v8647_v54  ;;  %v8653_v36 = vpack.c.bf16 %v13746_v13, %v13745_v37 }
0x1196   : > { %v8638_v30 = vpack.c.bf16 %v4410_v55, %v12116_v44  ;;  %8652 = vmatpush1.bf16.msk.msra.mxu0 %vm12274_vm1, %v8650_v4  ;;  %4791 = vmatprep.mubr.f32.mxu0 %v13480_v63  ;;  %v4415_v49 = vsel %vm13747_vm10, %v9524_v1, %v4410_v55  ;;  %v13749_v44 = vld [vmem:[#allocation6_spill] sm:$0xff]  ;;  %v4434_v1 = vpop.permute.xlu1 %4433 }
0x1197   : > { %8635 = vmatprep.subr.bf16.mxu1 %v8634_v2  ;;  %8655 = vmatprep.subr.msk.bf16.mxu0 %vm12274_vm1, %v8653_v36  ;;  %v8656_v59 = vpack.c.bf16 %v13749_v44, %v13748_v26  ;;  %v8641_v53 = vpack.c.bf16 %v4415_v49, %v12103_v40  ;;  %v4439_v40 = vsel %vm13756_vm0, %v9529_v34, %v4434_v1  ;;  %vm13762_vm0 = vcmask 252928  }
0x1198   : > { %8637 = vmatpush1.bf16.msra.mxu1 %v8636_v21 }
0x1199   : > { %v4457_v22 = vpop.permute.xlu0 %4456  ;;  %8640 = vmatprep.subr.msk.bf16.mxu1 %vm11412_vm8, %v8638_v30  ;;  %7803 = vmatmul.mubr.msk.f32.vlgmr.msra.gmra.mrb[36].mxu0 %vm13751_vm2, %v3651_v14 }
0x119a   : > { %8658 = vmatpush1.bf16.msk.msra.mxu0 %vm12274_vm1, %v8656_v59  ;;  %4862 = vmatprep.mubr.f32.mxu0 %v13480_v63  ;;  %v4462_v33 = vsel %vm13730_vm3, %v9534_v11, %v4457_v22  ;;  %v4480_v25 = vpop.permute.xlu1 %4479 }
0x119b   : > { %8661 = vmatprep.subr.msk.bf16.mxu0 %vm12274_vm1, %v8659_v19  ;;  %v8644_v41 = vpack.c.bf16 %v4462_v33, %v4439_v40  ;;  %v4485_v8 = vsel %vm13736_vm12, %v12259_v47, %v4480_v25  ;;  %vm13765_vm12 = vcmask 7168  }
0x119c   : > { %8642 = vmatpush1.bf16.msra.mxu1 %v8641_v53 }
0x119d   : > { %7806 = vmatmul.mubr.msk.f32.vlgmr.msra.gmra.mrb[38].mxu0 %vm13757_vm5, %v3651_v14  ;;  %8643 = vmatprep.subr.bf16.mxu1 %v13476_v42  ;;  %vm13763_vm5 = vcmask 244736  }
0x119e   : > { %8664 = vmatpush1.bf16.msk.msra.mxu0 %vm12274_vm1, %v8662_v6  ;;  %4933 = vmatprep.mubr.f32.mxu0 %v13480_v63 }
0x11a0   : > { %8646 = vmatpush1.bf16.msk.msra.mxu1 %vm10749_vm4, %v8644_v41 }
0x11a1   : > { %7809 = vmatmul.mubr.msk.f32.vlgmr.msra.gmra.mrb[40].mxu0 %vm13759_vm14, %v3651_v14  ;;  %4658 = vmatprep.subr.mxu1 %v13480_v63  ;;  %vm13764_vm14 = vcmask 236544  }
0x11a2   : > { %5234 = vmatprep.mubr.f32.mxu0 %v13480_v63 }
0x11a4   : > { %7799 = vmatpush1.msk.msra.mxu1 %vm13760_vm6, %v4485_v8  ;;  %vm13766_vm6 = vcmask 1039360  }
0x11a5   : > { %7800 = vmatmul.mubr.msk.f32.vlgmr.msra.gmra.mrb[30].mxu1 %vm13761_vm9, %v12210_v38  ;;  %vm13767_vm9 = vcmask 809984  }
0x11a6   : > { %5305 = vmatprep.mubr.f32.mxu1 %v13480_v63 }
0x11aa   : > { %v4495_v17 = vpop.permute.xlu0 %4494  ;;  %v4722_v45 = vpop.permute.xlu1 %4721 }
0x1254   : > { %v4566_v34 = vpop.f32.mrb[32].mxu0 }
0x1255   : > { %v4568_v0 = vpop.f32.mrb[33].mxu0  ;;  %v4567_v5 = vadd.f32 %v4566_v34, %v4495_v17 }
0x1256   : > { %v4569_v12 = vadd.f32 %v4568_v0, %v4495_v17 }
0x1257   : > { %v4713_v16 = vmul.f32 %v4567_v5, %v13694_v32 }
0x1258   : > { %v4714_v43 = vmul.f32 %v4569_v12, %v13695_v27 }
0x1268   : > { %v4637_v35 = vpop.f32.mrb[34].mxu0 }
0x1269   : > { %v4639_v58 = vpop.f32.mrb[35].mxu0  ;;  %v4638_v9 = vadd.f32 %v4637_v35, %v4495_v17 }
0x126a   : > { %v4640_v20 = vadd.f32 %v4639_v58, %v4495_v17 }
0x126b   : > { %v4715_v54 = vmul.f32 %v4638_v9, %v13696_v7 }
0x126c   : > { %v4793_v57 = vpop.f32.mrb[36].mxu0  ;;  %v4716_v24 = vmul.f32 %v4640_v20, %v13697_v29 }
0x126d   : > { %v4794_v47 = vadd.f32 %v4793_v57, %v4722_v45  ;;  %v4795_v3 = vpop.f32.mrb[37].mxu0 }
0x126e   : > { %v4796_v38 = vadd.f32 %v4795_v3, %v4722_v45 }
0x126f   : > { %v4940_v18 = vadd.f32 %v4794_v47, %v4713_v16  ;;  %v4953_v16 = vld [vmem:[%s13296_s13 + $0x8] sm:$0xff] }
0x1270   : > { %v4941_v52 = vadd.f32 %v4796_v38, %v4714_v43  ;;  %v4864_v23 = vpop.f32.mrb[38].mxu0 }
0x1271   : > { %v12348_v50 = vmul.f32 %v4940_v18, %v13694_v32  ;;  %v4865_v62 = vadd.f32 %v4864_v23, %v4722_v45  ;;  %v4866_v31 = vpop.f32.mrb[39].mxu0 }
0x1272   : > { %v12352_v61 = vmul.f32 %v4941_v52, %v13695_v27  ;;  %v4867_v4 = vadd.f32 %v4866_v31, %v4722_v45 }
0x1273   : > { %vm4958_vm1 = vcmp.ge.f32.partialorder %v12348_v50, 0.0  ;;  %v4964_v2 = vmul.f32 0.2, %v12348_v50  ;;  %v4942_v21 = vadd.f32 %v4865_v62, %v4715_v54 }
0x1274   : > { %vm4959_vm15 = vcmp.ge.f32.partialorder %v12352_v61, 0.0  ;;  %v4965_v55 = vmul.f32 0.2, %v12352_v61  ;;  %v4943_v37 = vadd.f32 %v4867_v4, %v4716_v24  ;;  %v4935_v13 = vpop.f32.mrb[40].mxu0 }
0x1275   : > { %v12359_v36 = vsel %vm4958_vm1, %v12348_v50, %v4964_v2  ;;  %v12362_v30 = vmul.f32 %v4942_v21, %v13696_v7  ;;  %v4937_v14 = vpop.f32.mrb[41].mxu0  ;;  %v4936_v19 = vadd.f32 %v4935_v13, %v4722_v45  ;;  %vm13768_vm1 = vcmask 801792  }
0x1276   : > { %v12365_v49 = vsel %vm4959_vm15, %v12352_v61, %v4965_v55  ;;  %5139 = vrot.lane.b32.xlu1 %v12359_v36, %s9892_s23  ;;  %v4938_v33 = vadd.f32 %v4937_v14, %v4722_v45  ;;  %v12381_v51 = vmul.f32 %v4943_v37, %v13697_v29  ;;  %vm13769_vm15 = vmmov %vm13762_vm0 }
0x1277   : > { %v9540_v26 = vpack.i.bf16 %v12365_v49, %v12359_v36  ;;  %v4966_v44 = vmul.f32 0.2, %v12362_v30  ;;  %vm4960_vm11 = vcmp.ge.f32.partialorder %v12362_v30, 0.0 }
0x1278   : > { %v4708_v59 = vpop.f32.mrb[30].mxu1  ;;  %v4967_v25 = vmul.f32 0.2, %v12381_v51  ;;  %vm4961_vm10 = vcmp.ge.f32.partialorder %v12381_v51, 0.0 }
0x1279   : > { %v4709_v22 = vadd.f32 %v4708_v59, %v4495_v17  ;;  %v4710_v48 = vpop.f32.mrb[31].mxu1  ;;  %9541 = vrot.lane.b32.xlu0 %v9540_v26, %s9887_s24  ;;  %v12377_v1 = vsel %vm4960_vm11, %v12362_v30, %v4966_v44  ;;  %vm13770_vm11 = vmmov %vm13763_vm5 }
0x127a   : > { %v4711_v15 = vadd.f32 %v4710_v48, %v4495_v17  ;;  %9546 = vrot.lane.b32.xlu1 %v9540_v26, %s9889_s18  ;;  %v9560_v41 = vpack.i.bf16 %v12377_v1, %v12365_v49  ;;  %v12393_v8 = vsel %vm4961_vm10, %v12381_v51, %v4967_v25  ;;  %vm13771_vm10 = vmmov %vm13762_vm0 }
0x127b   : > { %v4717_v53 = vmul.f32 %v4709_v22, %v13698_v46  ;;  %v9575_v34 = vpack.i.bf16 %v12393_v8, %v12377_v1  ;;  %v9585_v0 = vpack.i.bf16 %v12393_v8, %v12359_v36 }
0x127c   : > { %v4718_v39 = vmul.f32 %v4711_v15, %v13699_v60 }
0x127d   : > { %v4944_v6 = vadd.f32 %v4936_v19, %v4717_v53  ;;  %9551 = vrot.lane.b32.xlu0 %v9540_v26, %s9890_s30 }
0x127e   : > { %v4945_v40 = vadd.f32 %v4938_v33, %v4718_v39  ;;  %9556 = vrot.lane.b32.xlu1 %v9540_v26, %s9877_s16 }
0x127f   : > { %v12407_v17 = vmul.f32 %v4944_v6, %v13698_v46 }
0x1280   : > { %v12419_v58 = vmul.f32 %v4945_v40, %v13699_v60 }
0x1281   : > { %9561 = vrot.lane.b32.xlu0 %v9560_v41, %s9879_s29  ;;  %v4968_v35 = vmul.f32 0.2, %v12407_v17  ;;  %vm4962_vm2 = vcmp.ge.f32.partialorder %v12407_v17, 0.0 }
0x1282   : > { %5141 = vrot.lane.b32.xlu1 %v12365_v49, %s9892_s23  ;;  %v4969_v12 = vmul.f32 0.2, %v12419_v58  ;;  %vm4963_vm3 = vcmp.ge.f32.partialorder %v12419_v58, 0.0 }
0x1283   : > { %v12416_v5 = vsel %vm4962_vm2, %v12407_v17, %v4968_v35  ;;  %vm13772_vm2 = vmmov %vm13763_vm5 }
0x1284   : > { %v12432_v45 = vsel %vm4963_vm3, %v12419_v58, %v4969_v12  ;;  %vm13773_vm3 = vmmov %vm13766_vm6 }
0x1285   : > { %9566 = vrot.lane.b32.xlu0 %v9560_v41, %s9888_s0  ;;  %v9610_v57 = vpack.i.bf16 %v12432_v45, %v12416_v5 }
0x1286   : > { %9571 = vrot.lane.b32.xlu1 %v9560_v41, %s9891_s22 }
0x1289   : > { %5143 = vrot.lane.b32.xlu0 %v12377_v1, %s9892_s23 }
0x128a   : > { %9576 = vrot.lane.b32.xlu1 %v9575_v34, %s9887_s24 }
0x128d   : > { %9581 = vrot.lane.b32.xlu0 %v9575_v34, %s9889_s18 }
0x128e   : > { %9586 = vrot.lane.b32.xlu1 %v9585_v0, %s9879_s29 }
0x1291   : > { %9591 = vrot.lane.b32.xlu0 %v9575_v34, %s9890_s30 }
0x1292   : > { %9596 = vrot.lane.b32.xlu1 %v9575_v34, %s9877_s16 }
0x1295   : > { %9601 = vrot.lane.b32.xlu0 %v9585_v0, %s9888_s0 }
0x1296   : > { %9606 = vrot.lane.b32.xlu1 %v9585_v0, %s9891_s22 }
0x1299   : > { %5077 = vrot.lane.b32.xlu0 %v12416_v5, %s9879_s29 }
0x129a   : > { %4989 = vrot.lane.b32.xlu1 %v12416_v5, %s9887_s24 }
0x129d   : > { %5010 = vrot.lane.b32.xlu0 %v12416_v5, %s9889_s18 }
0x129e   : > { %5124 = vrot.lane.b32.xlu1 %v12416_v5, %s9891_s22 }
0x12a1   : > { %5101 = vrot.lane.b32.xlu0 %v12416_v5, %s9888_s0 }
0x12a2   : > { %5031 = vrot.lane.b32.xlu1 %v12416_v5, %s9890_s30 }
0x12a5   : > { %9611 = vrot.lane.b32.xlu0 %v9610_v57, %s9877_s16 }
0x12a6   : > { %5145 = vrot.lane.b32.xlu1 %v12393_v8, %s9892_s23 }
0x12a9   : > { %5147 = vrot.lane.b32.xlu0 %v12416_v5, %s9892_s23 }
0x12aa   : > { %5103 = vrot.lane.b32.xlu1 %v12432_v45, %s9888_s0 }
0x12ad   : > { %5079 = vrot.lane.b32.xlu0 %v12432_v45, %s9879_s29 }
0x12ae   : > { %5149 = vrot.lane.b32.xlu1 %v12432_v45, %s9892_s23 }
0x12b1   : > { %5126 = vrot.lane.b32.xlu0 %v12432_v45, %s9891_s22 }
0x12b5   : > { %5164 = vperm.xlu0 %8898, %v4953_v16  }
0x12e8   : > { %v12456_v9 = vpop.permute.xlu1 %5139 }
0x12eb   : > { %v9542_v47 = vpop.permute.xlu0 %9541 }
0x12ec   : > { %v9544_v3 = vunpack.i.h.bf16 %v9542_v47  ;;  %v9543_v43 = vunpack.i.l.bf16 %v9542_v47  ;;  %v9547_v20 = vpop.permute.xlu1 %9546 }
0x12ed   : > { %v9549_v38 = vunpack.i.h.bf16 %v9547_v20  ;;  %v9548_v18 = vunpack.i.l.bf16 %v9547_v20 }
0x12ee   : > { %v4991_v52 = vsel %vm13762_vm0, %v9543_v43, %v9544_v3  ;;  %vm13774_vm0 = vmmov %vm13764_vm14 }
0x12ef   : > { %v9552_v23 = vpop.permute.xlu0 %9551  ;;  %v5012_v54 = vsel %vm13763_vm5, %v9548_v18, %v9549_v38  ;;  %v8667_v2 = vpack.c.bf16 %v9548_v18, %v9543_v43  ;;  %vm13775_vm5 = vmmov %vm13774_vm0 }
0x12f0   : > { %v9554_v62 = vunpack.i.h.bf16 %v9552_v23  ;;  %v9553_v31 = vunpack.i.l.bf16 %v9552_v23  ;;  %v9557_v24 = vpop.permute.xlu1 %9556  ;;  %v8665_v4 = vpack.c.bf16 %v5012_v54, %v4991_v52 }
0x12f1   : > { %v9559_v21 = vunpack.i.h.bf16 %v9557_v24  ;;  %v9558_v55 = vunpack.i.l.bf16 %v9557_v24 }
0x12f2   : > { %8666 = vmatprep.subr.bf16.mxu0 %v8665_v4  ;;  %v5033_v37 = vsel %vm13764_vm14, %v9553_v31, %v9554_v62  ;;  %vm13776_vm14 = vmmov %vm13765_vm12 }
0x12f3   : > { %v12461_v13 = vpop.permute.xlu0 %9561  ;;  %8669 = vmatpush1.bf16.msk.msra.mxu0 %vm13703_vm7, %v8667_v2  ;;  %v5057_v14 = vsel %vm13765_vm12, %v9558_v55, %v9559_v21  ;;  %v8672_v48 = vpack.c.bf16 %v9558_v55, %v9553_v31 }
0x12f4   : > { %v9564_v26 = vunpack.i.h.bf16 %v12461_v13  ;;  %v9563_v44 = vunpack.i.l.bf16 %v12461_v13  ;;  %v12468_v59 = vpop.permute.xlu1 %5141  ;;  %v8670_v22 = vpack.c.bf16 %v5057_v14, %v5033_v37 }
0x12f6   : > { %8671 = vmatprep.subr.bf16.mxu0 %v8670_v22  ;;  %v5082_v15 = vsel %vm13766_vm6, %v9563_v44, %v9564_v26  ;;  %vm13777_vm6 = vmmov %vm13767_vm9 }
0x12f7   : > { %v12471_v19 = vpop.permute.xlu0 %9566  ;;  %8674 = vmatpush1.bf16.msk.msra.mxu0 %vm13707_vm13, %v8672_v48  ;;  %v8675_v53 = vpack.c.bf16 %v5082_v15, %v12365_v49 }
0x12f8   : > { %v12476_v33 = vpop.permute.xlu1 %9571  ;;  %v9569_v40 = vunpack.i.h.bf16 %v12471_v19  ;;  %v9568_v41 = vunpack.i.l.bf16 %v12471_v19 }
0x12f9   : > { %8676 = vmatprep.subr.bf16.mxu0 %v8675_v53  ;;  %v9574_v25 = vunpack.i.h.bf16 %v12476_v33  ;;  %v9573_v34 = vunpack.i.l.bf16 %v12476_v33 }
0x12fa   : > { %v5106_v43 = vsel %vm13767_vm9, %v9568_v41, %v9569_v40  ;;  %vm13778_vm9 = vmmov %vm13773_vm3 }
0x12fb   : > { %v12478_v39 = vpop.permute.xlu0 %5143  ;;  %v5129_v20 = vsel %vm13768_vm1, %v9573_v34, %v9574_v25 }
0x12fc   : > { %v12480_v6 = vpop.permute.xlu1 %9576  ;;  %v8679_v22 = vpack.c.bf16 %v5129_v20, %v5106_v43 }
0x12fd   : > { %v9579_v0 = vunpack.i.h.bf16 %v12480_v6  ;;  %v9578_v35 = vunpack.i.l.bf16 %v12480_v6 }
0x12ff   : > { %v9582_v49 = vpop.permute.xlu0 %9581  ;;  %v4992_v18 = vsel %vm13769_vm15, %v9544_v3, %v9578_v35  ;;  %v4993_v23 = vsel %vm13771_vm10, %v9578_v35, %v9579_v0  ;;  %vm13779_vm15 = vmmov %vm13773_vm3 }
0x1300   : > { %v9584_v12 = vunpack.i.h.bf16 %v9582_v49  ;;  %v9583_v57 = vunpack.i.l.bf16 %v9582_v49  ;;  %v9587_v16 = vpop.permute.xlu1 %9586 }
0x1301   : > { %v9588_v47 = vunpack.i.l.bf16 %v9587_v16  ;;  %v9589_v15 = vunpack.i.h.bf16 %v9587_v16 }
0x1302   : > { %v5013_v52 = vsel %vm13770_vm11, %v9549_v38, %v9583_v57  ;;  %v5014_v54 = vsel %vm13772_vm2, %v9583_v57, %v9584_v12  ;;  %vm13780_vm11 = vcmask 793600  }
0x1303   : > { %v5081_v31 = vsel %vm13773_vm3, %v9588_v47, %v9563_v44  ;;  %v12499_v24 = vpop.permute.xlu0 %9591  ;;  %v8683_v4 = vpack.c.bf16 %v5014_v54, %v4993_v23  ;;  %v8685_v2 = vpack.c.bf16 %v5013_v52, %v4992_v18  ;;  %v5083_v20 = vsel %vm13778_vm9, %v9564_v26, %v9589_v15  ;;  %vm13781_vm3 = vmmov %vm13780_vm11 }
0x1304   : > { %v9594_v55 = vunpack.i.h.bf16 %v12499_v24  ;;  %v9593_v37 = vunpack.i.l.bf16 %v12499_v24  ;;  %v12503_v13 = vpop.permute.xlu1 %9596  ;;  %v8677_v3 = vpack.c.bf16 %v5081_v31, %v12359_v36  ;;  %v5152_v31 = vsel %vm13780_vm11, %v12468_v59, %v12478_v39  ;;  %vm13790_vm11 = vmmov %vm13781_vm3 }
0x1305   : > { %v9599_v38 = vunpack.i.h.bf16 %v12503_v13  ;;  %v9598_v14 = vunpack.i.l.bf16 %v12503_v13  ;;  %8684 = vmatprep.subr.bf16.mxu1 %v8683_v4  ;;  %vm13787_vm9 = vcmask 236544  }
0x1306   : > { %v5034_v44 = vsel %vm13774_vm0, %v9554_v62, %v9593_v37  ;;  %8678 = vmatpush1.bf16.msra.mxu0 %v8677_v3  ;;  %8686 = vmatpush1.bf16.msra.mxu1 %v8685_v2  ;;  %v5035_v48 = vsel %vm13775_vm5, %v9593_v37, %v9594_v55  ;;  %vm13782_vm0 = vmmov %vm13777_vm6 }
0x1307   : > { %v5058_v53 = vsel %vm13776_vm14, %v9559_v21, %v9598_v14  ;;  %v9602_v6 = vpop.permute.xlu0 %9601  ;;  %8680 = vmatprep.subr.bf16.mxu0 %v8679_v22  ;;  %v5059_v36 = vsel %vm13765_vm12, %v9598_v14, %v9599_v38  ;;  %vm13783_vm5 = vmmov %vm13768_vm1  ;;  %vm13784_vm14 = vcmask 588800  }
0x1308   : > { %v9603_v35 = vunpack.i.l.bf16 %v9602_v6  ;;  %v9607_v49 = vpop.permute.xlu1 %9606  ;;  %v8687_v57 = vpack.c.bf16 %v5059_v36, %v5035_v48  ;;  %v8689_v47 = vpack.c.bf16 %v5058_v53, %v5034_v44  ;;  %v9604_v4 = vunpack.i.h.bf16 %v9602_v6  ;;  %vm13785_vm12 = vmmov %vm13768_vm1 }
0x1309   : > { %v9608_v62 = vunpack.i.l.bf16 %v9607_v49  ;;  %v9609_v2 = vunpack.i.h.bf16 %v9607_v49 }
0x130a   : > { %v5105_v43 = vsel %vm13777_vm6, %v9603_v35, %v9568_v41  ;;  %8688 = vmatprep.subr.bf16.mxu1 %v8687_v57  ;;  %v8693_v41 = vpack.c.bf16 %v5083_v20, %v12377_v1  ;;  %v5151_v1 = vsel %vm13781_vm3, %v12456_v9, %v12468_v59  ;;  %v5107_v44 = vsel %vm13782_vm0, %v9569_v40, %v9604_v4  ;;  %vm13786_vm6 = vmmov %vm13782_vm0 }
0x130b   : > { %v5128_v16 = vsel %vm13768_vm1, %v9608_v62, %v9573_v34  ;;  %v5078_v18 = vpop.permute.xlu0 %5077  ;;  %8690 = vmatpush1.bf16.msra.mxu1 %v8689_v47  ;;  %vm13788_vm1 = vcmask 7168  }
0x130c   : > { %v5084_v21 = vsel %vm13779_vm15, %v9589_v15, %v5078_v18  ;;  %v4990_v52 = vpop.permute.xlu1 %4989  ;;  %v8681_v23 = vpack.c.bf16 %v5128_v16, %v5105_v43  ;;  %vm13789_vm15 = vmmov %vm13788_vm1 }
0x130d   : > { %v8691_v54 = vpack.c.bf16 %v5084_v21, %v12393_v8  ;;  %v4994_v34 = vsel %vm13771_vm10, %v9579_v0, %v4990_v52  ;;  %v4952_v8 = vld [vmem:[%s13296_s13] sm:$0xff]  ;;  %v5130_v0 = vsel %vm13783_vm5, %v9574_v25, %v9609_v2  ;;  %vm13791_vm10 = vmmov %vm13781_vm3  ;;  %vm13793_vm3 = vcmask 1039360  }
0x130e   : > { %8682 = vmatpush1.bf16.msra.mxu0 %v8681_v23  ;;  %v8697_v59 = vpack.c.bf16 %v5130_v0, %v5107_v44 }
0x130f   : > { %v5011_v26 = vpop.permute.xlu0 %5010  ;;  %5186 = vmatprep.subr.mxu0 %v5152_v31  ;;  %8692 = vmatprep.subr.bf16.mxu1 %v8691_v54 }
0x1310   : > { %v5015_v37 = vsel %vm13772_vm2, %v9584_v12, %v5011_v26  ;;  %v8699_v3 = vpack.c.bf16 %v5011_v26, %v4990_v52  ;;  %v5125_v14 = vpop.permute.xlu1 %5124  ;;  %8694 = vmatpush1.bf16.msra.mxu1 %v8693_v41  ;;  %vm13792_vm2 = vmmov %vm13784_vm14 }
0x1311   : > { %v8701_v22 = vpack.c.bf16 %v5015_v37, %v4994_v34  ;;  %v5131_v48 = vsel %vm13785_vm12, %v9609_v2, %v5125_v14  ;;  %vm13795_vm12 = vcmask 957440  }
0x1312   : > { %5187 = vmatpush1.msra.mxu0 %v5151_v1 }
0x1313   : > { %v5102_v12 = vpop.permute.xlu0 %5101  ;;  %7818 = vmatmul.mubr.msk.f32.vlgmr.msra.gmra.mrb[42].mxu0 %vm13784_vm14, %v4952_v8  ;;  %8700 = vmatprep.subr.bf16.mxu0 %v8699_v3  ;;  %vm13794_vm14 = vmmov %vm13791_vm10 }
0x1314   : > { %v5108_v15 = vsel %vm13786_vm6, %v9604_v4, %v5102_v12  ;;  %v5032_v53 = vpop.permute.xlu1 %5031  ;;  %8702 = vmatpush1.bf16.msra.mxu0 %v8701_v22  ;;  %5376 = vmatprep.mubr.f32.mxu0 %v13480_v63  ;;  %vm13796_vm6 = vmmov %vm13792_vm2 }
0x1315   : > { %v8695_v9 = vpack.c.bf16 %v5131_v48, %v5108_v15  ;;  %v5036_v25 = vsel %vm13787_vm9, %v9594_v55, %v5032_v53 }
0x1317   : > { %v9612_v19 = vpop.permute.xlu0 %9611  ;;  %8696 = vmatprep.subr.bf16.mxu1 %v8695_v9 }
0x1318   : > { %v9614_v40 = vunpack.i.h.bf16 %v9612_v19  ;;  %v9613_v33 = vunpack.i.l.bf16 %v9612_v19  ;;  %8698 = vmatpush1.bf16.msra.mxu1 %v8697_v59  ;;  %v5146_v36 = vpop.permute.xlu1 %5145 }
0x1319   : > { %v5153_v43 = vsel %vm13791_vm10, %v12478_v39, %v5146_v36 }
0x131a   : > { %v5060_v6 = vsel %vm13788_vm1, %v9599_v38, %v9613_v33  ;;  %v5061_v35 = vsel %vm13789_vm15, %v9613_v33, %v9614_v40 }
0x131b   : > { %v5148_v49 = vpop.permute.xlu0 %5147  ;;  %v8703_v57 = vpack.c.bf16 %v5061_v35, %v5032_v53  ;;  %v8705_v47 = vpack.c.bf16 %v5060_v6, %v5036_v25 }
0x131c   : > { %v5154_v62 = vsel %vm13790_vm11, %v5146_v36, %v5148_v49  ;;  %v5104_v38 = vpop.permute.xlu1 %5103 }
0x131d   : > { %5257 = vmatprep.subr.mxu1 %v5154_v62  ;;  %8704 = vmatprep.subr.bf16.mxu0 %v8703_v57  ;;  %v5109_v39 = vsel %vm13782_vm0, %v5102_v12, %v5104_v38  ;;  %vm13798_vm0 = vcmask 244736  }
0x131e   : > { %5258 = vmatpush1.msra.mxu1 %v5153_v43  ;;  %8706 = vmatpush1.bf16.msra.mxu0 %v8705_v47 }
0x131f   : > { %v5080_v24 = vpop.permute.xlu0 %5079  ;;  %7819 = vmatmul.mubr.msk.f32.vlgmr.msra.gmra.mrb[32].mxu1 %vm13792_vm2, %v4952_v8 }
0x1320   : > { %v5085_v55 = vsel %vm13793_vm3, %v5078_v18, %v5080_v24  ;;  %v8707_v13 = vpack.c.bf16 %v5080_v24, %v12432_v45  ;;  %5665 = vmatprep.mubr.f32.mxu1 %v13480_v63  ;;  %v5150_v18 = vpop.permute.xlu1 %5149  ;;  %vm13797_vm3 = vcmask 252928  }
0x1321   : > { %v8710_v20 = vpack.c.bf16 %v5085_v55, %v12416_v5  ;;  %v5155_v5 = vsel %vm13794_vm14, %v5148_v49, %v5150_v18  ;;  %v4955_v55 = vld [vmem:[%s13296_s13 + $0x18] sm:$0xff]  ;;  %vm13800_vm14 = vcmask 7168  }
0x1322   : > { %8709 = vmatprep.subr.msk.bf16.mxu0 %vm11412_vm8, %v8707_v13  ;;  %v4957_v13 = vld [vmem:[%s13296_s13 + $0x28] sm:$0xff] }
0x1323   : > { %v5127_v16 = vpop.permute.xlu0 %5126  ;;  %8711 = vmatpush1.bf16.msra.mxu0 %v8710_v20 }
0x1324   : > { %v5132_v21 = vsel %vm13783_vm5, %v5125_v14, %v5127_v16  ;;  %8712 = vmatprep.subr.bf16.mxu0 %v13476_v42  ;;  %vm13799_vm5 = vcmask 236544  }
0x1325   : > { %v8713_v52 = vpack.c.bf16 %v5132_v21, %v5109_v39 }
0x1327   : > { %8715 = vmatpush1.bf16.msk.msra.mxu0 %vm10749_vm4, %v8713_v52 }
0x1328   : > { %5328 = vmatprep.subr.mxu0 %v13480_v63 }
0x132b   : > { %7823 = vmatpush1.msk.msra.mxu0 %vm13795_vm12, %v5155_v5  ;;  %vm13801_vm12 = vcmask 801792  }
0x132c   : > { %7824 = vmatmul.mubr.msk.f32.vlgmr.msra.gmra.mrb[44].mxu0 %vm13796_vm6, %v4952_v8  ;;  %vm13802_vm6 = vcmask 1039360  }
0x132d   : > { %5736 = vmatprep.mubr.f32.mxu0 %v13480_v63 }
0x1334   : > { %v5165_v45 = vpop.permute.xlu0 %5164 }
0x13e6   : > { %v5236_v23 = vpop.f32.mrb[42].mxu0 }
0x13e7   : > { %v5237_v54 = vadd.f32 %v5236_v23, %v5165_v45  ;;  %v5238_v31 = vpop.f32.mrb[43].mxu0 }
0x13e8   : > { %v5239_v41 = vadd.f32 %v5238_v31, %v5165_v45 }
0x13e9   : > { %v5383_v4 = vmul.f32 %v5237_v54, %v13694_v32 }
0x13ea   : > { %v5384_v2 = vmul.f32 %v5239_v41, %v13695_v27 }
0x13eb   : > { %vm5389_vm9 = vcmp.ge.f32.partialorder %v5383_v4, 0.0  ;;  %v5395_v26 = vmul.f32 0.2, %v5383_v4 }
0x13ec   : > { %v5396_v37 = vmul.f32 0.2, %v5384_v2  ;;  %vm5390_vm1 = vcmp.ge.f32.partialorder %v5384_v2, 0.0 }
0x13ed   : > { %v12572_v34 = vsel %vm5389_vm9, %v5383_v4, %v5395_v26  ;;  %vm13803_vm9 = vmmov %vm13802_vm6 }
0x13ee   : > { %5524 = vrot.lane.b32.xlu0 %v12572_v34, %s9888_s0  ;;  %5500 = vrot.lane.b32.xlu1 %v12572_v34, %s9879_s29  ;;  %v12578_v3 = vsel %vm5390_vm1, %v5384_v2, %v5396_v37  ;;  %vm13804_vm1 = vcmask 809984  }
0x13ef   : > { %v9615_v44 = vpack.i.bf16 %v12578_v3, %v12572_v34 }
0x13f2   : > { %v5307_v14 = vpop.f32.mrb[32].mxu1  ;;  %5572 = vrot.lane.b32.xlu0 %v12578_v3, %s9892_s23  ;;  %5547 = vrot.lane.b32.xlu1 %v12572_v34, %s9891_s22 }
0x13f3   : > { %v5308_v8 = vadd.f32 %v5307_v14, %v5165_v45  ;;  %v5309_v22 = vpop.f32.mrb[33].mxu1 }
0x13f4   : > { %v5310_v1 = vadd.f32 %v5309_v22, %v5165_v45 }
0x13f5   : > { %v5385_v0 = vmul.f32 %v5308_v8, %v13696_v7 }
0x13f6   : > { %9616 = vrot.lane.b32.xlu1 %v9615_v44, %s9887_s24  ;;  %v5386_v48 = vmul.f32 %v5310_v1, %v13697_v29 }
0x13f7   : > { %vm5391_vm15 = vcmp.ge.f32.partialorder %v5385_v0, 0.0  ;;  %v5397_v12 = vmul.f32 0.2, %v5385_v0 }
0x13f8   : > { %v5398_v9 = vmul.f32 0.2, %v5386_v48  ;;  %vm5392_vm11 = vcmp.ge.f32.partialorder %v5386_v48, 0.0 }
0x13f9   : > { %v12589_v15 = vsel %vm5391_vm15, %v5385_v0, %v5397_v12  ;;  %vm13805_vm15 = vmmov %vm13797_vm3 }
0x13fa   : > { %9621 = vrot.lane.b32.xlu1 %v9615_v44, %s9889_s18  ;;  %v9640_v53 = vpack.i.bf16 %v12589_v15, %v12578_v3  ;;  %v12596_v59 = vsel %vm5392_vm11, %v5386_v48, %v5398_v9  ;;  %vm13806_vm11 = vmmov %vm13798_vm0 }
0x13fb   : > { %v9650_v6 = vpack.i.bf16 %v12596_v59, %v12589_v15 }
0x13fc   : > { %9641 = vrot.lane.b32.xlu0 %v9640_v53, %s9888_s0 }
0x13fe   : > { %9626 = vrot.lane.b32.xlu1 %v9615_v44, %s9890_s30 }
0x13ff   : > { %v5378_v19 = vpop.f32.mrb[44].mxu0 }
0x1400   : > { %v5379_v40 = vadd.f32 %v5378_v19, %v5165_v45  ;;  %v5380_v33 = vpop.f32.mrb[45].mxu0  ;;  %9646 = vrot.lane.b32.xlu0 %v9640_v53, %s9891_s22 }
0x1401   : > { %v5381_v57 = vadd.f32 %v5380_v33, %v5165_v45 }
0x1402   : > { %v5387_v25 = vmul.f32 %v5379_v40, %v13698_v46  ;;  %9631 = vrot.lane.b32.xlu1 %v9615_v44, %s9877_s16 }
0x1403   : > { %v5388_v47 = vmul.f32 %v5381_v57, %v13699_v60 }
0x1404   : > { %9651 = vrot.lane.b32.xlu0 %v9650_v6, %s9887_s24  ;;  %v5399_v36 = vmul.f32 0.2, %v5387_v25  ;;  %vm5393_vm10 = vcmp.ge.f32.partialorder %v5387_v25, 0.0 }
0x1405   : > { %v5400_v62 = vmul.f32 0.2, %v5388_v47  ;;  %vm5394_vm2 = vcmp.ge.f32.partialorder %v5388_v47, 0.0 }
0x1406   : > { %9636 = vrot.lane.b32.xlu1 %v9640_v53, %s9879_s29  ;;  %v12606_v35 = vsel %vm5393_vm10, %v5387_v25, %v5399_v36  ;;  %vm13807_vm10 = vmmov %vm13797_vm3 }
0x1407   : > { %v9675_v49 = vpack.i.bf16 %v12606_v35, %v12596_v59  ;;  %v12622_v43 = vsel %vm5394_vm2, %v5388_v47, %v5400_v62  ;;  %vm13808_vm2 = vmmov %vm13798_vm0 }
0x1408   : > { %9656 = vrot.lane.b32.xlu0 %v9650_v6, %s9889_s18  ;;  %v9685_v24 = vpack.i.bf16 %v12622_v43, %v12606_v35 }
0x140a   : > { %5574 = vrot.lane.b32.xlu1 %v12589_v15, %s9892_s23 }
0x140c   : > { %9661 = vrot.lane.b32.xlu0 %v9650_v6, %s9890_s30 }
0x140e   : > { %9676 = vrot.lane.b32.xlu1 %v9675_v49, %s9888_s0 }
0x1410   : > { %9666 = vrot.lane.b32.xlu0 %v9650_v6, %s9877_s16 }
0x1412   : > { %9681 = vrot.lane.b32.xlu1 %v9675_v49, %s9891_s22 }
0x1414   : > { %9671 = vrot.lane.b32.xlu0 %v9675_v49, %s9879_s29 }
0x1416   : > { %5578 = vrot.lane.b32.xlu1 %v12606_v35, %s9892_s23 }
0x1418   : > { %5576 = vrot.lane.b32.xlu0 %v12596_v59, %s9892_s23 }
0x141a   : > { %5441 = vrot.lane.b32.xlu1 %v12606_v35, %s9889_s18 }
0x141c   : > { %5570 = vrot.lane.b32.xlu0 %v12572_v34, %s9892_s23 }
0x141e   : > { %9686 = vrot.lane.b32.xlu1 %v9685_v24, %s9877_s16 }
0x1420   : > { %5420 = vrot.lane.b32.xlu0 %v12606_v35, %s9887_s24 }
0x1422   : > { %5510 = vrot.lane.b32.xlu1 %v12622_v43, %s9879_s29 }
0x1424   : > { %5462 = vrot.lane.b32.xlu0 %v12606_v35, %s9890_s30 }
0x1426   : > { %5557 = vrot.lane.b32.xlu1 %v12622_v43, %s9891_s22 }
0x1428   : > { %5534 = vrot.lane.b32.xlu0 %v12622_v43, %s9888_s0 }
0x142a   : > { %5595 = vperm.xlu1 %8899, %v4955_v55  }
0x142c   : > { %5580 = vrot.lane.b32.xlu0 %v12622_v43, %s9892_s23 }
0x1430   : > { %5822 = vperm.xlu0 %8898, %v4957_v13  }
0x1460   : > { %v5501_v38 = vpop.permute.xlu1 %5500  ;;  %v5525_v20 = vpop.permute.xlu0 %5524 }
0x1464   : > { %v5548_v16 = vpop.permute.xlu1 %5547  ;;  %v12649_v21 = vpop.permute.xlu0 %5572 }
0x1468   : > { %v9617_v39 = vpop.permute.xlu1 %9616 }
0x1469   : > { %v9619_v52 = vunpack.i.h.bf16 %v9617_v39  ;;  %v9618_v18 = vunpack.i.l.bf16 %v9617_v39 }
0x146b   : > { %v5422_v31 = vsel %vm13797_vm3, %v9618_v18, %v9619_v52  ;;  %vm13809_vm3 = vmmov %vm13801_vm12 }
0x146c   : > { %v9622_v5 = vpop.permute.xlu1 %9621 }
0x146d   : > { %v9624_v45 = vunpack.i.h.bf16 %v9622_v5  ;;  %v9623_v23 = vunpack.i.l.bf16 %v9622_v5 }
0x146e   : > { %v12651_v54 = vpop.permute.xlu0 %9641 }
0x146f   : > { %v5443_v41 = vsel %vm13798_vm0, %v9623_v23, %v9624_v45  ;;  %v8718_v26 = vpack.c.bf16 %v9623_v23, %v9618_v18  ;;  %v9644_v19 = vunpack.i.h.bf16 %v12651_v54  ;;  %v9643_v40 = vunpack.i.l.bf16 %v12651_v54  ;;  %vm13810_vm0 = vmmov %vm13804_vm1 }
0x1470   : > { %v12655_v4 = vpop.permute.xlu1 %9626  ;;  %v8716_v2 = vpack.c.bf16 %v5443_v41, %v5422_v31 }
0x1471   : > { %v9629_v14 = vunpack.i.h.bf16 %v12655_v4  ;;  %v9628_v8 = vunpack.i.l.bf16 %v12655_v4  ;;  %v5537_v41 = vsel %vm13804_vm1, %v9643_v40, %v9644_v19  ;;  %vm13816_vm1 = vcmask 1039360  }
0x1472   : > { %v12657_v37 = vpop.permute.xlu0 %9646  ;;  %8717 = vmatprep.subr.bf16.mxu1 %v8716_v2 }
0x1473   : > { %8720 = vmatpush1.bf16.msk.msra.mxu1 %vm13703_vm7, %v8718_v26  ;;  %v9649_v0 = vunpack.i.h.bf16 %v12657_v37  ;;  %v9648_v12 = vunpack.i.l.bf16 %v12657_v37  ;;  %v5464_v53 = vsel %vm13799_vm5, %v9628_v8, %v9629_v14  ;;  %vm13811_vm5 = vcmask 793600  }
0x1474   : > { %v9632_v22 = vpop.permute.xlu1 %9631 }
0x1475   : > { %v9634_v1 = vunpack.i.h.bf16 %v9632_v22  ;;  %v9633_v44 = vunpack.i.l.bf16 %v9632_v22  ;;  %v5560_v24 = vsel %vm13801_vm12, %v9648_v12, %v9649_v0  ;;  %v5559_v26 = vsel %vm13809_vm3, %v5548_v16, %v9648_v12 }
0x1476   : > { %v12665_v48 = vpop.permute.xlu0 %9651 }
0x1477   : > { %v5488_v9 = vsel %vm13800_vm14, %v9633_v44, %v9634_v1  ;;  %v8723_v33 = vpack.c.bf16 %v9633_v44, %v9628_v8  ;;  %v9654_v36 = vunpack.i.h.bf16 %v12665_v48  ;;  %v9653_v49 = vunpack.i.l.bf16 %v12665_v48 }
0x1478   : > { %v9637_v25 = vpop.permute.xlu1 %9636  ;;  %v8721_v6 = vpack.c.bf16 %v5488_v9, %v5464_v53  ;;  %v8730_v44 = vpack.c.bf16 %v5560_v24, %v5537_v41  ;;  %vm13812_vm14 = vcmask 236544  }
0x1479   : > { %v9639_v57 = vunpack.i.h.bf16 %v9637_v25  ;;  %v9638_v47 = vunpack.i.l.bf16 %v9637_v25  ;;  %v5424_v2 = vsel %vm13807_vm10, %v9653_v49, %v9654_v36  ;;  %vm13813_vm12 = vmmov %vm13812_vm14 }
0x147a   : > { %v12673_v62 = vpop.permute.xlu0 %9656  ;;  %8722 = vmatprep.subr.bf16.mxu1 %v8721_v6  ;;  %vm13819_vm10 = vmmov %vm13810_vm0 }
0x147b   : > { %v5512_v55 = vsel %vm13802_vm6, %v5501_v38, %v9638_v47  ;;  %v9659_v13 = vunpack.i.h.bf16 %v12673_v62  ;;  %v9658_v39 = vunpack.i.l.bf16 %v12673_v62  ;;  %8725 = vmatpush1.bf16.msk.msra.mxu1 %vm13707_vm13, %v8723_v33  ;;  %v5513_v18 = vsel %vm13803_vm9, %v9638_v47, %v9639_v57 }
0x147c   : > { %v8728_v5 = vpack.c.bf16 %v5512_v55, %v12572_v34  ;;  %v12685_v23 = vpop.permute.xlu1 %5574  ;;  %v8726_v31 = vpack.c.bf16 %v5513_v18, %v12578_v3  ;;  %v5423_v38 = vsel %vm13805_vm15, %v9619_v52, %v9653_v49  ;;  %v5536_v52 = vsel %vm13810_vm0, %v5525_v20, %v9643_v40  ;;  %vm13817_vm15 = vmmov %vm13816_vm1 }
0x147d   : > { %v5444_v4 = vsel %vm13806_vm11, %v9624_v45, %v9658_v39  ;;  %v5445_v34 = vsel %vm13808_vm2, %v9658_v39, %v9659_v13  ;;  %v8732_v33 = vpack.c.bf16 %v5559_v26, %v5536_v52  ;;  %v5583_v20 = vsel %vm13811_vm5, %v12649_v21, %v12685_v23  ;;  %vm13818_vm11 = vmmov %vm13809_vm3 }
0x147e   : > { %v8736_v8 = vpack.c.bf16 %v5444_v4, %v5423_v38  ;;  %v12700_v3 = vpop.permute.xlu0 %9661  ;;  %8727 = vmatprep.subr.bf16.mxu1 %v8726_v31  ;;  %v8734_v22 = vpack.c.bf16 %v5445_v34, %v5424_v2  ;;  %vm13814_vm6 = vcmask 7168   ;;  %vm13820_vm2 = vmmov %vm13809_vm3 }
0x147f   : > { %8729 = vmatpush1.bf16.msra.mxu1 %v8728_v5  ;;  %v9664_v45 = vunpack.i.h.bf16 %v12700_v3  ;;  %v9663_v53 = vunpack.i.l.bf16 %v12700_v3  ;;  %vm13815_vm9 = vmmov %vm13814_vm6 }
0x1480   : > { %8735 = vmatprep.subr.bf16.mxu0 %v8734_v22  ;;  %v12705_v9 = vpop.permute.xlu1 %9676  ;;  %8731 = vmatprep.subr.bf16.mxu1 %v8730_v44  ;;  %vm13821_vm3 = vmmov %vm13810_vm0 }
0x1481   : > { %8737 = vmatpush1.bf16.msra.mxu0 %v8736_v8  ;;  %v5465_v40 = vsel %vm13812_vm14, %v9629_v14, %v9663_v53  ;;  %v5466_v49 = vsel %vm13813_vm12, %v9663_v53, %v9664_v45  ;;  %v9679_v31 = vunpack.i.h.bf16 %v12705_v9  ;;  %v9678_v41 = vunpack.i.l.bf16 %v12705_v9  ;;  %vm13822_vm0 = vmmov %vm13811_vm5 }
0x1482   : > { %v12707_v16 = vpop.permute.xlu0 %9666  ;;  %vm13823_vm5 = vcmask 588800   ;;  %vm13824_vm14 = vmmov %vm13822_vm0  ;;  %vm13825_vm12 = vcmask 244736  }
0x1483   : > { %v9669_v12 = vunpack.i.h.bf16 %v12707_v16  ;;  %v9668_v25 = vunpack.i.l.bf16 %v12707_v16  ;;  %8733 = vmatpush1.bf16.msra.mxu1 %v8732_v33  ;;  %v5539_v52 = vsel %vm13819_vm10, %v9678_v41, %v9679_v31 }
0x1484   : > { %v12715_v6 = vpop.permute.xlu1 %9681  ;;  %5617 = vmatprep.subr.mxu1 %v5583_v20 }
0x1485   : > { %v5489_v47 = vsel %vm13814_vm6, %v9634_v1, %v9668_v25  ;;  %v9684_v24 = vunpack.i.h.bf16 %v12715_v6  ;;  %v9683_v55 = vunpack.i.l.bf16 %v12715_v6  ;;  %v5490_v39 = vsel %vm13815_vm9, %v9668_v25, %v9669_v12  ;;  %vm13827_vm9 = vmmov %vm13822_vm0 }
0x1486   : > { %v8740_v18 = vpack.c.bf16 %v5489_v47, %v5465_v40  ;;  %v9672_v5 = vpop.permute.xlu0 %9671  ;;  %v8738_v14 = vpack.c.bf16 %v5490_v39, %v5466_v49  ;;  %v5538_v25 = vsel %vm13821_vm3, %v9644_v19, %v9678_v41  ;;  %vm13826_vm6 = vcmask 252928  }
0x1487   : > { %v9674_v38 = vunpack.i.h.bf16 %v9672_v5  ;;  %v9673_v4 = vunpack.i.l.bf16 %v9672_v5  ;;  %v5562_v26 = vsel %vm13818_vm11, %v9683_v55, %v9684_v24  ;;  %vm13830_vm11 = vcmask 236544  }
0x1488   : > { %v12728_v2 = vpop.permute.xlu1 %5578  ;;  %8739 = vmatprep.subr.bf16.mxu0 %v8738_v14  ;;  %v8746_v33 = vpack.c.bf16 %v5562_v26, %v5539_v52  ;;  %vm13833_vm3 = vcmask 64512  }
0x1489   : > { %v5514_v1 = vsel %vm13816_vm1, %v9639_v57, %v9673_v4  ;;  %8741 = vmatpush1.bf16.msra.mxu0 %v8740_v18  ;;  %v5515_v34 = vsel %vm13817_vm15, %v9673_v4, %v9674_v38  ;;  %v5561_v57 = vsel %vm13820_vm2, %v9649_v0, %v9683_v55  ;;  %vm13828_vm1 = vcmask 7168   ;;  %vm13829_vm15 = vmmov %vm13823_vm5 }
0x148a   : > { %v8744_v8 = vpack.c.bf16 %v5514_v1, %v12589_v15  ;;  %v5577_v22 = vpop.permute.xlu0 %5576  ;;  %v8742_v44 = vpack.c.bf16 %v5515_v34, %v12596_v59  ;;  %v4954_v59 = vld [vmem:[%s13296_s13 + $0x10] sm:$0xff]  ;;  %v8748_v20 = vpack.c.bf16 %v5561_v57, %v5538_v25  ;;  %vm13831_vm10 = vmmov %vm13828_vm1  ;;  %vm13832_vm2 = vcmask 1039360  }
0x148b   : > { %v5585_v54 = vsel %vm13824_vm14, %v5577_v22, %v12728_v2  ;;  %v5584_v39 = vsel %vm13827_vm9, %v12685_v23, %v5577_v22  ;;  %vm13836_vm14 = vcmask 801792  }
0x148c   : > { %v5442_v53 = vpop.permute.xlu1 %5441  ;;  %8743 = vmatprep.subr.bf16.mxu0 %v8742_v44 }
0x148d   : > { %8745 = vmatpush1.bf16.msra.mxu0 %v8744_v8  ;;  %v5446_v47 = vsel %vm13825_vm12, %v9659_v13, %v5442_v53  ;;  %v4956_v13 = vld [vmem:[%s13296_s13 + $0x20] sm:$0xff]  ;;  %vm13837_vm12 = vmmov %vm13827_vm9 }
0x148e   : > { %v5571_v15 = vpop.permute.xlu0 %5570  ;;  %8747 = vmatprep.subr.bf16.mxu0 %v8746_v33  ;;  %vm13839_vm9 = vmmov %vm13829_vm15 }
0x148f   : > { %v5582_v37 = vsel %vm13822_vm0, %v5571_v15, %v12649_v21  ;;  %vm13834_vm0 = vcmask 809984  }
0x1490   : > { %v9687_v40 = vpop.permute.xlu1 %9686  ;;  %5618 = vmatpush1.msra.mxu1 %v5582_v37 }
0x1491   : > { %7833 = vmatmul.mubr.msk.f32.vlgmr.msra.gmra.mrb[34].mxu1 %vm13823_vm5, %v4954_v59  ;;  %8749 = vmatpush1.bf16.msra.mxu0 %v8748_v20  ;;  %v9689_v0 = vunpack.i.h.bf16 %v9687_v40  ;;  %v9688_v19 = vunpack.i.l.bf16 %v9687_v40  ;;  %vm13835_vm5 = vmmov %vm13833_vm3 }
0x1492   : > { %v5421_v49 = vpop.permute.xlu0 %5420  ;;  %5688 = vmatprep.subr.mxu0 %v5585_v54  ;;  %5807 = vmatprep.mubr.f32.mxu1 %v13480_v63 }
0x1493   : > { %v5425_v21 = vsel %vm13826_vm6, %v9654_v36, %v5421_v49  ;;  %v8750_v55 = vpack.c.bf16 %v5442_v53, %v5421_v49  ;;  %v5492_v41 = vsel %vm13828_vm1, %v9688_v19, %v9689_v0  ;;  %v5491_v36 = vsel %vm13831_vm10, %v9669_v12, %v9688_v19  ;;  %vm13840_vm1 = vmmov %vm13833_vm3 }
0x1494   : > { %v8752_v18 = vpack.c.bf16 %v5446_v47, %v5425_v21  ;;  %v5511_v5 = vpop.permute.xlu1 %5510  ;;  %vm13838_vm6 = vcmask 957440  }
0x1495   : > { %5689 = vmatpush1.msra.mxu0 %v5584_v39  ;;  %8751 = vmatprep.subr.bf16.mxu1 %v8750_v55  ;;  %v5516_v3 = vsel %vm13832_vm2, %v9674_v38, %v5511_v5 }
0x1496   : > { %v5463_v14 = vpop.permute.xlu0 %5462  ;;  %7834 = vmatmul.mubr.msk.f32.vlgmr.msra.gmra.mrb[46].mxu0 %vm13829_vm15, %v4954_v59  ;;  %8753 = vmatpush1.bf16.msra.mxu1 %v8752_v18 }
0x1497   : > { %v5467_v48 = vsel %vm13830_vm11, %v9664_v45, %v5463_v14  ;;  %v8754_v62 = vpack.c.bf16 %v5492_v41, %v5463_v14  ;;  %5828 = vmatprep.subr.mxu0 %v12352_v61  ;;  %5892 = vmatprep.mubr.f32.mxu0 %v13480_v63  ;;  %v8758_v45 = vpack.c.bf16 %v5511_v5, %v12622_v43 }
0x1498   : > { %v8756_v23 = vpack.c.bf16 %v5491_v36, %v5467_v48  ;;  %5829 = vmatpush1.msra.mxu0 %v12348_v50  ;;  %v8761_v61 = vpack.c.bf16 %v5516_v3, %v12606_v35  ;;  %v5558_v12 = vpop.permute.xlu1 %5557 }
0x1499   : > { %5899 = vmatprep.subr.mxu0 %v12381_v51  ;;  %8755 = vmatprep.subr.bf16.mxu1 %v8754_v62  ;;  %v5563_v51 = vsel %vm13836_vm14, %v9684_v24, %v5558_v12  ;;  %vm13842_vm14 = vcmask 244736  }
0x149a   : > { %v5535_v16 = vpop.permute.xlu0 %5534  ;;  %8757 = vmatpush1.bf16.msra.mxu1 %v8756_v23  ;;  %7840 = vmatmul.mubr.msk.f32.vlgmr.msra.gmra.mrb[48].mxu0 %vm13833_vm3, %v4956_v13 }
0x149b   : > { %5900 = vmatpush1.msra.mxu0 %v12362_v30  ;;  %8760 = vmatprep.subr.msk.bf16.mxu1 %vm11412_vm8, %v8758_v45  ;;  %v5540_v50 = vsel %vm13834_vm0, %v9679_v31, %v5535_v16 }
0x149c   : > { %5963 = vmatprep.mubr.f32.mxu0 %v13480_v63  ;;  %v8764_v30 = vpack.c.bf16 %v5563_v51, %v5540_v50 }
0x149e   : > { %8762 = vmatpush1.bf16.msra.mxu1 %v8761_v61  ;;  %7841 = vmatmul.mubr.msk.f32.vlgmr.msra.gmra.mrb[50].mxu0 %vm13835_vm5, %v4956_v13  ;;  %v5581_v35 = vpop.permute.xlu0 %5580  ;;  %vm13841_vm5 = vcmask 252928  }
0x149f   : > { %8763 = vmatprep.subr.bf16.mxu1 %v13476_v42  ;;  %6335 = vmatprep.mubr.f32.mxu0 %v13480_v63  ;;  %v5586_v43 = vsel %vm13837_vm12, %v12728_v2, %v5581_v35  ;;  %vm13843_vm12 = vcmask 236544  }
0x14a2   : > { %8766 = vmatpush1.bf16.msk.msra.mxu1 %vm10749_vm4, %v8764_v30 }
0x14a3   : > { %5759 = vmatprep.subr.mxu1 %v13480_v63 }
0x14a6   : > { %7838 = vmatpush1.msk.msra.mxu1 %vm13838_vm6, %v5586_v43  ;;  %vm13844_vm6 = vcmask 7168  }
0x14a7   : > { %7839 = vmatmul.mubr.msk.f32.vlgmr.msra.gmra.mrb[36].mxu1 %vm13839_vm9, %v4954_v59  ;;  %5970 = vmatprep.subr.mxu1 %v12419_v58  ;;  %vm13845_vm9 = vcmask 1039360  }
0x14a8   : > { %5971 = vmatpush1.msra.mxu1 %v12407_v17  ;;  %6034 = vmatprep.mubr.f32.mxu1 %v13480_v63 }
0x14a9   : > { %v5596_v24 = vpop.permute.xlu1 %5595 }
0x14ab   : > { %7842 = vmatmul.mubr.msk.f32.vlgmr.msra.gmra.mrb[38].mxu1 %vm13840_vm1, %v4956_v13  ;;  %vm13846_vm1 = vmmov %vm13842_vm14 }
0x14ac   : > { %6406 = vmatprep.mubr.f32.mxu1 %v13480_v63 }
0x14af   : > { %v5823_v1 = vpop.permute.xlu0 %5822 }
0x1564   : > { %v5667_v9 = vpop.f32.mrb[34].mxu1 }
0x1565   : > { %v5669_v6 = vpop.f32.mrb[35].mxu1  ;;  %v5668_v38 = vadd.f32 %v5667_v9, %v5596_v24 }
0x1566   : > { %v5670_v2 = vadd.f32 %v5669_v6, %v5596_v24 }
0x1567   : > { %v5814_v26 = vmul.f32 %v5668_v38, %v13694_v32 }
0x1568   : > { %v5815_v22 = vmul.f32 %v5670_v2, %v13695_v27 }
0x1569   : > { %v5738_v31 = vpop.f32.mrb[46].mxu0 }
0x156a   : > { %v5740_v4 = vpop.f32.mrb[47].mxu0  ;;  %v5739_v58 = vadd.f32 %v5738_v31, %v5596_v24 }
0x156b   : > { %v5741_v44 = vadd.f32 %v5740_v4, %v5596_v24 }
0x156c   : > { %v5816_v25 = vmul.f32 %v5739_v58, %v13696_v7  ;;  %v6054_v58 = vld [vmem:[%s13297_s14 + $0x8] sm:$0xff] }
0x156d   : > { %v5894_v34 = vpop.f32.mrb[48].mxu0  ;;  %v5817_v37 = vmul.f32 %v5741_v44, %v13697_v29 }
0x156e   : > { %v5895_v8 = vadd.f32 %v5894_v34, %v5823_v1  ;;  %v5896_v17 = vpop.f32.mrb[49].mxu0 }
0x156f   : > { %v5897_v52 = vadd.f32 %v5896_v17, %v5823_v1 }
0x1570   : > { %v6041_v57 = vadd.f32 %v5895_v8, %v5814_v26 }
0x1571   : > { %v6042_v53 = vadd.f32 %v5897_v52, %v5815_v22  ;;  %v5965_v33 = vpop.f32.mrb[50].mxu0 }
0x1572   : > { %v12811_v15 = vmul.f32 %v6041_v57, %v13694_v32  ;;  %v5966_v59 = vadd.f32 %v5965_v33, %v5823_v1  ;;  %v5967_v20 = vpop.f32.mrb[51].mxu0 }
0x1573   : > { %v12815_v40 = vmul.f32 %v6042_v53, %v13695_v27  ;;  %v5968_v54 = vadd.f32 %v5967_v20, %v5823_v1 }
0x1574   : > { %vm6059_vm15 = vcmp.ge.f32.partialorder %v12811_v15, 0.0  ;;  %v6065_v0 = vmul.f32 0.2, %v12811_v15  ;;  %v6043_v19 = vadd.f32 %v5966_v59, %v5816_v25 }
0x1575   : > { %vm6060_vm11 = vcmp.ge.f32.partialorder %v12815_v40, 0.0  ;;  %v6066_v49 = vmul.f32 0.2, %v12815_v40  ;;  %v6044_v47 = vadd.f32 %v5968_v54, %v5817_v37 }
0x1576   : > { %v12822_v21 = vsel %vm6059_vm15, %v12811_v15, %v6065_v0  ;;  %v12825_v55 = vmul.f32 %v6043_v19, %v13696_v7  ;;  %vm13847_vm15 = vmmov %vm13846_vm1 }
0x1577   : > { %v12828_v39 = vsel %vm6060_vm11, %v12815_v40, %v6066_v49  ;;  %6217 = vrot.lane.b32.xlu0 %v12822_v21, %s9891_s22  ;;  %v12849_v50 = vmul.f32 %v6044_v47, %v13697_v29  ;;  %vm13848_vm11 = vmmov %vm13841_vm5 }
0x1578   : > { %v9690_v18 = vpack.i.bf16 %v12828_v39, %v12822_v21  ;;  %v6067_v5 = vmul.f32 0.2, %v12825_v55  ;;  %vm6061_vm10 = vcmp.ge.f32.partialorder %v12825_v55, 0.0 }
0x1579   : > { %v6068_v35 = vmul.f32 0.2, %v12849_v50  ;;  %vm6062_vm2 = vcmp.ge.f32.partialorder %v12849_v50, 0.0 }
0x157a   : > { %v5809_v14 = vpop.f32.mrb[36].mxu1  ;;  %9691 = vrot.lane.b32.xlu1 %v9690_v18, %s9887_s24  ;;  %v12840_v62 = vsel %vm6061_vm10, %v12825_v55, %v6067_v5  ;;  %vm13849_vm10 = vmmov %vm13841_vm5 }
0x157b   : > { %v5810_v41 = vadd.f32 %v5809_v14, %v5596_v24  ;;  %v5811_v48 = vpop.f32.mrb[37].mxu1  ;;  %6240 = vrot.lane.b32.xlu0 %v12822_v21, %s9892_s23  ;;  %v9710_v12 = vpack.i.bf16 %v12840_v62, %v12828_v39  ;;  %v12859_v43 = vsel %vm6062_vm2, %v12849_v50, %v6068_v35  ;;  %vm13850_vm2 = vcmask 801792  }
0x157c   : > { %v5812_v36 = vadd.f32 %v5811_v48, %v5596_v24  ;;  %v9730_v9 = vpack.i.bf16 %v12859_v43, %v12840_v62  ;;  %v9735_v24 = vpack.i.bf16 %v12859_v43, %v12822_v21 }
0x157d   : > { %v5818_v23 = vmul.f32 %v5810_v41, %v13698_v46 }
0x157e   : > { %v6036_v13 = vpop.f32.mrb[38].mxu1  ;;  %9701 = vrot.lane.b32.xlu1 %v9690_v18, %s9890_s30  ;;  %v5819_v16 = vmul.f32 %v5812_v36, %v13699_v60 }
0x157f   : > { %v6037_v3 = vadd.f32 %v6036_v13, %v5823_v1  ;;  %v6038_v45 = vpop.f32.mrb[39].mxu1  ;;  %9696 = vrot.lane.b32.xlu0 %v9690_v18, %s9889_s18 }
0x1580   : > { %v6039_v61 = vadd.f32 %v6038_v45, %v5823_v1 }
0x1581   : > { %v6045_v51 = vadd.f32 %v6037_v3, %v5818_v23 }
0x1582   : > { %v6046_v30 = vadd.f32 %v6039_v61, %v5819_v16  ;;  %9711 = vrot.lane.b32.xlu1 %v9710_v12, %s9879_s29 }
0x1583   : > { %9706 = vrot.lane.b32.xlu0 %v9690_v18, %s9877_s16  ;;  %v12869_v6 = vmul.f32 %v6045_v51, %v13698_v46 }
0x1584   : > { %v12883_v4 = vmul.f32 %v6046_v30, %v13699_v60 }
0x1585   : > { %v6069_v31 = vmul.f32 0.2, %v12869_v6  ;;  %vm6063_vm3 = vcmp.ge.f32.partialorder %v12869_v6, 0.0 }
0x1586   : > { %9716 = vrot.lane.b32.xlu1 %v9710_v12, %s9888_s0  ;;  %v6070_v2 = vmul.f32 0.2, %v12883_v4  ;;  %vm6064_vm0 = vcmp.ge.f32.partialorder %v12883_v4, 0.0 }
0x1587   : > { %6242 = vrot.lane.b32.xlu0 %v12828_v39, %s9892_s23  ;;  %v12880_v38 = vsel %vm6063_vm3, %v12869_v6, %v6069_v31  ;;  %vm13851_vm3 = vmmov %vm13845_vm9 }
0x1588   : > { %v9755_v1 = vpack.i.bf16 %v12880_v38, %v12859_v43  ;;  %v12897_v34 = vsel %vm6064_vm0, %v12883_v4, %v6070_v2  ;;  %vm13852_vm0 = vcmask 809984  }
0x1589   : > { %v9760_v26 = vpack.i.bf16 %v12897_v34, %v12880_v38 }
0x158a   : > { %6244 = vrot.lane.b32.xlu1 %v12840_v62, %s9892_s23 }
0x158b   : > { %9721 = vrot.lane.b32.xlu0 %v9710_v12, %s9891_s22 }
0x158e   : > { %9731 = vrot.lane.b32.xlu1 %v9730_v9, %s9889_s18 }
0x158f   : > { %9726 = vrot.lane.b32.xlu0 %v9730_v9, %s9887_s24 }
0x1592   : > { %9741 = vrot.lane.b32.xlu1 %v9730_v9, %s9890_s30 }
0x1593   : > { %9736 = vrot.lane.b32.xlu0 %v9735_v24, %s9879_s29 }
0x1596   : > { %9751 = vrot.lane.b32.xlu1 %v9735_v24, %s9888_s0 }
0x1597   : > { %9746 = vrot.lane.b32.xlu0 %v9730_v9, %s9877_s16 }
0x159a   : > { %6178 = vrot.lane.b32.xlu1 %v12880_v38, %s9879_s29 }
0x159b   : > { %6111 = vrot.lane.b32.xlu0 %v12880_v38, %s9889_s18 }
0x159e   : > { %6090 = vrot.lane.b32.xlu1 %v12880_v38, %s9887_s24 }
0x159f   : > { %9756 = vrot.lane.b32.xlu0 %v9755_v1, %s9891_s22 }
0x15a2   : > { %6202 = vrot.lane.b32.xlu1 %v12880_v38, %s9888_s0 }
0x15a3   : > { %6132 = vrot.lane.b32.xlu0 %v12880_v38, %s9890_s30 }
0x15a6   : > { %9761 = vrot.lane.b32.xlu1 %v9760_v26, %s9877_s16 }
0x15a7   : > { %6248 = vrot.lane.b32.xlu0 %v12880_v38, %s9892_s23 }
0x15aa   : > { %6246 = vrot.lane.b32.xlu1 %v12859_v43, %s9892_s23 }
0x15ab   : > { %6204 = vrot.lane.b32.xlu0 %v12897_v34, %s9888_s0 }
0x15ae   : > { %6180 = vrot.lane.b32.xlu1 %v12897_v34, %s9879_s29 }
0x15af   : > { %6250 = vrot.lane.b32.xlu0 %v12897_v34, %s9892_s23 }
0x15b2   : > { %6227 = vrot.lane.b32.xlu1 %v12897_v34, %s9891_s22 }
0x15b6   : > { %6265 = vperm.xlu1 %8899, %v6054_v58  }
0x15e9   : > { %v12921_v8 = vpop.permute.xlu0 %6217 }
0x15ec   : > { %v9692_v17 = vpop.permute.xlu1 %9691 }
0x15ed   : > { %v12923_v22 = vpop.permute.xlu0 %6240  ;;  %v9694_v44 = vunpack.i.h.bf16 %v9692_v17  ;;  %v9693_v52 = vunpack.i.l.bf16 %v9692_v17 }
0x15ef   : > { %v6092_v54 = vsel %vm13841_vm5, %v9693_v52, %v9694_v44  ;;  %vm13853_vm5 = vmmov %vm13850_vm2 }
0x15f0   : > { %v12925_v57 = vpop.permute.xlu1 %9701 }
0x15f1   : > { %v9697_v53 = vpop.permute.xlu0 %9696  ;;  %v9704_v59 = vunpack.i.h.bf16 %v12925_v57  ;;  %v9703_v20 = vunpack.i.l.bf16 %v12925_v57 }
0x15f2   : > { %v9699_v33 = vunpack.i.h.bf16 %v9697_v53  ;;  %v9698_v25 = vunpack.i.l.bf16 %v9697_v53 }
0x15f3   : > { %v6134_v36 = vsel %vm13843_vm12, %v9703_v20, %v9704_v59 }
0x15f4   : > { %v12929_v37 = vpop.permute.xlu1 %9711  ;;  %v6113_v0 = vsel %vm13842_vm14, %v9698_v25, %v9699_v33  ;;  %v8769_v5 = vpack.c.bf16 %v9698_v25, %v9693_v52  ;;  %vm13854_vm14 = vmmov %vm13843_vm12 }
0x15f5   : > { %v9714_v19 = vunpack.i.h.bf16 %v12929_v37  ;;  %v9713_v49 = vunpack.i.l.bf16 %v12929_v37  ;;  %v9707_v47 = vpop.permute.xlu0 %9706  ;;  %v8767_v18 = vpack.c.bf16 %v6113_v0, %v6092_v54  ;;  %vm13855_vm12 = vmmov %vm13852_vm0 }
0x15f6   : > { %v9709_v14 = vunpack.i.h.bf16 %v9707_v47  ;;  %v9708_v41 = vunpack.i.l.bf16 %v9707_v47 }
0x15f7   : > { %8768 = vmatprep.subr.bf16.mxu0 %v8767_v18  ;;  %v6183_v23 = vsel %vm13845_vm9, %v9713_v49, %v9714_v19  ;;  %vm13856_vm9 = vmmov %vm13854_vm14 }
0x15f8   : > { %v12935_v48 = vpop.permute.xlu1 %9716  ;;  %8771 = vmatpush1.bf16.msk.msra.mxu0 %vm13703_vm7, %v8769_v5  ;;  %v6158_v13 = vsel %vm13844_vm6, %v9708_v41, %v9709_v14  ;;  %v8774_v16 = vpack.c.bf16 %v9708_v41, %v9703_v20  ;;  %v8777_v61 = vpack.c.bf16 %v6183_v23, %v12828_v39 }
0x15f9   : > { %v12946_v3 = vpop.permute.xlu0 %6242  ;;  %v8772_v45 = vpack.c.bf16 %v6158_v13, %v6134_v36  ;;  %v9719_v25 = vunpack.i.h.bf16 %v12935_v48  ;;  %v9718_v20 = vunpack.i.l.bf16 %v12935_v48 }
0x15fb   : > { %8773 = vmatprep.subr.bf16.mxu0 %v8772_v45 }
0x15fc   : > { %v12949_v12 = vpop.permute.xlu1 %6244  ;;  %8776 = vmatpush1.bf16.msk.msra.mxu0 %vm13707_vm13, %v8774_v16  ;;  %v6207_v16 = vsel %vm13852_vm0, %v9718_v20, %v9719_v25  ;;  %vm13863_vm0 = vcmask 252928  }
0x15fd   : > { %v12953_v51 = vpop.permute.xlu0 %9721  ;;  %8778 = vmatprep.subr.bf16.mxu0 %v8777_v61 }
0x15fe   : > { %v9724_v1 = vunpack.i.h.bf16 %v12953_v51  ;;  %v9723_v26 = vunpack.i.l.bf16 %v12953_v51 }
0x1600   : > { %v9732_v30 = vpop.permute.xlu1 %9731 }
0x1601   : > { %v9734_v35 = vunpack.i.h.bf16 %v9732_v30  ;;  %v9733_v9 = vunpack.i.l.bf16 %v9732_v30  ;;  %v9727_v24 = vpop.permute.xlu0 %9726 }
0x1602   : > { %v9729_v31 = vunpack.i.h.bf16 %v9727_v24  ;;  %v9728_v2 = vunpack.i.l.bf16 %v9727_v24 }
0x1603   : > { %v6114_v39 = vsel %vm13846_vm1, %v9699_v33, %v9733_v9  ;;  %v6115_v58 = vsel %vm13847_vm15, %v9733_v9, %v9734_v35  ;;  %v6230_v33 = vsel %vm13850_vm2, %v9723_v26, %v9724_v1  ;;  %vm13857_vm1 = vmmov %vm13844_vm6 }
0x1604   : > { %v6093_v17 = vsel %vm13848_vm11, %v9694_v44, %v9728_v2  ;;  %v12960_v52 = vpop.permute.xlu1 %9741  ;;  %v6094_v53 = vsel %vm13849_vm10, %v9728_v2, %v9729_v31  ;;  %v8781_v24 = vpack.c.bf16 %v6230_v33, %v6207_v16  ;;  %v6229_v2 = vsel %vm13853_vm5, %v12921_v8, %v9723_v26  ;;  %vm13858_vm15 = vmmov %vm13851_vm3 }
0x1605   : > { %v8787_v54 = vpack.c.bf16 %v6114_v39, %v6093_v17  ;;  %v9737_v0 = vpop.permute.xlu0 %9736  ;;  %v8785_v47 = vpack.c.bf16 %v6115_v58, %v6094_v53  ;;  %v9743_v5 = vunpack.i.l.bf16 %v12960_v52  ;;  %v9744_v44 = vunpack.i.h.bf16 %v12960_v52  ;;  %vm13859_vm11 = vmmov %vm13851_vm3 }
0x1606   : > { %v9738_v18 = vunpack.i.l.bf16 %v9737_v0  ;;  %v9739_v61 = vunpack.i.h.bf16 %v9737_v0  ;;  %vm13860_vm10 = vcmask 793600  }
0x1607   : > { %8786 = vmatprep.subr.bf16.mxu1 %v8785_v47  ;;  %v6136_v53 = vsel %vm13856_vm9, %v9743_v5, %v9744_v44  ;;  %v6253_v0 = vsel %vm13860_vm10, %v12946_v3, %v12949_v12  ;;  %vm13861_vm2 = vmmov %vm13860_vm10 }
0x1608   : > { %v6182_v41 = vsel %vm13851_vm3, %v9738_v18, %v9713_v49  ;;  %v9752_v36 = vpop.permute.xlu1 %9751  ;;  %8788 = vmatpush1.bf16.msra.mxu1 %v8787_v54  ;;  %v6135_v49 = vsel %vm13854_vm14, %v9704_v59, %v9743_v5  ;;  %v6252_v47 = vsel %vm13861_vm2, %v12923_v22, %v12946_v3  ;;  %vm13862_vm3 = vcmask 244736   ;;  %vm13864_vm14 = vmmov %vm13853_vm5 }
0x1609   : > { %v8779_v13 = vpack.c.bf16 %v6182_v41, %v12822_v21  ;;  %v9753_v23 = vunpack.i.l.bf16 %v9752_v36  ;;  %v9747_v45 = vpop.permute.xlu0 %9746  ;;  %v6053_v41 = vld [vmem:[%s13297_s14] sm:$0xff]  ;;  %vm13871_vm10 = vmmov %vm13861_vm2 }
0x160a   : > { %v9749_v30 = vunpack.i.h.bf16 %v9747_v45  ;;  %v9748_v9 = vunpack.i.l.bf16 %v9747_v45 }
0x160b   : > { %v6206_v39 = vsel %vm13855_vm12, %v9753_v23, %v9718_v20  ;;  %8780 = vmatpush1.bf16.msra.mxu0 %v8779_v13  ;;  %v6184_v20 = vsel %vm13859_vm11, %v9714_v19, %v9739_v61  ;;  %v9754_v13 = vunpack.i.h.bf16 %v9752_v36  ;;  %vm13865_vm12 = vcmask 588800  }
0x160c   : > { %v8783_v21 = vpack.c.bf16 %v6229_v2, %v6206_v39  ;;  %v6159_v58 = vsel %vm13844_vm6, %v9709_v14, %v9748_v9  ;;  %v12982_v17 = vpop.permute.xlu1 %6178  ;;  %8782 = vmatprep.subr.bf16.mxu0 %v8781_v24  ;;  %v6160_v54 = vsel %vm13857_vm1, %v9748_v9, %v9749_v30  ;;  %v8795_v5 = vpack.c.bf16 %v6184_v20, %v12840_v62 }
0x160d   : > { %v8791_v8 = vpack.c.bf16 %v6159_v58, %v6135_v49  ;;  %v6185_v57 = vsel %vm13858_vm15, %v9739_v61, %v12982_v17  ;;  %v6112_v59 = vpop.permute.xlu0 %6111  ;;  %v8789_v26 = vpack.c.bf16 %v6160_v54, %v6136_v53  ;;  %vm13866_vm6 = vcmask 809984  }
0x160e   : > { %v8793_v14 = vpack.c.bf16 %v6185_v57, %v12859_v43  ;;  %v6116_v37 = vsel %vm13862_vm3, %v9734_v35, %v6112_v59  ;;  %vm13867_vm9 = vmmov %vm13866_vm6  ;;  %vm13868_vm1 = vcmask 236544   ;;  %vm13869_vm15 = vcmask 7168  }
0x160f   : > { %8784 = vmatpush1.bf16.msra.mxu0 %v8783_v21  ;;  %8790 = vmatprep.subr.bf16.mxu1 %v8789_v26  ;;  %v6208_v36 = vsel %vm13867_vm9, %v9719_v25, %v9754_v13  ;;  %vm13870_vm11 = vmmov %vm13869_vm15 }
0x1610   : > { %v6091_v18 = vpop.permute.xlu1 %6090  ;;  %6287 = vmatprep.subr.mxu0 %v6253_v0  ;;  %8792 = vmatpush1.bf16.msra.mxu1 %v8791_v8  ;;  %vm13872_vm3 = vmmov %vm13865_vm12 }
0x1611   : > { %v6095_v19 = vsel %vm13863_vm0, %v9729_v31, %v6091_v18  ;;  %v8801_v43 = vpack.c.bf16 %v6112_v59, %v6091_v18  ;;  %v9757_v33 = vpop.permute.xlu0 %9756  ;;  %8794 = vmatprep.subr.bf16.mxu1 %v8793_v14  ;;  %vm13873_vm0 = vcmask 1039360   ;;  %vm13877_vm9 = vmmov %vm13872_vm3 }
0x1612   : > { %v8803_v23 = vpack.c.bf16 %v6116_v37, %v6095_v19  ;;  %v9759_v45 = vunpack.i.h.bf16 %v9757_v33  ;;  %v9758_v22 = vunpack.i.l.bf16 %v9757_v33 }
0x1613   : > { %6288 = vmatpush1.msra.mxu0 %v6252_v47 }
0x1614   : > { %v6231_v62 = vsel %vm13853_vm5, %v9724_v1, %v9758_v22  ;;  %v6203_v3 = vpop.permute.xlu1 %6202  ;;  %v6232_v35 = vsel %vm13864_vm14, %v9758_v22, %v9759_v45  ;;  %7851 = vmatmul.mubr.msk.f32.vlgmr.msra.gmra.mrb[52].mxu0 %vm13865_vm12, %v6053_v41  ;;  %8796 = vmatpush1.bf16.msra.mxu1 %v8795_v5  ;;  %vm13874_vm5 = vmmov %vm13866_vm6 }
0x1615   : > { %v6209_v31 = vsel %vm13866_vm6, %v9754_v13, %v6203_v3  ;;  %8802 = vmatprep.subr.bf16.mxu0 %v8801_v43  ;;  %6477 = vmatprep.mubr.f32.mxu0 %v13480_v63  ;;  %v6133_v61 = vpop.permute.xlu0 %6132  ;;  %v8799_v51 = vpack.c.bf16 %v6231_v62, %v6208_v36  ;;  %vm13875_vm12 = vmmov %vm13861_vm2  ;;  %vm13876_vm6 = vcmask 957440  }
0x1616   : > { %v8797_v16 = vpack.c.bf16 %v6232_v35, %v6209_v31  ;;  %8804 = vmatpush1.bf16.msra.mxu0 %v8803_v23  ;;  %v6137_v2 = vsel %vm13868_vm1, %v9744_v44, %v6133_v61 }
0x1618   : > { %v9762_v1 = vpop.permute.xlu1 %9761  ;;  %8798 = vmatprep.subr.bf16.mxu1 %v8797_v16 }
0x1619   : > { %v9764_v9 = vunpack.i.h.bf16 %v9762_v1  ;;  %v9763_v24 = vunpack.i.l.bf16 %v9762_v1  ;;  %8800 = vmatpush1.bf16.msra.mxu1 %v8799_v51  ;;  %v6249_v21 = vpop.permute.xlu0 %6248 }
0x161b   : > { %v6161_v49 = vsel %vm13869_vm15, %v9749_v30, %v9763_v24  ;;  %v6162_v39 = vsel %vm13870_vm11, %v9763_v24, %v9764_v9 }
0x161c   : > { %v8807_v48 = vpack.c.bf16 %v6161_v49, %v6137_v2  ;;  %v6247_v25 = vpop.permute.xlu1 %6246  ;;  %v8805_v58 = vpack.c.bf16 %v6162_v39, %v6133_v61 }
0x161d   : > { %v6254_v53 = vsel %vm13871_vm10, %v12949_v12, %v6247_v25  ;;  %v6255_v54 = vsel %vm13861_vm2, %v6247_v25, %v6249_v21  ;;  %v6205_v8 = vpop.permute.xlu0 %6204 }
0x161e   : > { %6358 = vmatprep.subr.mxu1 %v6255_v54  ;;  %8806 = vmatprep.subr.bf16.mxu0 %v8805_v58  ;;  %v6210_v59 = vsel %vm13874_vm5, %v6203_v3, %v6205_v8  ;;  %v7155_v8 = vld [vmem:[#allocation2] sm:$0x1]  ;;  %vm13879_vm5 = vcmask 244736  }
0x161f   : > { %6359 = vmatpush1.msra.mxu1 %v6254_v53  ;;  %8808 = vmatpush1.bf16.msra.mxu0 %v8807_v48 }
0x1620   : > { %v6181_v52 = vpop.permute.xlu1 %6180  ;;  %7852 = vmatmul.mubr.msk.f32.vlgmr.msra.gmra.mrb[40].mxu1 %vm13872_vm3, %v6053_v41 }
0x1621   : > { %v6186_v44 = vsel %vm13873_vm0, %v12982_v17, %v6181_v52  ;;  %v8809_v30 = vpack.c.bf16 %v6181_v52, %v12897_v34  ;;  %6766 = vmatprep.mubr.f32.mxu1 %v13480_v63  ;;  %v6251_v17 = vpop.permute.xlu0 %6250  ;;  %vm13878_vm0 = vcmask 252928  }
0x1622   : > { %v8812_v57 = vpack.c.bf16 %v6186_v44, %v12880_v38  ;;  %v6256_v38 = vsel %vm13875_vm12, %v6249_v21, %v6251_v17  ;;  %v6056_v44 = vld [vmem:[%s13297_s14 + $0x18] sm:$0xff]  ;;  %vm13881_vm12 = vcmask 7168  }
0x1623   : > { %8811 = vmatprep.subr.msk.bf16.mxu0 %vm11412_vm8, %v8809_v30  ;;  %v6058_v30 = vld [vmem:[%s13297_s14 + $0x28] sm:$0xff] }
0x1624   : > { %v6228_v12 = vpop.permute.xlu1 %6227  ;;  %8813 = vmatpush1.bf16.msra.mxu0 %v8812_v57 }
0x1625   : > { %v6233_v26 = vsel %vm13864_vm14, %v9759_v45, %v6228_v12  ;;  %8814 = vmatprep.subr.bf16.mxu0 %v13476_v42  ;;  %vm13880_vm14 = vcmask 236544  }
0x1626   : > { %v8815_v20 = vpack.c.bf16 %v6233_v26, %v6210_v59 }
0x1628   : > { %8817 = vmatpush1.bf16.msk.msra.mxu0 %vm10749_vm4, %v8815_v20 }
0x1629   : > { %6429 = vmatprep.subr.mxu0 %v13480_v63 }
0x162c   : > { %7856 = vmatpush1.msk.msra.mxu0 %vm13876_vm6, %v6256_v38 }
0x162d   : > { %7857 = vmatmul.mubr.msk.f32.vlgmr.msra.gmra.mrb[54].mxu0 %vm13877_vm9, %v6053_v41  ;;  %vm13885_vm9 = vcmask 809984  }
0x162e   : > { %6837 = vmatprep.mubr.f32.mxu0 %v13480_v63 }
0x1635   : > { %v6266_v34 = vpop.permute.xlu1 %6265 }
0x16e7   : > { %v6337_v14 = vpop.f32.mrb[52].mxu0 }
0x16e8   : > { %v6338_v0 = vadd.f32 %v6337_v14, %v6266_v34  ;;  %v6339_v47 = vpop.f32.mrb[53].mxu0 }
0x16e9   : > { %v6340_v18 = vadd.f32 %v6339_v47, %v6266_v34 }
0x16ea   : > { %v6484_v5 = vmul.f32 %v6338_v0, %v13694_v32 }
0x16eb   : > { %v6485_v37 = vmul.f32 %v6340_v18, %v13695_v27 }
0x16ec   : > { %vm6490_vm1 = vcmp.ge.f32.partialorder %v6484_v5, 0.0  ;;  %v6496_v19 = vmul.f32 0.2, %v6484_v5 }
0x16ed   : > { %v6497_v33 = vmul.f32 0.2, %v6485_v37  ;;  %vm6491_vm15 = vcmp.ge.f32.partialorder %v6485_v37, 0.0 }
0x16ee   : > { %v13044_v43 = vsel %vm6490_vm1, %v6484_v5, %v6496_v19  ;;  %vm13886_vm1 = vmmov %vm13885_vm9 }
0x16ef   : > { %6625 = vrot.lane.b32.xlu0 %v13044_v43, %s9888_s0  ;;  %6601 = vrot.lane.b32.xlu1 %v13044_v43, %s9879_s29  ;;  %v13050_v41 = vsel %vm6491_vm15, %v6485_v37, %v6497_v33 }
0x16f0   : > { %v9765_v22 = vpack.i.bf16 %v13050_v41, %v13044_v43 }
0x16f3   : > { %v6408_v13 = vpop.f32.mrb[40].mxu1  ;;  %6671 = vrot.lane.b32.xlu0 %v13044_v43, %s9892_s23  ;;  %6648 = vrot.lane.b32.xlu1 %v13044_v43, %s9891_s22 }
0x16f4   : > { %v6409_v23 = vadd.f32 %v6408_v13, %v6266_v34  ;;  %v6410_v45 = vpop.f32.mrb[41].mxu1 }
0x16f5   : > { %v6411_v3 = vadd.f32 %v6410_v45, %v6266_v34 }
0x16f6   : > { %v6486_v62 = vmul.f32 %v6409_v23, %v13696_v7 }
0x16f7   : > { %9766 = vrot.lane.b32.xlu0 %v9765_v22, %s9887_s24  ;;  %9771 = vrot.lane.b32.xlu1 %v9765_v22, %s9889_s18  ;;  %v6487_v36 = vmul.f32 %v6411_v3, %v13697_v29 }
0x16f8   : > { %vm6492_vm11 = vcmp.ge.f32.partialorder %v6486_v62, 0.0  ;;  %v6498_v35 = vmul.f32 0.2, %v6486_v62 }
0x16f9   : > { %v6499_v61 = vmul.f32 0.2, %v6487_v36  ;;  %vm6493_vm10 = vcmp.ge.f32.partialorder %v6487_v36, 0.0 }
0x16fa   : > { %v13061_v31 = vsel %vm6492_vm11, %v6486_v62, %v6498_v35  ;;  %vm13888_vm11 = vmmov %vm13879_vm5 }
0x16fb   : > { %9776 = vrot.lane.b32.xlu0 %v9765_v22, %s9890_s30  ;;  %9781 = vrot.lane.b32.xlu1 %v9765_v22, %s9877_s16  ;;  %v9795_v16 = vpack.i.bf16 %v13061_v31, %v13050_v41  ;;  %v13071_v9 = vsel %vm6493_vm10, %v6487_v36, %v6499_v61  ;;  %vm13889_vm10 = vcmask 793600  }
0x16fc   : > { %v9805_v2 = vpack.i.bf16 %v13071_v9, %v13061_v31 }
0x16ff   : > { %6673 = vrot.lane.b32.xlu0 %v13050_v41, %s9892_s23  ;;  %9796 = vrot.lane.b32.xlu1 %v9795_v16, %s9891_s22 }
0x1700   : > { %v6479_v51 = vpop.f32.mrb[54].mxu0 }
0x1701   : > { %v6481_v1 = vpop.f32.mrb[55].mxu0  ;;  %v6480_v24 = vadd.f32 %v6479_v51, %v6266_v34 }
0x1702   : > { %v6482_v39 = vadd.f32 %v6481_v1, %v6266_v34 }
0x1703   : > { %9786 = vrot.lane.b32.xlu0 %v9795_v16, %s9879_s29  ;;  %6675 = vrot.lane.b32.xlu1 %v13061_v31, %s9892_s23  ;;  %v6488_v49 = vmul.f32 %v6480_v24, %v13698_v46 }
0x1704   : > { %v6489_v21 = vmul.f32 %v6482_v39, %v13699_v60 }
0x1705   : > { %v6500_v48 = vmul.f32 0.2, %v6488_v49  ;;  %vm6494_vm2 = vcmp.ge.f32.partialorder %v6488_v49, 0.0 }
0x1706   : > { %v6501_v58 = vmul.f32 0.2, %v6489_v21  ;;  %vm6495_vm3 = vcmp.ge.f32.partialorder %v6489_v21, 0.0 }
0x1707   : > { %9791 = vrot.lane.b32.xlu0 %v9795_v16, %s9888_s0  ;;  %9806 = vrot.lane.b32.xlu1 %v9805_v2, %s9889_s18  ;;  %v13084_v25 = vsel %vm6494_vm2, %v6488_v49, %v6500_v48  ;;  %vm13890_vm2 = vmmov %vm13878_vm0 }
0x1708   : > { %v9820_v53 = vpack.i.bf16 %v13084_v25, %v13071_v9  ;;  %v13091_v54 = vsel %vm6495_vm3, %v6489_v21, %v6501_v58  ;;  %vm13891_vm3 = vmmov %vm13878_vm0 }
0x1709   : > { %v9825_v52 = vpack.i.bf16 %v13091_v54, %v13084_v25 }
0x170b   : > { %9801 = vrot.lane.b32.xlu0 %v9805_v2, %s9887_s24  ;;  %9811 = vrot.lane.b32.xlu1 %v9805_v2, %s9890_s30 }
0x170f   : > { %9816 = vrot.lane.b32.xlu0 %v9805_v2, %s9877_s16  ;;  %6542 = vrot.lane.b32.xlu1 %v13084_v25, %s9889_s18 }
0x1713   : > { %6521 = vrot.lane.b32.xlu0 %v13084_v25, %s9887_s24  ;;  %9821 = vrot.lane.b32.xlu1 %v9820_v53, %s9879_s29 }
0x1717   : > { %6563 = vrot.lane.b32.xlu0 %v13084_v25, %s9890_s30  ;;  %9826 = vrot.lane.b32.xlu1 %v9825_v52, %s9877_s16 }
0x171b   : > { %9836 = vrot.lane.b32.xlu0 %v9820_v53, %s9891_s22  ;;  %9831 = vrot.lane.b32.xlu1 %v9820_v53, %s9888_s0 }
0x171f   : > { %6611 = vrot.lane.b32.xlu0 %v13091_v54, %s9879_s29  ;;  %6635 = vrot.lane.b32.xlu1 %v13091_v54, %s9888_s0 }
0x1723   : > { %6658 = vrot.lane.b32.xlu0 %v13091_v54, %s9891_s22  ;;  %6677 = vrot.lane.b32.xlu1 %v13071_v9, %s9892_s23 }
0x1727   : > { %6679 = vrot.lane.b32.xlu0 %v13084_v25, %s9892_s23  ;;  %6681 = vrot.lane.b32.xlu1 %v13091_v54, %s9892_s23 }
0x172b   : > { %6696 = vperm.xlu0 %8898, %v6056_v44   ;;  %6923 = vperm.xlu1 %8899, %v6058_v30  }
0x172f   : > { %7158 = vperm.xlu0 %8898, %v7155_v8  }
0x1761   : > { %v6626_v57 = vpop.permute.xlu0 %6625  ;;  %v6602_v12 = vpop.permute.xlu1 %6601 }
0x1765   : > { %v13121_v59 = vpop.permute.xlu0 %6671  ;;  %v6649_v26 = vpop.permute.xlu1 %6648 }
0x1769   : > { %v9767_v20 = vpop.permute.xlu0 %9766  ;;  %v9772_v17 = vpop.permute.xlu1 %9771 }
0x176a   : > { %v9769_v38 = vunpack.i.h.bf16 %v9767_v20  ;;  %v9768_v34 = vunpack.i.l.bf16 %v9767_v20  ;;  %v9774_v14 = vunpack.i.h.bf16 %v9772_v17  ;;  %v9773_v0 = vunpack.i.l.bf16 %v9772_v17 }
0x176c   : > { %v6523_v47 = vsel %vm13878_vm0, %v9768_v34, %v9769_v38  ;;  %v6544_v18 = vsel %vm13879_vm5, %v9773_v0, %v9774_v14  ;;  %v8820_v5 = vpack.c.bf16 %v9773_v0, %v9768_v34  ;;  %vm13892_vm0 = vmmov %vm13879_vm5 }
0x176d   : > { %v13125_v37 = vpop.permute.xlu0 %9776  ;;  %v13127_v19 = vpop.permute.xlu1 %9781  ;;  %v8818_v33 = vpack.c.bf16 %v6544_v18, %v6523_v47  ;;  %vm13893_vm5 = vmmov %vm13889_vm10 }
0x176e   : > { %v9779_v13 = vunpack.i.h.bf16 %v13125_v37  ;;  %v9778_v23 = vunpack.i.l.bf16 %v13125_v37  ;;  %v9784_v45 = vunpack.i.h.bf16 %v13127_v19  ;;  %v9783_v22 = vunpack.i.l.bf16 %v13127_v19 }
0x176f   : > { %8819 = vmatprep.subr.bf16.mxu1 %v8818_v33 }
0x1770   : > { %8822 = vmatpush1.bf16.msk.msra.mxu1 %vm13703_vm7, %v8820_v5  ;;  %v6565_v62 = vsel %vm13880_vm14, %v9778_v23, %v9779_v13  ;;  %v6589_v3 = vsel %vm13881_vm12, %v9783_v22, %v9784_v45  ;;  %v8825_v61 = vpack.c.bf16 %v9783_v22, %v9778_v23  ;;  %vm13882_vm7 = vcmask 1039360  }
0x1771   : > { %v6674_v35 = vpop.permute.xlu0 %6673  ;;  %v13137_v36 = vpop.permute.xlu1 %9796  ;;  %v8823_v16 = vpack.c.bf16 %v6589_v3, %v6565_v62  ;;  %vm13883_vm6 = vmmov %vm13882_vm7 }
0x1772   : > { %v9798_v2 = vunpack.i.l.bf16 %v13137_v36  ;;  %v9799_v49 = vunpack.i.h.bf16 %v13137_v36 }
0x1773   : > { %8824 = vmatprep.subr.bf16.mxu1 %v8823_v16 }
0x1774   : > { %8827 = vmatpush1.bf16.msk.msra.mxu1 %vm13707_vm13, %v8825_v61  ;;  %vm13884_vm13 = vcmask 801792  }
0x1775   : > { %v13141_v51 = vpop.permute.xlu0 %9786  ;;  %v13143_v1 = vpop.permute.xlu1 %6675  ;;  %v6660_v30 = vsel %vm13884_vm13, %v6649_v26, %v9798_v2  ;;  %vm13887_vm15 = vmmov %vm13884_vm13 }
0x1776   : > { %v9789_v10 = vunpack.i.h.bf16 %v13141_v51  ;;  %v9788_v24 = vunpack.i.l.bf16 %v13141_v51  ;;  %vm13896_vm13 = vmmov %vm13892_vm0 }
0x1778   : > { %v6613_v39 = vsel %vm13882_vm7, %v6602_v12, %v9788_v24  ;;  %v6614_v48 = vsel %vm13883_vm6, %v9788_v24, %v9789_v10  ;;  %vm13894_vm7 = vmmov %vm13880_vm14 }
0x1779   : > { %v8830_v28 = vpack.c.bf16 %v6613_v39, %v13044_v43  ;;  %v13154_v21 = vpop.permute.xlu0 %9791  ;;  %v9807_v58 = vpop.permute.xlu1 %9806  ;;  %v8828_v53 = vpack.c.bf16 %v6614_v48, %v13050_v41  ;;  %v6661_v41 = vsel %vm13887_vm15, %v9798_v2, %v9799_v49  ;;  %v13176_v2 = vld [vmem:[%s13297_s14 + $0x10] sm:$0xff]  ;;  %vm13895_vm6 = vmmov %vm13881_vm12  ;;  %vm13899_vm15 = vcmask 1039360  }
0x177a   : > { %v9794_v52 = vunpack.i.h.bf16 %v13154_v21  ;;  %v9793_v44 = vunpack.i.l.bf16 %v13154_v21  ;;  %v9808_v8 = vunpack.i.l.bf16 %v9807_v58  ;;  %v9809_v20 = vunpack.i.h.bf16 %v9807_v58 }
0x177b   : > { %8829 = vmatprep.subr.bf16.mxu1 %v8828_v53 }
0x177c   : > { %v6637_v12 = vsel %vm13885_vm9, %v6626_v57, %v9793_v44  ;;  %8831 = vmatpush1.bf16.msra.mxu1 %v8830_v28  ;;  %v6638_v43 = vsel %vm13886_vm1, %v9793_v44, %v9794_v52  ;;  %v6545_v5 = vsel %vm13888_vm11, %v9774_v14, %v9808_v8  ;;  %v6684_v57 = vsel %vm13889_vm10, %v6674_v35, %v13143_v1  ;;  %vm13898_vm1 = vmmov %vm13890_vm2 }
0x177d   : > { %v8834_v17 = vpack.c.bf16 %v6660_v30, %v6637_v12  ;;  %v9802_v34 = vpop.permute.xlu0 %9801  ;;  %v9812_v0 = vpop.permute.xlu1 %9811  ;;  %v8832_v47 = vpack.c.bf16 %v6661_v41, %v6638_v43  ;;  %v6546_v22 = vsel %vm13892_vm0, %v9808_v8, %v9809_v20  ;;  %vm13897_vm9 = vcmask 588800   ;;  %vm13900_vm11 = vmmov %vm13899_vm15 }
0x177e   : > { %v9804_v18 = vunpack.i.h.bf16 %v9802_v34  ;;  %v9803_v26 = vunpack.i.l.bf16 %v9802_v34  ;;  %v9813_v37 = vunpack.i.l.bf16 %v9812_v0  ;;  %v9814_v33 = vunpack.i.h.bf16 %v9812_v0  ;;  %vm13901_vm10 = vmmov %vm13894_vm7 }
0x177f   : > { %8833 = vmatprep.subr.bf16.mxu1 %v8832_v47  ;;  %vm13904_vm0 = vcmask 801792  }
0x1780   : > { %v6524_v19 = vsel %vm13890_vm2, %v9769_v38, %v9803_v26  ;;  %8835 = vmatpush1.bf16.msra.mxu1 %v8834_v17  ;;  %v6525_v23 = vsel %vm13891_vm3, %v9803_v26, %v9804_v18  ;;  %v6683_v38 = vsel %vm13893_vm5, %v13121_v59, %v6674_v35  ;;  %v6566_v39 = vsel %vm13880_vm14, %v9779_v13, %v9813_v37  ;;  %vm13902_vm2 = vmmov %vm13895_vm6 }
0x1781   : > { %v8838_v62 = vpack.c.bf16 %v6545_v5, %v6524_v19  ;;  %v9817_v3 = vpop.permute.xlu0 %9816  ;;  %v6543_v16 = vpop.permute.xlu1 %6542  ;;  %6718 = vmatprep.subr.mxu1 %v6684_v57  ;;  %v8836_v61 = vpack.c.bf16 %v6546_v22, %v6525_v23  ;;  %v6567_v28 = vsel %vm13894_vm7, %v9813_v37, %v9814_v33  ;;  %vm13903_vm3 = vmmov %vm13902_vm2  ;;  %vm13905_vm5 = vcmask 809984  }
0x1782   : > { %v9819_v24 = vunpack.i.h.bf16 %v9817_v3  ;;  %v9818_v14 = vunpack.i.l.bf16 %v9817_v3  ;;  %v6547_v44 = vsel %vm13896_vm13, %v9809_v20, %v6543_v16  ;;  %vm13906_vm14 = vmmov %vm13905_vm5 }
0x1783   : > { %8837 = vmatprep.subr.bf16.mxu0 %v8836_v61  ;;  %vm13908_vm7 = vmmov %vm13900_vm11 }
0x1784   : > { %v6590_v48 = vsel %vm13881_vm12, %v9784_v45, %v9818_v14  ;;  %6719 = vmatpush1.msra.mxu1 %v6683_v38  ;;  %8839 = vmatpush1.bf16.msra.mxu0 %v8838_v62  ;;  %v6591_v58 = vsel %vm13895_vm6, %v9818_v14, %v9819_v24  ;;  %vm13907_vm12 = vmmov %vm13904_vm0 }
0x1785   : > { %v8842_v53 = vpack.c.bf16 %v6590_v48, %v6566_v39  ;;  %v6522_v30 = vpop.permute.xlu0 %6521  ;;  %v9822_v8 = vpop.permute.xlu1 %9821  ;;  %7866 = vmatmul.mubr.msk.f32.vlgmr.msra.gmra.mrb[42].mxu1 %vm13897_vm9, %v13176_v2  ;;  %v8840_v59 = vpack.c.bf16 %v6591_v58, %v6567_v28  ;;  %vm13909_vm6 = vmmov %vm13905_vm5  ;;  %vm13911_vm9 = vcmask 793600  }
0x1786   : > { %v6526_v13 = vsel %vm13898_vm1, %v9804_v18, %v6522_v30  ;;  %v8852_v35 = vpack.c.bf16 %v6543_v16, %v6522_v30  ;;  %v9824_v12 = vunpack.i.h.bf16 %v9822_v8  ;;  %v9823_v45 = vunpack.i.l.bf16 %v9822_v8  ;;  %6908 = vmatprep.mubr.f32.mxu1 %v13480_v63  ;;  %vm13910_vm13 = vmmov %vm13904_vm0 }
0x1787   : > { %v8854_v43 = vpack.c.bf16 %v6547_v44, %v6526_v13  ;;  %8841 = vmatprep.subr.bf16.mxu0 %v8840_v59 }
0x1788   : > { %v6615_v41 = vsel %vm13899_vm15, %v9789_v10, %v9823_v45  ;;  %8843 = vmatpush1.bf16.msra.mxu0 %v8842_v53  ;;  %8853 = vmatprep.subr.bf16.mxu1 %v8852_v35  ;;  %v6616_v20 = vsel %vm13900_vm11, %v9823_v45, %v9824_v12  ;;  %vm13914_vm15 = vcmask 588800   ;;  %vm13915_vm11 = vcmask 957440  }
0x1789   : > { %v8846_v17 = vpack.c.bf16 %v6615_v41, %v13061_v31  ;;  %v6564_v34 = vpop.permute.xlu0 %6563  ;;  %v9827_v0 = vpop.permute.xlu1 %9826  ;;  %8855 = vmatpush1.bf16.msra.mxu1 %v8854_v43  ;;  %v8844_v47 = vpack.c.bf16 %v6616_v20, %v13071_v9 }
0x178a   : > { %v9829_v18 = vunpack.i.h.bf16 %v9827_v0  ;;  %v9828_v26 = vunpack.i.l.bf16 %v9827_v0  ;;  %v6568_v5 = vsel %vm13901_vm10, %v9814_v33, %v6564_v34  ;;  %vm13917_vm10 = vcmask 64512  }
0x178b   : > { %8845 = vmatprep.subr.bf16.mxu0 %v8844_v47 }
0x178c   : > { %v6592_v51 = vsel %vm13902_vm2, %v9819_v24, %v9828_v26  ;;  %8847 = vmatpush1.bf16.msra.mxu0 %v8846_v17  ;;  %v6593_v10 = vsel %vm13903_vm3, %v9828_v26, %v9829_v18  ;;  %vm13918_vm2 = vmmov %vm13917_vm10 }
0x178d   : > { %v8858_v37 = vpack.c.bf16 %v6592_v51, %v6568_v5  ;;  %v9837_v57 = vpop.permute.xlu0 %9836  ;;  %v9832_v19 = vpop.permute.xlu1 %9831  ;;  %v8856_v23 = vpack.c.bf16 %v6593_v10, %v6564_v34  ;;  %vm13919_vm3 = vmmov %vm13918_vm2 }
0x178e   : > { %v9839_v31 = vunpack.i.h.bf16 %v9837_v57  ;;  %v9838_v22 = vunpack.i.l.bf16 %v9837_v57  ;;  %v9834_v62 = vunpack.i.h.bf16 %v9832_v19  ;;  %v9833_v3 = vunpack.i.l.bf16 %v9832_v19 }
0x178f   : > { %8857 = vmatprep.subr.bf16.mxu1 %v8856_v23 }
0x1790   : > { %v6662_v9 = vsel %vm13904_vm0, %v9799_v49, %v9838_v22  ;;  %v6639_v33 = vsel %vm13905_vm5, %v9794_v52, %v9833_v3  ;;  %8859 = vmatpush1.bf16.msra.mxu1 %v8858_v37  ;;  %v6640_v16 = vsel %vm13906_vm14, %v9833_v3, %v9834_v62  ;;  %v6663_v61 = vsel %vm13907_vm12, %v9838_v22, %v9839_v31  ;;  %vm13920_vm0 = vmmov %vm13918_vm2 }
0x1791   : > { %v8850_v24 = vpack.c.bf16 %v6662_v9, %v6639_v33  ;;  %v6612_v14 = vpop.permute.xlu0 %6611  ;;  %v6636_v38 = vpop.permute.xlu1 %6635  ;;  %v8848_v39 = vpack.c.bf16 %v6663_v61, %v6640_v16  ;;  %vm13921_vm5 = vmmov %vm13920_vm0 }
0x1792   : > { %v6617_v48 = vsel %vm13908_vm7, %v9824_v12, %v6612_v14  ;;  %v8860_v28 = vpack.c.bf16 %v6612_v14, %v13091_v54  ;;  %v6641_v52 = vsel %vm13909_vm6, %v9834_v62, %v6636_v38  ;;  %v7154_v38 = vld [vmem:[%s13298_s15] sm:$0x1]  ;;  %vm13922_vm14 = vmmov %vm13920_vm0 }
0x1793   : > { %v8863_v36 = vpack.c.bf16 %v6617_v48, %v13084_v25  ;;  %8849 = vmatprep.subr.bf16.mxu0 %v8848_v39 }
0x1794   : > { %8851 = vmatpush1.bf16.msra.mxu0 %v8850_v24  ;;  %8862 = vmatprep.subr.msk.bf16.mxu1 %vm11412_vm8, %v8860_v28  ;;  %vm13912_vm8 = vmmov %vm13911_vm9 }
0x1795   : > { %v6659_v49 = vpop.permute.xlu0 %6658  ;;  %v6678_v21 = vpop.permute.xlu1 %6677  ;;  %8864 = vmatpush1.bf16.msra.mxu1 %v8863_v36  ;;  %vm13913_vm1 = vmmov %vm13912_vm8 }
0x1796   : > { %v6664_v58 = vsel %vm13910_vm13, %v9839_v31, %v6659_v49  ;;  %8865 = vmatprep.subr.bf16.mxu1 %v13476_v42  ;;  %v6685_v56 = vsel %vm13912_vm8, %v13143_v1, %v6678_v21  ;;  %v6057_v42 = vld [vmem:[%s13297_s14 + $0x20] sm:$0xff] }
0x1797   : > { %v8866_v53 = vpack.c.bf16 %v6664_v58, %v6641_v52 }
0x1799   : > { %v6680_v44 = vpop.permute.xlu0 %6679  ;;  %v6682_v30 = vpop.permute.xlu1 %6681  ;;  %8868 = vmatpush1.bf16.msk.msra.mxu1 %vm10749_vm4, %v8866_v53  ;;  %vm13916_vm4 = vmmov %vm13914_vm15 }
0x179a   : > { %v6686_v25 = vsel %vm13911_vm9, %v6678_v21, %v6680_v44  ;;  %6860 = vmatprep.subr.mxu1 %v13480_v63  ;;  %v6687_v54 = vsel %vm13913_vm1, %v6680_v44, %v6682_v30 }
0x179b   : > { %6789 = vmatprep.subr.mxu0 %v6686_v25 }
0x179c   : > { %6790 = vmatpush1.msra.mxu0 %v6685_v56 }
0x179d   : > { %7867 = vmatmul.mubr.msk.f32.vlgmr.msra.gmra.mrb[56].mxu0 %vm13914_vm15, %v13176_v2  ;;  %7871 = vmatpush1.msk.msra.mxu1 %vm13915_vm11, %v6687_v54 }
0x179e   : > { %6929 = vmatprep.subr.mxu0 %v12815_v40  ;;  %7872 = vmatmul.mubr.msk.f32.vlgmr.msra.gmra.mrb[44].mxu1 %vm13916_vm4, %v13176_v2 }
0x179f   : > { %6930 = vmatpush1.msra.mxu0 %v12811_v15  ;;  %7000 = vmatprep.subr.mxu1 %v12849_v50 }
0x17a0   : > { %7001 = vmatpush1.msra.mxu1 %v12825_v55  ;;  %7071 = vmatprep.subr.mxu0 %v12883_v4 }
0x17a1   : > { %6993 = vmatprep.mubr.f32.mxu0 %v13480_v63  ;;  %7064 = vmatprep.mubr.f32.mxu1 %v13480_v63 }
0x17a2   : > { %7873 = vmatmul.mubr.msk.f32.vlgmr.msra.gmra.mrb[58].mxu0 %vm13917_vm10, %v6057_v42  ;;  %7874 = vmatmul.mubr.msk.f32.vlgmr.msra.gmra.mrb[46].mxu1 %vm13918_vm2, %v6057_v42 }
0x17a3   : > { %7072 = vmatpush1.msra.mxu0 %v12869_v6  ;;  %7135 = vmatprep.mubr.f32.mxu0 %v13480_v63 }
0x17a4   : > { %7232 = vmatprep.mubr.f32.mxu1 %v13480_v63 }
0x17a6   : > { %7875 = vmatmul.mubr.msk.f32.vlgmr.msra.gmra.mrb[60].mxu0 %vm13919_vm3, %v6057_v42 }
0x17a7   : > { %7303 = vmatprep.mubr.f32.mxu0 %v13480_v63 }
0x17aa   : > { %v6697_v40 = vpop.permute.xlu0 %6696  ;;  %v6924_v6 = vpop.permute.xlu1 %6923 }
0x1858   : > { %v6768_v11 = vpop.f32.mrb[42].mxu1 }
0x1859   : > { %v6770_v15 = vpop.f32.mrb[43].mxu1  ;;  %v6769_v50 = vadd.f32 %v6768_v11, %v6697_v40 }
0x185a   : > { %v6771_v4 = vadd.f32 %v6770_v15, %v6697_v40 }
0x185b   : > { %v6915_v35 = vmul.f32 %v6769_v50, %v13694_v32 }
0x185c   : > { %v6916_v12 = vmul.f32 %v6771_v4, %v13695_v27 }
0x1870   : > { %v6839_v55 = vpop.f32.mrb[56].mxu0 }
0x1871   : > { %v6841_v1 = vpop.f32.mrb[57].mxu0  ;;  %v6910_v2 = vpop.f32.mrb[44].mxu1  ;;  %v6840_v8 = vadd.f32 %v6839_v55, %v6697_v40 }
0x1872   : > { %v6912_v59 = vpop.f32.mrb[45].mxu1  ;;  %v6842_v13 = vadd.f32 %v6841_v1, %v6697_v40  ;;  %v6911_v20 = vadd.f32 %v6910_v2, %v6697_v40 }
0x1873   : > { %v6917_v41 = vmul.f32 %v6840_v8, %v13696_v7  ;;  %v6913_v26 = vadd.f32 %v6912_v59, %v6697_v40 }
0x1874   : > { %v6918_v18 = vmul.f32 %v6842_v13, %v13697_v29  ;;  %v6919_v31 = vmul.f32 %v6911_v20, %v13698_v46 }
0x1875   : > { %v6995_v45 = vpop.f32.mrb[58].mxu0  ;;  %v7066_v43 = vpop.f32.mrb[46].mxu1  ;;  %v6920_v3 = vmul.f32 %v6913_v26, %v13699_v60 }
0x1876   : > { %v6996_v17 = vadd.f32 %v6995_v45, %v6924_v6  ;;  %v6997_v34 = vpop.f32.mrb[59].mxu0  ;;  %v7067_v0 = vadd.f32 %v7066_v43, %v6924_v6  ;;  %v7068_v47 = vpop.f32.mrb[47].mxu1 }
0x1877   : > { %v6998_v5 = vadd.f32 %v6997_v34, %v6924_v6  ;;  %v7069_v51 = vadd.f32 %v7068_v47, %v6924_v6 }
0x1878   : > { %v7142_v10 = vadd.f32 %v6996_v17, %v6915_v35  ;;  %v7144_v37 = vadd.f32 %v7067_v0, %v6917_v41  ;;  %v9893_v0 = vmov 1966171168  }
0x1879   : > { %v7143_v57 = vadd.f32 %v6998_v5, %v6916_v12  ;;  %v7145_v19 = vadd.f32 %v7069_v51, %v6918_v18  ;;  %v7137_v23 = vpop.f32.mrb[60].mxu0  ;;  %v7439_v47 = vunpack.c.l.s4 %v9893_v0 }
0x187a   : > { %v7138_v22 = vadd.f32 %v7137_v23, %v6924_v6  ;;  %v7139_v62 = vpop.f32.mrb[61].mxu0  ;;  %v7148_v61 = vmul.f32 %v7142_v10, %v13694_v32  ;;  %v7150_v24 = vmul.f32 %v7144_v37, %v13696_v7  ;;  %v7159_v7 = vpop.permute.xlu0 %7158  ;;  %v13924_v23 = vld [vmem:[#allocation13_spill] sm:$0xff] }
0x187b   : > { %v7140_v9 = vadd.f32 %v7139_v62, %v6924_v6  ;;  %v7149_v33 = vmul.f32 %v7143_v57, %v13695_v27  ;;  %v7151_v16 = vmul.f32 %v7145_v19, %v13697_v29  ;;  %v13923_v29 = vld [vmem:[#allocation14_spill] sm:$0xff]  ;;  %v7440_v18 = vunpack.c.0.s8 %v7439_v47 }
0x187c   : > { %v7146_v14 = vadd.f32 %v7138_v22, %v6919_v31  ;;  %v7164_v48 = vrot.slane %v7159_v7, %v13923_v29 }
0x187d   : > { %v7147_v39 = vadd.f32 %v7140_v9, %v6920_v3  ;;  %7168 = vmatprep.subr.mxu1 %v7149_v33  ;;  %7239 = vmatprep.subr.mxu0 %v7151_v16  ;;  %v7443_v31 = vsub.s32 %v7440_v18, %v13924_v23 }
0x187e   : > { %7169 = vmatpush1.msra.mxu1 %v7148_v61  ;;  %7240 = vmatpush1.msra.mxu0 %v7150_v24  ;;  %v7152_v32 = vmul.f32 %v7146_v14, %v13698_v46 }
0x187f   : > { %7876 = vmatmul.mubr.msk.f32.vlgmr.msra.gmra.mrb[48].mxu1 %vm13920_vm0, %v7154_v38  ;;  %7877 = vmatmul.mubr.msk.f32.vlgmr.msra.gmra.mrb[62].mxu0 %vm13921_vm5, %v7154_v38  ;;  %v7153_v27 = vmul.f32 %v7147_v39, %v13699_v60 }
0x1880   : > { %7374 = vmatprep.mubr.f32.mxu1 %v13480_v63 }
0x1881   : > { %7310 = vmatprep.subr.mxu1 %v7153_v27 }
0x1882   : > { %7311 = vmatpush1.msra.mxu1 %v7152_v32 }
0x1883   : > { %7878 = vmatmul.mubr.msk.f32.vlgmr.msra.gmra.mrb[50].mxu1 %vm13922_vm14, %v7154_v38 }
0x1952   : > { %v7234_v28 = vpop.f32.mrb[48].mxu1  ;;  %v7305_v36 = vpop.f32.mrb[62].mxu0 }
0x1953   : > { %v7235_v49 = vadd.f32 %v7234_v28, %v7164_v48  ;;  %v7236_v21 = vpop.f32.mrb[49].mxu1  ;;  %v13263_v52 = vadd.f32 %v7305_v36, %v7164_v48  ;;  %v7307_v58 = vpop.f32.mrb[63].mxu0 }
0x1954   : > { %v7237_v53 = vadd.f32 %v7236_v21, %v7164_v48  ;;  %v13265_v60 = vadd.f32 %v7307_v58, %v7164_v48 }
0x1955   : > { %v7387_v46 = vmin.f32 %v7235_v49, 20.0  ;;  %v7389_v63 = vmin.f32 %v13263_v52, 20.0  ;;  %vm7381_vm12 = vcmp.gt.f32.partialorder %v7235_v49, 20.0  ;;  %vm7383_vm6 = vcmp.gt.f32.partialorder %v13263_v52, 20.0 }
0x1956   : > { %v7388_v44 = vmin.f32 %v7237_v53, 20.0  ;;  %v7390_v30 = vmin.f32 %v13265_v60, 20.0  ;;  %v7376_v25 = vpop.f32.mrb[50].mxu1  ;;  %vm7382_vm7 = vcmp.gt.f32.partialorder %v7237_v53, 20.0  ;;  %vm7384_vm13 = vcmp.gt.f32.partialorder %v13265_v60, 20.0 }
0x1957   : > { %v7393_v56 = vmul.f32 1.442695, %v7387_v46  ;;  %v7397_v54 = vmul.f32 1.442695, %v7389_v63  ;;  %v7377_v42 = vadd.f32 %v7376_v25, %v7164_v48  ;;  %v7378_v11 = vpop.f32.mrb[51].mxu1 }
0x1958   : > { %v7395_v15 = vmul.f32 1.442695, %v7388_v44  ;;  %v7399_v40 = vmul.f32 1.442695, %v7390_v30  ;;  %v7379_v55 = vadd.f32 %v7378_v11, %v7164_v48 }
0x1959   : > { %9842 = vpow2.f32 %v7393_v56  ;;  %v7391_v50 = vmin.f32 %v7377_v42, 20.0  ;;  %vm7385_vm9 = vcmp.gt.f32.partialorder %v7377_v42, 20.0 }
0x195a   : > { %9844 = vpow2.f32 %v7395_v15  ;;  %v7392_v4 = vmin.f32 %v7379_v55, 20.0  ;;  %vm7386_vm8 = vcmp.gt.f32.partialorder %v7379_v55, 20.0 }
0x195b   : > { %9846 = vpow2.f32 %v7397_v54  ;;  %v7401_v1 = vmul.f32 1.442695, %v7391_v50 }
0x195c   : > { %9848 = vpow2.f32 %v7399_v40  ;;  %v7403_v2 = vmul.f32 1.442695, %v7392_v4 }
0x195d   : > { %9850 = vpow2.f32 %v7401_v1 }
0x195e   : > { %9852 = vpow2.f32 %v7403_v2 }
0x1963   : > { %v9843_v8 = vpop.eup %9842 }
0x1964   : > { %v9845_v59 = vpop.eup %9844  ;;  %v7405_v13 = vadd.f32 1.0, %v9843_v8 }
0x1965   : > { %v9847_v6 = vpop.eup %9846  ;;  %v7406_v35 = vadd.f32 1.0, %v9845_v59 }
0x1966   : > { %v9849_v12 = vpop.eup %9848  ;;  %9854 = vlog2.f32 %v7405_v13  ;;  %v7407_v45 = vadd.f32 1.0, %v9847_v6 }
0x1967   : > { %v9851_v43 = vpop.eup %9850  ;;  %9856 = vlog2.f32 %v7406_v35  ;;  %v7408_v41 = vadd.f32 1.0, %v9849_v12 }
0x1968   : > { %v9853_v20 = vpop.eup %9852  ;;  %9858 = vlog2.f32 %v7407_v45  ;;  %v7409_v17 = vadd.f32 1.0, %v9851_v43 }
0x1969   : > { %9860 = vlog2.f32 %v7408_v41  ;;  %v7410_v34 = vadd.f32 1.0, %v9853_v20 }
0x196a   : > { %9862 = vlog2.f32 %v7409_v17 }
0x196b   : > { %9864 = vlog2.f32 %v7410_v34 }
0x1970   : > { %v9855_v26 = vpop.eup %9854 }
0x1971   : > { %v9857_v5 = vpop.eup %9856  ;;  %v7412_v51 = vmul.f32 0.6931472, %v9855_v26 }
0x1972   : > { %v9859_v10 = vpop.eup %9858  ;;  %v7414_v37 = vmul.f32 0.6931472, %v9857_v5 }
0x1973   : > { %v9861_v57 = vpop.eup %9860  ;;  %v7423_v19 = vsel %vm7381_vm12, %v7235_v49, %v7412_v51  ;;  %v7416_v22 = vmul.f32 0.6931472, %v9859_v10 }
0x1974   : > { %v9863_v62 = vpop.eup %9862  ;;  %v7424_v3 = vsel %vm7382_vm7, %v7237_v53, %v7414_v37  ;;  %v7418_v9 = vmul.f32 0.6931472, %v9861_v57 }
0x1975   : > { %v9865_v33 = vpop.eup %9864  ;;  %v7435_v16 = vcombine.low %v7423_v19, %v7424_v3  ;;  %v7425_v61 = vsel %vm7383_vm6, %v13263_v52, %v7416_v22  ;;  %v7420_v24 = vmul.f32 0.6931472, %v9863_v62  ;;  %v13925_v52 = vlaneseq }
0x1976   : > { %v7426_v14 = vsel %vm7384_vm13, %v13265_v60, %v7418_v9  ;;  %v7422_v38 = vmul.f32 0.6931472, %v9865_v33 }
0x1977   : > { %v7444_v39 = vrot.slane %v7435_v16, %v7443_v31  ;;  %v7436_v27 = vcombine.low %v7425_v61, %v7426_v14  ;;  %v7427_v32 = vsel %vm7385_vm9, %v7377_v42, %v7420_v24  ;;  %vm7478_vm1 = vcmp.lt.s32.totalorder %v13925_v52, 660 }
0x1978   : > { %v7428_v7 = vsel %vm7386_vm8, %v7379_v55, %v7422_v38 }
0x1979   : > { %v7451_v29 = vrot.slane %v7436_v27, %v7443_v31  ;;  %v7437_v48 = vcombine.low %v7427_v32, %v7428_v7 }
0x197b   : > { %v7459_v28 = vcombine.low %v7444_v39, %v7451_v29  ;;  %v7458_v36 = vrot.slane %v7437_v48, %v7443_v31 }
0x197d   : > { %v7466_v49 = vrot.slane %v7459_v28, %v7443_v31  ;;  %v7473_v21 = vrot.slane %v7458_v36, %v7443_v31 }
0x197f   : > { %v7474_v58 = vcombine.low %v7466_v49, %v7473_v21 }
0x1981   : > { %7480 = vst.msk [vmem:[%s596_s1] sm:$0x3f] %vm7478_vm1, %v7474_v58 }
0x1982 PF: > { %s29_s26 = sadd.s32 1, %s9872_s26  }
0x1983   : > { %p26_p4 = scmp.ge.s32.totalorder %s29_s26, 4  }
0x1985   :  { %28 = sbr.rel (!%p26_p4) target bundleno = 3 (0x3), region = 127 }

</bundles_post_ra>
